<compile_context>
chip_gen: v7x
topology: tpu7x:2x2x1
jax: 0.10.0
libtpu: 0.0.40
codegen_flags: <defaults>
</compile_context>

<pallas_src>
import jax
import jax.numpy as jnp
from jax.experimental import pallas as pl
from jax.experimental.pallas import tpu as pltpu

PAST_LEN = 8
FUTURE_LEN = 12
CH_IN = 2
CH_OUT = 16
DIM_EMB = 64                      # GRU hidden size
DEST_EMB = 16
FEAT_DIM = DIM_EMB + DEST_EMB     # f is (N, 80)
MLP_IN = 2 * DIM_EMB + DEST_EMB   # 144
HIDDEN = (1024, 512, 1024)
OUT_X = PAST_LEN * 2              # 16
OUT_Y = FUTURE_LEN * 2            # 24
OUT_PAD = 128                     # lane-dense combined output slab


def _vmem_spec():
    return pl.BlockSpec(memory_space=pltpu.MemorySpace.VMEM)


# ---------------------------------------------------------------------------
# Fully fused DecomposeBlock kernel
# ---------------------------------------------------------------------------
def _decompose_kernel(x_true_ref, x_hat_ref, f_ref,
                      wconv_ref, bconv_ref,
                      wih_ref, whh_ref, bih_ref, bhh_ref,
                      w1_ref, b1_ref,
                      w2x_ref, b2x_ref, w3x_ref, b3x_ref,
                      w2y_ref, b2y_ref, w3y_ref, b3y_ref,
                      w4_ref, b4_ref,
                      out_ref):
    x = x_true_ref[...] - x_hat_ref[...]                 # (N, T, 2) f32
    N, T, C = x.shape

    # --- Conv1d(2->16, k=3, pad=1) as a single im2col matmul ------------------
    zeros_row = jnp.zeros((N, 1, C), x.dtype)
    xpad = jnp.concatenate([zeros_row, x, zeros_row], axis=1)      # (N, T+2, 2)
    cols = jnp.concatenate(                                        # (N, T, 6)
        [xpad[:, 0:T, :], xpad[:, 1:T + 1, :], xpad[:, 2:T + 2, :]], axis=-1)
    conv = jnp.dot(cols.reshape(N * T, 3 * C), wconv_ref[...],     # (N*T, 16)
                   preferred_element_type=jnp.float32)
    past_embed = jnp.maximum(conv + bconv_ref[...], 0.0)           # ReLU

    # --- GRU(16 -> 64), batch_first, h0 = 0 (PyTorch gate order r, z, n) ------
    # Input-side gates hoisted out of the recurrent loop.
    gi_all = (jnp.dot(past_embed, wih_ref[...],
                      preferred_element_type=jnp.float32)
              + bih_ref[...]).reshape(N, T, 3 * DIM_EMB)           # (N, T, 192)
    whh = whh_ref[...]                                             # (64, 192)
    bhh = bhh_ref[...]                                             # (1, 192)

    h = jnp.zeros((N, DIM_EMB), jnp.float32)
    for t in range(T):                                             # T small & static
        gi = gi_all[:, t, :]                                       # (N, 192)
        gh = jnp.dot(h, whh, preferred_element_type=jnp.float32) + bhh
        i_r, i_z, i_n = (gi[:, :DIM_EMB], gi[:, DIM_EMB:2 * DIM_EMB],
                         gi[:, 2 * DIM_EMB:])
        h_r, h_z, h_n = (gh[:, :DIM_EMB], gh[:, DIM_EMB:2 * DIM_EMB],
                         gh[:, 2 * DIM_EMB:])
        r = jax.nn.sigmoid(i_r + h_r)
        z = jax.nn.sigmoid(i_z + h_z)
        n = jnp.tanh(i_n + r * h_n)
        h = (1.0 - z) * n + z * h                                  # (N, 64)

    # --- input_feat = concat(f, state_past) in VMEM ---------------------------
    feat = jnp.concatenate([f_ref[...], h], axis=1)                # (N, 144)

    # --- both decoder MLPs (bf16 weights, f32 accumulation / activations) -----
    def dot_bf16(a_f32, w_ref):
        return jnp.dot(a_f32.astype(jnp.bfloat16), w_ref[...],
                       preferred_element_type=jnp.float32)

    # Fused layer-1 of decoder_x and decoder_y (identical input).
    h1 = jnp.maximum(dot_bf16(feat, w1_ref) + b1_ref[...], 0.0)    # (N, 2048)
    h1x = h1[:, :HIDDEN[0]]
    h1y = h1[:, HIDDEN[0]:]

    h2x = jnp.maximum(dot_bf16(h1x, w2x_ref) + b2x_ref[...], 0.0)  # (N, 512)
    h3x = jnp.maximum(dot_bf16(h2x, w3x_ref) + b3x_ref[...], 0.0)  # (N, 1024)
    h2y = jnp.maximum(dot_bf16(h1y, w2y_ref) + b2y_ref[...], 0.0)  # (N, 512)
    h3y = jnp.maximum(dot_bf16(h2y, w3y_ref) + b3y_ref[...], 0.0)  # (N, 1024)

    # Fused, lane-dense final layer: block-diag (2048, 128) weight -> one (N, 128)
    # unmasked store. Columns 0..15 = decoder_x output, 16..39 = decoder_y output.
    h3 = jnp.concatenate([h3x, h3y], axis=1)                       # (N, 2048)
    out = dot_bf16(h3, w4_ref) + b4_ref[...]                       # (N, 128)
    out_ref[...] = out.astype(out_ref.dtype)


# ---------------------------------------------------------------------------
# Parameter construction (deterministic, kaiming-style normal / zeros)
# ---------------------------------------------------------------------------
def _kaiming(key, shape, fan_in):
    return (jnp.sqrt(2.0 / fan_in) *
            jax.random.normal(key, shape, dtype=jnp.float32))


def init_params(key):
    keys = jax.random.split(key, 8)
    p = {}
    # Conv1d(2 -> 16, k=3) stored im2col-style as (3*C_in, C_out); bias zeros.
    p["conv_w"] = _kaiming(keys[0], (3 * CH_IN, CH_OUT), fan_in=3 * CH_IN)
    p["conv_b"] = jnp.zeros((1, CH_OUT), jnp.float32)
    # GRU(16 -> 64): W_ih stored (16, 192); W_hh stored (64, 192); biases zero.
    p["gru_wih"] = _kaiming(keys[1], (CH_OUT, 3 * DIM_EMB), fan_in=CH_OUT)
    p["gru_whh"] = _kaiming(keys[2], (DIM_EMB, 3 * DIM_EMB), fan_in=DIM_EMB)
    p["gru_bih"] = jnp.zeros((1, 3 * DIM_EMB), jnp.float32)
    p["gru_bhh"] = jnp.zeros((1, 3 * DIM_EMB), jnp.float32)

    def make_mlp(kbase, out_dim):
        dims = [MLP_IN, *HIDDEN, out_dim]
        ks = jax.random.split(kbase, len(dims) - 1)
        return [(_kaiming(ks[i], (dims[i], dims[i + 1]), fan_in=dims[i]),
                 jnp.zeros((1, dims[i + 1]), jnp.float32))
                for i in range(len(dims) - 1)]

    dec_x = make_mlp(keys[3], OUT_X)    # 144 -> 1024 -> 512 -> 1024 -> 16
    dec_y = make_mlp(keys[4], OUT_Y)    # 144 -> 1024 -> 512 -> 1024 -> 24

    # Fused layer-1 (shared input): (144, 2048)
    p["w1"] = jnp.concatenate([dec_x[0][0], dec_y[0][0]], axis=1).astype(jnp.bfloat16)
    p["b1"] = jnp.concatenate([dec_x[0][1], dec_y[0][1]], axis=1)

    p["w2x"] = dec_x[1][0].astype(jnp.bfloat16); p["b2x"] = dec_x[1][1]
    p["w3x"] = dec_x[2][0].astype(jnp.bfloat16); p["b3x"] = dec_x[2][1]
    p["w2y"] = dec_y[1][0].astype(jnp.bfloat16); p["b2y"] = dec_y[1][1]
    p["w3y"] = dec_y[2][0].astype(jnp.bfloat16); p["b3y"] = dec_y[2][1]

    # Fused, lane-padded block-diagonal final layer: (2048, 128)
    w4 = jnp.zeros((2 * HIDDEN[2], OUT_PAD), jnp.float32)
    w4 = w4.at[:HIDDEN[2], 0:OUT_X].set(dec_x[3][0])
    w4 = w4.at[HIDDEN[2]:, OUT_X:OUT_X + OUT_Y].set(dec_y[3][0])
    p["w4"] = w4.astype(jnp.bfloat16)
    b4 = jnp.zeros((1, OUT_PAD), jnp.float32)
    b4 = b4.at[:, 0:OUT_X].set(dec_x[3][1])
    b4 = b4.at[:, OUT_X:OUT_X + OUT_Y].set(dec_y[3][1])
    p["b4"] = b4
    return p


# ---------------------------------------------------------------------------
# Full DecomposeBlock forward: ONE pallas_call
# ---------------------------------------------------------------------------
def decompose_block_forward(params, x_true, x_hat, f):
    N = x_true.shape[0]
    out = pl.pallas_call(
        _decompose_kernel,
        out_shape=jax.ShapeDtypeStruct((N, OUT_PAD), jnp.float32),
        in_specs=[_vmem_spec()] * 21,
        out_specs=_vmem_spec(),
        compiler_params=pltpu.CompilerParams(vmem_limit_bytes=32 << 20),
    )(x_true, x_hat, f,
      params["conv_w"], params["conv_b"],
      params["gru_wih"], params["gru_whh"], params["gru_bih"], params["gru_bhh"],
      params["w1"], params["b1"],
      params["w2x"], params["b2x"], params["w3x"], params["b3x"],
      params["w2y"], params["b2y"], params["w3y"], params["b3y"],
      params["w4"], params["b4"])

    x_hat_after = out[:, :OUT_X].reshape(N, PAST_LEN, 2)
    y_hat = out[:, OUT_X:OUT_X + OUT_Y].reshape(N, FUTURE_LEN, 2)
    return x_hat_after, y_hat


if __name__ == "__main__":
    N = 8
    key = jax.random.PRNGKey(0)
    k_params, k_xt, k_xh, k_f = jax.random.split(key, 4)

    params = init_params(k_params)
    x_true = jax.random.normal(k_xt, (N, PAST_LEN, CH_IN), dtype=jnp.float32)
    x_hat = jax.random.normal(k_xh, (N, PAST_LEN, CH_IN), dtype=jnp.float32)
    f = jax.random.normal(k_f, (N, FEAT_DIM), dtype=jnp.float32)

    x_hat_after, y_hat = decompose_block_forward(params, x_true, x_hat, f)
    jax.block_until_ready((x_hat_after, y_hat))

    assert x_hat_after.shape == (N, PAST_LEN, 2)
    assert y_hat.shape == (N, FUTURE_LEN, 2)
    assert jnp.all(jnp.isfinite(x_hat_after)) and jnp.all(jnp.isfinite(y_hat))
    print("KERNEL_OK")
</pallas_src>

<mosaic_0001>
module attributes {stable_mosaic.version = 11 : i64} {
  func.func @_decompose_kernel(%arg0: memref<8x8x2xf32, #tpu.memory_space<vmem>>, %arg1: memref<8x8x2xf32, #tpu.memory_space<vmem>>, %arg2: memref<8x80xf32, #tpu.memory_space<vmem>>, %arg3: memref<6x16xf32, #tpu.memory_space<vmem>>, %arg4: memref<1x16xf32, #tpu.memory_space<vmem>>, %arg5: memref<16x192xf32, #tpu.memory_space<vmem>>, %arg6: memref<64x192xf32, #tpu.memory_space<vmem>>, %arg7: memref<1x192xf32, #tpu.memory_space<vmem>>, %arg8: memref<1x192xf32, #tpu.memory_space<vmem>>, %arg9: memref<144x2048xbf16, #tpu.memory_space<vmem>>, %arg10: memref<1x2048xf32, #tpu.memory_space<vmem>>, %arg11: memref<1024x512xbf16, #tpu.memory_space<vmem>>, %arg12: memref<1x512xf32, #tpu.memory_space<vmem>>, %arg13: memref<512x1024xbf16, #tpu.memory_space<vmem>>, %arg14: memref<1x1024xf32, #tpu.memory_space<vmem>>, %arg15: memref<1024x512xbf16, #tpu.memory_space<vmem>>, %arg16: memref<1x512xf32, #tpu.memory_space<vmem>>, %arg17: memref<512x1024xbf16, #tpu.memory_space<vmem>>, %arg18: memref<1x1024xf32, #tpu.memory_space<vmem>>, %arg19: memref<2048x128xbf16, #tpu.memory_space<vmem>>, %arg20: memref<1x128xf32, #tpu.memory_space<vmem>>, %arg21: memref<8x128xf32, #tpu.memory_space<vmem>>) attributes {dimension_semantics = [], scalar_prefetch = 0 : i64, scratch_operands = 0 : i64, tpu.core_type = #tpu.core_type<tc>} {
    %c0 = arith.constant 0 : index
    %c0_0 = arith.constant 0 : index
    %c0_1 = arith.constant 0 : index
    %0 = vector.load %arg0[%c0, %c0_0, %c0_1] : memref<8x8x2xf32, #tpu.memory_space<vmem>>, vector<8x8x2xf32>
    %c0_2 = arith.constant 0 : index
    %c0_3 = arith.constant 0 : index
    %c0_4 = arith.constant 0 : index
    %1 = vector.load %arg1[%c0_2, %c0_3, %c0_4] : memref<8x8x2xf32, #tpu.memory_space<vmem>>, vector<8x8x2xf32>
    %2 = arith.subf %0, %1 : vector<8x8x2xf32>
    %cst = arith.constant 0.000000e+00 : f32
    %3 = vector.broadcast %cst : f32 to vector<8x1x2xf32>
    %4 = tpu.concatenate %3, %2, %3 in 1 : vector<8x1x2xf32>, vector<8x8x2xf32>, vector<8x1x2xf32> -> vector<8x10x2xf32>
    %5 = vector.extract_strided_slice %4 {offsets = [0, 0, 0], sizes = [8, 8, 2], strides = [1, 1, 1]} : vector<8x10x2xf32> to vector<8x8x2xf32>
    %6 = vector.extract_strided_slice %4 {offsets = [0, 1, 0], sizes = [8, 8, 2], strides = [1, 1, 1]} : vector<8x10x2xf32> to vector<8x8x2xf32>
    %7 = vector.extract_strided_slice %4 {offsets = [0, 2, 0], sizes = [8, 8, 2], strides = [1, 1, 1]} : vector<8x10x2xf32> to vector<8x8x2xf32>
    %8 = tpu.concatenate %5, %6, %7 in 2 : vector<8x8x2xf32>, vector<8x8x2xf32>, vector<8x8x2xf32> -> vector<8x8x6xf32>
    %9 = vector.shape_cast %8 : vector<8x8x6xf32> to vector<64x6xf32>
    %c0_5 = arith.constant 0 : index
    %c0_6 = arith.constant 0 : index
    %10 = vector.load %arg3[%c0_5, %c0_6] : memref<6x16xf32, #tpu.memory_space<vmem>>, vector<6x16xf32>
    %cst_7 = arith.constant dense<0.000000e+00> : vector<64x16xf32>
    %11 = tpu.matmul %9, %10, %cst_7 {dimension_numbers = #tpu.dot_dimension_numbers<[1], [0], [0], [1], [0, 0, 1, 1], [], []>} : vector<64x6xf32>, vector<6x16xf32>, vector<64x16xf32> -> vector<64x16xf32>
    %c0_8 = arith.constant 0 : index
    %c0_9 = arith.constant 0 : index
    %12 = vector.load %arg4[%c0_8, %c0_9] : memref<1x16xf32, #tpu.memory_space<vmem>>, vector<1x16xf32>
    %13 = vector.broadcast %12 : vector<1x16xf32> to vector<64x16xf32>
    %14 = arith.addf %11, %13 : vector<64x16xf32>
    %cst_10 = arith.constant 0.000000e+00 : f32
    %15 = vector.broadcast %cst_10 : f32 to vector<64x16xf32>
    %16 = arith.maximumf %14, %15 : vector<64x16xf32>
    %c0_11 = arith.constant 0 : index
    %c0_12 = arith.constant 0 : index
    %17 = vector.load %arg5[%c0_11, %c0_12] : memref<16x192xf32, #tpu.memory_space<vmem>>, vector<16x192xf32>
    %cst_13 = arith.constant dense<0.000000e+00> : vector<64x192xf32>
    %18 = tpu.matmul %16, %17, %cst_13 {dimension_numbers = #tpu.dot_dimension_numbers<[1], [0], [0], [1], [0, 0, 1, 1], [], []>} : vector<64x16xf32>, vector<16x192xf32>, vector<64x192xf32> -> vector<64x192xf32>
    %c0_14 = arith.constant 0 : index
    %c0_15 = arith.constant 0 : index
    %19 = vector.load %arg7[%c0_14, %c0_15] : memref<1x192xf32, #tpu.memory_space<vmem>>, vector<1x192xf32>
    %20 = vector.broadcast %19 : vector<1x192xf32> to vector<64x192xf32>
    %21 = arith.addf %18, %20 : vector<64x192xf32>
    %22 = vector.shape_cast %21 : vector<64x192xf32> to vector<8x8x192xf32>
    %c0_16 = arith.constant 0 : index
    %c0_17 = arith.constant 0 : index
    %23 = vector.load %arg6[%c0_16, %c0_17] : memref<64x192xf32, #tpu.memory_space<vmem>>, vector<64x192xf32>
    %c0_18 = arith.constant 0 : index
    %c0_19 = arith.constant 0 : index
    %24 = vector.load %arg8[%c0_18, %c0_19] : memref<1x192xf32, #tpu.memory_space<vmem>>, vector<1x192xf32>
    %cst_20 = arith.constant 0.000000e+00 : f32
    %25 = vector.broadcast %cst_20 : f32 to vector<8x64xf32>
    %26 = vector.extract_strided_slice %22 {offsets = [0, 0, 0], sizes = [8, 1, 192], strides = [1, 1, 1]} : vector<8x8x192xf32> to vector<8x1x192xf32>
    %27 = vector.shape_cast %26 : vector<8x1x192xf32> to vector<8x192xf32>
    %cst_21 = arith.constant dense<0.000000e+00> : vector<8x192xf32>
    %28 = tpu.matmul %25, %23, %cst_21 {dimension_numbers = #tpu.dot_dimension_numbers<[1], [0], [0], [1], [0, 0, 1, 1], [], []>} : vector<8x64xf32>, vector<64x192xf32>, vector<8x192xf32> -> vector<8x192xf32>
    %29 = vector.broadcast %24 : vector<1x192xf32> to vector<8x192xf32>
    %30 = arith.addf %28, %29 : vector<8x192xf32>
    %31 = vector.extract_strided_slice %27 {offsets = [0, 0], sizes = [8, 64], strides = [1, 1]} : vector<8x192xf32> to vector<8x64xf32>
    %32 = vector.extract_strided_slice %27 {offsets = [0, 64], sizes = [8, 64], strides = [1, 1]} : vector<8x192xf32> to vector<8x64xf32>
    %33 = vector.extract_strided_slice %27 {offsets = [0, 128], sizes = [8, 64], strides = [1, 1]} : vector<8x192xf32> to vector<8x64xf32>
    %34 = vector.extract_strided_slice %30 {offsets = [0, 0], sizes = [8, 64], strides = [1, 1]} : vector<8x192xf32> to vector<8x64xf32>
    %35 = vector.extract_strided_slice %30 {offsets = [0, 64], sizes = [8, 64], strides = [1, 1]} : vector<8x192xf32> to vector<8x64xf32>
    %36 = vector.extract_strided_slice %30 {offsets = [0, 128], sizes = [8, 64], strides = [1, 1]} : vector<8x192xf32> to vector<8x64xf32>
    %37 = arith.addf %31, %34 : vector<8x64xf32>
    %38 = arith.negf %37 : vector<8x64xf32>
    %39 = math.exp %38 : vector<8x64xf32>
    %cst_22 = arith.constant 1.000000e+00 : f32
    %40 = vector.broadcast %cst_22 : f32 to vector<8x64xf32>
    %41 = arith.addf %40, %39 : vector<8x64xf32>
    %42 = arith.divf %40, %41 : vector<8x64xf32>
    %43 = arith.addf %32, %35 : vector<8x64xf32>
    %44 = arith.negf %43 : vector<8x64xf32>
    %45 = math.exp %44 : vector<8x64xf32>
    %cst_23 = arith.constant 1.000000e+00 : f32
    %46 = vector.broadcast %cst_23 : f32 to vector<8x64xf32>
    %47 = arith.addf %46, %45 : vector<8x64xf32>
    %48 = arith.divf %46, %47 : vector<8x64xf32>
    %49 = arith.mulf %42, %36 : vector<8x64xf32>
    %50 = arith.addf %33, %49 : vector<8x64xf32>
    %51 = math.tanh %50 : vector<8x64xf32>
    %cst_24 = arith.constant 1.000000e+00 : f32
    %52 = vector.broadcast %cst_24 : f32 to vector<8x64xf32>
    %53 = arith.subf %52, %48 : vector<8x64xf32>
    %54 = arith.mulf %53, %51 : vector<8x64xf32>
    %55 = arith.mulf %48, %25 : vector<8x64xf32>
    %56 = arith.addf %54, %55 : vector<8x64xf32>
    %57 = vector.extract_strided_slice %22 {offsets = [0, 1, 0], sizes = [8, 1, 192], strides = [1, 1, 1]} : vector<8x8x192xf32> to vector<8x1x192xf32>
    %58 = vector.shape_cast %57 : vector<8x1x192xf32> to vector<8x192xf32>
    %cst_25 = arith.constant dense<0.000000e+00> : vector<8x192xf32>
    %59 = tpu.matmul %56, %23, %cst_25 {dimension_numbers = #tpu.dot_dimension_numbers<[1], [0], [0], [1], [0, 0, 1, 1], [], []>} : vector<8x64xf32>, vector<64x192xf32>, vector<8x192xf32> -> vector<8x192xf32>
    %60 = vector.broadcast %24 : vector<1x192xf32> to vector<8x192xf32>
    %61 = arith.addf %59, %60 : vector<8x192xf32>
    %62 = vector.extract_strided_slice %58 {offsets = [0, 0], sizes = [8, 64], strides = [1, 1]} : vector<8x192xf32> to vector<8x64xf32>
    %63 = vector.extract_strided_slice %58 {offsets = [0, 64], sizes = [8, 64], strides = [1, 1]} : vector<8x192xf32> to vector<8x64xf32>
    %64 = vector.extract_strided_slice %58 {offsets = [0, 128], sizes = [8, 64], strides = [1, 1]} : vector<8x192xf32> to vector<8x64xf32>
    %65 = vector.extract_strided_slice %61 {offsets = [0, 0], sizes = [8, 64], strides = [1, 1]} : vector<8x192xf32> to vector<8x64xf32>
    %66 = vector.extract_strided_slice %61 {offsets = [0, 64], sizes = [8, 64], strides = [1, 1]} : vector<8x192xf32> to vector<8x64xf32>
    %67 = vector.extract_strided_slice %61 {offsets = [0, 128], sizes = [8, 64], strides = [1, 1]} : vector<8x192xf32> to vector<8x64xf32>
    %68 = arith.addf %62, %65 : vector<8x64xf32>
    %69 = arith.negf %68 : vector<8x64xf32>
    %70 = math.exp %69 : vector<8x64xf32>
    %cst_26 = arith.constant 1.000000e+00 : f32
    %71 = vector.broadcast %cst_26 : f32 to vector<8x64xf32>
    %72 = arith.addf %71, %70 : vector<8x64xf32>
    %73 = arith.divf %71, %72 : vector<8x64xf32>
    %74 = arith.addf %63, %66 : vector<8x64xf32>
    %75 = arith.negf %74 : vector<8x64xf32>
    %76 = math.exp %75 : vector<8x64xf32>
    %cst_27 = arith.constant 1.000000e+00 : f32
    %77 = vector.broadcast %cst_27 : f32 to vector<8x64xf32>
    %78 = arith.addf %77, %76 : vector<8x64xf32>
    %79 = arith.divf %77, %78 : vector<8x64xf32>
    %80 = arith.mulf %73, %67 : vector<8x64xf32>
    %81 = arith.addf %64, %80 : vector<8x64xf32>
    %82 = math.tanh %81 : vector<8x64xf32>
    %cst_28 = arith.constant 1.000000e+00 : f32
    %83 = vector.broadcast %cst_28 : f32 to vector<8x64xf32>
    %84 = arith.subf %83, %79 : vector<8x64xf32>
    %85 = arith.mulf %84, %82 : vector<8x64xf32>
    %86 = arith.mulf %79, %56 : vector<8x64xf32>
    %87 = arith.addf %85, %86 : vector<8x64xf32>
    %88 = vector.extract_strided_slice %22 {offsets = [0, 2, 0], sizes = [8, 1, 192], strides = [1, 1, 1]} : vector<8x8x192xf32> to vector<8x1x192xf32>
    %89 = vector.shape_cast %88 : vector<8x1x192xf32> to vector<8x192xf32>
    %cst_29 = arith.constant dense<0.000000e+00> : vector<8x192xf32>
    %90 = tpu.matmul %87, %23, %cst_29 {dimension_numbers = #tpu.dot_dimension_numbers<[1], [0], [0], [1], [0, 0, 1, 1], [], []>} : vector<8x64xf32>, vector<64x192xf32>, vector<8x192xf32> -> vector<8x192xf32>
    %91 = vector.broadcast %24 : vector<1x192xf32> to vector<8x192xf32>
    %92 = arith.addf %90, %91 : vector<8x192xf32>
    %93 = vector.extract_strided_slice %89 {offsets = [0, 0], sizes = [8, 64], strides = [1, 1]} : vector<8x192xf32> to vector<8x64xf32>
    %94 = vector.extract_strided_slice %89 {offsets = [0, 64], sizes = [8, 64], strides = [1, 1]} : vector<8x192xf32> to vector<8x64xf32>
    %95 = vector.extract_strided_slice %89 {offsets = [0, 128], sizes = [8, 64], strides = [1, 1]} : vector<8x192xf32> to vector<8x64xf32>
    %96 = vector.extract_strided_slice %92 {offsets = [0, 0], sizes = [8, 64], strides = [1, 1]} : vector<8x192xf32> to vector<8x64xf32>
    %97 = vector.extract_strided_slice %92 {offsets = [0, 64], sizes = [8, 64], strides = [1, 1]} : vector<8x192xf32> to vector<8x64xf32>
    %98 = vector.extract_strided_slice %92 {offsets = [0, 128], sizes = [8, 64], strides = [1, 1]} : vector<8x192xf32> to vector<8x64xf32>
    %99 = arith.addf %93, %96 : vector<8x64xf32>
    %100 = arith.negf %99 : vector<8x64xf32>
    %101 = math.exp %100 : vector<8x64xf32>
    %cst_30 = arith.constant 1.000000e+00 : f32
    %102 = vector.broadcast %cst_30 : f32 to vector<8x64xf32>
    %103 = arith.addf %102, %101 : vector<8x64xf32>
    %104 = arith.divf %102, %103 : vector<8x64xf32>
    %105 = arith.addf %94, %97 : vector<8x64xf32>
    %106 = arith.negf %105 : vector<8x64xf32>
    %107 = math.exp %106 : vector<8x64xf32>
    %cst_31 = arith.constant 1.000000e+00 : f32
    %108 = vector.broadcast %cst_31 : f32 to vector<8x64xf32>
    %109 = arith.addf %108, %107 : vector<8x64xf32>
    %110 = arith.divf %108, %109 : vector<8x64xf32>
    %111 = arith.mulf %104, %98 : vector<8x64xf32>
    %112 = arith.addf %95, %111 : vector<8x64xf32>
    %113 = math.tanh %112 : vector<8x64xf32>
    %cst_32 = arith.constant 1.000000e+00 : f32
    %114 = vector.broadcast %cst_32 : f32 to vector<8x64xf32>
    %115 = arith.subf %114, %110 : vector<8x64xf32>
    %116 = arith.mulf %115, %113 : vector<8x64xf32>
    %117 = arith.mulf %110, %87 : vector<8x64xf32>
    %118 = arith.addf %116, %117 : vector<8x64xf32>
    %119 = vector.extract_strided_slice %22 {offsets = [0, 3, 0], sizes = [8, 1, 192], strides = [1, 1, 1]} : vector<8x8x192xf32> to vector<8x1x192xf32>
    %120 = vector.shape_cast %119 : vector<8x1x192xf32> to vector<8x192xf32>
    %cst_33 = arith.constant dense<0.000000e+00> : vector<8x192xf32>
    %121 = tpu.matmul %118, %23, %cst_33 {dimension_numbers = #tpu.dot_dimension_numbers<[1], [0], [0], [1], [0, 0, 1, 1], [], []>} : vector<8x64xf32>, vector<64x192xf32>, vector<8x192xf32> -> vector<8x192xf32>
    %122 = vector.broadcast %24 : vector<1x192xf32> to vector<8x192xf32>
    %123 = arith.addf %121, %122 : vector<8x192xf32>
    %124 = vector.extract_strided_slice %120 {offsets = [0, 0], sizes = [8, 64], strides = [1, 1]} : vector<8x192xf32> to vector<8x64xf32>
    %125 = vector.extract_strided_slice %120 {offsets = [0, 64], sizes = [8, 64], strides = [1, 1]} : vector<8x192xf32> to vector<8x64xf32>
    %126 = vector.extract_strided_slice %120 {offsets = [0, 128], sizes = [8, 64], strides = [1, 1]} : vector<8x192xf32> to vector<8x64xf32>
    %127 = vector.extract_strided_slice %123 {offsets = [0, 0], sizes = [8, 64], strides = [1, 1]} : vector<8x192xf32> to vector<8x64xf32>
    %128 = vector.extract_strided_slice %123 {offsets = [0, 64], sizes = [8, 64], strides = [1, 1]} : vector<8x192xf32> to vector<8x64xf32>
    %129 = vector.extract_strided_slice %123 {offsets = [0, 128], sizes = [8, 64], strides = [1, 1]} : vector<8x192xf32> to vector<8x64xf32>
    %130 = arith.addf %124, %127 : vector<8x64xf32>
    %131 = arith.negf %130 : vector<8x64xf32>
    %132 = math.exp %131 : vector<8x64xf32>
    %cst_34 = arith.constant 1.000000e+00 : f32
    %133 = vector.broadcast %cst_34 : f32 to vector<8x64xf32>
    %134 = arith.addf %133, %132 : vector<8x64xf32>
    %135 = arith.divf %133, %134 : vector<8x64xf32>
    %136 = arith.addf %125, %128 : vector<8x64xf32>
    %137 = arith.negf %136 : vector<8x64xf32>
    %138 = math.exp %137 : vector<8x64xf32>
    %cst_35 = arith.constant 1.000000e+00 : f32
    %139 = vector.broadcast %cst_35 : f32 to vector<8x64xf32>
    %140 = arith.addf %139, %138 : vector<8x64xf32>
    %141 = arith.divf %139, %140 : vector<8x64xf32>
    %142 = arith.mulf %135, %129 : vector<8x64xf32>
    %143 = arith.addf %126, %142 : vector<8x64xf32>
    %144 = math.tanh %143 : vector<8x64xf32>
    %cst_36 = arith.constant 1.000000e+00 : f32
    %145 = vector.broadcast %cst_36 : f32 to vector<8x64xf32>
    %146 = arith.subf %145, %141 : vector<8x64xf32>
    %147 = arith.mulf %146, %144 : vector<8x64xf32>
    %148 = arith.mulf %141, %118 : vector<8x64xf32>
    %149 = arith.addf %147, %148 : vector<8x64xf32>
    %150 = vector.extract_strided_slice %22 {offsets = [0, 4, 0], sizes = [8, 1, 192], strides = [1, 1, 1]} : vector<8x8x192xf32> to vector<8x1x192xf32>
    %151 = vector.shape_cast %150 : vector<8x1x192xf32> to vector<8x192xf32>
    %cst_37 = arith.constant dense<0.000000e+00> : vector<8x192xf32>
    %152 = tpu.matmul %149, %23, %cst_37 {dimension_numbers = #tpu.dot_dimension_numbers<[1], [0], [0], [1], [0, 0, 1, 1], [], []>} : vector<8x64xf32>, vector<64x192xf32>, vector<8x192xf32> -> vector<8x192xf32>
    %153 = vector.broadcast %24 : vector<1x192xf32> to vector<8x192xf32>
    %154 = arith.addf %152, %153 : vector<8x192xf32>
    %155 = vector.extract_strided_slice %151 {offsets = [0, 0], sizes = [8, 64], strides = [1, 1]} : vector<8x192xf32> to vector<8x64xf32>
    %156 = vector.extract_strided_slice %151 {offsets = [0, 64], sizes = [8, 64], strides = [1, 1]} : vector<8x192xf32> to vector<8x64xf32>
    %157 = vector.extract_strided_slice %151 {offsets = [0, 128], sizes = [8, 64], strides = [1, 1]} : vector<8x192xf32> to vector<8x64xf32>
    %158 = vector.extract_strided_slice %154 {offsets = [0, 0], sizes = [8, 64], strides = [1, 1]} : vector<8x192xf32> to vector<8x64xf32>
    %159 = vector.extract_strided_slice %154 {offsets = [0, 64], sizes = [8, 64], strides = [1, 1]} : vector<8x192xf32> to vector<8x64xf32>
    %160 = vector.extract_strided_slice %154 {offsets = [0, 128], sizes = [8, 64], strides = [1, 1]} : vector<8x192xf32> to vector<8x64xf32>
    %161 = arith.addf %155, %158 : vector<8x64xf32>
    %162 = arith.negf %161 : vector<8x64xf32>
    %163 = math.exp %162 : vector<8x64xf32>
    %cst_38 = arith.constant 1.000000e+00 : f32
    %164 = vector.broadcast %cst_38 : f32 to vector<8x64xf32>
    %165 = arith.addf %164, %163 : vector<8x64xf32>
    %166 = arith.divf %164, %165 : vector<8x64xf32>
    %167 = arith.addf %156, %159 : vector<8x64xf32>
    %168 = arith.negf %167 : vector<8x64xf32>
    %169 = math.exp %168 : vector<8x64xf32>
    %cst_39 = arith.constant 1.000000e+00 : f32
    %170 = vector.broadcast %cst_39 : f32 to vector<8x64xf32>
    %171 = arith.addf %170, %169 : vector<8x64xf32>
    %172 = arith.divf %170, %171 : vector<8x64xf32>
    %173 = arith.mulf %166, %160 : vector<8x64xf32>
    %174 = arith.addf %157, %173 : vector<8x64xf32>
    %175 = math.tanh %174 : vector<8x64xf32>
    %cst_40 = arith.constant 1.000000e+00 : f32
    %176 = vector.broadcast %cst_40 : f32 to vector<8x64xf32>
    %177 = arith.subf %176, %172 : vector<8x64xf32>
    %178 = arith.mulf %177, %175 : vector<8x64xf32>
    %179 = arith.mulf %172, %149 : vector<8x64xf32>
    %180 = arith.addf %178, %179 : vector<8x64xf32>
    %181 = vector.extract_strided_slice %22 {offsets = [0, 5, 0], sizes = [8, 1, 192], strides = [1, 1, 1]} : vector<8x8x192xf32> to vector<8x1x192xf32>
    %182 = vector.shape_cast %181 : vector<8x1x192xf32> to vector<8x192xf32>
    %cst_41 = arith.constant dense<0.000000e+00> : vector<8x192xf32>
    %183 = tpu.matmul %180, %23, %cst_41 {dimension_numbers = #tpu.dot_dimension_numbers<[1], [0], [0], [1], [0, 0, 1, 1], [], []>} : vector<8x64xf32>, vector<64x192xf32>, vector<8x192xf32> -> vector<8x192xf32>
    %184 = vector.broadcast %24 : vector<1x192xf32> to vector<8x192xf32>
    %185 = arith.addf %183, %184 : vector<8x192xf32>
    %186 = vector.extract_strided_slice %182 {offsets = [0, 0], sizes = [8, 64], strides = [1, 1]} : vector<8x192xf32> to vector<8x64xf32>
    %187 = vector.extract_strided_slice %182 {offsets = [0, 64], sizes = [8, 64], strides = [1, 1]} : vector<8x192xf32> to vector<8x64xf32>
    %188 = vector.extract_strided_slice %182 {offsets = [0, 128], sizes = [8, 64], strides = [1, 1]} : vector<8x192xf32> to vector<8x64xf32>
    %189 = vector.extract_strided_slice %185 {offsets = [0, 0], sizes = [8, 64], strides = [1, 1]} : vector<8x192xf32> to vector<8x64xf32>
    %190 = vector.extract_strided_slice %185 {offsets = [0, 64], sizes = [8, 64], strides = [1, 1]} : vector<8x192xf32> to vector<8x64xf32>
    %191 = vector.extract_strided_slice %185 {offsets = [0, 128], sizes = [8, 64], strides = [1, 1]} : vector<8x192xf32> to vector<8x64xf32>
    %192 = arith.addf %186, %189 : vector<8x64xf32>
    %193 = arith.negf %192 : vector<8x64xf32>
    %194 = math.exp %193 : vector<8x64xf32>
    %cst_42 = arith.constant 1.000000e+00 : f32
    %195 = vector.broadcast %cst_42 : f32 to vector<8x64xf32>
    %196 = arith.addf %195, %194 : vector<8x64xf32>
    %197 = arith.divf %195, %196 : vector<8x64xf32>
    %198 = arith.addf %187, %190 : vector<8x64xf32>
    %199 = arith.negf %198 : vector<8x64xf32>
    %200 = math.exp %199 : vector<8x64xf32>
    %cst_43 = arith.constant 1.000000e+00 : f32
    %201 = vector.broadcast %cst_43 : f32 to vector<8x64xf32>
    %202 = arith.addf %201, %200 : vector<8x64xf32>
    %203 = arith.divf %201, %202 : vector<8x64xf32>
    %204 = arith.mulf %197, %191 : vector<8x64xf32>
    %205 = arith.addf %188, %204 : vector<8x64xf32>
    %206 = math.tanh %205 : vector<8x64xf32>
    %cst_44 = arith.constant 1.000000e+00 : f32
    %207 = vector.broadcast %cst_44 : f32 to vector<8x64xf32>
    %208 = arith.subf %207, %203 : vector<8x64xf32>
    %209 = arith.mulf %208, %206 : vector<8x64xf32>
    %210 = arith.mulf %203, %180 : vector<8x64xf32>
    %211 = arith.addf %209, %210 : vector<8x64xf32>
    %212 = vector.extract_strided_slice %22 {offsets = [0, 6, 0], sizes = [8, 1, 192], strides = [1, 1, 1]} : vector<8x8x192xf32> to vector<8x1x192xf32>
    %213 = vector.shape_cast %212 : vector<8x1x192xf32> to vector<8x192xf32>
    %cst_45 = arith.constant dense<0.000000e+00> : vector<8x192xf32>
    %214 = tpu.matmul %211, %23, %cst_45 {dimension_numbers = #tpu.dot_dimension_numbers<[1], [0], [0], [1], [0, 0, 1, 1], [], []>} : vector<8x64xf32>, vector<64x192xf32>, vector<8x192xf32> -> vector<8x192xf32>
    %215 = vector.broadcast %24 : vector<1x192xf32> to vector<8x192xf32>
    %216 = arith.addf %214, %215 : vector<8x192xf32>
    %217 = vector.extract_strided_slice %213 {offsets = [0, 0], sizes = [8, 64], strides = [1, 1]} : vector<8x192xf32> to vector<8x64xf32>
    %218 = vector.extract_strided_slice %213 {offsets = [0, 64], sizes = [8, 64], strides = [1, 1]} : vector<8x192xf32> to vector<8x64xf32>
    %219 = vector.extract_strided_slice %213 {offsets = [0, 128], sizes = [8, 64], strides = [1, 1]} : vector<8x192xf32> to vector<8x64xf32>
    %220 = vector.extract_strided_slice %216 {offsets = [0, 0], sizes = [8, 64], strides = [1, 1]} : vector<8x192xf32> to vector<8x64xf32>
    %221 = vector.extract_strided_slice %216 {offsets = [0, 64], sizes = [8, 64], strides = [1, 1]} : vector<8x192xf32> to vector<8x64xf32>
    %222 = vector.extract_strided_slice %216 {offsets = [0, 128], sizes = [8, 64], strides = [1, 1]} : vector<8x192xf32> to vector<8x64xf32>
    %223 = arith.addf %217, %220 : vector<8x64xf32>
    %224 = arith.negf %223 : vector<8x64xf32>
    %225 = math.exp %224 : vector<8x64xf32>
    %cst_46 = arith.constant 1.000000e+00 : f32
    %226 = vector.broadcast %cst_46 : f32 to vector<8x64xf32>
    %227 = arith.addf %226, %225 : vector<8x64xf32>
    %228 = arith.divf %226, %227 : vector<8x64xf32>
    %229 = arith.addf %218, %221 : vector<8x64xf32>
    %230 = arith.negf %229 : vector<8x64xf32>
    %231 = math.exp %230 : vector<8x64xf32>
    %cst_47 = arith.constant 1.000000e+00 : f32
    %232 = vector.broadcast %cst_47 : f32 to vector<8x64xf32>
    %233 = arith.addf %232, %231 : vector<8x64xf32>
    %234 = arith.divf %232, %233 : vector<8x64xf32>
    %235 = arith.mulf %228, %222 : vector<8x64xf32>
    %236 = arith.addf %219, %235 : vector<8x64xf32>
    %237 = math.tanh %236 : vector<8x64xf32>
    %cst_48 = arith.constant 1.000000e+00 : f32
    %238 = vector.broadcast %cst_48 : f32 to vector<8x64xf32>
    %239 = arith.subf %238, %234 : vector<8x64xf32>
    %240 = arith.mulf %239, %237 : vector<8x64xf32>
    %241 = arith.mulf %234, %211 : vector<8x64xf32>
    %242 = arith.addf %240, %241 : vector<8x64xf32>
    %243 = vector.extract_strided_slice %22 {offsets = [0, 7, 0], sizes = [8, 1, 192], strides = [1, 1, 1]} : vector<8x8x192xf32> to vector<8x1x192xf32>
    %244 = vector.shape_cast %243 : vector<8x1x192xf32> to vector<8x192xf32>
    %cst_49 = arith.constant dense<0.000000e+00> : vector<8x192xf32>
    %245 = tpu.matmul %242, %23, %cst_49 {dimension_numbers = #tpu.dot_dimension_numbers<[1], [0], [0], [1], [0, 0, 1, 1], [], []>} : vector<8x64xf32>, vector<64x192xf32>, vector<8x192xf32> -> vector<8x192xf32>
    %246 = vector.broadcast %24 : vector<1x192xf32> to vector<8x192xf32>
    %247 = arith.addf %245, %246 : vector<8x192xf32>
    %248 = vector.extract_strided_slice %244 {offsets = [0, 0], sizes = [8, 64], strides = [1, 1]} : vector<8x192xf32> to vector<8x64xf32>
    %249 = vector.extract_strided_slice %244 {offsets = [0, 64], sizes = [8, 64], strides = [1, 1]} : vector<8x192xf32> to vector<8x64xf32>
    %250 = vector.extract_strided_slice %244 {offsets = [0, 128], sizes = [8, 64], strides = [1, 1]} : vector<8x192xf32> to vector<8x64xf32>
    %251 = vector.extract_strided_slice %247 {offsets = [0, 0], sizes = [8, 64], strides = [1, 1]} : vector<8x192xf32> to vector<8x64xf32>
    %252 = vector.extract_strided_slice %247 {offsets = [0, 64], sizes = [8, 64], strides = [1, 1]} : vector<8x192xf32> to vector<8x64xf32>
    %253 = vector.extract_strided_slice %247 {offsets = [0, 128], sizes = [8, 64], strides = [1, 1]} : vector<8x192xf32> to vector<8x64xf32>
    %254 = arith.addf %248, %251 : vector<8x64xf32>
    %255 = arith.negf %254 : vector<8x64xf32>
    %256 = math.exp %255 : vector<8x64xf32>
    %cst_50 = arith.constant 1.000000e+00 : f32
    %257 = vector.broadcast %cst_50 : f32 to vector<8x64xf32>
    %258 = arith.addf %257, %256 : vector<8x64xf32>
    %259 = arith.divf %257, %258 : vector<8x64xf32>
    %260 = arith.addf %249, %252 : vector<8x64xf32>
    %261 = arith.negf %260 : vector<8x64xf32>
    %262 = math.exp %261 : vector<8x64xf32>
    %cst_51 = arith.constant 1.000000e+00 : f32
    %263 = vector.broadcast %cst_51 : f32 to vector<8x64xf32>
    %264 = arith.addf %263, %262 : vector<8x64xf32>
    %265 = arith.divf %263, %264 : vector<8x64xf32>
    %266 = arith.mulf %259, %253 : vector<8x64xf32>
    %267 = arith.addf %250, %266 : vector<8x64xf32>
    %268 = math.tanh %267 : vector<8x64xf32>
    %cst_52 = arith.constant 1.000000e+00 : f32
    %269 = vector.broadcast %cst_52 : f32 to vector<8x64xf32>
    %270 = arith.subf %269, %265 : vector<8x64xf32>
    %271 = arith.mulf %270, %268 : vector<8x64xf32>
    %272 = arith.mulf %265, %242 : vector<8x64xf32>
    %273 = arith.addf %271, %272 : vector<8x64xf32>
    %c0_53 = arith.constant 0 : index
    %c0_54 = arith.constant 0 : index
    %274 = vector.load %arg2[%c0_53, %c0_54] : memref<8x80xf32, #tpu.memory_space<vmem>>, vector<8x80xf32>
    %275 = tpu.concatenate %274, %273 in 1 : vector<8x80xf32>, vector<8x64xf32> -> vector<8x144xf32>
    %276 = arith.truncf %275 : vector<8x144xf32> to vector<8x144xbf16>
    %c0_55 = arith.constant 0 : index
    %c0_56 = arith.constant 0 : index
    %277 = vector.load %arg9[%c0_55, %c0_56] : memref<144x2048xbf16, #tpu.memory_space<vmem>>, vector<144x2048xbf16>
    %cst_57 = arith.constant dense<0.000000e+00> : vector<8x2048xf32>
    %278 = tpu.matmul %276, %277, %cst_57 {dimension_numbers = #tpu.dot_dimension_numbers<[1], [0], [0], [1], [0, 0, 1, 1], [], []>} : vector<8x144xbf16>, vector<144x2048xbf16>, vector<8x2048xf32> -> vector<8x2048xf32>
    %c0_58 = arith.constant 0 : index
    %c0_59 = arith.constant 0 : index
    %279 = vector.load %arg10[%c0_58, %c0_59] : memref<1x2048xf32, #tpu.memory_space<vmem>>, vector<1x2048xf32>
    %280 = vector.broadcast %279 : vector<1x2048xf32> to vector<8x2048xf32>
    %281 = arith.addf %278, %280 : vector<8x2048xf32>
    %cst_60 = arith.constant 0.000000e+00 : f32
    %282 = vector.broadcast %cst_60 : f32 to vector<8x2048xf32>
    %283 = arith.maximumf %281, %282 : vector<8x2048xf32>
    %284 = vector.extract_strided_slice %283 {offsets = [0, 0], sizes = [8, 1024], strides = [1, 1]} : vector<8x2048xf32> to vector<8x1024xf32>
    %285 = vector.extract_strided_slice %283 {offsets = [0, 1024], sizes = [8, 1024], strides = [1, 1]} : vector<8x2048xf32> to vector<8x1024xf32>
    %286 = arith.truncf %284 : vector<8x1024xf32> to vector<8x1024xbf16>
    %c0_61 = arith.constant 0 : index
    %c0_62 = arith.constant 0 : index
    %287 = vector.load %arg11[%c0_61, %c0_62] : memref<1024x512xbf16, #tpu.memory_space<vmem>>, vector<1024x512xbf16>
    %cst_63 = arith.constant dense<0.000000e+00> : vector<8x512xf32>
    %288 = tpu.matmul %286, %287, %cst_63 {dimension_numbers = #tpu.dot_dimension_numbers<[1], [0], [0], [1], [0, 0, 1, 1], [], []>} : vector<8x1024xbf16>, vector<1024x512xbf16>, vector<8x512xf32> -> vector<8x512xf32>
    %c0_64 = arith.constant 0 : index
    %c0_65 = arith.constant 0 : index
    %289 = vector.load %arg12[%c0_64, %c0_65] : memref<1x512xf32, #tpu.memory_space<vmem>>, vector<1x512xf32>
    %290 = vector.broadcast %289 : vector<1x512xf32> to vector<8x512xf32>
    %291 = arith.addf %288, %290 : vector<8x512xf32>
    %cst_66 = arith.constant 0.000000e+00 : f32
    %292 = vector.broadcast %cst_66 : f32 to vector<8x512xf32>
    %293 = arith.maximumf %291, %292 : vector<8x512xf32>
    %294 = arith.truncf %293 : vector<8x512xf32> to vector<8x512xbf16>
    %c0_67 = arith.constant 0 : index
    %c0_68 = arith.constant 0 : index
    %295 = vector.load %arg13[%c0_67, %c0_68] : memref<512x1024xbf16, #tpu.memory_space<vmem>>, vector<512x1024xbf16>
    %cst_69 = arith.constant dense<0.000000e+00> : vector<8x1024xf32>
    %296 = tpu.matmul %294, %295, %cst_69 {dimension_numbers = #tpu.dot_dimension_numbers<[1], [0], [0], [1], [0, 0, 1, 1], [], []>} : vector<8x512xbf16>, vector<512x1024xbf16>, vector<8x1024xf32> -> vector<8x1024xf32>
    %c0_70 = arith.constant 0 : index
    %c0_71 = arith.constant 0 : index
    %297 = vector.load %arg14[%c0_70, %c0_71] : memref<1x1024xf32, #tpu.memory_space<vmem>>, vector<1x1024xf32>
    %298 = vector.broadcast %297 : vector<1x1024xf32> to vector<8x1024xf32>
    %299 = arith.addf %296, %298 : vector<8x1024xf32>
    %cst_72 = arith.constant 0.000000e+00 : f32
    %300 = vector.broadcast %cst_72 : f32 to vector<8x1024xf32>
    %301 = arith.maximumf %299, %300 : vector<8x1024xf32>
    %302 = arith.truncf %285 : vector<8x1024xf32> to vector<8x1024xbf16>
    %c0_73 = arith.constant 0 : index
    %c0_74 = arith.constant 0 : index
    %303 = vector.load %arg15[%c0_73, %c0_74] : memref<1024x512xbf16, #tpu.memory_space<vmem>>, vector<1024x512xbf16>
    %cst_75 = arith.constant dense<0.000000e+00> : vector<8x512xf32>
    %304 = tpu.matmul %302, %303, %cst_75 {dimension_numbers = #tpu.dot_dimension_numbers<[1], [0], [0], [1], [0, 0, 1, 1], [], []>} : vector<8x1024xbf16>, vector<1024x512xbf16>, vector<8x512xf32> -> vector<8x512xf32>
    %c0_76 = arith.constant 0 : index
    %c0_77 = arith.constant 0 : index
    %305 = vector.load %arg16[%c0_76, %c0_77] : memref<1x512xf32, #tpu.memory_space<vmem>>, vector<1x512xf32>
    %306 = vector.broadcast %305 : vector<1x512xf32> to vector<8x512xf32>
    %307 = arith.addf %304, %306 : vector<8x512xf32>
    %cst_78 = arith.constant 0.000000e+00 : f32
    %308 = vector.broadcast %cst_78 : f32 to vector<8x512xf32>
    %309 = arith.maximumf %307, %308 : vector<8x512xf32>
    %310 = arith.truncf %309 : vector<8x512xf32> to vector<8x512xbf16>
    %c0_79 = arith.constant 0 : index
    %c0_80 = arith.constant 0 : index
    %311 = vector.load %arg17[%c0_79, %c0_80] : memref<512x1024xbf16, #tpu.memory_space<vmem>>, vector<512x1024xbf16>
    %cst_81 = arith.constant dense<0.000000e+00> : vector<8x1024xf32>
    %312 = tpu.matmul %310, %311, %cst_81 {dimension_numbers = #tpu.dot_dimension_numbers<[1], [0], [0], [1], [0, 0, 1, 1], [], []>} : vector<8x512xbf16>, vector<512x1024xbf16>, vector<8x1024xf32> -> vector<8x1024xf32>
    %c0_82 = arith.constant 0 : index
    %c0_83 = arith.constant 0 : index
    %313 = vector.load %arg18[%c0_82, %c0_83] : memref<1x1024xf32, #tpu.memory_space<vmem>>, vector<1x1024xf32>
    %314 = vector.broadcast %313 : vector<1x1024xf32> to vector<8x1024xf32>
    %315 = arith.addf %312, %314 : vector<8x1024xf32>
    %cst_84 = arith.constant 0.000000e+00 : f32
    %316 = vector.broadcast %cst_84 : f32 to vector<8x1024xf32>
    %317 = arith.maximumf %315, %316 : vector<8x1024xf32>
    %318 = tpu.concatenate %301, %317 in 1 : vector<8x1024xf32>, vector<8x1024xf32> -> vector<8x2048xf32>
    %319 = arith.truncf %318 : vector<8x2048xf32> to vector<8x2048xbf16>
    %c0_85 = arith.constant 0 : index
    %c0_86 = arith.constant 0 : index
    %320 = vector.load %arg19[%c0_85, %c0_86] : memref<2048x128xbf16, #tpu.memory_space<vmem>>, vector<2048x128xbf16>
    %cst_87 = arith.constant dense<0.000000e+00> : vector<8x128xf32>
    %321 = tpu.matmul %319, %320, %cst_87 {dimension_numbers = #tpu.dot_dimension_numbers<[1], [0], [0], [1], [0, 0, 1, 1], [], []>} : vector<8x2048xbf16>, vector<2048x128xbf16>, vector<8x128xf32> -> vector<8x128xf32>
    %c0_88 = arith.constant 0 : index
    %c0_89 = arith.constant 0 : index
    %322 = vector.load %arg20[%c0_88, %c0_89] : memref<1x128xf32, #tpu.memory_space<vmem>>, vector<1x128xf32>
    %323 = vector.broadcast %322 : vector<1x128xf32> to vector<8x128xf32>
    %324 = arith.addf %321, %323 : vector<8x128xf32>
    %c0_90 = arith.constant 0 : index
    %c0_91 = arith.constant 0 : index
    %325 = vector.load %arg21[%c0_90, %c0_91] : memref<8x128xf32, #tpu.memory_space<vmem>>, vector<8x128xf32>
    tpu.vector_store %arg21[%c0_90, %c0_91], %324 {strides = array<i32>} : memref<8x128xf32, #tpu.memory_space<vmem>>, vector<8x128xf32>,
    return
  }
}

</mosaic_0001>

<bundles_post_ra>
// kernel: tpu_custom_call.1
= control target key start
LH: loop header
LB: loop body
LE: loop exit
PB: predicated region body
PF: predicated region fallthrough
CT: control target
= control target key end

     0   :  { %s18660_s0 = inlined_call_operand.vmem [shape: f32[8,8,2], index: 0, kind: input, shape index: {}]   ;;  %s18661_s1 = inlined_call_operand.vmem [shape: f32[8,8,2], index: 1, kind: input, shape index: {}]   ;;  %s18662_s2 = inlined_call_operand.hbm [shape: f32[8,80], index: 2, kind: input, shape index: {}]   ;;  %s18663_s3 = inlined_call_operand.hbm [shape: f32[6,16], index: 3, kind: input, shape index: {}]   ;;  %s18664_s4 = inlined_call_operand.vmem [shape: f32[1,16], index: 4, kind: input, shape index: {}]   ;;  %s18665_s5 = inlined_call_operand.vmem [shape: f32[16,192], index: 5, kind: input, shape index: {}]   ;;  %s18666_s6 = inlined_call_operand.vmem [shape: f32[64,192], index: 6, kind: input, shape index: {}]   ;;  %s18667_s7 = inlined_call_operand.hbm [shape: f32[1,192], index: 7, kind: input, shape index: {}]   ;;  %s18668_s8 = inlined_call_operand.hbm [shape: f32[1,192], index: 8, kind: input, shape index: {}]   ;;  %s18669_s9 = inlined_call_operand.hbm [shape: bf16[144,2048], index: 9, kind: input, shape index: {}]   ;;  %s18670_s10 = inlined_call_operand.vmem [shape: f32[1,2048], index: 10, kind: input, shape index: {}]   ;;  %s18671_s11 = inlined_call_operand.hbm [shape: bf16[1024,512], index: 11, kind: input, shape index: {}]   ;;  %s18672_s12 = inlined_call_operand.vmem [shape: f32[1,512], index: 12, kind: input, shape index: {}]   ;;  %s18673_s13 = inlined_call_operand.hbm [shape: bf16[512,1024], index: 13, kind: input, shape index: {}]   ;;  %s18674_s14 = inlined_call_operand.vmem [shape: f32[1,1024], index: 14, kind: input, shape index: {}]   ;;  %s18675_s15 = inlined_call_operand.hbm [shape: bf16[1024,512], index: 15, kind: input, shape index: {}]   ;;  %s18676_s16 = inlined_call_operand.vmem [shape: f32[1,512], index: 16, kind: input, shape index: {}]   ;;  %s18677_s17 = inlined_call_operand.hbm [shape: bf16[512,1024], index: 17, kind: input, shape index: {}]   ;;  %s18678_s18 = inlined_call_operand.vmem [shape: f32[1,1024], index: 18, kind: input, shape index: {}]   ;;  %s18679_s19 = inlined_call_operand.hbm [shape: bf16[2048,128], index: 19, kind: input, shape index: {}]   ;;  %s18680_s20 = inlined_call_operand.vmem [shape: f32[1,128], index: 20, kind: input, shape index: {}]   ;;  %s18681_s21 = inlined_call_operand.hbm [shape: f32[8,128], index: 21, kind: output, shape index: {}]  }
   0x1   :  { %18687 = sst [smem:[#allocation27_spill]] %s18660_s0 }
   0x2   :  { %18688 = sst [smem:[#allocation28_spill]] %s18661_s1 }
   0x3   :  { %18689 = sst [smem:[#allocation29_spill]] %s18662_s2 }
   0x4   :  { %18690 = sst [smem:[#allocation30_spill]] %s18663_s3 }
   0x5   :  { %18691 = sst [smem:[#allocation31_spill]] %s18664_s4 }
   0x6   :  { %18692 = sst [smem:[#allocation32_spill]] %s18665_s5 }
   0x7   :  { %26 = vsyncpa [#allocation3], 0 }
   0x8   :  { %27 = vsyncpa [#allocation6], 0 }
   0x9   :  { %28 = vsyncpa [#allocation9], 0 }
   0xa   :  { %29 = vsyncpa [#allocation12], 0 }
   0xb   :  { %30 = vsyncpa [#allocation15], 0 }
   0xc   :  { %31 = vsyncpa [#allocation18], 0 }
   0xd   :  { %32 = vsyncpa [#allocation4], 0  ;;  %s16731_s2 = smov [#allocation5]   ;;  %s16732_s26 = smov [#allocation8]  }
   0xe   :  { %s53_s25 = sshll.u32 %s16731_s2, 4  ;;  %s79_s27 = sshll.u32 %s16732_s26, 4  ;;  %s54_s25 = int_to_ptr.vmem [resolvable:$true] %s53_s25  ;;  %s80_s27 = int_to_ptr.vmem [resolvable:$true] %s79_s27 }
   0xf   :  { %s18693_s29 = sld [smem:[#allocation30_spill]] }
  0x15   :  { %s16475_s0 = scalar_lea.hbm %s18693_s29, 128 }
  0x16   :  { %p16476_p0 = scmp.ne.s32.totalorder %s18693_s29, %s16475_s0  ;;  %p16479_p1 = scmp.lt.u32.totalorder %s16475_s0, %s18693_s29 }
  0x18   :  { %p16481_p2 = pnand %p16479_p1, %p16476_p0 }
  0x1a   :  { %16484 = shalt.err (!%p16481_p2)
}
  0x1b   :  { %s16485_s23 = scalar_lea.vmem %s54_s25, 128  ;;  %p16490_p4 = scmp.lt.s32.totalorder %s54_s25, %s54_s25 }
  0x1c   :  { %p16486_p3 = scmp.ne.s32.totalorder %s54_s25, %s16485_s23  ;;  %p16491_p5 = scmp.lt.s32.totalorder %s16485_s23, %s16485_s23 }
  0x1e   :  { %p16492_p6 = por %p16491_p5, %p16490_p4 }
  0x20   :  { %p16493_p7 = pnand %p16492_p6, %p16486_p3 }
  0x22   :  { %16496 = shalt.err (!%p16493_p7)
}
  0x23   :  { %56 = dma.hbm_to_vmem [thread:$0]  %s18693_s29, 128, %s54_s25, [#allocation6]  }
  0x24   :  { %s16497_s3 = scalar_lea.hbm %s18668_s8, 32 }
  0x25   :  { %p16498_p8 = scmp.ne.s32.totalorder %s18668_s8, %s16497_s3  ;;  %p16501_p9 = scmp.lt.u32.totalorder %s16497_s3, %s18668_s8 }
  0x27   :  { %p16503_p10 = pnand %p16501_p9, %p16498_p8 }
  0x29   :  { %16506 = shalt.err (!%p16503_p10)
}
  0x2a   :  { %s16507_s5 = scalar_lea.vmem %s80_s27, 32  ;;  %p16512_p12 = scmp.lt.s32.totalorder %s80_s27, %s80_s27 }
  0x2b   :  { %p16508_p11 = scmp.ne.s32.totalorder %s80_s27, %s16507_s5  ;;  %p16513_p13 = scmp.lt.s32.totalorder %s16507_s5, %s16507_s5 }
  0x2d   :  { %p16514_p0 = por %p16513_p13, %p16512_p12 }
  0x2f   :  { %p16515_p1 = pnand %p16514_p0, %p16508_p11 }
  0x31   :  { %16518 = shalt.err (!%p16515_p1)
}
  0x32   :  { %82 = dma.hbm_to_vmem [thread:$0]  %s18668_s8, 32, %s80_s27, [#allocation9]  }
  0x33   :  { %s16733_s22 = smov [#allocation11]   ;;  %s16519_s2 = scalar_lea.hbm %s18671_s11, 32768 }
  0x34   :  { %s102_s23 = sshll.u32 %s16733_s22, 4  ;;  %p16520_p2 = scmp.ne.s32.totalorder %s18671_s11, %s16519_s2  ;;  %s103_s23 = int_to_ptr.vmem [resolvable:$true] %s102_s23 }
  0x35   :  { %p16523_p3 = scmp.lt.u32.totalorder %s16519_s2, %s18671_s11 }
  0x37   :  { %p16525_p4 = pnand %p16523_p3, %p16520_p2 }
  0x39   :  { %16528 = shalt.err (!%p16525_p4)
}
  0x3a   :  { %s16529_s0 = scalar_lea.vmem %s103_s23, 32768  ;;  %p16534_p6 = scmp.lt.s32.totalorder %s103_s23, %s103_s23 }
  0x3b   :  { %p16530_p5 = scmp.ne.s32.totalorder %s103_s23, %s16529_s0  ;;  %p16535_p7 = scmp.lt.s32.totalorder %s16529_s0, %s16529_s0 }
  0x3d   :  { %p16536_p8 = por %p16535_p7, %p16534_p6 }
  0x3f   :  { %p16537_p9 = pnand %p16536_p8, %p16530_p5 }
  0x41   :  { %16540 = shalt.err (!%p16537_p9)
}
  0x42   :  { %s16734_s8 = smov 256   ;;  %s16735_s27 = smov 16  }
  0x43   :  { %108 = dma.hbm_to_vmem [thread:$0]  %s18671_s11, 32768, %s103_s23, [#allocation12], %s16734_s8, %s16734_s8, %s16735_s27  }
  0x44   :  { %s16736_s25 = smov [#allocation14]   ;;  %s16737_s22 = smov [#allocation2]  }
  0x45   :  { %s130_s29 = sshll.u32 %s16736_s25, 4  ;;  %s43_s1 = sshll.u32 %s16737_s22, 4  ;;  %s131_s29 = int_to_ptr.vmem [resolvable:$true] %s130_s29  ;;  %s44_s1 = int_to_ptr.vmem [resolvable:$true] %s43_s1 }
  0x46   :  { %s16541_s26 = scalar_lea.hbm %s18675_s15, 32768 }
  0x47   :  { %p16542_p10 = scmp.ne.s32.totalorder %s18675_s15, %s16541_s26  ;;  %p16545_p11 = scmp.lt.u32.totalorder %s16541_s26, %s18675_s15 }
  0x49   :  { %p16547_p12 = pnand %p16545_p11, %p16542_p10 }
  0x4b   :  { %16550 = shalt.err (!%p16547_p12)
}
  0x4c   :  { %s16551_s11 = scalar_lea.vmem %s131_s29, 32768  ;;  %p16556_p0 = scmp.lt.s32.totalorder %s131_s29, %s131_s29 }
  0x4d   :  { %p16552_p13 = scmp.ne.s32.totalorder %s131_s29, %s16551_s11  ;;  %p16557_p1 = scmp.lt.s32.totalorder %s16551_s11, %s16551_s11 }
  0x4f   :  { %p16558_p2 = por %p16557_p1, %p16556_p0 }
  0x51   :  { %p16559_p3 = pnand %p16558_p2, %p16552_p13 }
  0x53   :  { %16562 = shalt.err (!%p16559_p3)
}
  0x54   :  { %136 = dma.hbm_to_vmem [thread:$0]  %s18675_s15, 32768, %s131_s29, [#allocation15], %s16734_s8, %s16734_s8, %s16735_s27  }
  0x55   :  { %s18694_s22 = sld [smem:[#allocation29_spill]] }
  0x5b   :  { %s16563_s24 = scalar_lea.hbm %s18694_s22, 128 }
  0x5c   :  { %p16564_p4 = scmp.ne.s32.totalorder %s18694_s22, %s16563_s24  ;;  %p16567_p5 = scmp.lt.u32.totalorder %s16563_s24, %s18694_s22 }
  0x5e   :  { %p16569_p6 = pnand %p16567_p5, %p16564_p4 }
  0x60   :  { %16572 = shalt.err (!%p16569_p6)
}
  0x61   :  { %s16573_s4 = scalar_lea.vmem %s44_s1, 128  ;;  %p16578_p8 = scmp.lt.s32.totalorder %s44_s1, %s44_s1 }
  0x62   :  { %p16574_p7 = scmp.ne.s32.totalorder %s44_s1, %s16573_s4  ;;  %p16579_p9 = scmp.lt.s32.totalorder %s16573_s4, %s16573_s4 }
  0x64   :  { %p16580_p10 = por %p16579_p9, %p16578_p8 }
  0x66   :  { %p16581_p11 = pnand %p16580_p10, %p16574_p7 }
  0x68   :  { %16584 = shalt.err (!%p16581_p11)
}
  0x69   :  { %46 = dma.hbm_to_vmem [thread:$0]  %s18694_s22, 128, %s44_s1, [#allocation3]  }
  0x6a   :  { %s16738_s29 = smov [#allocation7]   ;;  %s16739_s11 = smov [#allocation10]  }
  0x6b   :  { %s69_s0 = sshll.u32 %s16738_s29, 4  ;;  %s88_s23 = sshll.u32 %s16739_s11, 4  ;;  %s70_s0 = int_to_ptr.vmem [resolvable:$true] %s69_s0  ;;  %s89_s23 = int_to_ptr.vmem [resolvable:$true] %s88_s23 }
  0x6c   :  { %s16585_s25 = scalar_lea.hbm %s18667_s7, 32 }
  0x6d   :  { %p16586_p12 = scmp.ne.s32.totalorder %s18667_s7, %s16585_s25  ;;  %p16589_p13 = scmp.lt.u32.totalorder %s16585_s25, %s18667_s7 }
  0x6f   :  { %p16591_p0 = pnand %p16589_p13, %p16586_p12 }
  0x71   :  { %16594 = shalt.err (!%p16591_p0)
}
  0x72   :  { %s16595_s1 = scalar_lea.vmem %s70_s0, 32  ;;  %p16600_p2 = scmp.lt.s32.totalorder %s70_s0, %s70_s0 }
  0x73   :  { %p16596_p1 = scmp.ne.s32.totalorder %s70_s0, %s16595_s1  ;;  %p16601_p3 = scmp.lt.s32.totalorder %s16595_s1, %s16595_s1 }
  0x75   :  { %p16602_p4 = por %p16601_p3, %p16600_p2 }
  0x77   :  { %p16603_p5 = pnand %p16602_p4, %p16596_p1 }
  0x79   :  { %16606 = shalt.err (!%p16603_p5)
}
  0x7a   :  { %72 = dma.hbm_to_vmem [thread:$0]  %s18667_s7, 32, %s70_s0, [#allocation6]  }
  0x7b   :  { %s16607_s8 = scalar_lea.hbm %s18669_s9, 18432 }
  0x7c   :  { %p16608_p6 = scmp.ne.s32.totalorder %s18669_s9, %s16607_s8  ;;  %p16611_p7 = scmp.lt.u32.totalorder %s16607_s8, %s18669_s9 }
  0x7e   :  { %p16613_p8 = pnand %p16611_p7, %p16608_p6 }
  0x80   :  { %16616 = shalt.err (!%p16613_p8)
}
  0x81   :  { %s16617_s25 = scalar_lea.vmem %s89_s23, 18432  ;;  %p16622_p10 = scmp.lt.s32.totalorder %s89_s23, %s89_s23 }
  0x82   :  { %p16618_p9 = scmp.ne.s32.totalorder %s89_s23, %s16617_s25  ;;  %p16623_p11 = scmp.lt.s32.totalorder %s16617_s25, %s16617_s25 }
  0x84   :  { %p16624_p12 = por %p16623_p11, %p16622_p10 }
  0x86   :  { %p16625_p13 = pnand %p16624_p12, %p16618_p9 }
  0x88   :  { %16628 = shalt.err (!%p16625_p13)
}
  0x89   :  { %s16740_s7 = smov 1024   ;;  %s16741_s0 = smov 64  }
  0x8a   :  { %94 = dma.hbm_to_vmem [thread:$0]  %s18669_s9, 18432, %s89_s23, [#allocation9], %s16740_s7, %s16740_s7, %s16741_s0  }
  0x8b   :  { %s16742_s26 = smov [#allocation13]   ;;  %s16629_s28 = scalar_lea.hbm %s18673_s13, 32768 }
  0x8c   :  { %s116_s3 = sshll.u32 %s16742_s26, 4  ;;  %p16630_p0 = scmp.ne.s32.totalorder %s18673_s13, %s16629_s28  ;;  %s117_s3 = int_to_ptr.vmem [resolvable:$true] %s116_s3 }
  0x8d   :  { %p16633_p1 = scmp.lt.u32.totalorder %s16629_s28, %s18673_s13 }
  0x8f   :  { %p16635_p2 = pnand %p16633_p1, %p16630_p0 }
  0x91   :  { %16638 = shalt.err (!%p16635_p2)
}
  0x92   :  { %s16639_s11 = scalar_lea.vmem %s117_s3, 32768  ;;  %p16644_p4 = scmp.lt.s32.totalorder %s117_s3, %s117_s3 }
  0x93   :  { %p16640_p3 = scmp.ne.s32.totalorder %s117_s3, %s16639_s11  ;;  %p16645_p5 = scmp.lt.s32.totalorder %s16639_s11, %s16639_s11 }
  0x95   :  { %p16646_p6 = por %p16645_p5, %p16644_p4 }
  0x97   :  { %p16647_p7 = pnand %p16646_p6, %p16640_p3 }
  0x99   :  { %16650 = shalt.err (!%p16647_p7)
}
  0x9a   :  { %s16743_s9 = smov 512   ;;  %s16744_s23 = smov 32  }
  0x9b   :  { %122 = dma.hbm_to_vmem [thread:$0]  %s18673_s13, 32768, %s117_s3, [#allocation12], %s16743_s9, %s16743_s9, %s16744_s23  }
  0x9c   :  { %s16745_s25 = smov [#allocation16]   ;;  %s16746_s24 = smov [#allocation17]  }
  0x9d   :  { %s144_s7 = sshll.u32 %s16745_s25, 4  ;;  %s158_s2 = sshll.u32 %s16746_s24, 4  ;;  %s145_s7 = int_to_ptr.vmem [resolvable:$true] %s144_s7  ;;  %s16960_s2 = int_to_ptr.vmem [resolvable:$true] %s158_s2 }
  0x9e   :  { %s16651_s22 = scalar_lea.hbm %s18677_s17, 32768 }
  0x9f   :  { %p16652_p8 = scmp.ne.s32.totalorder %s18677_s17, %s16651_s22  ;;  %p16655_p9 = scmp.lt.u32.totalorder %s16651_s22, %s18677_s17 }
  0xa1   :  { %p16657_p10 = pnand %p16655_p9, %p16652_p8 }
  0xa3   :  { %16660 = shalt.err (!%p16657_p10)
}
  0xa4   :  { %s16661_s13 = scalar_lea.vmem %s145_s7, 32768  ;;  %p16666_p12 = scmp.lt.s32.totalorder %s145_s7, %s145_s7 }
  0xa5   :  { %p16662_p11 = scmp.ne.s32.totalorder %s145_s7, %s16661_s13  ;;  %p16667_p13 = scmp.lt.s32.totalorder %s16661_s13, %s16661_s13 }
  0xa7   :  { %p16668_p0 = por %p16667_p13, %p16666_p12 }
  0xa9   :  { %p16669_p1 = pnand %p16668_p0, %p16662_p11 }
  0xab   :  { %16672 = shalt.err (!%p16669_p1)
}
  0xac   :  { %150 = dma.hbm_to_vmem [thread:$0]  %s18677_s17, 32768, %s145_s7, [#allocation15], %s16743_s9, %s16743_s9, %s16744_s23  }
  0xad   :  { %s16673_s5 = scalar_lea.hbm %s18679_s19, 16384 }
  0xae   :  { %p16674_p2 = scmp.ne.s32.totalorder %s18679_s19, %s16673_s5  ;;  %p16677_p3 = scmp.lt.u32.totalorder %s16673_s5, %s18679_s19 }
  0xb0   :  { %p16679_p4 = pnand %p16677_p3, %p16674_p2 }
  0xb2   :  { %16682 = shalt.err (!%p16679_p4)
}
  0xb3   :  { %s16683_s22 = scalar_lea.vmem %s16960_s2, 16384  ;;  %p16688_p6 = scmp.lt.s32.totalorder %s16960_s2, %s16960_s2 }
  0xb4   :  { %p16684_p5 = scmp.ne.s32.totalorder %s16960_s2, %s16683_s22  ;;  %p16689_p7 = scmp.lt.s32.totalorder %s16683_s22, %s16683_s22 }
  0xb6   :  { %p16690_p8 = por %p16689_p7, %p16688_p6 }
  0xb8   :  { %p16691_p9 = pnand %p16690_p8, %p16684_p5 }
  0xba   :  { %16694 = shalt.err (!%p16691_p9)
}
  0xbb   :  { %s16747_s17 = smov 4  }
  0xbc   :  { %164 = dma.hbm_to_vmem [thread:$0]  %s18679_s19, 16384, %s16960_s2, [#allocation18], %s16741_s0, %s16741_s0, %s16747_s17  }
  0xbd   :  { %16717 = dma.done.wait [#allocation3], 128  }
  0xbe   :  { %16718 = vsyncadd [#allocation3], 4294967168 }
  0xbf   :  { %16719 = dma.done.wait [#allocation6], 160  }
  0xc0   :  { %16720 = vsyncadd [#allocation6], 4294967136 }
  0xc1   :  { %16721 = dma.done.wait [#allocation9], 18464  }
  0xc2   :  { %16722 = vsyncadd [#allocation9], 4294948832 }
  0xc3   :  { %16723 = dma.done.wait [#allocation12], 65536  }
  0xc4   :  { %16724 = vsyncadd [#allocation12], 4294901760 }
  0xc5   :  { %16725 = dma.done.wait [#allocation15], 65536  }
  0xc6   :  { %16726 = vsyncadd [#allocation15], 4294901760 }
  0xc7   :  { %16727 = dma.done.wait [#allocation18], 16384  }
  0xc8   :  { %16728 = vsyncadd [#allocation18], 4294950912  ;;  %s18695_s4 = sld [smem:[#allocation27_spill]]  ;;  %s18696_s13 = sld [smem:[#allocation28_spill]]  ;;  %vm246_vm0 = vcmask 1040384   ;;  %vm328_vm1 = vcmask 1045504  }
  0xc9   :  { %vm279_vm2 = vcmask 1046528   ;;  %v395_v24 = vld [vmem:[#allocation5] sm:$0x3f]  ;;  %s16748_s5 = smov 2   ;;  %vm377_vm3 = vcmask 15360   ;;  %vm386_vm4 = vcmask 31744  }
  0xca   :  { %14924 = vmatprep.subr.msk.mxu0 %vm328_vm1, %v395_v24  ;;  %vm403_vm5 = vcmask 48128   ;;  %s18697_s7 = sld [smem:[#allocation32_spill]]  ;;  %vm560_vm6 = vcmask 130048   ;;  %vm986_vm7 = vcmask 1041409   ;;  %vm989_vm8 = vcmask 1042434  }
  0xcb   :  { %14925 = vmatpush3.msk.msra.mxu0 %vm328_vm1, %v395_v24  ;;  %vm992_vm9 = vcmask 1043459   ;;  %vm995_vm10 = vcmask 1044484   ;;  %vm998_vm11 = vcmask 1045509   ;;  %vm1001_vm12 = vcmask 1046534  }
  0xcc   :  { %vm1004_vm13 = vcmask 1047559   ;;  %vm726_vm14 = vcmask 523264   ;;  %vm3026_vm15 = vcmask 654336  }
  0xce   :  { %v198_v0 = vld [vmem:[%s18695_s4] sm:$0xff]  ;;  %v199_v2 = vld [vmem:[%s18695_s4 + $0x8] sm:$0xff]  ;;  %v201_v5 = vld [vmem:[%s18695_s4 + $0x18] sm:$0xff] }
  0xcf   :  { %v206_v1 = vld [vmem:[%s18696_s13] sm:$0xff]  ;;  %v207_v4 = vld [vmem:[%s18696_s13 + $0x8] sm:$0xff]  ;;  %v209_v6 = vld [vmem:[%s18696_s13 + $0x18] sm:$0xff] }
  0xd0   :  { %v214_v3 = vsub.f32 %v198_v0, %v206_v1  ;;  %v215_v7 = vsub.f32 %v199_v2, %v207_v4  ;;  %v217_v8 = vsub.f32 %v201_v5, %v209_v6  ;;  %v200_v9 = vld [vmem:[%s18695_s4 + $0x10] sm:$0xff]  ;;  %v203_v11 = vld [vmem:[%s18695_s4 + $0x28] sm:$0xff]  ;;  %v202_v15 = vld [vmem:[%s18695_s4 + $0x20] sm:$0xff] }
  0xd1   :  { %v208_v10 = vld [vmem:[%s18696_s13 + $0x10] sm:$0xff]  ;;  %v211_v14 = vld [vmem:[%s18696_s13 + $0x28] sm:$0xff]  ;;  %v210_v16 = vld [vmem:[%s18696_s13 + $0x20] sm:$0xff] }
  0xd2   :  { %v230_v12 = vrot.slane %v214_v3, 7  ;;  %v216_v13 = vsub.f32 %v200_v9, %v208_v10  ;;  %v231_v17 = vrot.slane %v215_v7, 7  ;;  %v233_v18 = vrot.slane %v217_v8, 7  ;;  %v205_v33 = vld [vmem:[%s18695_s4 + $0x38] sm:$0xff]  ;;  %v204_v46 = vld [vmem:[%s18695_s4 + $0x30] sm:$0xff]  ;;  %s18698_s4 = sld [smem:[#allocation31_spill]] }
  0xd3   :  { %v219_v19 = vsub.f32 %v203_v11, %v211_v14  ;;  %v218_v23 = vsub.f32 %v202_v15, %v210_v16  ;;  %v213_v34 = vld [vmem:[%s18696_s13 + $0x38] sm:$0xff]  ;;  %v212_v53 = vld [vmem:[%s18696_s13 + $0x30] sm:$0xff] }
  0xd4   :  { %v17031_v20 = vsel %vm246_vm0, 0.0, %v230_v12  ;;  %v255_v21 = vsel %vm246_vm0, %v230_v12, 0.0  ;;  %v232_v22 = vrot.slane %v216_v13, 7  ;;  %v17038_v29 = vsel %vm246_vm0, 0.0, %v231_v17 }
  0xd5   :  { %v329_v25 = vrot.slane %v17031_v20, 2  ;;  %v330_v26 = vrot.slane %v255_v21, 2  ;;  %v280_v27 = vrot.slane %v17031_v20, 1  ;;  %v281_v28 = vrot.slane %v255_v21, 1 }
  0xd6   :  { %v256_v30 = vsel %vm246_vm0, %v231_v17, 0.0  ;;  %v17042_v31 = vsel %vm246_vm0, 0.0, %v233_v18  ;;  %v258_v32 = vsel %vm246_vm0, %v233_v18, 0.0  ;;  %v332_v37 = vrot.slane %v17038_v29, 2 }
  0xd7   :  { %v331_v35 = vsel %vm328_vm1, %v329_v25, %v330_v26  ;;  %v282_v36 = vsel %vm279_vm2, %v280_v27, %v281_v28  ;;  %v333_v38 = vrot.slane %v256_v30, 2  ;;  %v283_v39 = vrot.slane %v17038_v29, 1  ;;  %v699_v26 = vld [vmem:[%s18666_s6 + $0x8] sm:$0xff]  ;;  %v701_v27 = vld [vmem:[%s18666_s6 + $0x18] sm:$0xff] }
  0xd8   :  { %353 = vrot.lane.b32.xlu1 %v331_v35, %s16747_s17  ;;  %304 = vrot.lane.b32.xlu0 %v282_v36, %s16748_s5  ;;  %v284_v40 = vrot.slane %v256_v30, 1  ;;  %v289_v41 = vrot.slane %v17042_v31, 1  ;;  %v290_v42 = vrot.slane %v258_v32, 1  ;;  %v17061_v44 = vsel %vm246_vm0, 0.0, %v232_v22 }
  0xd9   :  { %v334_v43 = vsel %vm328_vm1, %v332_v37, %v333_v38  ;;  %v257_v45 = vsel %vm246_vm0, %v232_v22, 0.0  ;;  %v286_v48 = vrot.slane %v17061_v44, 1  ;;  %v338_v50 = vrot.slane %v17042_v31, 2 }
  0xda   :  { %v285_v47 = vsel %vm279_vm2, %v283_v39, %v284_v40  ;;  %v287_v49 = vrot.slane %v257_v45, 1  ;;  %v235_v51 = vrot.slane %v219_v19, 7  ;;  %v221_v52 = vsub.f32 %v205_v33, %v213_v34  ;;  %v698_v39 = vld [vmem:[%s18666_s6] sm:$0xff]  ;;  %v700_v40 = vld [vmem:[%s18666_s6 + $0x10] sm:$0xff] }
  0xdb   :  { %v291_v54 = vsel %vm279_vm2, %v289_v41, %v290_v42  ;;  %v339_v55 = vrot.slane %v258_v32, 2  ;;  %v335_v56 = vrot.slane %v17061_v44, 2  ;;  %v234_v57 = vrot.slane %v218_v23, 7 }
  0xdc   :  { %355 = vrot.lane.b32.xlu1 %v334_v43, %s16747_s17  ;;  %306 = vrot.lane.b32.xlu0 %v285_v47, %s16748_s5  ;;  %v288_v58 = vsel %vm279_vm2, %v286_v48, %v287_v49  ;;  %v336_v59 = vrot.slane %v257_v45, 2  ;;  %v17079_v60 = vsel %vm246_vm0, 0.0, %v235_v51  ;;  %v260_v61 = vsel %vm246_vm0, %v235_v51, 0.0  ;;  %v703_v43 = vld [vmem:[%s18666_s6 + $0x28] sm:$0xff]  ;;  %v705_v45 = vld [vmem:[%s18666_s6 + $0x38] sm:$0xff] }
  0xdd   :  { %v17083_v62 = vsel %vm246_vm0, 0.0, %v234_v57  ;;  %v259_v63 = vsel %vm246_vm0, %v234_v57, 0.0  ;;  %v220_v0 = vsub.f32 %v204_v46, %v212_v53  ;;  %v295_v1 = vrot.slane %v17079_v60, 1  ;;  %v702_v48 = vld [vmem:[%s18666_s6 + $0x20] sm:$0xff]  ;;  %v704_v49 = vld [vmem:[%s18666_s6 + $0x30] sm:$0xff]  ;;  %v709_v53 = vld [vmem:[%s18666_s6 + $0x58] sm:$0xff] }
  0xde   :  { %v296_v2 = vrot.slane %v260_v61, 1  ;;  %v237_v3 = vrot.slane %v221_v52, 7  ;;  %v340_v4 = vsel %vm328_vm1, %v338_v50, %v339_v55  ;;  %v337_v5 = vsel %vm328_vm1, %v335_v56, %v336_v59  ;;  %v706_v57 = vld [vmem:[%s18666_s6 + $0x40] sm:$0xff] }
  0xdf   :  { %v292_v6 = vrot.slane %v17083_v62, 1  ;;  %v293_v7 = vrot.slane %v259_v63, 1  ;;  %v236_v8 = vrot.slane %v220_v0, 7  ;;  %v344_v10 = vrot.slane %v17079_v60, 2 }
  0xe0   :  { %310 = vrot.lane.b32.xlu1 %v291_v54, %s16748_s5  ;;  %308 = vrot.lane.b32.xlu0 %v288_v58, %s16748_s5  ;;  %v297_v9 = vsel %vm279_vm2, %v295_v1, %v296_v2  ;;  %v345_v11 = vrot.slane %v260_v61, 2  ;;  %v341_v13 = vrot.slane %v17083_v62, 2  ;;  %v342_v14 = vrot.slane %v259_v63, 2  ;;  %v708_v58 = vld [vmem:[%s18666_s6 + $0x50] sm:$0xff] }
  0xe1   :  { %v294_v12 = vsel %vm279_vm2, %v292_v6, %v293_v7  ;;  %v17099_v15 = vsel %vm246_vm0, 0.0, %v237_v3  ;;  %v262_v16 = vsel %vm246_vm0, %v237_v3, 0.0  ;;  %v17103_v17 = vsel %vm246_vm0, 0.0, %v236_v8 }
  0xe2   :  { %v261_v18 = vsel %vm246_vm0, %v236_v8, 0.0  ;;  %v346_v19 = vsel %vm328_vm1, %v344_v10, %v345_v11  ;;  %v301_v21 = vrot.slane %v17099_v15, 1  ;;  %v343_v22 = vsel %vm328_vm1, %v341_v13, %v342_v14 }
  0xe3   :  { %v302_v23 = vrot.slane %v262_v16, 1  ;;  %v298_v24 = vrot.slane %v17103_v17, 1  ;;  %v299_v25 = vrot.slane %v261_v18, 1  ;;  %v17118_v28 = vpack.c.bf16 %v701_v27, %v699_v26  ;;  %v546_v27 = vld [vmem:[%s18697_s7 + $0x10] sm:$0xff] }
  0xe4   :  { %359 = vrot.lane.b32.xlu1 %v340_v4, %s16747_s17  ;;  %357 = vrot.lane.b32.xlu0 %v337_v5, %s16747_s17  ;;  %v350_v30 = vrot.slane %v17099_v15, 2  ;;  %v351_v32 = vrot.slane %v262_v16, 2  ;;  %v347_v35 = vrot.slane %v17103_v17, 2  ;;  %v348_v36 = vrot.slane %v261_v18, 2 }
  0xe5   :  { %v303_v33 = vsel %vm279_vm2, %v301_v21, %v302_v23  ;;  %v300_v34 = vsel %vm279_vm2, %v298_v24, %v299_v25  ;;  %14943 = vmatprep.subr.bf16.mxu0 %v17118_v28  ;;  %v17155_v52 = vpack.c.bf16 %v700_v40, %v698_v39  ;;  %v17165_v55 = vpack.c.bf16 %v705_v45, %v703_v43  ;;  %v713_v24 = vld [vmem:[%s18666_s6 + $0x78] sm:$0xff]  ;;  %v544_v25 = vld [vmem:[%s18697_s7] sm:$0xff] }
  0xe6   :  { %v352_v37 = vsel %vm328_vm1, %v350_v30, %v351_v32  ;;  %v349_v38 = vsel %vm328_vm1, %v347_v35, %v348_v36  ;;  %v17176_v63 = vpack.c.bf16 %v704_v49, %v702_v48  ;;  %v17186_v4 = vpack.c.bf16 %v708_v58, %v706_v57  ;;  %v710_v30 = vld [vmem:[%s18666_s6 + $0x60] sm:$0xff]  ;;  %v712_v32 = vld [vmem:[%s18666_s6 + $0x70] sm:$0xff] }
  0xe7   :  { %v16749_v35 = vmov 0.0   ;;  %v13345_v36 = vld [vmem:[%s18698_s4] ss:$0 sm:$0xff] }
  0xe8   :  { %314 = vrot.lane.b32.xlu1 %v297_v9, %s16748_s5  ;;  %312 = vrot.lane.b32.xlu0 %v294_v12, %s16748_s5 }
  0xe9   :  { %649 = vmatprep.mubr.f32.mxu1 %v16749_v35 }
  0xec   :  { %363 = vrot.lane.b32.xlu1 %v346_v19, %s16747_s17  ;;  %361 = vrot.lane.b32.xlu0 %v343_v22, %s16747_s17  ;;  %v545_v22 = vld [vmem:[%s18697_s7 + $0x8] sm:$0xff] }
  0xf0   :  { %318 = vrot.lane.b32.xlu1 %v303_v33, %s16748_s5  ;;  %316 = vrot.lane.b32.xlu0 %v300_v34, %s16748_s5  ;;  %v14940_v33 = vpack.c.bf16 %v546_v27, %v544_v25  ;;  %v17236_v34 = vpack.c.bf16 %v712_v32, %v710_v30 }
  0xf4   :  { %367 = vrot.lane.b32.xlu1 %v352_v37, %s16747_s17  ;;  %365 = vrot.lane.b32.xlu0 %v349_v38, %s16747_s17 }
 0x14a   :  { %v354_v41 = vpop.permute.xlu1 %353  ;;  %v305_v42 = vpop.permute.xlu0 %304 }
 0x14b   :  { %v378_v46 = vsel %vm377_vm3, %v17031_v20, %v305_v42  ;;  %v707_v20 = vld [vmem:[%s18666_s6 + $0x48] sm:$0xff] }
 0x14c   :  { %v387_v47 = vsel %vm386_vm4, %v378_v46, %v354_v41 }
 0x14d   :  { %14926 = vmatprep.mubr.msk.f32.mxu0 %vm403_vm5, %v387_v47 }
 0x14e   :  { %v356_v50 = vpop.permute.xlu1 %355  ;;  %v307_v51 = vpop.permute.xlu0 %306 }
 0x14f   :  { %v379_v54 = vsel %vm377_vm3, %v17038_v29, %v307_v51  ;;  %v17179_v29 = vpack.c.bf16 %v709_v53, %v707_v20 }
 0x150   :  { %v388_v56 = vsel %vm386_vm4, %v379_v54, %v356_v50 }
 0x151   :  { %14927 = vmatmul.mubr.msk.f32.vlgmr.msra.gmra.mrb[0].mxu0 %vm403_vm5, %v388_v56 }
 0x152   :  { %v311_v59 = vpop.permute.xlu1 %310  ;;  %v309_v61 = vpop.permute.xlu0 %308  ;;  %14945 = vmatpush1.bf16.msra.mxu0 %v17155_v52 }
 0x153   :  { %14947 = vmatprep.subr.bf16.mxu0 %v17165_v55  ;;  %v381_v0 = vsel %vm377_vm3, %v17042_v31, %v311_v59  ;;  %v380_v1 = vsel %vm377_vm3, %v17061_v44, %v309_v61 }
 0x156   :  { %v360_v2 = vpop.permute.xlu1 %359  ;;  %v358_v3 = vpop.permute.xlu0 %357  ;;  %14949 = vmatpush1.bf16.msra.mxu0 %v17176_v63 }
 0x157   :  { %v390_v5 = vsel %vm386_vm4, %v381_v0, %v360_v2  ;;  %v389_v6 = vsel %vm386_vm4, %v380_v1, %v358_v3  ;;  %14951 = vmatprep.subr.bf16.mxu0 %v17179_v29 }
 0x158   :  { %14929 = vmatprep.mubr.msk.f32.mxu0 %vm403_vm5, %v389_v6 }
 0x159   :  { %14930 = vmatmul.mubr.msk.f32.gmra.mrb[2].mxu0 %vm403_vm5, %v390_v5  ;;  %v550_v5 = vlaneseq }
 0x15a   :  { %v315_v31 = vpop.permute.xlu1 %314  ;;  %v313_v7 = vpop.permute.xlu0 %312  ;;  %14953 = vmatpush1.bf16.msra.mxu0 %v17186_v4 }
 0x15b   :  { %v383_v44 = vsel %vm377_vm3, %v17079_v60, %v315_v31  ;;  %v382_v8 = vsel %vm377_vm3, %v17083_v62, %v313_v7  ;;  %v17283_v6 = vshrl.u32 %v550_v5, 7  ;;  %v714_v7 = vld [vmem:[#allocation8] sm:$0x3] }
 0x15d   :  { %v17286_v31 = vsub.s32 0, %v17283_v6 }
 0x15e   :  { %v364_v9 = vpop.permute.xlu1 %363  ;;  %v362_v10 = vpop.permute.xlu0 %361 }
 0x15f   :  { %v392_v11 = vsel %vm386_vm4, %v383_v44, %v364_v9  ;;  %v391_v12 = vsel %vm386_vm4, %v382_v8, %v362_v10  ;;  %v548_v44 = vld [vmem:[#allocation7] sm:$0x3]  ;;  %v17289_v8 = vrot.slane %v714_v7, %v17286_v31 }
 0x160   :  { %14932 = vmatprep.mubr.msk.f32.mxu0 %vm403_vm5, %v391_v12  ;;  %v17292_v9 = vrot.slane %v548_v44, %v17286_v31 }
 0x161   :  { %14933 = vmatmul.mubr.msk.f32.gmra.mrb[4].mxu0 %vm403_vm5, %v392_v11 }
 0x162   :  { %v319_v13 = vpop.permute.xlu1 %318  ;;  %v317_v14 = vpop.permute.xlu0 %316 }
 0x163   :  { %v385_v16 = vsel %vm377_vm3, %v17099_v15, %v319_v13  ;;  %v384_v60 = vsel %vm377_vm3, %v17103_v17, %v317_v14  ;;  %v547_v15 = vld [vmem:[%s18697_s7 + $0x18] sm:$0xff]  ;;  %v711_v17 = vld [vmem:[%s18666_s6 + $0x68] sm:$0xff] }
 0x164   :  { %v14938_v23 = vpack.c.bf16 %v547_v15, %v545_v22  ;;  %v17225_v26 = vpack.c.bf16 %v713_v24, %v711_v17 }
 0x166   :  { %v368_v18 = vpop.permute.xlu1 %367  ;;  %v366_v62 = vpop.permute.xlu0 %365  ;;  %14939 = vmatprep.subr.bf16.mxu1 %v14938_v23  ;;  %14955 = vmatprep.subr.bf16.mxu0 %v17225_v26 }
 0x167   :  { %v394_v19 = vsel %vm386_vm4, %v385_v16, %v368_v18  ;;  %v393_v21 = vsel %vm386_vm4, %v384_v60, %v366_v62  ;;  %14941 = vmatpush1.bf16.msra.mxu1 %v14940_v33  ;;  %14957 = vmatpush1.bf16.msra.mxu0 %v17236_v34 }
 0x168   :  { %14935 = vmatprep.mubr.msk.f32.mxu0 %vm403_vm5, %v393_v21  ;;  %14959 = vmatprep.subr.bf16.mxu0 %v17118_v28 }
 0x169   :  { %14936 = vmatmul.mubr.msk.f32.gmra.mrb[6].mxu0 %vm403_vm5, %v394_v19  ;;  %14975 = vmatprep.subr.bf16.mxu1 %v17118_v28 }
 0x16a   :  { %794 = vmatprep.mubr.f32.mxu0 %v16749_v35 }
 0x16d   :  { %795 = vmatmul.mubr.f32.vlgmr.msra.gmra.mrb[8].mxu0 %v16749_v35 }
 0x16e   :  { %14961 = vmatpush1.bf16.msra.mxu0 %v17155_v52  ;;  %1074 = vmatprep.mubr.f32.mxu0 %v16749_v35 }
 0x16f   :  { %14963 = vmatprep.subr.bf16.mxu0 %v17165_v55 }
 0x172   :  { %14965 = vmatpush1.bf16.msra.mxu0 %v17176_v63 }
 0x173   :  { %14967 = vmatprep.subr.bf16.mxu0 %v17179_v29 }
 0x176   :  { %14969 = vmatpush1.bf16.msra.mxu0 %v17186_v4 }
 0x177   :  { %14971 = vmatprep.subr.bf16.mxu0 %v17225_v26 }
 0x17a   :  { %14973 = vmatpush1.bf16.msra.mxu0 %v17236_v34 }
 0x17b   :  { %14991 = vmatprep.subr.bf16.mxu0 %v17118_v28 }
 0x224   :  { %v14928_v37 = vpop.f32.mrb[0].mxu0 }
 0x225   :  { %v497_v38 = vpop.f32.mrb[1].mxu0  ;;  %v503_v40 = vadd.f32 %v14928_v37, %v13345_v36 }
 0x226   :  { %v498_v39 = vadd.f32 %v13345_v36, %v497_v38 }
 0x227   :  { %v537_v42 = vmax.f32 %v503_v40, 0.0 }
 0x228   :  { %v536_v41 = vmax.f32 %v498_v39, 0.0 }
 0x22a   :  { %13355 = vmatmul.mubr.msk.f32.vlgmr.msra.gmra.mrb[0].mxu1 %vm560_vm6, %v536_v41 }
 0x22b   :  { %655 = vmatprep.mubr.f32.mxu1 %v16749_v35  ;;  %14977 = vmatpush1.bf16.msra.mxu1 %v17155_v52 }
 0x22c   :  { %v14931_v43 = vpop.f32.mrb[2].mxu0  ;;  %14979 = vmatprep.subr.bf16.mxu1 %v17165_v55 }
 0x22d   :  { %v507_v45 = vpop.f32.mrb[3].mxu0  ;;  %v513_v47 = vadd.f32 %v14931_v43, %v13345_v36 }
 0x22e   :  { %v508_v46 = vadd.f32 %v13345_v36, %v507_v45  ;;  %13356 = vmatmul.mubr.msk.f32.gmra.mrb[2].mxu1 %vm560_vm6, %v537_v42 }
 0x22f   :  { %661 = vmatprep.mubr.f32.mxu1 %v16749_v35  ;;  %14981 = vmatpush1.bf16.msra.mxu1 %v17176_v63  ;;  %v539_v49 = vmax.f32 %v513_v47, 0.0 }
 0x230   :  { %v538_v48 = vmax.f32 %v508_v46, 0.0  ;;  %14983 = vmatprep.subr.bf16.mxu1 %v17179_v29 }
 0x232   :  { %13357 = vmatmul.mubr.msk.f32.gmra.mrb[4].mxu1 %vm560_vm6, %v538_v48 }
 0x233   :  { %667 = vmatprep.mubr.f32.mxu1 %v16749_v35  ;;  %14985 = vmatpush1.bf16.msra.mxu1 %v17186_v4 }
 0x234   :  { %v14934_v50 = vpop.f32.mrb[4].mxu0  ;;  %14987 = vmatprep.subr.bf16.mxu1 %v17225_v26 }
 0x235   :  { %v517_v51 = vpop.f32.mrb[5].mxu0  ;;  %v523_v53 = vadd.f32 %v14934_v50, %v13345_v36 }
 0x236   :  { %v518_v20 = vadd.f32 %v13345_v36, %v517_v51  ;;  %13358 = vmatmul.mubr.msk.f32.gmra.mrb[6].mxu1 %vm560_vm6, %v539_v49 }
 0x237   :  { %673 = vmatprep.mubr.f32.mxu1 %v16749_v35  ;;  %14989 = vmatpush1.bf16.msra.mxu1 %v17236_v34  ;;  %v541_v56 = vmax.f32 %v523_v53, 0.0 }
 0x238   :  { %v540_v54 = vmax.f32 %v518_v20, 0.0  ;;  %15007 = vmatprep.subr.bf16.mxu1 %v17118_v28 }
 0x23a   :  { %13359 = vmatmul.mubr.msk.f32.gmra.mrb[8].mxu1 %vm560_vm6, %v540_v54  ;;  %v17339_v54 = vsub.s32 1, %v17283_v6 }
 0x23b   :  { %679 = vmatprep.mubr.f32.mxu1 %v16749_v35 }
 0x23c   :  { %v14937_v57 = vpop.f32.mrb[6].mxu0 }
 0x23d   :  { %v527_v58 = vpop.f32.mrb[7].mxu0  ;;  %v533_v61 = vadd.f32 %v14937_v57, %v13345_v36 }
 0x23e   :  { %v528_v59 = vadd.f32 %v13345_v36, %v527_v58  ;;  %13360 = vmatmul.mubr.msk.f32.gmra.mrb[10].mxu1 %vm560_vm6, %v541_v56 }
 0x23f   :  { %685 = vmatprep.mubr.f32.mxu1 %v16749_v35  ;;  %v543_v1 = vmax.f32 %v533_v61, 0.0  ;;  %v17344_v61 = vrot.slane %v714_v7, %v17339_v54 }
 0x240   :  { %v542_v0 = vmax.f32 %v528_v59, 0.0  ;;  %v796_v2 = vpop.f32.mrb[8].mxu0 }
 0x241   :  { %v17281_v3 = vpop.f32.mrb[9].mxu0  ;;  %v17295_v10 = vadd.f32 %v796_v2, %v17289_v8 }
 0x242   :  { %13361 = vmatmul.mubr.msk.f32.gmra.mrb[12].mxu1 %vm560_vm6, %v542_v0  ;;  %v17358_v7 = vadd.f32 %v17281_v3, %v17344_v61 }
 0x243   :  { %691 = vmatprep.mubr.f32.mxu1 %v16749_v35  ;;  %v802_v14 = vrot.slane %v17295_v10, 1  ;;  %v803_v21 = vrot.slane %v17295_v10, 2  ;;  %v804_v25 = vrot.slane %v17295_v10, 3  ;;  %v805_v37 = vrot.slane %v17295_v10, 4 }
 0x244   :  { %v806_v49 = vrot.slane %v17295_v10, 5  ;;  %v807_v59 = vrot.slane %v17295_v10, 6 }
 0x246   :  { %13362 = vmatmul.mubr.msk.f32.gmra.mrb[14].mxu1 %vm560_vm6, %v543_v1 }
 0x247   :  { %1362 = vmatprep.mubr.f32.mxu1 %v16749_v35 }
 0x2fd   :  { %v651_v11 = vpop.f32.mrb[0].mxu1 }
 0x2fe   :  { %v17298_v12 = vadd.f32 %v651_v11, %v17292_v9  ;;  %v17300_v13 = vpop.f32.mrb[1].mxu1  ;;  %v17352_v11 = vrot.slane %v548_v44, %v17339_v54 }
 0x300   :  { %v817_v16 = vadd.f32 %v17295_v10, %v17298_v12 }
 0x301   :  { %v657_v60 = vpop.f32.mrb[2].mxu1 }
 0x302   :  { %v13363_v18 = vmul.f32 -1.442695, %v817_v16  ;;  %v17306_v62 = vadd.f32 %v657_v60, %v17292_v9  ;;  %v17308_v19 = vpop.f32.mrb[3].mxu1 }
 0x304   :  { %16090 = vpow2.f32 %v13363_v18  ;;  %v818_v22 = vadd.f32 %v802_v14, %v17306_v62  ;;  %v808_v18 = vrot.slane %v17295_v10, 7 }
 0x305   :  { %v663_v15 = vpop.f32.mrb[4].mxu1 }
 0x306   :  { %v13364_v17 = vmul.f32 -1.442695, %v818_v22  ;;  %v17313_v23 = vadd.f32 %v663_v15, %v17292_v9  ;;  %v17315_v24 = vpop.f32.mrb[5].mxu1 }
 0x308   :  { %16092 = vpow2.f32 %v13364_v17  ;;  %v819_v27 = vadd.f32 %v803_v21, %v17313_v23 }
 0x309   :  { %v669_v30 = vpop.f32.mrb[6].mxu1 }
 0x30a   :  { %v13365_v32 = vmul.f32 -1.442695, %v819_v27  ;;  %v17320_v33 = vadd.f32 %v669_v30, %v17292_v9  ;;  %v17322_v36 = vpop.f32.mrb[7].mxu1 }
 0x30c   :  { %16094 = vpow2.f32 %v13365_v32  ;;  %v820_v38 = vadd.f32 %v804_v25, %v17320_v33  ;;  %v17369_v25 = vadd.f32 %v17300_v13, %v17352_v11  ;;  %v874_v32 = vrot.slane %v17358_v7, 1 }
 0x30d   :  { %v675_v39 = vpop.f32.mrb[8].mxu1  ;;  %v17380_v13 = vadd.f32 %v17308_v19, %v17352_v11 }
 0x30e   :  { %v16091_v40 = vpop.eup %16090  ;;  %v13366_v41 = vmul.f32 -1.442695, %v820_v38  ;;  %v17327_v42 = vadd.f32 %v675_v39, %v17292_v9  ;;  %v17329_v43 = vpop.f32.mrb[9].mxu1 }
 0x30f   :  { %v849_v45 = vadd.f32 1.0, %v16091_v40 }
 0x310   :  { %16096 = vpow2.f32 %v13366_v41  ;;  %v821_v46 = vadd.f32 %v805_v37, %v17327_v42 }
 0x311   :  { %16098 = vrcp.f32 %v849_v45  ;;  %v681_v47 = vpop.f32.mrb[10].mxu1  ;;  %v875_v45 = vrot.slane %v17358_v7, 2 }
 0x312   :  { %v16093_v48 = vpop.eup %16092  ;;  %v13367_v50 = vmul.f32 -1.442695, %v821_v46  ;;  %v17334_v51 = vadd.f32 %v681_v47, %v17292_v9  ;;  %v17336_v20 = vpop.f32.mrb[11].mxu1 }
 0x313   :  { %v850_v53 = vadd.f32 1.0, %v16093_v48  ;;  %v17389_v48 = vadd.f32 %v17315_v24, %v17352_v11 }
 0x314   :  { %16100 = vpow2.f32 %v13367_v50  ;;  %v822_v56 = vadd.f32 %v806_v49, %v17334_v51 }
 0x315   :  { %16102 = vrcp.f32 %v850_v53  ;;  %v687_v57 = vpop.f32.mrb[12].mxu1  ;;  %v876_v53 = vrot.slane %v17358_v7, 3 }
 0x316   :  { %v16095_v58 = vpop.eup %16094  ;;  %v13368_v0 = vmul.f32 -1.442695, %v822_v56  ;;  %v17347_v1 = vadd.f32 %v687_v57, %v17292_v9  ;;  %v17349_v2 = vpop.f32.mrb[13].mxu1 }
 0x317   :  { %v851_v5 = vadd.f32 1.0, %v16095_v58  ;;  %v17398_v58 = vadd.f32 %v17322_v36, %v17352_v11 }
 0x318   :  { %16104 = vpow2.f32 %v13368_v0  ;;  %v823_v14 = vadd.f32 %v807_v59, %v17347_v1 }
 0x319   :  { %16106 = vrcp.f32 %v851_v5  ;;  %v693_v16 = vpop.f32.mrb[14].mxu1  ;;  %v877_v5 = vrot.slane %v17358_v7, 4 }
 0x31a   :  { %v16097_v60 = vpop.eup %16096  ;;  %v13369_v21 = vmul.f32 -1.442695, %v823_v14  ;;  %v17361_v22 = vadd.f32 %v693_v16, %v17292_v9  ;;  %v17363_v15 = vpop.f32.mrb[15].mxu1 }
 0x31b   :  { %v17365_v44 = vpop.eup %16098  ;;  %v852_v17 = vadd.f32 1.0, %v16097_v60 }
 0x31c   :  { %16108 = vpow2.f32 %v13369_v21  ;;  %v824_v10 = vadd.f32 %v808_v18, %v17361_v22  ;;  %v889_v3 = vmul.f32 %v17365_v44, %v17358_v7  ;;  %v17407_v18 = vadd.f32 %v17329_v43, %v17352_v11 }
 0x31d   :  { %16110 = vrcp.f32 %v852_v17 }
 0x31e   :  { %v16101_v27 = vpop.eup %16100  ;;  %v13370_v30 = vmul.f32 -1.442695, %v824_v10  ;;  %v897_v9 = vadd.f32 %v889_v3, %v17369_v25  ;;  %v878_v10 = vrot.slane %v17358_v7, 5 }
 0x31f   :  { %v17376_v37 = vpop.eup %16102  ;;  %v853_v38 = vadd.f32 1.0, %v16101_v27  ;;  %v17417_v27 = vadd.f32 %v17336_v20, %v17352_v11 }
 0x320   :  { %16112 = vpow2.f32 %v13370_v30  ;;  %v890_v39 = vmul.f32 %v17376_v37, %v874_v32  ;;  %v879_v32 = vrot.slane %v17358_v7, 6 }
 0x321   :  { %16114 = vrcp.f32 %v853_v38 }
 0x322   :  { %v16105_v40 = vpop.eup %16104  ;;  %16116 = vtanh.f32 %v897_v9  ;;  %v898_v41 = vadd.f32 %v890_v39, %v17380_v13  ;;  %v17428_v39 = vadd.f32 %v17349_v2, %v17352_v11 }
 0x323   :  { %v17385_v46 = vpop.eup %16106  ;;  %v854_v47 = vadd.f32 1.0, %v16105_v40 }
 0x324   :  { %16118 = vtanh.f32 %v898_v41  ;;  %v891_v19 = vmul.f32 %v17385_v46, %v875_v45  ;;  %v880_v45 = vrot.slane %v17358_v7, 7 }
 0x325   :  { %16120 = vrcp.f32 %v854_v47 }
 0x326   :  { %v16109_v49 = vpop.eup %16108  ;;  %v899_v50 = vadd.f32 %v891_v19, %v17389_v48  ;;  %v17438_v19 = vadd.f32 %v17363_v15, %v17352_v11  ;;  %v914_v15 = vsub.f32 1.0, %v17376_v37 }
 0x327   :  { %v17394_v56 = vpop.eup %16110  ;;  %v855_v57 = vadd.f32 1.0, %v16109_v49 }
 0x328   :  { %16122 = vtanh.f32 %v899_v50  ;;  %v892_v24 = vmul.f32 %v17394_v56, %v876_v53 }
 0x329   :  { %16124 = vrcp.f32 %v855_v57 }
 0x32a   :  { %v16113_v59 = vpop.eup %16112  ;;  %v900_v0 = vadd.f32 %v892_v24, %v17398_v58  ;;  %v913_v24 = vsub.f32 1.0, %v17365_v44 }
 0x32b   :  { %v17403_v14 = vpop.eup %16114  ;;  %v856_v16 = vadd.f32 1.0, %v16113_v59 }
 0x32c   :  { %v16117_v60 = vpop.eup %16116  ;;  %16126 = vtanh.f32 %v900_v0  ;;  %v893_v36 = vmul.f32 %v17403_v14, %v877_v5  ;;  %v962_v0 = vmul.f32 0.0, %v17376_v37 }
 0x32d   :  { %16128 = vrcp.f32 %v856_v16  ;;  %929 = vrot.lane.b32.xlu0 %v16117_v60, %s16741_s0  ;;  %v915_v16 = vsub.f32 1.0, %v17385_v46 }
 0x32e   :  { %v16119_v21 = vpop.eup %16118  ;;  %v901_v17 = vadd.f32 %v893_v36, %v17407_v18 }
 0x32f   :  { %v17413_v3 = vpop.eup %16120 }
 0x330   :  { %16130 = vtanh.f32 %v901_v17  ;;  %v894_v43 = vmul.f32 %v17413_v3, %v878_v10  ;;  %v963_v17 = vmul.f32 0.0, %v17385_v46 }
 0x331   :  { %931 = vrot.lane.b32.xlu0 %v16119_v21, %s16741_s0 }
 0x332   :  { %v16123_v30 = vpop.eup %16122  ;;  %v902_v9 = vadd.f32 %v894_v43, %v17417_v27  ;;  %v961_v43 = vmul.f32 0.0, %v17365_v44 }
 0x333   :  { %v17423_v38 = vpop.eup %16124  ;;  %933 = vrot.lane.b32.xlu1 %v16123_v30, %s16741_s0 }
 0x334   :  { %16132 = vtanh.f32 %v902_v9  ;;  %v895_v20 = vmul.f32 %v17423_v38, %v879_v32  ;;  %v916_v32 = vsub.f32 1.0, %v17394_v56 }
 0x336   :  { %v16127_v40 = vpop.eup %16126  ;;  %v903_v41 = vadd.f32 %v895_v20, %v17428_v39 }
 0x337   :  { %v17433_v47 = vpop.eup %16128  ;;  %935 = vrot.lane.b32.xlu1 %v16127_v40, %s16741_s0 }
 0x338   :  { %16134 = vtanh.f32 %v903_v41  ;;  %v896_v2 = vmul.f32 %v17433_v47, %v880_v45  ;;  %v964_v41 = vmul.f32 0.0, %v17394_v56 }
 0x33a   :  { %v16131_v49 = vpop.eup %16130  ;;  %v904_v50 = vadd.f32 %v896_v2, %v17438_v19 }
 0x33b   :  { %937 = vrot.lane.b32.xlu0 %v16131_v49, %s16741_s0  ;;  %v917_v49 = vsub.f32 1.0, %v17403_v14 }
 0x33c   :  { %16136 = vtanh.f32 %v904_v50 }
 0x33e   :  { %v16133_v53 = vpop.eup %16132 }
 0x33f   :  { %939 = vrot.lane.b32.xlu1 %v16133_v53, %s16741_s0 }
 0x342   :  { %v16135_v7 = vpop.eup %16134 }
 0x343   :  { %941 = vrot.lane.b32.xlu0 %v16135_v7, %s16741_s0  ;;  %v965_v7 = vmul.f32 0.0, %v17403_v14 }
 0x346   :  { %v16137_v57 = vpop.eup %16136 }
 0x347   :  { %943 = vrot.lane.b32.xlu1 %v16137_v57, %s16741_s0 }
 0x39f   :  { %v930_v11 = vpop.permute.xlu0 %929 }
 0x3a0   :  { %v953_v60 = vmul.f32 %v930_v11, %v913_v24 }
 0x3a2   :  { %v17458_v37 = vadd.f32 %v961_v43, %v953_v60  ;;  %v919_v60 = vsub.f32 1.0, %v17423_v38 }
 0x3a3   :  { %v932_v59 = vpop.permute.xlu0 %931 }
 0x3a4   :  { %v954_v5 = vmul.f32 %v932_v59, %v914_v15  ;;  %v918_v15 = vsub.f32 1.0, %v17413_v3 }
 0x3a5   :  { %v934_v36 = vpop.permute.xlu1 %933 }
 0x3a6   :  { %v17450_v21 = vadd.f32 %v962_v0, %v954_v5  ;;  %v955_v10 = vmul.f32 %v934_v36, %v915_v16  ;;  %v966_v0 = vmul.f32 0.0, %v17413_v3 }
 0x3a8   :  { %v985_v30 = vrot.slane %v17450_v21, 7  ;;  %v17455_v9 = vadd.f32 %v963_v17, %v955_v10  ;;  %v967_v10 = vmul.f32 0.0, %v17423_v38 }
 0x3a9   :  { %v936_v20 = vpop.permute.xlu1 %935 }
 0x3aa   :  { %v988_v40 = vrot.slane %v17455_v9, 6  ;;  %v956_v45 = vmul.f32 %v936_v20, %v916_v32  ;;  %v987_v44 = vsel %vm986_vm7, %v985_v30, %v17458_v37  ;;  %v920_v20 = vsub.f32 1.0, %v17433_v47 }
 0x3ac   :  { %v990_v46 = vsel %vm989_vm8, %v988_v40, %v987_v44  ;;  %v17467_v2 = vadd.f32 %v964_v41, %v956_v45  ;;  %v968_v45 = vmul.f32 0.0, %v17433_v47 }
 0x3ad   :  { %v938_v50 = vpop.permute.xlu0 %937 }
 0x3ae   :  { %v991_v53 = vrot.slane %v17467_v2, 5  ;;  %v957_v57 = vmul.f32 %v938_v50, %v917_v49 }
 0x3b0   :  { %v993_v56 = vsel %vm992_vm9, %v991_v53, %v990_v46  ;;  %v17473_v11 = vadd.f32 %v965_v7, %v957_v57 }
 0x3b1   :  { %v940_v24 = vpop.permute.xlu1 %939 }
 0x3b2   :  { %v994_v59 = vrot.slane %v17473_v11, 4  ;;  %v958_v5 = vmul.f32 %v940_v24, %v918_v15 }
 0x3b4   :  { %v17478_v16 = vadd.f32 %v966_v0, %v958_v5  ;;  %v996_v14 = vsel %vm995_vm10, %v994_v59, %v993_v56 }
 0x3b5   :  { %v942_v36 = vpop.permute.xlu0 %941 }
 0x3b6   :  { %v997_v17 = vrot.slane %v17478_v16, 3  ;;  %v959_v43 = vmul.f32 %v942_v36, %v919_v60 }
 0x3b8   :  { %v17484_v32 = vadd.f32 %v967_v10, %v959_v43  ;;  %v999_v3 = vsel %vm998_vm11, %v997_v17, %v996_v14 }
 0x3b9   :  { %v944_v40 = vpop.permute.xlu1 %943 }
 0x3ba   :  { %v1000_v41 = vrot.slane %v17484_v32, 2  ;;  %v960_v44 = vmul.f32 %v944_v40, %v920_v20 }
 0x3bc   :  { %v17490_v46 = vadd.f32 %v968_v45, %v960_v44  ;;  %v1002_v49 = vsel %vm1001_vm12, %v1000_v41, %v999_v3 }
 0x3be   :  { %v1003_v38 = vrot.slane %v17490_v46, 1 }
 0x3c0   :  { %v1005_v50 = vsel %vm1004_vm13, %v1003_v38, %v1002_v49 }
 0x3c1   :  { %1006 = vrot.lane.b32.xlu0 %v1005_v50, %s16741_s0 }
 0x433   :  { %v1007_v53 = vpop.permute.xlu0 %1006 }
 0x434   :  { %13371 = vmatmul.mubr.msk.f32.vlgmr.msra.gmra.mrb[10].mxu0 %vm726_vm14, %v1007_v53 }
 0x435   :  { %14993 = vmatpush1.bf16.msra.mxu0 %v17155_v52  ;;  %1650 = vmatprep.mubr.f32.mxu0 %v16749_v35 }
 0x436   :  { %14995 = vmatprep.subr.bf16.mxu0 %v17165_v55 }
 0x439   :  { %14997 = vmatpush1.bf16.msra.mxu0 %v17176_v63 }
 0x43a   :  { %14999 = vmatprep.subr.bf16.mxu0 %v17179_v29 }
 0x43d   :  { %15001 = vmatpush1.bf16.msra.mxu0 %v17186_v4 }
 0x43e   :  { %15003 = vmatprep.subr.bf16.mxu0 %v17225_v26 }
 0x441   :  { %15005 = vmatpush1.bf16.msra.mxu0 %v17236_v34 }
 0x442   :  { %15023 = vmatprep.subr.bf16.mxu0 %v17118_v28 }
 0x507   :  { %v1076_v47 = vpop.f32.mrb[10].mxu0 }
 0x508   :  { %v1077_v7 = vadd.f32 %v1076_v47, %v17289_v8  ;;  %v1078_v57 = vpop.f32.mrb[11].mxu0 }
 0x50a   :  { %v1082_v56 = vrot.slane %v1077_v7, 7  ;;  %v1083_v15 = vrot.slane %v1077_v7, 1  ;;  %v1084_v24 = vrot.slane %v1077_v7, 2  ;;  %v1085_v59 = vrot.slane %v1077_v7, 3 }
 0x50b   :  { %v1086_v0 = vrot.slane %v1077_v7, 4  ;;  %v1087_v5 = vrot.slane %v1077_v7, 5  ;;  %v1088_v60 = vrot.slane %v1077_v7, 6  ;;  %v1098_v14 = vadd.f32 %v1077_v7, %v17306_v62 }
 0x50c   :  { %v1097_v36 = vadd.f32 %v1082_v56, %v17298_v12  ;;  %v1099_v17 = vadd.f32 %v1083_v15, %v17313_v23  ;;  %v1100_v10 = vadd.f32 %v1084_v24, %v17320_v33  ;;  %v1101_v43 = vadd.f32 %v1085_v59, %v17327_v42 }
 0x50d   :  { %v1102_v20 = vadd.f32 %v1086_v0, %v17334_v51  ;;  %v1103_v3 = vadd.f32 %v1087_v5, %v17347_v1  ;;  %v13373_v40 = vmul.f32 -1.442695, %v1098_v14  ;;  %v1104_v41 = vadd.f32 %v1088_v60, %v17361_v22 }
 0x50e   :  { %v13372_v45 = vmul.f32 -1.442695, %v1097_v36  ;;  %v13374_v44 = vmul.f32 -1.442695, %v1099_v17  ;;  %v13375_v49 = vmul.f32 -1.442695, %v1100_v10 }
 0x50f   :  { %16138 = vpow2.f32 %v13373_v40  ;;  %v13376_v38 = vmul.f32 -1.442695, %v1101_v43  ;;  %v13377_v50 = vmul.f32 -1.442695, %v1102_v20  ;;  %v13378_v53 = vmul.f32 -1.442695, %v1103_v3 }
 0x510   :  { %16140 = vpow2.f32 %v13372_v45  ;;  %v13379_v47 = vmul.f32 -1.442695, %v1104_v41  ;;  %v1079_v41 = vadd.f32 %v1078_v57, %v17344_v61  ;;  %v1244_v57 = vrot.slane %v17473_v11, 7 }
 0x511   :  { %16142 = vpow2.f32 %v13374_v44  ;;  %v1241_v44 = vrot.slane %v17458_v37, 7 }
 0x512   :  { %16144 = vpow2.f32 %v13375_v49  ;;  %v1154_v49 = vrot.slane %v1079_v41, 7  ;;  %v1158_v11 = vrot.slane %v1079_v41, 4 }
 0x513   :  { %16146 = vpow2.f32 %v13376_v38 }
 0x514   :  { %16148 = vpow2.f32 %v13377_v50  ;;  %v1242_v50 = vrot.slane %v17455_v9, 7 }
 0x515   :  { %16150 = vpow2.f32 %v13378_v53  ;;  %v1243_v53 = vrot.slane %v17467_v2, 7  ;;  %v1157_v2 = vrot.slane %v1079_v41, 3 }
 0x516   :  { %16152 = vpow2.f32 %v13379_v47 }
 0x519   :  { %v16139_v7 = vpop.eup %16138 }
 0x51a   :  { %v16141_v56 = vpop.eup %16140  ;;  %v1130_v15 = vadd.f32 1.0, %v16139_v7  ;;  %v1155_v7 = vrot.slane %v1079_v41, 1 }
 0x51b   :  { %v16143_v24 = vpop.eup %16142  ;;  %v1129_v59 = vadd.f32 1.0, %v16141_v56 }
 0x51c   :  { %v16145_v0 = vpop.eup %16144  ;;  %16154 = vrcp.f32 %v1130_v15  ;;  %v1131_v5 = vadd.f32 1.0, %v16143_v24  ;;  %v1156_v24 = vrot.slane %v1079_v41, 2 }
 0x51d   :  { %v16147_v60 = vpop.eup %16146  ;;  %16156 = vrcp.f32 %v1129_v59  ;;  %v1132_v14 = vadd.f32 1.0, %v16145_v0 }
 0x51e   :  { %v16149_v36 = vpop.eup %16148  ;;  %16158 = vrcp.f32 %v1131_v5  ;;  %v1133_v17 = vadd.f32 1.0, %v16147_v60 }
 0x51f   :  { %v16151_v10 = vpop.eup %16150  ;;  %16160 = vrcp.f32 %v1132_v14  ;;  %v1134_v43 = vadd.f32 1.0, %v16149_v36  ;;  %v1159_v36 = vrot.slane %v1079_v41, 5 }
 0x520   :  { %v16153_v20 = vpop.eup %16152  ;;  %16162 = vrcp.f32 %v1133_v17  ;;  %v1135_v3 = vadd.f32 1.0, %v16151_v10 }
 0x521   :  { %16164 = vrcp.f32 %v1134_v43  ;;  %v1136_v40 = vadd.f32 1.0, %v16153_v20 }
 0x522   :  { %16166 = vrcp.f32 %v1135_v3 }
 0x523   :  { %16168 = vrcp.f32 %v1136_v40 }
 0x526   :  { %v17516_v45 = vpop.eup %16154 }
 0x527   :  { %v17519_v38 = vpop.eup %16156  ;;  %v1170_v47 = vmul.f32 %v17516_v45, %v1079_v41 }
 0x528   :  { %v17524_v56 = vpop.eup %16158  ;;  %v1169_v15 = vmul.f32 %v17519_v38, %v1154_v49  ;;  %v17529_v59 = vmul.f32 %v17519_v38, %v1241_v44  ;;  %v1245_v44 = vrot.slane %v17478_v16, 7 }
 0x529   :  { %v17531_v37 = vpop.eup %16160  ;;  %v1178_v0 = vadd.f32 %v1170_v47, %v17380_v13  ;;  %v1171_v9 = vmul.f32 %v17524_v56, %v1155_v7  ;;  %v1258_v5 = vmul.f32 %v17524_v56, %v1242_v50  ;;  %v1160_v50 = vrot.slane %v1079_v41, 6 }
 0x52a   :  { %v17536_v60 = vpop.eup %16162  ;;  %v1172_v14 = vmul.f32 %v17531_v37, %v1156_v24  ;;  %v17540_v17 = vmul.f32 %v17531_v37, %v1243_v53  ;;  %v1177_v20 = vadd.f32 %v1169_v15, %v17369_v25  ;;  %v1246_v7 = vrot.slane %v17484_v32, 7 }
 0x52b   :  { %v17542_v10 = vpop.eup %16164  ;;  %16170 = vtanh.f32 %v1178_v0  ;;  %v1179_v43 = vadd.f32 %v1171_v9, %v17389_v48  ;;  %v1173_v3 = vmul.f32 %v17536_v60, %v1157_v2  ;;  %v17552_v47 = vmul.f32 %v17536_v60, %v1244_v57 }
 0x52c   :  { %v17547_v40 = vpop.eup %16166  ;;  %v1174_v49 = vmul.f32 %v17542_v10, %v1158_v11  ;;  %v1180_v24 = vadd.f32 %v1172_v14, %v17398_v58  ;;  %v1247_v0 = vrot.slane %v17490_v46, 7  ;;  %v17562_v16 = vmul.f32 %v17542_v10, %v1245_v44 }
 0x52d   :  { %v17554_v53 = vpop.eup %16168  ;;  %16172 = vtanh.f32 %v1179_v43  ;;  %v1175_v15 = vmul.f32 %v17547_v40, %v1159_v36  ;;  %v1181_v41 = vadd.f32 %v1173_v3, %v17407_v18  ;;  %v17566_v57 = vmul.f32 %v17547_v40, %v1246_v7 }
 0x52e   :  { %v1176_v9 = vmul.f32 %v17554_v53, %v1160_v50  ;;  %16174 = vtanh.f32 %v1177_v20  ;;  %v17569_v32 = vmul.f32 %v17554_v53, %v1247_v0  ;;  %v1182_v2 = vadd.f32 %v1174_v49, %v17417_v27 }
 0x52f   :  { %16176 = vtanh.f32 %v1180_v24  ;;  %v1183_v46 = vadd.f32 %v1175_v15, %v17428_v39  ;;  %v1195_v24 = vsub.f32 1.0, %v17524_v56  ;;  %v1194_v0 = vsub.f32 1.0, %v17516_v45 }
 0x530   :  { %16178 = vtanh.f32 %v1181_v41  ;;  %v1184_v11 = vadd.f32 %v1176_v9, %v17438_v19  ;;  %v1193_v41 = vsub.f32 1.0, %v17519_v38  ;;  %v1198_v21 = vsub.f32 1.0, %v17542_v10 }
 0x531   :  { %16180 = vtanh.f32 %v1182_v2 }
 0x532   :  { %16182 = vtanh.f32 %v1183_v46 }
 0x533   :  { %16184 = vtanh.f32 %v1184_v11 }
 0x535   :  { %v16171_v14 = vpop.eup %16170 }
 0x536   :  { %1211 = vrot.lane.b32.xlu1 %v16171_v14, %s16741_s0 }
 0x537   :  { %v16173_v36 = vpop.eup %16172 }
 0x538   :  { %1213 = vrot.lane.b32.xlu0 %v16173_v36, %s16741_s0  ;;  %v16175_v43 = vpop.eup %16174  ;;  %v1196_v36 = vsub.f32 1.0, %v17531_v37 }
 0x539   :  { %v16177_v20 = vpop.eup %16176 }
 0x53a   :  { %1209 = vrot.lane.b32.xlu1 %v16175_v43, %s16741_s0  ;;  %v16179_v3 = vpop.eup %16178 }
 0x53b   :  { %v16181_v44 = vpop.eup %16180 }
 0x53c   :  { %1215 = vrot.lane.b32.xlu0 %v16177_v20, %s16741_s0  ;;  %v16183_v49 = vpop.eup %16182  ;;  %v1257_v20 = vmul.f32 %v17516_v45, %v985_v30 }
 0x53d   :  { %v16185_v50 = vpop.eup %16184 }
 0x53e   :  { %1217 = vrot.lane.b32.xlu1 %v16179_v3, %s16741_s0 }
 0x540   :  { %1219 = vrot.lane.b32.xlu0 %v16181_v44, %s16741_s0  ;;  %v1197_v44 = vsub.f32 1.0, %v17536_v60 }
 0x542   :  { %1221 = vrot.lane.b32.xlu1 %v16183_v49, %s16741_s0 }
 0x544   :  { %1223 = vrot.lane.b32.xlu0 %v16185_v50, %s16741_s0 }
 0x5a8   :  { %v1212_v7 = vpop.permute.xlu1 %1211 }
 0x5a9   :  { %v1234_v46 = vmul.f32 %v1212_v7, %v1194_v0 }
 0x5aa   :  { %v1214_v15 = vpop.permute.xlu0 %1213 }
 0x5ab   :  { %v1235_v9 = vmul.f32 %v1214_v15, %v1195_v24  ;;  %v17595_v38 = vadd.f32 %v1257_v20, %v1234_v46  ;;  %v1199_v24 = vsub.f32 1.0, %v17547_v40 }
 0x5ac   :  { %v1210_v2 = vpop.permute.xlu1 %1209 }
 0x5ad   :  { %v17585_v14 = vadd.f32 %v1258_v5, %v1235_v9  ;;  %v1233_v11 = vmul.f32 %v1210_v2, %v1193_v41  ;;  %v1200_v2 = vsub.f32 1.0, %v17554_v53 }
 0x5ae   :  { %v1216_v43 = vpop.permute.xlu0 %1215 }
 0x5af   :  { %v17592_v56 = vadd.f32 %v17529_v59, %v1233_v11  ;;  %v1236_v3 = vmul.f32 %v1216_v43, %v1196_v36  ;;  %v1282_v7 = vrot.slane %v17585_v14, 7 }
 0x5b0   :  { %v1218_v49 = vpop.permute.xlu1 %1217 }
 0x5b1   :  { %v1280_v5 = vrot.slane %v17592_v56, 1  ;;  %v17599_v50 = vadd.f32 %v17540_v17, %v1236_v3  ;;  %v1237_v37 = vmul.f32 %v1218_v49, %v1197_v44 }
 0x5b2   :  { %v1220_v30 = vpop.permute.xlu0 %1219 }
 0x5b3   :  { %v1281_v45 = vsel %vm986_vm7, %v17595_v38, %v1280_v5  ;;  %v1284_v59 = vrot.slane %v17599_v50, 6  ;;  %v17607_v60 = vadd.f32 %v17552_v47, %v1237_v37  ;;  %v1238_v15 = vmul.f32 %v1220_v30, %v1198_v21 }
 0x5b4   :  { %v1283_v17 = vsel %vm989_vm8, %v1282_v7, %v1281_v45  ;;  %v1222_v0 = vpop.permute.xlu1 %1221 }
 0x5b5   :  { %v1285_v9 = vsel %vm992_vm9, %v1284_v59, %v1283_v17  ;;  %v1286_v10 = vrot.slane %v17607_v60, 5  ;;  %v1239_v41 = vmul.f32 %v1222_v0, %v1199_v24  ;;  %v17617_v46 = vadd.f32 %v17562_v16, %v1238_v15 }
 0x5b6   :  { %v1224_v47 = vpop.permute.xlu0 %1223 }
 0x5b7   :  { %v17620_v11 = vadd.f32 %v17566_v57, %v1239_v41  ;;  %v1240_v40 = vmul.f32 %v1224_v47, %v1200_v2  ;;  %v1287_v36 = vsel %vm995_vm10, %v1286_v10, %v1285_v9  ;;  %v1288_v43 = vrot.slane %v17617_v46, 4 }
 0x5b9   :  { %v1290_v20 = vrot.slane %v17620_v11, 3  ;;  %v17626_v3 = vadd.f32 %v17569_v32, %v1240_v40  ;;  %v1289_v44 = vsel %vm998_vm11, %v1288_v43, %v1287_v36 }
 0x5bb   :  { %v1292_v53 = vrot.slane %v17626_v3, 2  ;;  %v1291_v16 = vsel %vm1001_vm12, %v1290_v20, %v1289_v44 }
 0x5bd   :  { %v1293_v49 = vsel %vm1004_vm13, %v1292_v53, %v1291_v16 }
 0x5be   :  { %1294 = vrot.lane.b32.xlu1 %v1293_v49, %s16741_s0 }
 0x630   :  { %v1295_v57 = vpop.permute.xlu1 %1294 }
 0x631   :  { %13380 = vmatmul.mubr.msk.f32.vlgmr.msra.gmra.mrb[16].mxu1 %vm726_vm14, %v1295_v57 }
 0x632   :  { %15009 = vmatpush1.bf16.msra.mxu1 %v17155_v52  ;;  %1938 = vmatprep.mubr.f32.mxu1 %v16749_v35 }
 0x633   :  { %15011 = vmatprep.subr.bf16.mxu1 %v17165_v55 }
 0x636   :  { %15013 = vmatpush1.bf16.msra.mxu1 %v17176_v63 }
 0x637   :  { %15015 = vmatprep.subr.bf16.mxu1 %v17179_v29 }
 0x63a   :  { %15017 = vmatpush1.bf16.msra.mxu1 %v17186_v4 }
 0x63b   :  { %15019 = vmatprep.subr.bf16.mxu1 %v17225_v26 }
 0x63e   :  { %15021 = vmatpush1.bf16.msra.mxu1 %v17236_v34 }
 0x63f   :  { %15039 = vmatprep.subr.bf16.mxu1 %v17118_v28 }
 0x704   :  { %v1364_v32 = vpop.f32.mrb[16].mxu1 }
 0x705   :  { %v1365_v5 = vadd.f32 %v1364_v32, %v17289_v8  ;;  %v1366_v37 = vpop.f32.mrb[17].mxu1 }
 0x707   :  { %v1370_v21 = vrot.slane %v1365_v5, 6  ;;  %v1371_v30 = vrot.slane %v1365_v5, 7  ;;  %v1372_v45 = vrot.slane %v1365_v5, 1  ;;  %v1373_v59 = vrot.slane %v1365_v5, 2 }
 0x708   :  { %v1374_v24 = vrot.slane %v1365_v5, 3  ;;  %v1375_v17 = vrot.slane %v1365_v5, 4  ;;  %v1376_v15 = vrot.slane %v1365_v5, 5  ;;  %v1387_v0 = vadd.f32 %v1365_v5, %v17313_v23 }
 0x709   :  { %v1385_v9 = vadd.f32 %v1370_v21, %v17298_v12  ;;  %v1386_v10 = vadd.f32 %v1371_v30, %v17306_v62  ;;  %v1388_v41 = vadd.f32 %v1372_v45, %v17320_v33  ;;  %v1389_v2 = vadd.f32 %v1373_v59, %v17327_v42 }
 0x70a   :  { %v1390_v47 = vadd.f32 %v1374_v24, %v17334_v51  ;;  %v1391_v40 = vadd.f32 %v1375_v17, %v17347_v1  ;;  %v13383_v36 = vmul.f32 -1.442695, %v1387_v0  ;;  %v1392_v43 = vadd.f32 %v1376_v15, %v17361_v22 }
 0x70b   :  { %v13381_v20 = vmul.f32 -1.442695, %v1385_v9  ;;  %v13382_v44 = vmul.f32 -1.442695, %v1386_v10  ;;  %v13384_v53 = vmul.f32 -1.442695, %v1388_v41 }
 0x70c   :  { %16186 = vpow2.f32 %v13383_v36  ;;  %v13385_v16 = vmul.f32 -1.442695, %v1389_v2  ;;  %v13386_v49 = vmul.f32 -1.442695, %v1390_v47  ;;  %v13387_v57 = vmul.f32 -1.442695, %v1391_v40 }
 0x70d   :  { %16188 = vpow2.f32 %v13381_v20  ;;  %v13388_v32 = vmul.f32 -1.442695, %v1392_v43  ;;  %v1367_v43 = vadd.f32 %v1366_v37, %v17344_v61  ;;  %v1533_v37 = vrot.slane %v17617_v46, 7 }
 0x70e   :  { %16190 = vpow2.f32 %v13382_v44  ;;  %v1530_v44 = vrot.slane %v17595_v38, 7 }
 0x70f   :  { %16192 = vpow2.f32 %v13384_v53  ;;  %v1529_v53 = vrot.slane %v17592_v56, 7 }
 0x710   :  { %16194 = vpow2.f32 %v13385_v16  ;;  %v1442_v16 = vrot.slane %v1367_v43, 6 }
 0x711   :  { %16196 = vpow2.f32 %v13386_v49 }
 0x712   :  { %16198 = vpow2.f32 %v13387_v57  ;;  %v1531_v57 = vrot.slane %v17599_v50, 7 }
 0x713   :  { %16200 = vpow2.f32 %v13388_v32  ;;  %v1532_v32 = vrot.slane %v17607_v60, 7 }
 0x716   :  { %v16187_v5 = vpop.eup %16186 }
 0x717   :  { %v16189_v21 = vpop.eup %16188  ;;  %v1419_v30 = vadd.f32 1.0, %v16187_v5 }
 0x718   :  { %v16191_v45 = vpop.eup %16190  ;;  %v1417_v59 = vadd.f32 1.0, %v16189_v21  ;;  %v1443_v21 = vrot.slane %v1367_v43, 7 }
 0x719   :  { %v16193_v24 = vpop.eup %16192  ;;  %16202 = vrcp.f32 %v1419_v30  ;;  %v1418_v17 = vadd.f32 1.0, %v16191_v45 }
 0x71a   :  { %v16195_v15 = vpop.eup %16194  ;;  %16204 = vrcp.f32 %v1417_v59  ;;  %v1420_v0 = vadd.f32 1.0, %v16193_v24  ;;  %v1444_v59 = vrot.slane %v1367_v43, 1 }
 0x71b   :  { %v16197_v9 = vpop.eup %16196  ;;  %16206 = vrcp.f32 %v1418_v17  ;;  %v1421_v10 = vadd.f32 1.0, %v16195_v15  ;;  %v1445_v17 = vrot.slane %v1367_v43, 2 }
 0x71c   :  { %v16199_v41 = vpop.eup %16198  ;;  %16208 = vrcp.f32 %v1420_v0  ;;  %v1422_v2 = vadd.f32 1.0, %v16197_v9  ;;  %v1446_v9 = vrot.slane %v1367_v43, 3 }
 0x71d   :  { %v16201_v47 = vpop.eup %16200  ;;  %16210 = vrcp.f32 %v1421_v10  ;;  %v1423_v40 = vadd.f32 1.0, %v16199_v41 }
 0x71e   :  { %16212 = vrcp.f32 %v1422_v2  ;;  %v1424_v36 = vadd.f32 1.0, %v16201_v47 }
 0x71f   :  { %16214 = vrcp.f32 %v1423_v40  ;;  %v1447_v40 = vrot.slane %v1367_v43, 4 }
 0x720   :  { %16216 = vrcp.f32 %v1424_v36 }
 0x723   :  { %v17653_v20 = vpop.eup %16202 }
 0x724   :  { %v17657_v49 = vpop.eup %16204  ;;  %v1459_v5 = vmul.f32 %v17653_v20, %v1367_v43 }
 0x725   :  { %v17662_v30 = vpop.eup %16206  ;;  %v1457_v45 = vmul.f32 %v17657_v49, %v1442_v16  ;;  %v1544_v38 = vmul.f32 %v17657_v49, %v1529_v53  ;;  %v1448_v16 = vrot.slane %v1367_v43, 5 }
 0x726   :  { %v17667_v56 = vpop.eup %16208  ;;  %v1467_v24 = vadd.f32 %v1459_v5, %v17389_v48  ;;  %v1458_v50 = vmul.f32 %v17662_v30, %v1443_v21  ;;  %v17672_v60 = vmul.f32 %v17662_v30, %v1530_v44 }
 0x727   :  { %v17674_v15 = vpop.eup %16210  ;;  %v1465_v0 = vadd.f32 %v1457_v45, %v17369_v25  ;;  %v1460_v46 = vmul.f32 %v17667_v56, %v1444_v59  ;;  %v1547_v10 = vmul.f32 %v17667_v56, %v1531_v57  ;;  %v1535_v57 = vrot.slane %v17626_v3, 7 }
 0x728   :  { %v17679_v41 = vpop.eup %16212  ;;  %16218 = vtanh.f32 %v1467_v24  ;;  %v1466_v2 = vadd.f32 %v1458_v50, %v17380_v13  ;;  %v1461_v47 = vmul.f32 %v17674_v15, %v1445_v17  ;;  %v1534_v59 = vrot.slane %v17620_v11, 7 }
 0x729   :  { %v17683_v36 = vpop.eup %16214  ;;  %16220 = vtanh.f32 %v1465_v0  ;;  %v1468_v44 = vadd.f32 %v1460_v46, %v17398_v58  ;;  %v1462_v53 = vmul.f32 %v17679_v41, %v1446_v9  ;;  %v1549_v45 = vmul.f32 %v17679_v41, %v1533_v37 }
 0x72a   :  { %v17687_v5 = vpop.eup %16216  ;;  %v1463_v21 = vmul.f32 %v17683_v36, %v1447_v40  ;;  %v1548_v50 = vmul.f32 %v17674_v15, %v1532_v32  ;;  %16222 = vtanh.f32 %v1466_v2  ;;  %v1469_v43 = vadd.f32 %v1461_v47, %v17407_v18 }
 0x72b   :  { %v1464_v24 = vmul.f32 %v17687_v5, %v1448_v16  ;;  %v1470_v17 = vadd.f32 %v1462_v53, %v17417_v27  ;;  %v17697_v0 = vmul.f32 %v17687_v5, %v1535_v57  ;;  %16224 = vtanh.f32 %v1468_v44 }
 0x72c   :  { %v17701_v3 = vmul.f32 %v17683_v36, %v1534_v59  ;;  %v1471_v11 = vadd.f32 %v1463_v21, %v17428_v39  ;;  %v1481_v57 = vsub.f32 1.0, %v17657_v49  ;;  %v1486_v49 = vsub.f32 1.0, %v17679_v41 }
 0x72d   :  { %16226 = vtanh.f32 %v1470_v17  ;;  %v1472_v37 = vadd.f32 %v1464_v24, %v17438_v19  ;;  %v1482_v24 = vsub.f32 1.0, %v17662_v30  ;;  %v1483_v17 = vsub.f32 1.0, %v17653_v20 }
 0x72e   :  { %16228 = vtanh.f32 %v1469_v43  ;;  %v1546_v30 = vmul.f32 %v17653_v20, %v1282_v7  ;;  %v1488_v7 = vsub.f32 1.0, %v17687_v5 }
 0x72f   :  { %16230 = vtanh.f32 %v1472_v37 }
 0x730   :  { %16232 = vtanh.f32 %v1471_v11  ;;  %v1484_v11 = vsub.f32 1.0, %v17667_v56 }
 0x732   :  { %v16219_v46 = vpop.eup %16218 }
 0x733   :  { %v16221_v32 = vpop.eup %16220  ;;  %1501 = vrot.lane.b32.xlu1 %v16219_v46, %s16741_s0 }
 0x734   :  { %1497 = vrot.lane.b32.xlu0 %v16221_v32, %s16741_s0  ;;  %v16223_v9 = vpop.eup %16222 }
 0x735   :  { %v16225_v2 = vpop.eup %16224 }
 0x737   :  { %1499 = vrot.lane.b32.xlu1 %v16223_v9, %s16741_s0  ;;  %v16227_v47 = vpop.eup %16226 }
 0x738   :  { %1503 = vrot.lane.b32.xlu0 %v16225_v2, %s16741_s0  ;;  %v16229_v40 = vpop.eup %16228 }
 0x739   :  { %v16231_v44 = vpop.eup %16230 }
 0x73a   :  { %v16233_v53 = vpop.eup %16232 }
 0x73b   :  { %1507 = vrot.lane.b32.xlu1 %v16227_v47, %s16741_s0 }
 0x73c   :  { %1505 = vrot.lane.b32.xlu0 %v16229_v40, %s16741_s0 }
 0x73f   :  { %1511 = vrot.lane.b32.xlu1 %v16231_v44, %s16741_s0  ;;  %v1485_v44 = vsub.f32 1.0, %v17674_v15 }
 0x740   :  { %1509 = vrot.lane.b32.xlu0 %v16233_v53, %s16741_s0 }
 0x7a5   :  { %v1502_v16 = vpop.permute.xlu1 %1501 }
 0x7a6   :  { %v1498_v21 = vpop.permute.xlu0 %1497  ;;  %v1523_v9 = vmul.f32 %v1502_v16, %v1483_v17 }
 0x7a7   :  { %v1521_v59 = vmul.f32 %v1498_v21, %v1481_v57 }
 0x7a8   :  { %v17731_v21 = vadd.f32 %v1546_v30, %v1523_v9 }
 0x7a9   :  { %v17716_v43 = vadd.f32 %v1544_v38, %v1521_v59  ;;  %v1500_v37 = vpop.permute.xlu1 %1499 }
 0x7aa   :  { %v1522_v46 = vmul.f32 %v1500_v37, %v1482_v24  ;;  %v1504_v32 = vpop.permute.xlu0 %1503  ;;  %v1487_v24 = vsub.f32 1.0, %v17683_v36 }
 0x7ab   :  { %v1524_v2 = vmul.f32 %v1504_v32, %v1484_v11  ;;  %v1568_v56 = vrot.slane %v17716_v43, 2 }
 0x7ac   :  { %v17720_v47 = vadd.f32 %v17672_v60, %v1522_v46 }
 0x7ad   :  { %v17726_v40 = vadd.f32 %v1547_v10, %v1524_v2  ;;  %v1508_v38 = vpop.permute.xlu1 %1507 }
 0x7ae   :  { %v1569_v53 = vrot.slane %v17720_v47, 1  ;;  %v1526_v16 = vmul.f32 %v1508_v38, %v1486_v49  ;;  %v1506_v57 = vpop.permute.xlu0 %1505 }
 0x7af   :  { %v1525_v60 = vmul.f32 %v1506_v57, %v1485_v44  ;;  %v1572_v14 = vrot.slane %v17726_v40, 7 }
 0x7b0   :  { %v1570_v41 = vsel %vm986_vm7, %v1569_v53, %v1568_v56  ;;  %v17735_v59 = vadd.f32 %v1549_v45, %v1526_v16 }
 0x7b1   :  { %v1571_v20 = vsel %vm989_vm8, %v17731_v21, %v1570_v41  ;;  %v17740_v15 = vadd.f32 %v1548_v50, %v1525_v60  ;;  %v1512_v10 = vpop.permute.xlu1 %1511 }
 0x7b2   :  { %v1528_v17 = vmul.f32 %v1512_v10, %v1488_v7  ;;  %v1510_v37 = vpop.permute.xlu0 %1509  ;;  %v1573_v45 = vsel %vm992_vm9, %v1572_v14, %v1571_v20  ;;  %v1576_v32 = vrot.slane %v17735_v59, 5 }
 0x7b3   :  { %v1574_v11 = vrot.slane %v17740_v15, 6  ;;  %v1527_v46 = vmul.f32 %v1510_v37, %v1487_v24 }
 0x7b4   :  { %v17749_v5 = vadd.f32 %v17697_v0, %v1528_v17 }
 0x7b5   :  { %v17752_v50 = vadd.f32 %v17701_v3, %v1527_v46  ;;  %v1575_v9 = vsel %vm995_vm10, %v1574_v11, %v1573_v45 }
 0x7b6   :  { %v1577_v36 = vsel %vm998_vm11, %v1576_v32, %v1575_v9  ;;  %v1580_v49 = vrot.slane %v17749_v5, 3 }
 0x7b7   :  { %v1578_v2 = vrot.slane %v17752_v50, 4 }
 0x7b9   :  { %v1579_v30 = vsel %vm1001_vm12, %v1578_v2, %v1577_v36 }
 0x7ba   :  { %v1581_v38 = vsel %vm1004_vm13, %v1580_v49, %v1579_v30 }
 0x7bb   :  { %1582 = vrot.lane.b32.xlu0 %v1581_v38, %s16741_s0 }
 0x82d   :  { %v1583_v44 = vpop.permute.xlu0 %1582 }
 0x82e   :  { %13389 = vmatmul.mubr.msk.f32.vlgmr.msra.gmra.mrb[12].mxu0 %vm726_vm14, %v1583_v44 }
 0x82f   :  { %15025 = vmatpush1.bf16.msra.mxu0 %v17155_v52  ;;  %2226 = vmatprep.mubr.f32.mxu0 %v16749_v35 }
 0x830   :  { %15027 = vmatprep.subr.bf16.mxu0 %v17165_v55 }
 0x833   :  { %15029 = vmatpush1.bf16.msra.mxu0 %v17176_v63 }
 0x834   :  { %15031 = vmatprep.subr.bf16.mxu0 %v17179_v29 }
 0x837   :  { %15033 = vmatpush1.bf16.msra.mxu0 %v17186_v4 }
 0x838   :  { %15035 = vmatprep.subr.bf16.mxu0 %v17225_v26 }
 0x83b   :  { %15037 = vmatpush1.bf16.msra.mxu0 %v17236_v34 }
 0x83c   :  { %15055 = vmatprep.subr.bf16.mxu0 %v17118_v28 }
 0x901   :  { %v1652_v0 = vpop.f32.mrb[12].mxu0 }
 0x902   :  { %v1653_v3 = vadd.f32 %v1652_v0, %v17289_v8  ;;  %v1654_v56 = vpop.f32.mrb[13].mxu0 }
 0x904   :  { %v1658_v53 = vrot.slane %v1653_v3, 5  ;;  %v1659_v16 = vrot.slane %v1653_v3, 6  ;;  %v1660_v57 = vrot.slane %v1653_v3, 7  ;;  %v1661_v60 = vrot.slane %v1653_v3, 1 }
 0x905   :  { %v1662_v41 = vrot.slane %v1653_v3, 2  ;;  %v1663_v7 = vrot.slane %v1653_v3, 3  ;;  %v1664_v20 = vrot.slane %v1653_v3, 4  ;;  %v1676_v10 = vadd.f32 %v1653_v3, %v17320_v33 }
 0x906   :  { %v1673_v24 = vadd.f32 %v1658_v53, %v17298_v12  ;;  %v1674_v17 = vadd.f32 %v1659_v16, %v17306_v62  ;;  %v1675_v37 = vadd.f32 %v1660_v57, %v17313_v23  ;;  %v1677_v28 = vadd.f32 %v1661_v60, %v17327_v42 }
 0x907   :  { %v1678_v11 = vadd.f32 %v1662_v41, %v17334_v51  ;;  %v1679_v46 = vadd.f32 %v1663_v7, %v17347_v1  ;;  %v13393_v45 = vmul.f32 -1.442695, %v1676_v10  ;;  %v1680_v32 = vadd.f32 %v1664_v20, %v17361_v22 }
 0x908   :  { %v13390_v9 = vmul.f32 -1.442695, %v1673_v24  ;;  %v13391_v36 = vmul.f32 -1.442695, %v1674_v17  ;;  %v13392_v2 = vmul.f32 -1.442695, %v1675_v37 }
 0x909   :  { %16234 = vpow2.f32 %v13393_v45  ;;  %v13394_v49 = vmul.f32 -1.442695, %v1677_v28  ;;  %v13395_v30 = vmul.f32 -1.442695, %v1678_v11  ;;  %v13396_v38 = vmul.f32 -1.442695, %v1679_v46 }
 0x90a   :  { %16236 = vpow2.f32 %v13390_v9  ;;  %v13397_v44 = vmul.f32 -1.442695, %v1680_v32  ;;  %v1655_v45 = vadd.f32 %v1654_v56, %v17344_v61  ;;  %v1817_v9 = vrot.slane %v17716_v43, 7 }
 0x90b   :  { %16238 = vpow2.f32 %v13391_v36  ;;  %v1820_v56 = vrot.slane %v17740_v15, 7 }
 0x90c   :  { %16240 = vpow2.f32 %v13392_v2  ;;  %v1730_v36 = vrot.slane %v1655_v45, 5  ;;  %v1734_v15 = vrot.slane %v1655_v45, 2 }
 0x90d   :  { %16242 = vpow2.f32 %v13394_v49  ;;  %v1819_v49 = vrot.slane %v17731_v21, 7 }
 0x90e   :  { %16244 = vpow2.f32 %v13395_v30  ;;  %v1818_v30 = vrot.slane %v17720_v47, 7  ;;  %v1733_v47 = vrot.slane %v1655_v45, 1 }
 0x90f   :  { %16246 = vpow2.f32 %v13396_v38 }
 0x910   :  { %16248 = vpow2.f32 %v13397_v44  ;;  %v1731_v44 = vrot.slane %v1655_v45, 6 }
 0x913   :  { %v16235_v0 = vpop.eup %16234 }
 0x914   :  { %v16237_v3 = vpop.eup %16236  ;;  %v1708_v53 = vadd.f32 1.0, %v16235_v0 }
 0x915   :  { %v16239_v16 = vpop.eup %16238  ;;  %v1705_v57 = vadd.f32 1.0, %v16237_v3 }
 0x916   :  { %v16241_v60 = vpop.eup %16240  ;;  %16250 = vrcp.f32 %v1708_v53  ;;  %v1706_v41 = vadd.f32 1.0, %v16239_v16  ;;  %v1732_v53 = vrot.slane %v1655_v45, 7 }
 0x917   :  { %v16243_v7 = vpop.eup %16242  ;;  %16252 = vrcp.f32 %v1705_v57  ;;  %v1707_v20 = vadd.f32 1.0, %v16241_v60 }
 0x918   :  { %v16245_v10 = vpop.eup %16244  ;;  %16254 = vrcp.f32 %v1706_v41  ;;  %v1709_v24 = vadd.f32 1.0, %v16243_v7 }
 0x919   :  { %v16247_v17 = vpop.eup %16246  ;;  %16256 = vrcp.f32 %v1707_v20  ;;  %v1710_v37 = vadd.f32 1.0, %v16245_v10  ;;  %v1735_v20 = vrot.slane %v1655_v45, 3 }
 0x91a   :  { %v16249_v28 = vpop.eup %16248  ;;  %16258 = vrcp.f32 %v1709_v24  ;;  %v1711_v11 = vadd.f32 1.0, %v16247_v17 }
 0x91b   :  { %16260 = vrcp.f32 %v1710_v37  ;;  %v1712_v46 = vadd.f32 1.0, %v16249_v28 }
 0x91c   :  { %16262 = vrcp.f32 %v1711_v11 }
 0x91d   :  { %16264 = vrcp.f32 %v1712_v46  ;;  %v1821_v46 = vrot.slane %v17735_v59, 7 }
 0x920   :  { %v17781_v32 = vpop.eup %16250 }
 0x921   :  { %v17784_v2 = vpop.eup %16252  ;;  %v1748_v38 = vmul.f32 %v17781_v32, %v1655_v45 }
 0x922   :  { %v17789_v0 = vpop.eup %16254  ;;  %v1745_v3 = vmul.f32 %v17784_v2, %v1730_v36  ;;  %v17794_v16 = vmul.f32 %v17784_v2, %v1817_v9  ;;  %v1736_v36 = vrot.slane %v1655_v45, 4 }
 0x923   :  { %v17796_v43 = vpop.eup %16256  ;;  %v1756_v57 = vadd.f32 %v1748_v38, %v17398_v58  ;;  %v1746_v21 = vmul.f32 %v17789_v0, %v1731_v44  ;;  %v1833_v60 = vmul.f32 %v17789_v0, %v1818_v30  ;;  %v1822_v38 = vrot.slane %v17752_v50, 7 }
 0x924   :  { %v17801_v41 = vpop.eup %16258  ;;  %v1747_v7 = vmul.f32 %v17796_v43, %v1732_v53  ;;  %v17805_v10 = vmul.f32 %v17796_v43, %v1819_v49  ;;  %v1753_v37 = vadd.f32 %v1745_v3, %v17369_v25  ;;  %v1823_v53 = vrot.slane %v17749_v5, 7 }
 0x925   :  { %v17807_v24 = vpop.eup %16260  ;;  %16266 = vtanh.f32 %v1756_v57  ;;  %v1754_v17 = vadd.f32 %v1746_v21, %v17380_v13  ;;  %v1749_v28 = vmul.f32 %v17801_v41, %v1733_v47  ;;  %v1836_v30 = vmul.f32 %v17801_v41, %v1820_v56 }
 0x926   :  { %v17812_v11 = vpop.eup %16262  ;;  %v1750_v9 = vmul.f32 %v17807_v24, %v1734_v15  ;;  %v1837_v59 = vmul.f32 %v17807_v24, %v1821_v46  ;;  %v1755_v45 = vadd.f32 %v1747_v7, %v17389_v48 }
 0x927   :  { %v17817_v49 = vpop.eup %16264  ;;  %16268 = vtanh.f32 %v1754_v17  ;;  %v1757_v44 = vadd.f32 %v1749_v28, %v17407_v18  ;;  %v1751_v3 = vmul.f32 %v17812_v11, %v1735_v20  ;;  %v17827_v56 = vmul.f32 %v17812_v11, %v1822_v38 }
 0x928   :  { %v1752_v57 = vmul.f32 %v17817_v49, %v1736_v36  ;;  %16270 = vtanh.f32 %v1753_v37  ;;  %v17830_v21 = vmul.f32 %v17817_v49, %v1823_v53  ;;  %v1758_v50 = vadd.f32 %v1750_v9, %v17417_v27 }
 0x929   :  { %16272 = vtanh.f32 %v1757_v44  ;;  %v1759_v47 = vadd.f32 %v1751_v3, %v17428_v39  ;;  %v1770_v38 = vsub.f32 1.0, %v17789_v0  ;;  %v1769_v53 = vsub.f32 1.0, %v17784_v2 }
 0x92a   :  { %16274 = vtanh.f32 %v1755_v45  ;;  %v1760_v15 = vadd.f32 %v1752_v57, %v17438_v19 }
 0x92b   :  { %16276 = vtanh.f32 %v1758_v50 }
 0x92c   :  { %16278 = vtanh.f32 %v1759_v47  ;;  %v1773_v47 = vsub.f32 1.0, %v17801_v41 }
 0x92d   :  { %16280 = vtanh.f32 %v1760_v15 }
 0x92f   :  { %v16267_v5 = vpop.eup %16266 }
 0x930   :  { %1791 = vrot.lane.b32.xlu1 %v16267_v5, %s16741_s0 }
 0x931   :  { %v16269_v20 = vpop.eup %16268 }
 0x932   :  { %1787 = vrot.lane.b32.xlu0 %v16269_v20, %s16741_s0  ;;  %v16271_v7 = vpop.eup %16270 }
 0x933   :  { %v16273_v17 = vpop.eup %16272 }
 0x934   :  { %1785 = vrot.lane.b32.xlu1 %v16271_v7, %s16741_s0  ;;  %v16275_v37 = vpop.eup %16274  ;;  %v1771_v7 = vsub.f32 1.0, %v17796_v43 }
 0x935   :  { %v16277_v28 = vpop.eup %16276 }
 0x936   :  { %1793 = vrot.lane.b32.xlu0 %v16273_v17, %s16741_s0  ;;  %v16279_v46 = vpop.eup %16278  ;;  %v1772_v17 = vsub.f32 1.0, %v17781_v32 }
 0x937   :  { %v16281_v9 = vpop.eup %16280 }
 0x938   :  { %1789 = vrot.lane.b32.xlu1 %v16275_v37, %s16741_s0  ;;  %v1774_v37 = vsub.f32 1.0, %v17807_v24  ;;  %v1835_v24 = vmul.f32 %v17781_v32, %v1572_v14 }
 0x93a   :  { %1795 = vrot.lane.b32.xlu0 %v16277_v28, %s16741_s0 }
 0x93c   :  { %1797 = vrot.lane.b32.xlu1 %v16279_v46, %s16741_s0 }
 0x93e   :  { %1799 = vrot.lane.b32.xlu0 %v16281_v9, %s16741_s0 }
 0x9a2   :  { %v1792_v36 = vpop.permute.xlu1 %1791 }
 0x9a3   :  { %v1812_v41 = vmul.f32 %v1792_v36, %v1772_v17 }
 0x9a4   :  { %v1788_v44 = vpop.permute.xlu0 %1787 }
 0x9a5   :  { %v1810_v3 = vmul.f32 %v1788_v44, %v1770_v38  ;;  %v1775_v44 = vsub.f32 1.0, %v17812_v11  ;;  %v17869_v36 = vadd.f32 %v1835_v24, %v1812_v41 }
 0x9a6   :  { %v1786_v57 = vpop.permute.xlu1 %1785 }
 0x9a7   :  { %v17845_v45 = vadd.f32 %v1833_v60, %v1810_v3  ;;  %v1809_v50 = vmul.f32 %v1786_v57, %v1769_v53 }
 0x9a8   :  { %v1794_v5 = vpop.permute.xlu0 %1793 }
 0x9a9   :  { %v17849_v15 = vadd.f32 %v17794_v16, %v1809_v50  ;;  %v1813_v20 = vmul.f32 %v1794_v5, %v1773_v47  ;;  %v1857_v2 = vrot.slane %v17845_v45, 2  ;;  %v1776_v50 = vsub.f32 1.0, %v17817_v49 }
 0x9aa   :  { %v1790_v0 = vpop.permute.xlu1 %1789 }
 0x9ab   :  { %v1856_v60 = vrot.slane %v17849_v15, 3  ;;  %v17856_v28 = vadd.f32 %v1836_v30, %v1813_v20  ;;  %v1811_v46 = vmul.f32 %v1790_v0, %v1771_v7 }
 0x9ac   :  { %v1796_v9 = vpop.permute.xlu0 %1795 }
 0x9ad   :  { %v1858_v16 = vsel %vm986_vm7, %v1857_v2, %v1856_v60  ;;  %v17860_v38 = vadd.f32 %v17805_v10, %v1811_v46  ;;  %v1814_v43 = vmul.f32 %v1796_v9, %v1774_v37  ;;  %v1862_v10 = vrot.slane %v17856_v28, 7 }
 0x9ae   :  { %v1798_v3 = vpop.permute.xlu1 %1797 }
 0x9af   :  { %v1859_v53 = vrot.slane %v17860_v38, 1  ;;  %v17867_v30 = vadd.f32 %v1837_v59, %v1814_v43  ;;  %v1815_v57 = vmul.f32 %v1798_v3, %v1775_v44 }
 0x9b0   :  { %v1800_v47 = vpop.permute.xlu0 %1799 }
 0x9b1   :  { %v1860_v5 = vsel %vm989_vm8, %v1859_v53, %v1858_v16  ;;  %v1864_v11 = vrot.slane %v17867_v30, 6  ;;  %v17876_v40 = vadd.f32 %v17827_v56, %v1815_v57  ;;  %v1816_v14 = vmul.f32 %v1800_v47, %v1776_v50 }
 0x9b2   :  { %v1861_v32 = vsel %vm992_vm9, %v17869_v36, %v1860_v5 }
 0x9b3   :  { %v1866_v59 = vrot.slane %v17876_v40, 5  ;;  %v1863_v49 = vsel %vm995_vm10, %v1862_v10, %v1861_v32  ;;  %v17885_v20 = vadd.f32 %v17830_v21, %v1816_v14 }
 0x9b4   :  { %v1865_v7 = vsel %vm998_vm11, %v1864_v11, %v1863_v49 }
 0x9b5   :  { %v1867_v17 = vsel %vm1001_vm12, %v1866_v59, %v1865_v7  ;;  %v1868_v56 = vrot.slane %v17885_v20, 4 }
 0x9b7   :  { %v1869_v0 = vsel %vm1004_vm13, %v1868_v56, %v1867_v17 }
 0x9b8   :  { %1870 = vrot.lane.b32.xlu1 %v1869_v0, %s16741_s0 }
 0xa2a   :  { %v1871_v37 = vpop.permute.xlu1 %1870 }
 0xa2b   :  { %13398 = vmatmul.mubr.msk.f32.vlgmr.msra.gmra.mrb[18].mxu1 %vm726_vm14, %v1871_v37 }
 0xa2c   :  { %15041 = vmatpush1.bf16.msra.mxu1 %v17155_v52  ;;  %2514 = vmatprep.mubr.f32.mxu1 %v16749_v35 }
 0xa2d   :  { %15043 = vmatprep.subr.bf16.mxu1 %v17165_v55 }
 0xa30   :  { %15045 = vmatpush1.bf16.msra.mxu1 %v17176_v63 }
 0xa31   :  { %15047 = vmatprep.subr.bf16.mxu1 %v17179_v29 }
 0xa34   :  { %15049 = vmatpush1.bf16.msra.mxu1 %v17186_v4 }
 0xa35   :  { %15051 = vmatprep.subr.bf16.mxu1 %v17225_v26 }
 0xa38   :  { %15053 = vmatpush1.bf16.msra.mxu1 %v17236_v34 }
 0xafe   :  { %v1940_v21 = vpop.f32.mrb[18].mxu1 }
 0xaff   :  { %v1941_v2 = vadd.f32 %v1940_v21, %v17289_v8  ;;  %v1942_v60 = vpop.f32.mrb[19].mxu1 }
 0xb01   :  { %v1946_v46 = vrot.slane %v1941_v2, 4  ;;  %v1947_v41 = vrot.slane %v1941_v2, 5  ;;  %v1948_v9 = vrot.slane %v1941_v2, 6  ;;  %v1949_v16 = vrot.slane %v1941_v2, 7 }
 0xb02   :  { %v1950_v43 = vrot.slane %v1941_v2, 1  ;;  %v1951_v44 = vrot.slane %v1941_v2, 2  ;;  %v1952_v24 = vrot.slane %v1941_v2, 3  ;;  %v1965_v3 = vadd.f32 %v1941_v2, %v17327_v42 }
 0xb03   :  { %v1961_v53 = vadd.f32 %v1946_v46, %v17298_v12  ;;  %v1962_v57 = vadd.f32 %v1947_v41, %v17306_v62  ;;  %v1963_v50 = vadd.f32 %v1948_v9, %v17313_v23  ;;  %v1964_v47 = vadd.f32 %v1949_v16, %v17320_v33 }
 0xb04   :  { %v1966_v5 = vadd.f32 %v1950_v43, %v17334_v51  ;;  %v1967_v11 = vadd.f32 %v1951_v44, %v17347_v1  ;;  %v13403_v14 = vmul.f32 -1.442695, %v1965_v3  ;;  %v1968_v32 = vadd.f32 %v1952_v24, %v17361_v22 }
 0xb05   :  { %v13399_v59 = vmul.f32 -1.442695, %v1961_v53  ;;  %v13400_v49 = vmul.f32 -1.442695, %v1962_v57  ;;  %v13401_v7 = vmul.f32 -1.442695, %v1963_v50 }
 0xb06   :  { %v13402_v17 = vmul.f32 -1.442695, %v1964_v47  ;;  %16282 = vpow2.f32 %v13403_v14  ;;  %v13404_v56 = vmul.f32 -1.442695, %v1966_v5  ;;  %v13405_v0 = vmul.f32 -1.442695, %v1967_v11 }
 0xb07   :  { %16284 = vpow2.f32 %v13399_v59  ;;  %v13406_v37 = vmul.f32 -1.442695, %v1968_v32  ;;  %v1943_v14 = vadd.f32 %v1942_v60, %v17344_v61  ;;  %v2108_v59 = vrot.slane %v17869_v36, 7 }
 0xb08   :  { %16286 = vpow2.f32 %v13400_v49  ;;  %v2106_v49 = vrot.slane %v17845_v45, 7 }
 0xb09   :  { %16288 = vpow2.f32 %v13401_v7  ;;  %v2105_v7 = vrot.slane %v17849_v15, 7  ;;  %v2019_v60 = vrot.slane %v1943_v14, 5  ;;  %v2021_v36 = vrot.slane %v1943_v14, 7 }
 0xb0a   :  { %16290 = vpow2.f32 %v13402_v17  ;;  %v2018_v17 = vrot.slane %v1943_v14, 4 }
 0xb0b   :  { %16292 = vpow2.f32 %v13404_v56 }
 0xb0c   :  { %16294 = vpow2.f32 %v13405_v0  ;;  %v2107_v0 = vrot.slane %v17860_v38, 7  ;;  %v2022_v38 = vrot.slane %v1943_v14, 1 }
 0xb0d   :  { %16296 = vpow2.f32 %v13406_v37  ;;  %v2109_v37 = vrot.slane %v17867_v30, 7 }
 0xb10   :  { %v16283_v21 = vpop.eup %16282 }
 0xb11   :  { %v16285_v2 = vpop.eup %16284  ;;  %v1997_v46 = vadd.f32 1.0, %v16283_v21 }
 0xb12   :  { %v16287_v41 = vpop.eup %16286  ;;  %v1993_v9 = vadd.f32 1.0, %v16285_v2 }
 0xb13   :  { %v16289_v16 = vpop.eup %16288  ;;  %16298 = vrcp.f32 %v1997_v46  ;;  %v1994_v43 = vadd.f32 1.0, %v16287_v41  ;;  %v2020_v41 = vrot.slane %v1943_v14, 6 }
 0xb14   :  { %v16291_v44 = vpop.eup %16290  ;;  %16300 = vrcp.f32 %v1993_v9  ;;  %v1995_v24 = vadd.f32 1.0, %v16289_v16 }
 0xb15   :  { %v16293_v3 = vpop.eup %16292  ;;  %16302 = vrcp.f32 %v1994_v43  ;;  %v1996_v53 = vadd.f32 1.0, %v16291_v44 }
 0xb16   :  { %v16295_v57 = vpop.eup %16294  ;;  %16304 = vrcp.f32 %v1995_v24  ;;  %v1998_v50 = vadd.f32 1.0, %v16293_v3  ;;  %v2024_v3 = vrot.slane %v1943_v14, 3 }
 0xb17   :  { %v16297_v47 = vpop.eup %16296  ;;  %16306 = vrcp.f32 %v1996_v53  ;;  %v1999_v5 = vadd.f32 1.0, %v16295_v57 }
 0xb18   :  { %16308 = vrcp.f32 %v1998_v50  ;;  %v2000_v11 = vadd.f32 1.0, %v16297_v47 }
 0xb19   :  { %16310 = vrcp.f32 %v1999_v5  ;;  %v2023_v5 = vrot.slane %v1943_v14, 2 }
 0xb1a   :  { %16312 = vrcp.f32 %v2000_v11 }
 0xb1d   :  { %v17911_v32 = vpop.eup %16298 }
 0xb1e   :  { %v17916_v56 = vpop.eup %16300  ;;  %v2037_v21 = vmul.f32 %v17911_v32, %v1943_v14 }
 0xb1f   :  { %v17921_v2 = vpop.eup %16302  ;;  %v2033_v46 = vmul.f32 %v17916_v56, %v2018_v17  ;;  %v2120_v45 = vmul.f32 %v17916_v56, %v2105_v7 }
 0xb20   :  { %v17925_v9 = vpop.eup %16304  ;;  %v2045_v15 = vadd.f32 %v2037_v21, %v17407_v18  ;;  %v2034_v16 = vmul.f32 %v17921_v2, %v2019_v60  ;;  %v2121_v30 = vmul.f32 %v17921_v2, %v2106_v49 }
 0xb21   :  { %v17930_v43 = vpop.eup %16306  ;;  %v2041_v44 = vadd.f32 %v2033_v46, %v17369_v25  ;;  %v2035_v24 = vmul.f32 %v17925_v9, %v2020_v41  ;;  %v2122_v53 = vmul.f32 %v17925_v9, %v2107_v0  ;;  %v2111_v0 = vrot.slane %v17885_v20, 7 }
 0xb22   :  { %v17935_v57 = vpop.eup %16308  ;;  %16314 = vtanh.f32 %v2045_v15  ;;  %v2042_v50 = vadd.f32 %v2034_v16, %v17380_v13  ;;  %v2036_v47 = vmul.f32 %v17930_v43, %v2021_v36  ;;  %v2123_v17 = vmul.f32 %v17930_v43, %v2108_v59 }
 0xb23   :  { %v17939_v11 = vpop.eup %16310  ;;  %16316 = vtanh.f32 %v2041_v44  ;;  %v2043_v49 = vadd.f32 %v2035_v24, %v17389_v48  ;;  %v2038_v7 = vmul.f32 %v17935_v57, %v2022_v38  ;;  %v2110_v46 = vrot.slane %v17876_v40, 7 }
 0xb24   :  { %v17944_v21 = vpop.eup %16312  ;;  %v2039_v60 = vmul.f32 %v17939_v11, %v2023_v5  ;;  %v2125_v14 = vmul.f32 %v17935_v57, %v2109_v37  ;;  %16318 = vtanh.f32 %v2042_v50  ;;  %v2044_v36 = vadd.f32 %v2036_v47, %v17398_v58 }
 0xb25   :  { %v2040_v41 = vmul.f32 %v17944_v21, %v2024_v3  ;;  %v17953_v15 = vmul.f32 %v17944_v21, %v2111_v0  ;;  %16320 = vtanh.f32 %v2043_v49  ;;  %v2046_v59 = vadd.f32 %v2038_v7, %v17417_v27 }
 0xb26   :  { %v17957_v16 = vmul.f32 %v17939_v11, %v2110_v46  ;;  %16322 = vtanh.f32 %v2044_v36  ;;  %v2047_v40 = vadd.f32 %v2039_v60, %v17428_v39  ;;  %v2057_v7 = vsub.f32 1.0, %v17916_v56 }
 0xb27   :  { %v2048_v20 = vadd.f32 %v2040_v41, %v17438_v19  ;;  %16324 = vtanh.f32 %v2046_v59  ;;  %v2058_v46 = vsub.f32 1.0, %v17921_v2  ;;  %v2059_v59 = vsub.f32 1.0, %v17925_v9 }
 0xb29   :  { %16326 = vtanh.f32 %v2048_v20 }
 0xb2a   :  { %16328 = vtanh.f32 %v2047_v40 }
 0xb2c   :  { %v16315_v38 = vpop.eup %16314 }
 0xb2d   :  { %v16317_v37 = vpop.eup %16316  ;;  %2081 = vrot.lane.b32.xlu1 %v16315_v38, %s16741_s0 }
 0xb2e   :  { %2073 = vrot.lane.b32.xlu0 %v16317_v37, %s16741_s0  ;;  %v16319_v44 = vpop.eup %16318 }
 0xb2f   :  { %v16321_v24 = vpop.eup %16320 }
 0xb30   :  { %v16323_v3 = vpop.eup %16322 }
 0xb31   :  { %2075 = vrot.lane.b32.xlu1 %v16319_v44, %s16741_s0  ;;  %v16325_v50 = vpop.eup %16324  ;;  %v2060_v44 = vsub.f32 1.0, %v17930_v43 }
 0xb32   :  { %2077 = vrot.lane.b32.xlu0 %v16321_v24, %s16741_s0  ;;  %v2061_v24 = vsub.f32 1.0, %v17911_v32 }
 0xb33   :  { %v16327_v47 = vpop.eup %16326 }
 0xb34   :  { %v16329_v5 = vpop.eup %16328 }
 0xb35   :  { %2079 = vrot.lane.b32.xlu1 %v16323_v3, %s16741_s0 }
 0xb36   :  { %2083 = vrot.lane.b32.xlu0 %v16325_v50, %s16741_s0  ;;  %v2062_v50 = vsub.f32 1.0, %v17935_v57  ;;  %v2124_v57 = vmul.f32 %v17911_v32, %v1862_v10 }
 0xb39   :  { %2087 = vrot.lane.b32.xlu1 %v16327_v47, %s16741_s0 }
 0xb3a   :  { %2085 = vrot.lane.b32.xlu0 %v16329_v5, %s16741_s0 }
 0xb9f   :  { %v2082_v49 = vpop.permute.xlu1 %2081 }
 0xba0   :  { %v2074_v0 = vpop.permute.xlu0 %2073  ;;  %v2101_v5 = vmul.f32 %v2082_v49, %v2061_v24  ;;  %v2063_v49 = vsub.f32 1.0, %v17939_v11 }
 0xba1   :  { %v2097_v60 = vmul.f32 %v2074_v0, %v2057_v7 }
 0xba3   :  { %v17971_v41 = vadd.f32 %v2120_v45, %v2097_v60  ;;  %v2076_v36 = vpop.permute.xlu1 %2075 }
 0xba4   :  { %v2098_v20 = vmul.f32 %v2076_v36, %v2058_v46  ;;  %v2078_v40 = vpop.permute.xlu0 %2077 }
 0xba5   :  { %v2099_v38 = vmul.f32 %v2078_v40, %v2059_v59  ;;  %v2144_v2 = vrot.slane %v17971_v41, 4 }
 0xba6   :  { %v17974_v37 = vadd.f32 %v2121_v30, %v2098_v20 }
 0xba7   :  { %v17978_v3 = vadd.f32 %v2122_v53, %v2099_v38  ;;  %v2080_v56 = vpop.permute.xlu1 %2079  ;;  %v2064_v53 = vsub.f32 1.0, %v17944_v21  ;;  %v17996_v38 = vadd.f32 %v2124_v57, %v2101_v5 }
 0xba8   :  { %v2145_v45 = vrot.slane %v17974_v37, 3  ;;  %v2100_v47 = vmul.f32 %v2080_v56, %v2060_v44  ;;  %v2084_v9 = vpop.permute.xlu0 %2083 }
 0xba9   :  { %v2147_v7 = vrot.slane %v17978_v3, 2  ;;  %v2102_v30 = vmul.f32 %v2084_v9, %v2062_v50 }
 0xbaa   :  { %v2146_v0 = vsel %vm986_vm7, %v2145_v45, %v2144_v2  ;;  %v17985_v43 = vadd.f32 %v2123_v17, %v2100_v47 }
 0xbab   :  { %v2148_v60 = vsel %vm989_vm8, %v2147_v7, %v2146_v0  ;;  %v17992_v46 = vadd.f32 %v2125_v14, %v2102_v30  ;;  %v2088_v36 = vpop.permute.xlu1 %2087 }
 0xbac   :  { %v2149_v59 = vrot.slane %v17985_v43, 1  ;;  %v2104_v20 = vmul.f32 %v2088_v36, %v2064_v53  ;;  %v2086_v40 = vpop.permute.xlu0 %2085 }
 0xbad   :  { %v2103_v17 = vmul.f32 %v2086_v40, %v2063_v49  ;;  %v2152_v28 = vrot.slane %v17992_v46, 7 }
 0xbae   :  { %v2150_v21 = vsel %vm992_vm9, %v2149_v59, %v2148_v60  ;;  %v18001_v10 = vadd.f32 %v17953_v15, %v2104_v20 }
 0xbaf   :  { %v18004_v32 = vadd.f32 %v17957_v16, %v2103_v17  ;;  %v2151_v11 = vsel %vm995_vm10, %v17996_v38, %v2150_v21 }
 0xbb0   :  { %v2156_v44 = vrot.slane %v18001_v10, 5  ;;  %v2153_v24 = vsel %vm998_vm11, %v2152_v28, %v2151_v11 }
 0xbb1   :  { %v2154_v14 = vrot.slane %v18004_v32, 6 }
 0xbb3   :  { %v2155_v56 = vsel %vm1001_vm12, %v2154_v14, %v2153_v24 }
 0xbb4   :  { %v2157_v50 = vsel %vm1004_vm13, %v2156_v44, %v2155_v56 }
 0xbb5   :  { %2158 = vrot.lane.b32.xlu0 %v2157_v50, %s16741_s0 }
 0xc27   :  { %v2159_v15 = vpop.permute.xlu0 %2158 }
 0xc28   :  { %13407 = vmatmul.mubr.msk.f32.vlgmr.msra.gmra.mrb[14].mxu0 %vm726_vm14, %v2159_v15 }
 0xc29   :  { %15057 = vmatpush1.bf16.msra.mxu0 %v17155_v52  ;;  %2802 = vmatprep.mubr.f32.mxu0 %v16749_v35 }
 0xc2a   :  { %15059 = vmatprep.subr.bf16.mxu0 %v17165_v55 }
 0xc2d   :  { %15061 = vmatpush1.bf16.msra.mxu0 %v17176_v63 }
 0xc2e   :  { %15063 = vmatprep.subr.bf16.mxu0 %v17179_v29 }
 0xc31   :  { %15065 = vmatpush1.bf16.msra.mxu0 %v17186_v4 }
 0xc32   :  { %15067 = vmatprep.subr.bf16.mxu0 %v17225_v26 }
 0xc35   :  { %15069 = vmatpush1.bf16.msra.mxu0 %v17236_v34 }
 0xcfb   :  { %v2228_v16 = vpop.f32.mrb[14].mxu0 }
 0xcfc   :  { %v2229_v2 = vadd.f32 %v2228_v16, %v17289_v8  ;;  %v2230_v45 = vpop.f32.mrb[15].mxu0 }
 0xcfe   :  { %v2234_v47 = vrot.slane %v2229_v2, 3  ;;  %v2235_v52 = vrot.slane %v2229_v2, 4  ;;  %v2236_v9 = vrot.slane %v2229_v2, 5  ;;  %v2237_v35 = vrot.slane %v2229_v2, 6 }
 0xcff   :  { %v2238_v5 = vrot.slane %v2229_v2, 7  ;;  %v2239_v55 = vrot.slane %v2229_v2, 1  ;;  %v2240_v7 = vrot.slane %v2229_v2, 2  ;;  %v2254_v63 = vadd.f32 %v2229_v2, %v17334_v51 }
 0xd00   :  { %v2249_v29 = vadd.f32 %v2234_v47, %v17298_v12  ;;  %v2250_v4 = vadd.f32 %v2235_v52, %v17306_v62  ;;  %v2251_v26 = vadd.f32 %v2236_v9, %v17313_v23  ;;  %v2252_v34 = vadd.f32 %v2237_v35, %v17320_v33 }
 0xd01   :  { %v2253_v30 = vadd.f32 %v2238_v5, %v17327_v42  ;;  %v2255_v0 = vadd.f32 %v2239_v55, %v17347_v1  ;;  %v13413_v53 = vmul.f32 -1.442695, %v2254_v63  ;;  %v2256_v57 = vadd.f32 %v2240_v7, %v17361_v22 }
 0xd02   :  { %v13408_v60 = vmul.f32 -1.442695, %v2249_v29  ;;  %v13409_v36 = vmul.f32 -1.442695, %v2250_v4  ;;  %v13410_v49 = vmul.f32 -1.442695, %v2251_v26  ;;  %v2231_v7 = vadd.f32 %v2230_v45, %v17344_v61 }
 0xd03   :  { %v13411_v59 = vmul.f32 -1.442695, %v2252_v34  ;;  %16330 = vpow2.f32 %v13413_v53  ;;  %v13412_v20 = vmul.f32 -1.442695, %v2253_v30  ;;  %v13414_v40 = vmul.f32 -1.442695, %v2255_v0 }
 0xd04   :  { %16332 = vpow2.f32 %v13408_v60  ;;  %v13415_v17 = vmul.f32 -1.442695, %v2256_v57  ;;  %v2393_v29 = vrot.slane %v17971_v41, 7  ;;  %v2306_v4 = vrot.slane %v2231_v7, 3 }
 0xd05   :  { %16334 = vpow2.f32 %v13409_v36  ;;  %v2394_v34 = vrot.slane %v17974_v37, 7  ;;  %v2395_v30 = vrot.slane %v17978_v3, 7  ;;  %v2307_v0 = vrot.slane %v2231_v7, 4 }
 0xd06   :  { %16336 = vpow2.f32 %v13410_v49  ;;  %v2396_v45 = vrot.slane %v17985_v43, 7  ;;  %v2308_v36 = vrot.slane %v2231_v7, 5  ;;  %v2309_v3 = vrot.slane %v2231_v7, 6 }
 0xd07   :  { %16338 = vpow2.f32 %v13411_v59  ;;  %v2398_v59 = vrot.slane %v18004_v32, 7 }
 0xd08   :  { %16340 = vpow2.f32 %v13412_v20 }
 0xd09   :  { %16342 = vpow2.f32 %v13414_v40 }
 0xd0a   :  { %16344 = vpow2.f32 %v13415_v17 }
 0xd0d   :  { %v16331_v21 = vpop.eup %16330 }
 0xd0e   :  { %v16333_v11 = vpop.eup %16332  ;;  %v2286_v14 = vadd.f32 1.0, %v16331_v21  ;;  %v2310_v21 = vrot.slane %v2231_v7, 7 }
 0xd0f   :  { %v16335_v44 = vpop.eup %16334  ;;  %v2281_v24 = vadd.f32 1.0, %v16333_v11 }
 0xd10   :  { %v16337_v56 = vpop.eup %16336  ;;  %16346 = vrcp.f32 %v2286_v14  ;;  %v2282_v50 = vadd.f32 1.0, %v16335_v44 }
 0xd11   :  { %v16339_v15 = vpop.eup %16338  ;;  %16348 = vrcp.f32 %v2281_v24  ;;  %v2283_v16 = vadd.f32 1.0, %v16337_v56  ;;  %v2311_v24 = vrot.slane %v2231_v7, 1  ;;  %v2312_v56 = vrot.slane %v2231_v7, 2 }
 0xd12   :  { %v16341_v2 = vpop.eup %16340  ;;  %16350 = vrcp.f32 %v2282_v50  ;;  %v2284_v47 = vadd.f32 1.0, %v16339_v15 }
 0xd13   :  { %v16343_v52 = vpop.eup %16342  ;;  %16352 = vrcp.f32 %v2283_v16  ;;  %v2285_v9 = vadd.f32 1.0, %v16341_v2 }
 0xd14   :  { %v16345_v35 = vpop.eup %16344  ;;  %16354 = vrcp.f32 %v2284_v47  ;;  %v2287_v5 = vadd.f32 1.0, %v16343_v52  ;;  %v2397_v52 = vrot.slane %v17996_v38, 7 }
 0xd15   :  { %16356 = vrcp.f32 %v2285_v9  ;;  %v2288_v55 = vadd.f32 1.0, %v16345_v35 }
 0xd16   :  { %16358 = vrcp.f32 %v2287_v5  ;;  %v2399_v5 = vrot.slane %v18001_v10, 7 }
 0xd17   :  { %16360 = vrcp.f32 %v2288_v55 }
 0xd1a   :  { %v18035_v63 = vpop.eup %16346 }
 0xd1b   :  { %v18038_v26 = vpop.eup %16348  ;;  %v2326_v53 = vmul.f32 %v18035_v63, %v2231_v7 }
 0xd1c   :  { %v18043_v57 = vpop.eup %16350  ;;  %v2321_v60 = vmul.f32 %v18038_v26, %v2306_v4  ;;  %v18048_v49 = vmul.f32 %v18038_v26, %v2393_v29 }
 0xd1d   :  { %v18050_v41 = vpop.eup %16352  ;;  %v2322_v37 = vmul.f32 %v18043_v57, %v2307_v0  ;;  %v2409_v20 = vmul.f32 %v18043_v57, %v2394_v34 }
 0xd1e   :  { %v18055_v40 = vpop.eup %16354  ;;  %v2329_v17 = vadd.f32 %v2321_v60, %v17369_v25  ;;  %v2323_v43 = vmul.f32 %v18050_v41, %v2308_v36  ;;  %v18060_v11 = vmul.f32 %v18050_v41, %v2395_v30  ;;  %v2334_v30 = vadd.f32 %v2326_v53, %v17417_v27 }
 0xd1f   :  { %v18062_v14 = vpop.eup %16356  ;;  %v2330_v44 = vadd.f32 %v2322_v37, %v17380_v13  ;;  %v2324_v32 = vmul.f32 %v18055_v40, %v2309_v3  ;;  %v2411_v2 = vmul.f32 %v18055_v40, %v2396_v45 }
 0xd20   :  { %v18066_v50 = vpop.eup %16358  ;;  %16362 = vtanh.f32 %v2329_v17  ;;  %v2331_v15 = vadd.f32 %v2323_v43, %v17389_v48  ;;  %v2325_v16 = vmul.f32 %v18062_v14, %v2310_v21  ;;  %v2412_v29 = vmul.f32 %v18062_v14, %v2397_v52 }
 0xd21   :  { %v18071_v47 = vpop.eup %16360  ;;  %16364 = vtanh.f32 %v2330_v44  ;;  %v2332_v9 = vadd.f32 %v2324_v32, %v17398_v58  ;;  %v2327_v35 = vmul.f32 %v18066_v50, %v2311_v24  ;;  %v2414_v7 = vmul.f32 %v18066_v50, %v2398_v59 }
 0xd22   :  { %v2328_v55 = vmul.f32 %v18071_v47, %v2312_v56  ;;  %16366 = vtanh.f32 %v2331_v15  ;;  %v2333_v4 = vadd.f32 %v2325_v16, %v17407_v18  ;;  %v18082_v34 = vmul.f32 %v18071_v47, %v2399_v5 }
 0xd23   :  { %16368 = vtanh.f32 %v2332_v9  ;;  %v2335_v38 = vadd.f32 %v2327_v35, %v17428_v39  ;;  %v2345_v17 = vsub.f32 1.0, %v18038_v26  ;;  %v2346_v43 = vsub.f32 1.0, %v18043_v57 }
 0xd24   :  { %16370 = vtanh.f32 %v2333_v4  ;;  %v2336_v10 = vadd.f32 %v2328_v55, %v17438_v19  ;;  %v2347_v15 = vsub.f32 1.0, %v18050_v41  ;;  %v2348_v52 = vsub.f32 1.0, %v18055_v40 }
 0xd25   :  { %16372 = vtanh.f32 %v2335_v38 }
 0xd26   :  { %16374 = vtanh.f32 %v2334_v30 }
 0xd27   :  { %16376 = vtanh.f32 %v2336_v10 }
 0xd2a   :  { %v16363_v0 = vpop.eup %16362 }
 0xd2b   :  { %v16365_v45 = vpop.eup %16364  ;;  %2361 = vrot.lane.b32.xlu1 %v16363_v0, %s16741_s0 }
 0xd2c   :  { %2363 = vrot.lane.b32.xlu0 %v16365_v45, %s16741_s0  ;;  %v16367_v60 = vpop.eup %16366 }
 0xd2d   :  { %v16369_v36 = vpop.eup %16368 }
 0xd2e   :  { %v16371_v59 = vpop.eup %16370 }
 0xd2f   :  { %2365 = vrot.lane.b32.xlu1 %v16367_v60, %s16741_s0  ;;  %v16373_v37 = vpop.eup %16372 }
 0xd30   :  { %2367 = vrot.lane.b32.xlu0 %v16369_v36, %s16741_s0  ;;  %v16375_v53 = vpop.eup %16374 }
 0xd31   :  { %v16377_v3 = vpop.eup %16376 }
 0xd33   :  { %2369 = vrot.lane.b32.xlu1 %v16371_v59, %s16741_s0 }
 0xd34   :  { %2373 = vrot.lane.b32.xlu0 %v16373_v37, %s16741_s0 }
 0xd37   :  { %2371 = vrot.lane.b32.xlu1 %v16375_v53, %s16741_s0 }
 0xd38   :  { %2375 = vrot.lane.b32.xlu0 %v16377_v3, %s16741_s0 }
 0xd9d   :  { %v2362_v21 = vpop.permute.xlu1 %2361 }
 0xd9e   :  { %v2364_v44 = vpop.permute.xlu0 %2363  ;;  %v2385_v32 = vmul.f32 %v2362_v21, %v2345_v17  ;;  %v2413_v17 = vmul.f32 %v18035_v63, %v2152_v28 }
 0xd9f   :  { %v2386_v24 = vmul.f32 %v2364_v44, %v2346_v43 }
 0xda0   :  { %v18098_v56 = vadd.f32 %v18048_v49, %v2385_v32  ;;  %v2349_v49 = vsub.f32 1.0, %v18062_v14  ;;  %v2350_v14 = vsub.f32 1.0, %v18035_v63 }
 0xda1   :  { %v18101_v16 = vadd.f32 %v2409_v20, %v2386_v24  ;;  %v2366_v9 = vpop.permute.xlu1 %2365  ;;  %v2351_v20 = vsub.f32 1.0, %v18066_v50 }
 0xda2   :  { %v2432_v35 = vrot.slane %v18098_v56, 5  ;;  %v2368_v5 = vpop.permute.xlu0 %2367  ;;  %v2387_v26 = vmul.f32 %v2366_v9, %v2347_v15 }
 0xda3   :  { %v2433_v57 = vrot.slane %v18101_v16, 4  ;;  %v2388_v55 = vmul.f32 %v2368_v5, %v2348_v52 }
 0xda4   :  { %v18107_v4 = vadd.f32 %v18060_v11, %v2387_v26 }
 0xda5   :  { %v2434_v38 = vsel %vm986_vm7, %v2433_v57, %v2432_v35  ;;  %v18111_v41 = vadd.f32 %v2411_v2, %v2388_v55  ;;  %v2370_v40 = vpop.permute.xlu1 %2369  ;;  %v2352_v2 = vsub.f32 1.0, %v18071_v47 }
 0xda6   :  { %v2435_v30 = vrot.slane %v18107_v4, 3  ;;  %v2374_v10 = vpop.permute.xlu0 %2373  ;;  %v2389_v0 = vmul.f32 %v2370_v40, %v2349_v49 }
 0xda7   :  { %v2437_v45 = vrot.slane %v18111_v41, 2  ;;  %v2391_v60 = vmul.f32 %v2374_v10, %v2351_v20 }
 0xda8   :  { %v2436_v36 = vsel %vm989_vm8, %v2435_v30, %v2434_v38  ;;  %v18117_v11 = vadd.f32 %v2412_v29, %v2389_v0 }
 0xda9   :  { %v18120_v59 = vadd.f32 %v2414_v7, %v2391_v60  ;;  %v2372_v37 = vpop.permute.xlu1 %2371  ;;  %v2438_v50 = vsel %vm992_vm9, %v2437_v45, %v2436_v36 }
 0xdaa   :  { %v2439_v53 = vrot.slane %v18117_v11, 1  ;;  %v2376_v3 = vpop.permute.xlu0 %2375  ;;  %v2390_v43 = vmul.f32 %v2372_v37, %v2350_v14 }
 0xdab   :  { %v2392_v21 = vmul.f32 %v2376_v3, %v2352_v2  ;;  %v2442_v7 = vrot.slane %v18120_v59, 7 }
 0xdac   :  { %v18128_v29 = vadd.f32 %v2413_v17, %v2390_v43  ;;  %v2440_v44 = vsel %vm995_vm10, %v2439_v53, %v2438_v50 }
 0xdad   :  { %v18133_v47 = vadd.f32 %v18082_v34, %v2392_v21 }
 0xdae   :  { %v2441_v32 = vsel %vm998_vm11, %v18128_v29, %v2440_v44 }
 0xdaf   :  { %v2444_v24 = vrot.slane %v18133_v47, 6  ;;  %v2443_v46 = vsel %vm1001_vm12, %v2442_v7, %v2441_v32 }
 0xdb1   :  { %v2445_v28 = vsel %vm1004_vm13, %v2444_v24, %v2443_v46 }
 0xdb2   :  { %2446 = vrot.lane.b32.xlu1 %v2445_v28, %s16741_s0 }
 0xe24   :  { %v2447_v63 = vpop.permute.xlu1 %2446 }
 0xe25   :  { %13416 = vmatmul.mubr.msk.f32.vlgmr.msra.gmra.mrb[20].mxu1 %vm726_vm14, %v2447_v63 }
 0xef8   :  { %v2516_v15 = vpop.f32.mrb[20].mxu1 }
 0xef9   :  { %v2517_v34 = vadd.f32 %v2516_v15, %v17289_v8  ;;  %v2518_v52 = vpop.f32.mrb[21].mxu1 }
 0xefb   :  { %v2522_v9 = vrot.slane %v2517_v34, 2  ;;  %v2523_v35 = vrot.slane %v2517_v34, 3  ;;  %v2524_v5 = vrot.slane %v2517_v34, 4  ;;  %v2525_v26 = vrot.slane %v2517_v34, 5 }
 0xefc   :  { %v2526_v57 = vrot.slane %v2517_v34, 6  ;;  %v2527_v55 = vrot.slane %v2517_v34, 7  ;;  %v2528_v49 = vrot.slane %v2517_v34, 1  ;;  %v2543_v38 = vadd.f32 %v2517_v34, %v17347_v1 }
 0xefd   :  { %v2537_v20 = vadd.f32 %v2522_v9, %v17298_v12  ;;  %v2538_v40 = vadd.f32 %v2523_v35, %v17306_v62  ;;  %v2539_v30 = vadd.f32 %v2524_v5, %v17313_v23  ;;  %v2540_v10 = vadd.f32 %v2525_v26, %v17320_v33 }
 0xefe   :  { %v2541_v0 = vadd.f32 %v2526_v57, %v17327_v42  ;;  %v2542_v45 = vadd.f32 %v2527_v55, %v17334_v51  ;;  %v13423_v60 = vmul.f32 -1.442695, %v2543_v38  ;;  %v2544_v36 = vadd.f32 %v2528_v49, %v17361_v22 }
 0xeff   :  { %v13417_v14 = vmul.f32 -1.442695, %v2537_v20  ;;  %v13418_v2 = vmul.f32 -1.442695, %v2538_v40  ;;  %v13419_v37 = vmul.f32 -1.442695, %v2539_v30  ;;  %v2519_v49 = vadd.f32 %v2518_v52, %v17344_v61 }
 0xf00   :  { %v13420_v50 = vmul.f32 -1.442695, %v2540_v10  ;;  %16378 = vpow2.f32 %v13423_v60  ;;  %v13421_v53 = vmul.f32 -1.442695, %v2541_v0  ;;  %v13422_v3 = vmul.f32 -1.442695, %v2542_v45 }
 0xf01   :  { %16380 = vpow2.f32 %v13417_v14  ;;  %v13424_v17 = vmul.f32 -1.442695, %v2544_v36  ;;  %v2681_v20 = vrot.slane %v18098_v56, 7  ;;  %v2594_v40 = vrot.slane %v2519_v49, 2 }
 0xf02   :  { %16382 = vpow2.f32 %v13418_v2  ;;  %v2682_v10 = vrot.slane %v18101_v16, 7  ;;  %v2683_v0 = vrot.slane %v18107_v4, 7  ;;  %v2595_v45 = vrot.slane %v2519_v49, 3 }
 0xf03   :  { %16384 = vpow2.f32 %v13419_v37  ;;  %v2684_v52 = vrot.slane %v18111_v41, 7  ;;  %v2596_v2 = vrot.slane %v2519_v49, 4  ;;  %v2597_v4 = vrot.slane %v2519_v49, 5 }
 0xf04   :  { %16386 = vpow2.f32 %v13420_v50  ;;  %v2686_v50 = vrot.slane %v18128_v29, 7 }
 0xf05   :  { %16388 = vpow2.f32 %v13421_v53 }
 0xf06   :  { %16390 = vpow2.f32 %v13422_v3 }
 0xf07   :  { %16392 = vpow2.f32 %v13424_v17 }
 0xf0a   :  { %v16379_v43 = vpop.eup %16378 }
 0xf0b   :  { %v16381_v21 = vpop.eup %16380  ;;  %v2575_v44 = vadd.f32 1.0, %v16379_v43  ;;  %v2598_v43 = vrot.slane %v2519_v49, 6 }
 0xf0c   :  { %v16383_v32 = vpop.eup %16382  ;;  %v2569_v24 = vadd.f32 1.0, %v16381_v21 }
 0xf0d   :  { %v16385_v46 = vpop.eup %16384  ;;  %16394 = vrcp.f32 %v2575_v44  ;;  %v2570_v28 = vadd.f32 1.0, %v16383_v32 }
 0xf0e   :  { %v16387_v63 = vpop.eup %16386  ;;  %16396 = vrcp.f32 %v2569_v24  ;;  %v2571_v15 = vadd.f32 1.0, %v16385_v46  ;;  %v2599_v24 = vrot.slane %v2519_v49, 7  ;;  %v2600_v46 = vrot.slane %v2519_v49, 1 }
 0xf0f   :  { %v16389_v34 = vpop.eup %16388  ;;  %16398 = vrcp.f32 %v2570_v28  ;;  %v2572_v9 = vadd.f32 1.0, %v16387_v63 }
 0xf10   :  { %v16391_v35 = vpop.eup %16390  ;;  %16400 = vrcp.f32 %v2571_v15  ;;  %v2573_v5 = vadd.f32 1.0, %v16389_v34 }
 0xf11   :  { %v16393_v26 = vpop.eup %16392  ;;  %16402 = vrcp.f32 %v2572_v9  ;;  %v2574_v57 = vadd.f32 1.0, %v16391_v35  ;;  %v2685_v35 = vrot.slane %v18117_v11, 7 }
 0xf12   :  { %16404 = vrcp.f32 %v2573_v5  ;;  %v2576_v55 = vadd.f32 1.0, %v16393_v26 }
 0xf13   :  { %16406 = vrcp.f32 %v2574_v57  ;;  %v2687_v57 = vrot.slane %v18133_v47, 7 }
 0xf14   :  { %16408 = vrcp.f32 %v2576_v55 }
 0xf17   :  { %v18154_v38 = vpop.eup %16394 }
 0xf18   :  { %v18157_v30 = vpop.eup %16396  ;;  %v2615_v60 = vmul.f32 %v18154_v38, %v2519_v49 }
 0xf19   :  { %v18162_v36 = vpop.eup %16398  ;;  %v2609_v14 = vmul.f32 %v18157_v30, %v2594_v40  ;;  %v18167_v37 = vmul.f32 %v18157_v30, %v2681_v20 }
 0xf1a   :  { %v18169_v56 = vpop.eup %16400  ;;  %v2610_v16 = vmul.f32 %v18162_v36, %v2595_v45  ;;  %v2697_v53 = vmul.f32 %v18162_v36, %v2682_v10  ;;  %v2623_v47 = vadd.f32 %v2615_v60, %v17428_v39 }
 0xf1b   :  { %v18174_v3 = vpop.eup %16402  ;;  %v2617_v17 = vadd.f32 %v2609_v14, %v17369_v25  ;;  %v2611_v41 = vmul.f32 %v18169_v56, %v2596_v2  ;;  %v18179_v21 = vmul.f32 %v18169_v56, %v2683_v0 }
 0xf1c   :  { %v18181_v44 = vpop.eup %16404  ;;  %v2618_v32 = vadd.f32 %v2610_v16, %v17380_v13  ;;  %v2612_v29 = vmul.f32 %v18174_v3, %v2597_v4  ;;  %v2699_v34 = vmul.f32 %v18174_v3, %v2684_v52 }
 0xf1d   :  { %v18185_v28 = vpop.eup %16406  ;;  %16410 = vtanh.f32 %v2617_v17  ;;  %v2619_v63 = vadd.f32 %v2611_v41, %v17389_v48  ;;  %v2613_v15 = vmul.f32 %v18181_v44, %v2598_v43  ;;  %v2700_v20 = vmul.f32 %v18181_v44, %v2685_v35 }
 0xf1e   :  { %v18190_v9 = vpop.eup %16408  ;;  %16412 = vtanh.f32 %v2618_v32  ;;  %v2620_v5 = vadd.f32 %v2612_v29, %v17398_v58  ;;  %v2614_v26 = vmul.f32 %v18185_v28, %v2599_v24  ;;  %v2701_v49 = vmul.f32 %v18185_v28, %v2686_v50 }
 0xf1f   :  { %v2616_v55 = vmul.f32 %v18190_v9, %v2600_v46  ;;  %16414 = vtanh.f32 %v2619_v63  ;;  %v2621_v40 = vadd.f32 %v2613_v15, %v17407_v18  ;;  %v18201_v10 = vmul.f32 %v18190_v9, %v2687_v57 }
 0xf20   :  { %16416 = vtanh.f32 %v2620_v5  ;;  %v2622_v11 = vadd.f32 %v2614_v26, %v17417_v27  ;;  %v2633_v17 = vsub.f32 1.0, %v18157_v30  ;;  %v2634_v41 = vsub.f32 1.0, %v18162_v36 }
 0xf21   :  { %16418 = vtanh.f32 %v2621_v40  ;;  %v2624_v0 = vadd.f32 %v2616_v55, %v17438_v19  ;;  %v2635_v63 = vsub.f32 1.0, %v18169_v56  ;;  %v2636_v35 = vsub.f32 1.0, %v18174_v3 }
 0xf22   :  { %16420 = vtanh.f32 %v2622_v11 }
 0xf23   :  { %16422 = vtanh.f32 %v2624_v0 }
 0xf24   :  { %16424 = vtanh.f32 %v2623_v47 }
 0xf27   :  { %v16411_v45 = vpop.eup %16410 }
 0xf28   :  { %v16413_v52 = vpop.eup %16412  ;;  %2649 = vrot.lane.b32.xlu0 %v16411_v45, %s16741_s0 }
 0xf29   :  { %2651 = vrot.lane.b32.xlu1 %v16413_v52, %s16741_s0  ;;  %v16415_v14 = vpop.eup %16414 }
 0xf2a   :  { %v16417_v2 = vpop.eup %16416 }
 0xf2b   :  { %v16419_v50 = vpop.eup %16418 }
 0xf2c   :  { %2653 = vrot.lane.b32.xlu0 %v16415_v14, %s16741_s0  ;;  %v16421_v16 = vpop.eup %16420 }
 0xf2d   :  { %2655 = vrot.lane.b32.xlu1 %v16417_v2, %s16741_s0  ;;  %v16423_v60 = vpop.eup %16422 }
 0xf2e   :  { %v16425_v4 = vpop.eup %16424 }
 0xf30   :  { %2657 = vrot.lane.b32.xlu0 %v16419_v50, %s16741_s0 }
 0xf31   :  { %2659 = vrot.lane.b32.xlu1 %v16421_v16, %s16741_s0 }
 0xf34   :  { %2663 = vrot.lane.b32.xlu0 %v16423_v60, %s16741_s0 }
 0xf35   :  { %2661 = vrot.lane.b32.xlu1 %v16425_v4, %s16741_s0 }
 0xf9a   :  { %v2650_v43 = vpop.permute.xlu0 %2649 }
 0xf9b   :  { %v2652_v32 = vpop.permute.xlu1 %2651  ;;  %v2673_v29 = vmul.f32 %v2650_v43, %v2633_v17 }
 0xf9c   :  { %v2674_v24 = vmul.f32 %v2652_v32, %v2634_v41 }
 0xf9d   :  { %v18217_v46 = vadd.f32 %v18167_v37, %v2673_v29  ;;  %v2637_v37 = vsub.f32 1.0, %v18181_v44  ;;  %v2640_v44 = vsub.f32 1.0, %v18190_v9 }
 0xf9e   :  { %v18220_v15 = vadd.f32 %v2697_v53, %v2674_v24  ;;  %v2654_v5 = vpop.permute.xlu0 %2653  ;;  %v2638_v53 = vsub.f32 1.0, %v18185_v28 }
 0xf9f   :  { %v2720_v26 = vrot.slane %v18217_v46, 6  ;;  %v2656_v57 = vpop.permute.xlu1 %2655  ;;  %v2675_v30 = vmul.f32 %v2654_v5, %v2635_v63 }
 0xfa0   :  { %v2721_v36 = vrot.slane %v18220_v15, 5  ;;  %v2676_v55 = vmul.f32 %v2656_v57, %v2636_v35 }
 0xfa1   :  { %v18226_v40 = vadd.f32 %v18179_v21, %v2675_v30 }
 0xfa2   :  { %v2722_v11 = vsel %vm986_vm7, %v2721_v36, %v2720_v26  ;;  %v18230_v56 = vadd.f32 %v2699_v34, %v2676_v55  ;;  %v2658_v3 = vpop.permute.xlu0 %2657  ;;  %v2639_v34 = vsub.f32 1.0, %v18154_v38 }
 0xfa3   :  { %v2723_v0 = vrot.slane %v18226_v40, 4  ;;  %v2660_v47 = vpop.permute.xlu1 %2659  ;;  %v2677_v45 = vmul.f32 %v2658_v3, %v2637_v37 }
 0xfa4   :  { %v2725_v52 = vrot.slane %v18230_v56, 3  ;;  %v2678_v14 = vmul.f32 %v2660_v47, %v2638_v53 }
 0xfa5   :  { %v2724_v2 = vsel %vm989_vm8, %v2723_v0, %v2722_v11  ;;  %v18236_v21 = vadd.f32 %v2700_v20, %v2677_v45  ;;  %v2702_v20 = vmul.f32 %v18154_v38, %v2442_v7 }
 0xfa6   :  { %v18239_v50 = vadd.f32 %v2701_v49, %v2678_v14  ;;  %v2664_v16 = vpop.permute.xlu0 %2663  ;;  %v2726_v28 = vsel %vm992_vm9, %v2725_v52, %v2724_v2 }
 0xfa7   :  { %v2727_v60 = vrot.slane %v18236_v21, 2  ;;  %v2662_v4 = vpop.permute.xlu1 %2661  ;;  %v2680_v17 = vmul.f32 %v2664_v16, %v2640_v44 }
 0xfa8   :  { %v2729_v41 = vrot.slane %v18239_v50, 1  ;;  %v2679_v43 = vmul.f32 %v2662_v4, %v2639_v34 }
 0xfa9   :  { %v18249_v9 = vadd.f32 %v18201_v10, %v2680_v17  ;;  %v2728_v49 = vsel %vm995_vm10, %v2727_v60, %v2726_v28 }
 0xfaa   :  { %v18252_v32 = vadd.f32 %v2702_v20, %v2679_v43  ;;  %v2730_v29 = vsel %vm998_vm11, %v2729_v41, %v2728_v49 }
 0xfab   :  { %v2732_v24 = vrot.slane %v18249_v9, 7 }
 0xfac   :  { %v2731_v63 = vsel %vm1001_vm12, %v18252_v32, %v2730_v29 }
 0xfad   :  { %v2733_v59 = vsel %vm1004_vm13, %v2732_v24, %v2731_v63 }
 0xfae   :  { %2734 = vrot.lane.b32.xlu0 %v2733_v59, %s16741_s0 }
0x1020   :  { %v2735_v7 = vpop.permute.xlu0 %2734 }
0x1021   :  { %13425 = vmatmul.mubr.msk.f32.vlgmr.msra.gmra.mrb[16].mxu0 %vm726_vm14, %v2735_v7 }
0x10f4   :  { %v2804_v38 = vpop.f32.mrb[16].mxu0 }
0x10f5   :  { %v2805_v10 = vadd.f32 %v2804_v38, %v17289_v8  ;;  %v2806_v35 = vpop.f32.mrb[17].mxu0 }
0x10f6   :  { %v2807_v7 = vadd.f32 %v2806_v35, %v17344_v61  ;;  %v2972_v61 = vrot.slane %v18230_v56, 7 }
0x10f7   :  { %v2810_v5 = vrot.slane %v2805_v10, 1  ;;  %v2811_v26 = vrot.slane %v2805_v10, 2  ;;  %v2812_v57 = vrot.slane %v2805_v10, 3  ;;  %v2813_v30 = vrot.slane %v2805_v10, 4 }
0x10f8   :  { %v2814_v36 = vrot.slane %v2805_v10, 5  ;;  %v2815_v55 = vrot.slane %v2805_v10, 6  ;;  %v2816_v37 = vrot.slane %v2805_v10, 7  ;;  %v2832_v11 = vadd.f32 %v2805_v10, %v17361_v22 }
0x10f9   :  { %v2825_v53 = vadd.f32 %v2810_v5, %v17298_v12  ;;  %v2826_v3 = vadd.f32 %v2811_v26, %v17306_v62  ;;  %v2827_v0 = vadd.f32 %v2812_v57, %v17313_v23  ;;  %v2828_v47 = vadd.f32 %v2813_v30, %v17320_v33 }
0x10fa   :  { %v2829_v8 = vadd.f32 %v2814_v36, %v17327_v42  ;;  %v2830_v45 = vadd.f32 %v2815_v55, %v17334_v51  ;;  %v13433_v52 = vmul.f32 -1.442695, %v2832_v11  ;;  %v2831_v14 = vadd.f32 %v2816_v37, %v17347_v1 }
0x10fb   :  { %v13426_v2 = vmul.f32 -1.442695, %v2825_v53  ;;  %v13427_v44 = vmul.f32 -1.442695, %v2826_v3  ;;  %v13428_v34 = vmul.f32 -1.442695, %v2827_v0 }
0x10fc   :  { %v13429_v16 = vmul.f32 -1.442695, %v2828_v47  ;;  %16426 = vpow2.f32 %v13433_v52  ;;  %v13430_v12 = vmul.f32 -1.442695, %v2829_v8  ;;  %v13431_v62 = vmul.f32 -1.442695, %v2830_v45 }
0x10fd   :  { %16428 = vpow2.f32 %v13426_v2  ;;  %v13432_v23 = vmul.f32 -1.442695, %v2831_v14  ;;  %v2969_v10 = vrot.slane %v18217_v46, 7  ;;  %v2882_v5 = vrot.slane %v2807_v7, 1 }
0x10fe   :  { %16430 = vpow2.f32 %v13427_v44  ;;  %v2970_v57 = vrot.slane %v18220_v15, 7  ;;  %v2971_v30 = vrot.slane %v18226_v40, 7  ;;  %v2883_v36 = vrot.slane %v2807_v7, 2 }
0x10ff   :  { %16432 = vpow2.f32 %v13428_v34  ;;  %v2884_v11 = vrot.slane %v2807_v7, 3  ;;  %v2974_v3 = vrot.slane %v18239_v50, 7  ;;  %v2885_v40 = vrot.slane %v2807_v7, 4 }
0x1100   :  { %16434 = vpow2.f32 %v13429_v16  ;;  %v2886_v45 = vrot.slane %v2807_v7, 5  ;;  %v2887_v44 = vrot.slane %v2807_v7, 6  ;;  %v2888_v34 = vrot.slane %v2807_v7, 7 }
0x1101   :  { %16436 = vpow2.f32 %v13430_v12 }
0x1102   :  { %16438 = vpow2.f32 %v13431_v62 }
0x1103   :  { %16440 = vpow2.f32 %v13432_v23 }
0x1106   :  { %v16427_v33 = vpop.eup %16426 }
0x1107   :  { %v16429_v42 = vpop.eup %16428  ;;  %v2864_v51 = vadd.f32 1.0, %v16427_v33  ;;  %v2973_v33 = vrot.slane %v18236_v21, 7 }
0x1108   :  { %v16431_v22 = vpop.eup %16430  ;;  %v2857_v1 = vadd.f32 1.0, %v16429_v42 }
0x1109   :  { %v16433_v28 = vpop.eup %16432  ;;  %16442 = vrcp.f32 %v2864_v51  ;;  %v2858_v60 = vadd.f32 1.0, %v16431_v22  ;;  %v2975_v51 = vrot.slane %v18252_v32, 7 }
0x110a   :  { %v16435_v4 = vpop.eup %16434  ;;  %16444 = vrcp.f32 %v2857_v1  ;;  %v2859_v17 = vadd.f32 1.0, %v16433_v28 }
0x110b   :  { %v16437_v41 = vpop.eup %16436  ;;  %16446 = vrcp.f32 %v2858_v60  ;;  %v2860_v20 = vadd.f32 1.0, %v16435_v4 }
0x110c   :  { %v16439_v43 = vpop.eup %16438  ;;  %16448 = vrcp.f32 %v2859_v17  ;;  %v2861_v49 = vadd.f32 1.0, %v16437_v41 }
0x110d   :  { %v16441_v29 = vpop.eup %16440  ;;  %16450 = vrcp.f32 %v2860_v20  ;;  %v2862_v63 = vadd.f32 1.0, %v16439_v43  ;;  %v3030_v20 = vld [vmem:[#allocation10] sm:$0xff]  ;;  %v3031_v43 = vld [vmem:[#allocation10 + $0x8] sm:$0xff] }
0x110e   :  { %16452 = vrcp.f32 %v2861_v49  ;;  %v2863_v59 = vadd.f32 1.0, %v16441_v29 }
0x110f   :  { %16454 = vrcp.f32 %v2862_v63  ;;  %v3039_v63 = vld [vmem:[#allocation10 + $0x48] sm:$0xff] }
0x1110   :  { %16456 = vrcp.f32 %v2863_v59  ;;  %v3046_v59 = vld [vmem:[#allocation10 + $0x80] sm:$0xff] }
0x1113   :  { %v18273_v38 = vpop.eup %16442 }
0x1114   :  { %v18276_v26 = vpop.eup %16444  ;;  %v2904_v55 = vmul.f32 %v18273_v38, %v2807_v7  ;;  %v3054_v7 = vld [vmem:[#allocation10 + $0xc0] sm:$0xff] }
0x1115   :  { %v18281_v37 = vpop.eup %16446  ;;  %v2897_v35 = vmul.f32 %v18276_v26, %v2882_v5  ;;  %v18286_v53 = vmul.f32 %v18276_v26, %v2969_v10  ;;  %v13436_v10 = vcombine.low %v3031_v43, %v3039_v63  ;;  %v13437_v5 = vcombine.high %v3031_v43, %v3039_v63  ;;  %v3134_v63 = vld [vmem:[#allocation10 + $0x340] sm:$0xff] }
0x1116   :  { %v18288_v46 = vpop.eup %16448  ;;  %v2898_v15 = vmul.f32 %v18281_v37, %v2883_v36  ;;  %v18293_v0 = vmul.f32 %v18281_v37, %v2970_v57  ;;  %v2912_v60 = vadd.f32 %v2904_v55, %v17438_v19  ;;  %v13451_v57 = vcombine.high %v3046_v59, %v3054_v7  ;;  %v3055_v36 = vld [vmem:[#allocation10 + $0xc8] sm:$0xff]  ;;  %v3062_v55 = vld [vmem:[#allocation10 + $0x100] sm:$0xff] }
0x1117   :  { %v18295_v47 = vpop.eup %16450  ;;  %v2905_v56 = vadd.f32 %v2897_v35, %v17369_v25  ;;  %v2899_v8 = vmul.f32 %v18288_v46, %v2884_v11  ;;  %v18300_v52 = vmul.f32 %v18288_v46, %v2971_v30  ;;  %v3047_v30 = vld [vmem:[#allocation10 + $0x88] sm:$0xff]  ;;  %v3070_v35 = vld [vmem:[#allocation10 + $0x140] sm:$0xff]  ;;  %4022 = vmatprep.subr.bf16.mxu0 %v13437_v5 }
0x1118   :  { %v18302_v14 = vpop.eup %16452  ;;  %v2906_v50 = vadd.f32 %v2898_v15, %v17380_v13  ;;  %v2900_v2 = vmul.f32 %v18295_v47, %v2885_v40  ;;  %v18311_v62 = vmul.f32 %v18295_v47, %v2972_v61  ;;  %v13453_v61 = vcombine.high %v3047_v30, %v3055_v36  ;;  %v3063_v11 = vld [vmem:[#allocation10 + $0x108] sm:$0xff]  ;;  %4023 = vmatpush1.bf16.msra.mxu0 %v13436_v10 }
0x1119   :  { %v18306_v16 = vpop.eup %16454  ;;  %16458 = vtanh.f32 %v2905_v56  ;;  %v2907_v12 = vadd.f32 %v2899_v8, %v17389_v48  ;;  %v2901_v25 = vmul.f32 %v18302_v14, %v2886_v45  ;;  %v18324_v1 = vmul.f32 %v18302_v14, %v2973_v33 }
0x111a   :  { %v18313_v23 = vpop.eup %16456  ;;  %16460 = vtanh.f32 %v2906_v50  ;;  %v2908_v13 = vadd.f32 %v2900_v2, %v17398_v58  ;;  %v2902_v42 = vmul.f32 %v18306_v16, %v2887_v44  ;;  %v18321_v48 = vmul.f32 %v18306_v16, %v2974_v3  ;;  %v3071_v3 = vld [vmem:[#allocation10 + $0x148] sm:$0xff]  ;;  %v3078_v2 = vld [vmem:[#allocation10 + $0x180] sm:$0xff]  ;;  %4024 = vmatprep.subr.bf16.mxu0 %v13453_v61 }
0x111b   :  { %v2903_v22 = vmul.f32 %v18313_v23, %v2888_v34  ;;  %16462 = vtanh.f32 %v2907_v12  ;;  %v2909_v28 = vadd.f32 %v2901_v25, %v17407_v18  ;;  %v18328_v21 = vmul.f32 %v18313_v23, %v2975_v51  ;;  %v3086_v44 = vld [vmem:[#allocation10 + $0x1c0] sm:$0xff]  ;;  %v3079_v34 = vld [vmem:[#allocation10 + $0x188] sm:$0xff] }
0x111c   :  { %16464 = vtanh.f32 %v2908_v13  ;;  %v2910_v58 = vadd.f32 %v2902_v42, %v17417_v27  ;;  %v13450_v40 = vcombine.low %v3046_v59, %v3054_v7  ;;  %v13452_v8 = vcombine.low %v3047_v30, %v3055_v36  ;;  %v3087_v12 = vld [vmem:[#allocation10 + $0x1c8] sm:$0xff]  ;;  %v3094_v51 = vld [vmem:[#allocation10 + $0x200] sm:$0xff] }
0x111d   :  { %16466 = vtanh.f32 %v2909_v28  ;;  %v2911_v32 = vadd.f32 %v2903_v22, %v17428_v39  ;;  %v3038_v39 = vld [vmem:[#allocation10 + $0x40] sm:$0xff]  ;;  %v13467_v45 = vcombine.high %v3062_v55, %v3070_v35  ;;  %v13469_v50 = vcombine.high %v3063_v11, %v3071_v3  ;;  %v3095_v28 = vld [vmem:[#allocation10 + $0x208] sm:$0xff] }
0x111e   :  { %16468 = vtanh.f32 %v2910_v58  ;;  %v13434_v19 = vcombine.low %v3030_v20, %v3038_v39  ;;  %v13435_v29 = vcombine.high %v3030_v20, %v3038_v39  ;;  %v13466_v25 = vcombine.low %v3062_v55, %v3070_v35  ;;  %4025 = vmatpush1.bf16.msra.mxu0 %v13452_v8  ;;  %v3102_v22 = vld [vmem:[#allocation10 + $0x240] sm:$0xff]  ;;  %v3103_v58 = vld [vmem:[#allocation10 + $0x248] sm:$0xff] }
0x111f   :  { %16470 = vtanh.f32 %v2911_v32  ;;  %v13468_v33 = vcombine.low %v3063_v11, %v3071_v3  ;;  %v13483_v13 = vcombine.high %v3078_v2, %v3086_v44  ;;  %4026 = vmatprep.subr.bf16.mxu0 %v13469_v50  ;;  %v13485_v42 = vcombine.high %v3079_v34, %v3087_v12  ;;  %v3119_v20 = vld [vmem:[#allocation10 + $0x2c8] sm:$0xff]  ;;  %v3142_v36 = vld [vmem:[#allocation10 + $0x380] sm:$0xff] }
0x1120   :  { %16472 = vtanh.f32 %v2912_v60  ;;  %3981 = vmatprep.subr.bf16.mxu1 %v13435_v29  ;;  %v13482_v32 = vcombine.low %v3078_v2, %v3086_v44  ;;  %v13484_v60 = vcombine.low %v3079_v34, %v3087_v12  ;;  %v13498_v39 = vcombine.low %v3094_v51, %v3102_v22  ;;  %v3126_v29 = vld [vmem:[#allocation10 + $0x300] sm:$0xff]  ;;  %v3127_v59 = vld [vmem:[#allocation10 + $0x308] sm:$0xff] }
0x1121   :  { %3982 = vmatpush1.bf16.msra.mxu1 %v13434_v19  ;;  %v13500_v43 = vcombine.low %v3095_v28, %v3103_v58  ;;  %v3135_v7 = vld [vmem:[#allocation10 + $0x348] sm:$0xff]  ;;  %v3150_v55 = vld [vmem:[#allocation10 + $0x3c0] sm:$0xff]  ;;  %v13530_v11 = vcombine.low %v3126_v29, %v3134_v63 }
0x1122   :  { %3983 = vmatprep.subr.bf16.mxu1 %v13451_v57  ;;  %4027 = vmatpush1.bf16.msra.mxu0 %v13468_v33  ;;  %v13531_v57 = vcombine.high %v3126_v29, %v3134_v63  ;;  %v13533_v30 = vcombine.high %v3127_v59, %v3135_v7  ;;  %v3143_v61 = vld [vmem:[#allocation10 + $0x388] sm:$0xff]  ;;  %v13532_v3 = vcombine.low %v3127_v59, %v3135_v7  ;;  %v3166_v8 = vld [vmem:[#allocation10 + $0x440] sm:$0xff]  ;;  %v2928_v7 = vsub.f32 1.0, %v18273_v38 }
0x1123   :  { %v16459_v4 = vpop.eup %16458  ;;  %4028 = vmatprep.subr.bf16.mxu0 %v13485_v42  ;;  %v3151_v35 = vld [vmem:[#allocation10 + $0x3c8] sm:$0xff]  ;;  %v13546_v2 = vcombine.low %v3142_v36, %v3150_v55  ;;  %v2922_v42 = vsub.f32 1.0, %v18281_v37 }
0x1124   :  { %v16461_v17 = vpop.eup %16460  ;;  %2937 = vrot.lane.b32.xlu1 %v16459_v4, %s16741_s0  ;;  %v13499_v4 = vcombine.high %v3094_v51, %v3102_v22  ;;  %v3167_v50 = vld [vmem:[#allocation10 + $0x448] sm:$0xff]  ;;  %v13548_v44 = vcombine.low %v3143_v61, %v3151_v35 }
0x1125   :  { %2939 = vrot.lane.b32.xlu0 %v16461_v17, %s16741_s0  ;;  %v16463_v18 = vpop.eup %16462  ;;  %3984 = vmatpush1.bf16.msra.mxu1 %v13450_v40  ;;  %v13501_v17 = vcombine.high %v3095_v28, %v3103_v58  ;;  %v13549_v40 = vcombine.high %v3143_v61, %v3151_v35 }
0x1126   :  { %v16465_v41 = vpop.eup %16464  ;;  %3985 = vmatprep.subr.bf16.mxu1 %v13467_v45  ;;  %4029 = vmatpush1.bf16.msra.mxu0 %v13484_v60  ;;  %v3159_v45 = vld [vmem:[#allocation10 + $0x408] sm:$0xff]  ;;  %v2923_v60 = vsub.f32 1.0, %v18288_v46  ;;  %v2926_v46 = vsub.f32 1.0, %v18306_v16  ;;  %v3041_v16 = vld [vmem:[#allocation10 + $0x58] sm:$0xff] }
0x1127   :  { %v16467_v27 = vpop.eup %16466  ;;  %4030 = vmatprep.subr.bf16.mxu0 %v13501_v17  ;;  %v13565_v12 = vcombine.high %v3159_v45, %v3167_v50  ;;  %v13564_v33 = vcombine.low %v3159_v45, %v3167_v50  ;;  %v2924_v17 = vsub.f32 1.0, %v18295_v47 }
0x1128   :  { %2941 = vrot.lane.b32.xlu1 %v16463_v18, %s16741_s0  ;;  %v16469_v49 = vpop.eup %16468  ;;  %v3110_v18 = vld [vmem:[#allocation10 + $0x280] sm:$0xff] }
0x1129   :  { %2943 = vrot.lane.b32.xlu0 %v16465_v41, %s16741_s0  ;;  %v16471_v15 = vpop.eup %16470  ;;  %3986 = vmatpush1.bf16.msra.mxu1 %v13466_v25  ;;  %v3118_v41 = vld [vmem:[#allocation10 + $0x2c0] sm:$0xff] }
0x112a   :  { %v16473_v56 = vpop.eup %16472  ;;  %3987 = vmatprep.subr.bf16.mxu1 %v13483_v13  ;;  %v13514_v10 = vcombine.low %v3110_v18, %v3118_v41  ;;  %4031 = vmatpush1.bf16.msra.mxu0 %v13500_v43  ;;  %v2921_v13 = vsub.f32 1.0, %v18276_v26  ;;  %v2925_v43 = vsub.f32 1.0, %v18302_v14 }
0x112c   :  { %2945 = vrot.lane.b32.xlu1 %v16467_v27, %s16741_s0  ;;  %v3111_v27 = vld [vmem:[#allocation10 + $0x288] sm:$0xff] }
0x112d   :  { %2947 = vrot.lane.b32.xlu0 %v16469_v49, %s16741_s0  ;;  %3988 = vmatpush1.bf16.msra.mxu1 %v13482_v32  ;;  %v13515_v49 = vcombine.high %v3110_v18, %v3118_v41  ;;  %v13517_v19 = vcombine.high %v3111_v27, %v3119_v20  ;;  %v13516_v5 = vcombine.low %v3111_v27, %v3119_v20 }
0x112e   :  { %3989 = vmatprep.subr.bf16.mxu1 %v13499_v4 }
0x112f   :  { %4032 = vmatprep.subr.bf16.mxu0 %v13517_v19 }
0x1130   :  { %2949 = vrot.lane.b32.xlu1 %v16471_v15, %s16741_s0  ;;  %4033 = vmatpush1.bf16.msra.mxu0 %v13516_v5  ;;  %v13547_v15 = vcombine.high %v3142_v36, %v3150_v55  ;;  %v3032_v5 = vld [vmem:[#allocation10 + $0x10] sm:$0xff] }
0x1131   :  { %2951 = vrot.lane.b32.xlu0 %v16473_v56, %s16741_s0  ;;  %3990 = vmatpush1.bf16.msra.mxu1 %v13498_v39  ;;  %v3158_v56 = vld [vmem:[#allocation10 + $0x400] sm:$0xff] }
0x1132   :  { %3991 = vmatprep.subr.bf16.mxu1 %v13515_v49  ;;  %4034 = vmatprep.subr.bf16.mxu0 %v13533_v30  ;;  %v13563_v34 = vcombine.high %v3158_v56, %v3166_v8  ;;  %v13562_v25 = vcombine.low %v3158_v56, %v3166_v8 }
0x1134   :  { %4035 = vmatpush1.bf16.msra.mxu0 %v13532_v3 }
0x1135   :  { %3992 = vmatpush1.bf16.msra.mxu1 %v13514_v10  ;;  %4036 = vmatprep.subr.bf16.mxu0 %v13549_v40  ;;  %v2927_v10 = vsub.f32 1.0, %v18313_v23 }
0x1136   :  { %3993 = vmatprep.subr.bf16.mxu1 %v13531_v57  ;;  %v3033_v57 = vld [vmem:[#allocation10 + $0x18] sm:$0xff] }
0x1137   :  { %v13441_v3 = vcombine.high %v3033_v57, %v3041_v16 }
0x1138   :  { %4037 = vmatpush1.bf16.msra.mxu0 %v13548_v44 }
0x1139   :  { %3994 = vmatpush1.bf16.msra.mxu1 %v13530_v11  ;;  %4038 = vmatprep.subr.bf16.mxu0 %v13565_v12  ;;  %v13440_v11 = vcombine.low %v3033_v57, %v3041_v16  ;;  %v3113_v57 = vld [vmem:[#allocation10 + $0x298] sm:$0xff] }
0x113a   :  { %3995 = vmatprep.subr.bf16.mxu1 %v13547_v15 }
0x113c   :  { %4039 = vmatpush1.bf16.msra.mxu0 %v13564_v33  ;;  %v3048_v33 = vld [vmem:[#allocation10 + $0x90] sm:$0xff] }
0x113d   :  { %3996 = vmatpush1.bf16.msra.mxu1 %v13546_v2  ;;  %4104 = vmatprep.subr.bf16.mxu0 %v13441_v3 }
0x113e   :  { %3997 = vmatprep.subr.bf16.mxu1 %v13563_v34 }
0x1141   :  { %3998 = vmatpush1.bf16.msra.mxu1 %v13562_v25  ;;  %v3000_v25 = vld [vmem:[#allocation2] sm:$0xff] }
0x1196   :  { %v2938_v51 = vpop.permute.xlu1 %2937 }
0x1197   :  { %v2940_v22 = vpop.permute.xlu0 %2939  ;;  %v2961_v28 = vmul.f32 %v2938_v51, %v2921_v13  ;;  %v3056_v13 = vld [vmem:[#allocation10 + $0xd0] sm:$0xff]  ;;  %v3057_v51 = vld [vmem:[#allocation10 + $0xd8] sm:$0xff] }
0x1198   :  { %v2962_v58 = vmul.f32 %v2940_v22, %v2922_v42  ;;  %v3049_v42 = vld [vmem:[#allocation10 + $0x98] sm:$0xff] }
0x1199   :  { %v2992_v32 = vadd.f32 %v18286_v53, %v2961_v28  ;;  %v13455_v28 = vcombine.high %v3048_v33, %v3056_v13 }
0x119a   :  { %v2993_v4 = vadd.f32 %v18293_v0, %v2962_v58  ;;  %v2942_v18 = vpop.permute.xlu1 %2941  ;;  %v13457_v58 = vcombine.high %v3049_v42, %v3057_v51 }
0x119b   :  { %v3009_v41 = vrot.slane %v2992_v32, 7  ;;  %v2944_v27 = vpop.permute.xlu0 %2943  ;;  %v2963_v20 = vmul.f32 %v2942_v18, %v2923_v60  ;;  %v3072_v32 = vld [vmem:[#allocation10 + $0x150] sm:$0xff]  ;;  %v3065_v60 = vld [vmem:[#allocation10 + $0x118] sm:$0xff]  ;;  %v13456_v18 = vcombine.low %v3049_v42, %v3057_v51 }
0x119c   :  { %v3010_v39 = vrot.slane %v2993_v4, 6  ;;  %v2964_v26 = vmul.f32 %v2944_v27, %v2924_v17  ;;  %v3073_v4 = vld [vmem:[#allocation10 + $0x158] sm:$0xff]  ;;  %v13454_v17 = vcombine.low %v3048_v33, %v3056_v13 }
0x119d   :  { %v2994_v37 = vadd.f32 %v18300_v52, %v2963_v20  ;;  %v3040_v52 = vld [vmem:[#allocation10 + $0x50] sm:$0xff]  ;;  %v13473_v27 = vcombine.high %v3065_v60, %v3073_v4  ;;  %v3169_v33 = vld [vmem:[#allocation10 + $0x458] sm:$0xff] }
0x119e   :  { %v3011_v49 = vsel %vm986_vm7, %v3010_v39, %v3009_v41  ;;  %v2995_v53 = vadd.f32 %v18311_v62, %v2964_v26  ;;  %v2946_v19 = vpop.permute.xlu1 %2945  ;;  %v13438_v62 = vcombine.low %v3032_v5, %v3040_v52  ;;  %v13439_v36 = vcombine.high %v3032_v5, %v3040_v52  ;;  %v3080_v20 = vld [vmem:[#allocation10 + $0x190] sm:$0xff]  ;;  %v3081_v26 = vld [vmem:[#allocation10 + $0x198] sm:$0xff] }
0x119f   :  { %v3012_v0 = vrot.slane %v2994_v37, 5  ;;  %v2948_v29 = vpop.permute.xlu0 %2947  ;;  %v2965_v47 = vmul.f32 %v2946_v19, %v2925_v43  ;;  %v3088_v39 = vld [vmem:[#allocation10 + $0x1d0] sm:$0xff]  ;;  %v3089_v37 = vld [vmem:[#allocation10 + $0x1d8] sm:$0xff] }
0x11a0   :  { %v3014_v63 = vrot.slane %v2995_v53, 4  ;;  %v2966_v59 = vmul.f32 %v2948_v29, %v2926_v46  ;;  %4063 = vmatprep.subr.bf16.mxu1 %v13439_v36  ;;  %v13487_v53 = vcombine.high %v3080_v20, %v3088_v39  ;;  %v13489_v46 = vcombine.high %v3081_v26, %v3089_v37  ;;  %v3096_v19 = vld [vmem:[#allocation10 + $0x210] sm:$0xff]  ;;  %v3097_v29 = vld [vmem:[#allocation10 + $0x218] sm:$0xff] }
0x11a1   :  { %v3013_v14 = vsel %vm989_vm8, %v3012_v0, %v3011_v49  ;;  %v2996_v30 = vadd.f32 %v18324_v1, %v2965_v47  ;;  %v13472_v49 = vcombine.low %v3065_v60, %v3073_v4  ;;  %v3104_v0 = vld [vmem:[#allocation10 + $0x250] sm:$0xff]  ;;  %v3105_v47 = vld [vmem:[#allocation10 + $0x258] sm:$0xff] }
0x11a2   :  { %v2997_v55 = vadd.f32 %v18321_v48, %v2966_v59  ;;  %v2950_v61 = vpop.permute.xlu1 %2949  ;;  %v3015_v35 = vsel %vm992_vm9, %v3014_v63, %v3013_v14  ;;  %v2991_v48 = vmul.f32 %v18273_v38, %v2732_v24  ;;  %v3064_v38 = vld [vmem:[#allocation10 + $0x110] sm:$0xff]  ;;  %v13486_v63 = vcombine.low %v3080_v20, %v3088_v39  ;;  %v3121_v14 = vld [vmem:[#allocation10 + $0x2d8] sm:$0xff]  ;;  %v3059_v20 = vld [vmem:[#allocation10 + $0xe8] sm:$0xff] }
0x11a3   :  { %v3016_v15 = vrot.slane %v2996_v30, 3  ;;  %v2952_v40 = vpop.permute.xlu0 %2951  ;;  %v2967_v23 = vmul.f32 %v2950_v61, %v2927_v10  ;;  %v13471_v41 = vcombine.high %v3064_v38, %v3072_v32  ;;  %v13470_v43 = vcombine.low %v3064_v38, %v3072_v32  ;;  %v3112_v5 = vld [vmem:[#allocation10 + $0x290] sm:$0xff]  ;;  %v3042_v38 = vld [vmem:[#allocation10 + $0x60] sm:$0xff] }
0x11a4   :  { %v3018_v56 = vrot.slane %v2997_v55, 2  ;;  %v2968_v8 = vmul.f32 %v2952_v40, %v2928_v7  ;;  %v13488_v59 = vcombine.low %v3081_v26, %v3089_v37  ;;  %v13503_v7 = vcombine.high %v3096_v19, %v3104_v0  ;;  %v3120_v52 = vld [vmem:[#allocation10 + $0x2d0] sm:$0xff] }
0x11a5   :  { %v2998_v45 = vadd.f32 %v18328_v21, %v2967_v23  ;;  %v3017_v1 = vsel %vm995_vm10, %v3016_v15, %v3015_v35  ;;  %v13505_v10 = vcombine.high %v3097_v29, %v3105_v47  ;;  %v13502_v30 = vcombine.low %v3096_v19, %v3104_v0  ;;  %v3128_v55 = vld [vmem:[#allocation10 + $0x310] sm:$0xff]  ;;  %v3129_v35 = vld [vmem:[#allocation10 + $0x318] sm:$0xff]  ;;  %v3075_v19 = vld [vmem:[#allocation10 + $0x168] sm:$0xff] }
0x11a6   :  { %v3019_v50 = vsel %vm998_vm11, %v3018_v56, %v3017_v1  ;;  %v2999_v44 = vadd.f32 %v2991_v48, %v2968_v8  ;;  %v13519_v36 = vcombine.high %v3112_v5, %v3120_v52  ;;  %v13521_v16 = vcombine.high %v3113_v57, %v3121_v14  ;;  %v3136_v61 = vld [vmem:[#allocation10 + $0x350] sm:$0xff]  ;;  %v3153_v1 = vld [vmem:[#allocation10 + $0x3d8] sm:$0xff] }
0x11a7   :  { %v3020_v2 = vrot.slane %v2998_v45, 1  ;;  %v13518_v3 = vcombine.low %v3112_v5, %v3120_v52  ;;  %v13520_v15 = vcombine.low %v3113_v57, %v3121_v14  ;;  %v13535_v40 = vcombine.high %v3128_v55, %v3136_v61  ;;  %v3144_v56 = vld [vmem:[#allocation10 + $0x390] sm:$0xff]  ;;  %v3145_v45 = vld [vmem:[#allocation10 + $0x398] sm:$0xff]  ;;  %v3091_v5 = vld [vmem:[#allocation10 + $0x1e8] sm:$0xff] }
0x11a8   :  { %v3152_v8 = vld [vmem:[#allocation10 + $0x3d0] sm:$0xff]  ;;  %v13534_v48 = vcombine.low %v3128_v55, %v3136_v61  ;;  %v13552_v13 = vcombine.low %v3145_v45, %v3153_v1  ;;  %v3107_v55 = vld [vmem:[#allocation10 + $0x268] sm:$0xff] }
0x11a9   :  { %v3021_v34 = vsel %vm1001_vm12, %v3020_v2, %v3019_v50  ;;  %v13551_v2 = vcombine.high %v3144_v56, %v3152_v8 }
0x11aa   :  { %v3022_v12 = vsel %vm1004_vm13, %v2999_v44, %v3021_v34  ;;  %v13553_v44 = vcombine.high %v3145_v45, %v3153_v1  ;;  %v3160_v34 = vld [vmem:[#allocation10 + $0x410] sm:$0xff] }
0x11ab   :  { %3023 = vrot.lane.b32.xlu1 %v3022_v12, %s16735_s27  ;;  %v3168_v12 = vld [vmem:[#allocation10 + $0x450] sm:$0xff] }
0x11ac   :  { %v13567_v42 = vcombine.high %v3160_v34, %v3168_v12  ;;  %v13566_v32 = vcombine.low %v3160_v34, %v3168_v12  ;;  %v3139_v34 = vld [vmem:[#allocation10 + $0x368] sm:$0xff] }
0x121d   :  { %v3024_v21 = vpop.permute.xlu1 %3023 }
0x121e   :  { %v3027_v9 = vsel %vm3026_vm15, %v3000_v25, %v3024_v21  ;;  %v18367_v22 = vpack.c.bf16 %v3024_v21, %v3024_v21  ;;  %v3161_v25 = vld [vmem:[#allocation10 + $0x418] sm:$0xff]  ;;  %v13550_v21 = vcombine.low %v3144_v56, %v3152_v8  ;;  %v3123_v56 = vld [vmem:[#allocation10 + $0x2e8] sm:$0xff] }
0x121f   :  { %v18369_v24 = vpack.c.bf16 %v3027_v9, %v3027_v9  ;;  %v13569_v51 = vcombine.high %v3161_v25, %v3169_v33  ;;  %v3034_v9 = vld [vmem:[#allocation10 + $0x20] sm:$0xff]  ;;  %v13568_v60 = vcombine.low %v3161_v25, %v3169_v33 }
0x1220   :  { %13578 = vmatprep.mubr.msk.bf16.mxu1 %vm560_vm6, %v18367_v22  ;;  %13579 = vmatprep.mubr.msk.bf16.mxu0 %vm560_vm6, %v18367_v22  ;;  %v13443_v4 = vcombine.high %v3034_v9, %v3042_v38  ;;  %v13442_v39 = vcombine.low %v3034_v9, %v3042_v38  ;;  %v3155_v9 = vld [vmem:[#allocation10 + $0x3e8] sm:$0xff] }
0x1221   :  { %4014 = vmatmul.mubr.bf16.vlgmr.msra.gmra.mrb[24].mxu1 %v18369_v24  ;;  %4055 = vmatmul.mubr.bf16.vlgmr.msra.gmra.mrb[20].mxu0 %v18369_v24 }
0x1222   :  { %4064 = vmatpush1.bf16.msra.mxu1 %v13438_v62  ;;  %4105 = vmatpush1.bf16.msra.mxu0 %v13440_v11  ;;  %v13504_v62 = vcombine.low %v3097_v29, %v3105_v47  ;;  %v3137_v11 = vld [vmem:[#allocation10 + $0x358] sm:$0xff] }
0x1223   :  { %13580 = vmatprep.mubr.msk.bf16.mxu1 %vm560_vm6, %v18367_v22  ;;  %13581 = vmatprep.mubr.msk.bf16.mxu0 %vm560_vm6, %v18367_v22  ;;  %v13537_v23 = vcombine.high %v3129_v35, %v3137_v11  ;;  %v13536_v50 = vcombine.low %v3129_v35, %v3137_v11 }
0x1224   :  { %4065 = vmatprep.subr.bf16.mxu1 %v13455_v28  ;;  %4106 = vmatprep.subr.bf16.mxu0 %v13457_v58  ;;  %v3035_v28 = vld [vmem:[#allocation10 + $0x28] sm:$0xff] }
0x1225   :  { %v3043_v58 = vld [vmem:[#allocation10 + $0x68] sm:$0xff] }
0x1226   :  { %4066 = vmatpush1.bf16.msra.mxu1 %v13454_v17  ;;  %4107 = vmatpush1.bf16.msra.mxu0 %v13456_v18  ;;  %v13445_v17 = vcombine.high %v3035_v28, %v3043_v58  ;;  %v3050_v18 = vld [vmem:[#allocation10 + $0xa0] sm:$0xff]  ;;  %v13444_v26 = vcombine.low %v3035_v28, %v3043_v58 }
0x1227   :  { %4067 = vmatprep.subr.bf16.mxu1 %v13471_v41  ;;  %4108 = vmatprep.subr.bf16.mxu0 %v13473_v27  ;;  %v3058_v41 = vld [vmem:[#allocation10 + $0xe0] sm:$0xff]  ;;  %v3051_v27 = vld [vmem:[#allocation10 + $0xa8] sm:$0xff] }
0x1228   :  { %v13459_v37 = vcombine.high %v3050_v18, %v3058_v41  ;;  %v13458_v0 = vcombine.low %v3050_v18, %v3058_v41  ;;  %v13460_v29 = vcombine.low %v3051_v27, %v3059_v20  ;;  %v3171_v18 = vld [vmem:[#allocation10 + $0x468] sm:$0xff] }
0x122a   :  { %4068 = vmatpush1.bf16.msra.mxu1 %v13470_v43  ;;  %4109 = vmatpush1.bf16.msra.mxu0 %v13472_v49  ;;  %v13461_v43 = vcombine.high %v3051_v27, %v3059_v20  ;;  %v3066_v49 = vld [vmem:[#allocation10 + $0x120] sm:$0xff] }
0x122b   :  { %4069 = vmatprep.subr.bf16.mxu1 %v13487_v53  ;;  %4110 = vmatprep.subr.bf16.mxu0 %v13489_v46  ;;  %v3074_v53 = vld [vmem:[#allocation10 + $0x160] sm:$0xff]  ;;  %v3067_v46 = vld [vmem:[#allocation10 + $0x128] sm:$0xff] }
0x122c   :  { %v13475_v47 = vcombine.high %v3066_v49, %v3074_v53  ;;  %v13474_v52 = vcombine.low %v3066_v49, %v3074_v53  ;;  %v13476_v57 = vcombine.low %v3067_v46, %v3075_v19  ;;  %v3045_v49 = vld [vmem:[#allocation10 + $0x78] sm:$0xff] }
0x122e   :  { %4070 = vmatpush1.bf16.msra.mxu1 %v13486_v63  ;;  %4111 = vmatpush1.bf16.msra.mxu0 %v13488_v59  ;;  %v13477_v63 = vcombine.high %v3067_v46, %v3075_v19  ;;  %v3082_v59 = vld [vmem:[#allocation10 + $0x1a0] sm:$0xff] }
0x122f   :  { %4071 = vmatprep.subr.bf16.mxu1 %v13503_v7  ;;  %4112 = vmatprep.subr.bf16.mxu0 %v13505_v10  ;;  %v3090_v7 = vld [vmem:[#allocation10 + $0x1e0] sm:$0xff]  ;;  %v3083_v10 = vld [vmem:[#allocation10 + $0x1a8] sm:$0xff] }
0x1230   :  { %v13491_v14 = vcombine.high %v3082_v59, %v3090_v7  ;;  %v13490_v61 = vcombine.low %v3082_v59, %v3090_v7  ;;  %v13492_v35 = vcombine.low %v3083_v10, %v3091_v5  ;;  %v3053_v59 = vld [vmem:[#allocation10 + $0xb8] sm:$0xff] }
0x1231   :  { %v3061_v7 = vld [vmem:[#allocation10 + $0xf8] sm:$0xff] }
0x1232   :  { %4072 = vmatpush1.bf16.msra.mxu1 %v13502_v30  ;;  %4113 = vmatpush1.bf16.msra.mxu0 %v13504_v62  ;;  %v13493_v30 = vcombine.high %v3083_v10, %v3091_v5  ;;  %v3098_v62 = vld [vmem:[#allocation10 + $0x220] sm:$0xff] }
0x1233   :  { %4073 = vmatprep.subr.bf16.mxu1 %v13519_v36  ;;  %4114 = vmatprep.subr.bf16.mxu0 %v13521_v16  ;;  %v3106_v36 = vld [vmem:[#allocation10 + $0x260] sm:$0xff]  ;;  %v3099_v16 = vld [vmem:[#allocation10 + $0x228] sm:$0xff] }
0x1234   :  { %v13507_v11 = vcombine.high %v3098_v62, %v3106_v36  ;;  %v13506_v8 = vcombine.low %v3098_v62, %v3106_v36  ;;  %v13508_v45 = vcombine.low %v3099_v16, %v3107_v55  ;;  %v3077_v62 = vld [vmem:[#allocation10 + $0x178] sm:$0xff] }
0x1236   :  { %4074 = vmatpush1.bf16.msra.mxu1 %v13518_v3  ;;  %4115 = vmatpush1.bf16.msra.mxu0 %v13520_v15  ;;  %v13509_v3 = vcombine.high %v3099_v16, %v3107_v55  ;;  %v3114_v15 = vld [vmem:[#allocation10 + $0x2a0] sm:$0xff]  ;;  %v13464_v16 = vcombine.low %v3053_v59, %v3061_v7 }
0x1237   :  { %4075 = vmatprep.subr.bf16.mxu1 %v13535_v40  ;;  %4116 = vmatprep.subr.bf16.mxu0 %v13537_v23  ;;  %v3122_v40 = vld [vmem:[#allocation10 + $0x2e0] sm:$0xff]  ;;  %v3115_v23 = vld [vmem:[#allocation10 + $0x2a8] sm:$0xff] }
0x1238   :  { %v13523_v1 = vcombine.high %v3114_v15, %v3122_v40  ;;  %v13522_v12 = vcombine.low %v3114_v15, %v3122_v40  ;;  %v13524_v25 = vcombine.low %v3115_v23, %v3123_v56  ;;  %v3093_v15 = vld [vmem:[#allocation10 + $0x1f8] sm:$0xff] }
0x123a   :  { %4076 = vmatpush1.bf16.msra.mxu1 %v13534_v48  ;;  %4117 = vmatpush1.bf16.msra.mxu0 %v13536_v50  ;;  %v13525_v48 = vcombine.high %v3115_v23, %v3123_v56  ;;  %v3130_v50 = vld [vmem:[#allocation10 + $0x320] sm:$0xff] }
0x123b   :  { %4077 = vmatprep.subr.bf16.mxu1 %v13551_v2  ;;  %4118 = vmatprep.subr.bf16.mxu0 %v13553_v44  ;;  %v3138_v2 = vld [vmem:[#allocation10 + $0x360] sm:$0xff]  ;;  %v3131_v44 = vld [vmem:[#allocation10 + $0x328] sm:$0xff] }
0x123c   :  { %v13539_v33 = vcombine.high %v3130_v50, %v3138_v2  ;;  %v13538_v38 = vcombine.low %v3130_v50, %v3138_v2  ;;  %v13540_v28 = vcombine.low %v3131_v44, %v3139_v34  ;;  %v3109_v50 = vld [vmem:[#allocation10 + $0x278] sm:$0xff] }
0x123e   :  { %4078 = vmatpush1.bf16.msra.mxu1 %v13550_v21  ;;  %4119 = vmatpush1.bf16.msra.mxu0 %v13552_v13  ;;  %v13541_v21 = vcombine.high %v3131_v44, %v3139_v34  ;;  %v3146_v13 = vld [vmem:[#allocation10 + $0x3a0] sm:$0xff] }
0x123f   :  { %4079 = vmatprep.subr.bf16.mxu1 %v13567_v42  ;;  %4120 = vmatprep.subr.bf16.mxu0 %v13569_v51  ;;  %v3154_v42 = vld [vmem:[#allocation10 + $0x3e0] sm:$0xff]  ;;  %v3147_v51 = vld [vmem:[#allocation10 + $0x3a8] sm:$0xff] }
0x1240   :  { %v13555_v58 = vcombine.high %v3146_v13, %v3154_v42  ;;  %v13554_v41 = vcombine.low %v3146_v13, %v3154_v42  ;;  %v13556_v27 = vcombine.low %v3147_v51, %v3155_v9 }
0x1242   :  { %4080 = vmatpush1.bf16.msra.mxu1 %v13566_v32  ;;  %4121 = vmatpush1.bf16.msra.mxu0 %v13568_v60  ;;  %v13557_v32 = vcombine.high %v3147_v51, %v3155_v9  ;;  %v3162_v60 = vld [vmem:[#allocation10 + $0x420] sm:$0xff] }
0x1243   :  { %4145 = vmatprep.subr.bf16.mxu1 %v13443_v4  ;;  %4186 = vmatprep.subr.bf16.mxu0 %v13445_v17  ;;  %v3170_v4 = vld [vmem:[#allocation10 + $0x460] sm:$0xff]  ;;  %v3163_v17 = vld [vmem:[#allocation10 + $0x428] sm:$0xff] }
0x1244   :  { %v13571_v20 = vcombine.high %v3162_v60, %v3170_v4  ;;  %v13570_v53 = vcombine.low %v3162_v60, %v3170_v4  ;;  %v13572_v46 = vcombine.low %v3163_v17, %v3171_v18 }
0x1245   :  { %4096 = vmatmul.mubr.bf16.vlgmr.msra.gmra.mrb[28].mxu1 %v18369_v24  ;;  %4137 = vmatmul.mubr.bf16.vlgmr.msra.gmra.mrb[24].mxu0 %v18369_v24 }
0x1246   :  { %4146 = vmatpush1.bf16.msra.mxu1 %v13442_v39  ;;  %13582 = vmatprep.mubr.msk.bf16.mxu1 %vm560_vm6, %v18367_v22  ;;  %v13573_v39 = vcombine.high %v3163_v17, %v3171_v18 }
0x1247   :  { %4187 = vmatpush1.bf16.msra.mxu0 %v13444_v26  ;;  %13583 = vmatprep.mubr.msk.bf16.mxu0 %vm560_vm6, %v18367_v22  ;;  %v3036_v26 = vld [vmem:[#allocation10 + $0x30] sm:$0xff] }
0x1248   :  { %4147 = vmatprep.subr.bf16.mxu1 %v13459_v37  ;;  %4188 = vmatprep.subr.bf16.mxu0 %v13461_v43  ;;  %v3044_v37 = vld [vmem:[#allocation10 + $0x70] sm:$0xff]  ;;  %v3037_v43 = vld [vmem:[#allocation10 + $0x38] sm:$0xff] }
0x1249   :  { %v13447_v19 = vcombine.high %v3036_v26, %v3044_v37  ;;  %v13448_v10 = vcombine.low %v3037_v43, %v3045_v49 }
0x124a   :  { %4148 = vmatpush1.bf16.msra.mxu1 %v13458_v0  ;;  %v13449_v0 = vcombine.high %v3037_v43, %v3045_v49 }
0x124b   :  { %4189 = vmatpush1.bf16.msra.mxu0 %v13460_v29  ;;  %4149 = vmatprep.subr.bf16.mxu1 %v13475_v47  ;;  %v3052_v29 = vld [vmem:[#allocation10 + $0xb0] sm:$0xff] }
0x124c   :  { %4190 = vmatprep.subr.bf16.mxu0 %v13477_v63  ;;  %v3060_v47 = vld [vmem:[#allocation10 + $0xf0] sm:$0xff]  ;;  %v13446_v63 = vcombine.low %v3036_v26, %v3044_v37 }
0x124d   :  { %v13463_v5 = vcombine.high %v3052_v29, %v3060_v47  ;;  %v13462_v36 = vcombine.low %v3052_v29, %v3060_v47 }
0x124e   :  { %4150 = vmatpush1.bf16.msra.mxu1 %v13474_v52  ;;  %v3068_v52 = vld [vmem:[#allocation10 + $0x130] sm:$0xff] }
0x124f   :  { %4191 = vmatpush1.bf16.msra.mxu0 %v13476_v57  ;;  %4151 = vmatprep.subr.bf16.mxu1 %v13491_v14  ;;  %v3076_v57 = vld [vmem:[#allocation10 + $0x170] sm:$0xff]  ;;  %v13465_v14 = vcombine.high %v3053_v59, %v3061_v7 }
0x1250   :  { %4192 = vmatprep.subr.bf16.mxu0 %v13493_v30  ;;  %v3069_v30 = vld [vmem:[#allocation10 + $0x138] sm:$0xff]  ;;  %v13479_v55 = vcombine.high %v3068_v52, %v3076_v57  ;;  %v13478_v40 = vcombine.low %v3068_v52, %v3076_v57  ;;  %v15194_v57 = vld [vmem:[#allocation11] ss:$16 sps:$4 sm:$0xff]  }
0x1251   :  { %v13480_v23 = vcombine.low %v3069_v30, %v3077_v62  ;;  %v15199_v52 = vld [vmem:[#allocation11 + $0xc] ss:$16 sps:$4 sm:$0xff]  }
0x1252   :  { %4152 = vmatpush1.bf16.msra.mxu1 %v13490_v61  ;;  %v13481_v61 = vcombine.high %v3069_v30, %v3077_v62  ;;  %v15202_v30 = vld [vmem:[#allocation11 + $0x24] ss:$16 sps:$4 sm:$0xff]   ;;  %v15205_v62 = vld [vmem:[#allocation11 + $0x2c] ss:$16 sps:$4 sm:$0xff]  }
0x1253   :  { %4193 = vmatpush1.bf16.msra.mxu0 %v13492_v35  ;;  %4153 = vmatprep.subr.bf16.mxu1 %v13507_v11  ;;  %v3084_v35 = vld [vmem:[#allocation10 + $0x1b0] sm:$0xff] }
0x1254   :  { %4194 = vmatprep.subr.bf16.mxu0 %v13509_v3  ;;  %v3092_v11 = vld [vmem:[#allocation10 + $0x1f0] sm:$0xff]  ;;  %v3085_v3 = vld [vmem:[#allocation10 + $0x1b8] sm:$0xff] }
0x1255   :  { %v13495_v56 = vcombine.high %v3084_v35, %v3092_v11  ;;  %v13496_v2 = vcombine.low %v3085_v3, %v3093_v15 }
0x1256   :  { %4154 = vmatpush1.bf16.msra.mxu1 %v13506_v8  ;;  %v13497_v8 = vcombine.high %v3085_v3, %v3093_v15  ;;  %v15214_v3 = vld [vmem:[#allocation11 + $0x64] ss:$16 sps:$4 sm:$0xff]   ;;  %v15217_v15 = vld [vmem:[#allocation11 + $0x6c] ss:$16 sps:$4 sm:$0xff]  }
0x1257   :  { %4195 = vmatpush1.bf16.msra.mxu0 %v13508_v45  ;;  %4155 = vmatprep.subr.bf16.mxu1 %v13523_v1  ;;  %v3100_v45 = vld [vmem:[#allocation10 + $0x230] sm:$0xff] }
0x1258   :  { %4196 = vmatprep.subr.bf16.mxu0 %v13525_v48  ;;  %v3108_v1 = vld [vmem:[#allocation10 + $0x270] sm:$0xff]  ;;  %v3101_v48 = vld [vmem:[#allocation10 + $0x238] sm:$0xff] }
0x1259   :  { %v13511_v44 = vcombine.high %v3100_v45, %v3108_v1  ;;  %v13513_v34 = vcombine.high %v3101_v48, %v3109_v50  ;;  %v13510_v13 = vcombine.low %v3100_v45, %v3108_v1  ;;  %v13512_v42 = vcombine.low %v3101_v48, %v3109_v50  ;;  %v15221_v45 = vld [vmem:[#allocation11 + $0x88] ss:$16 sps:$4 sm:$0xff]   ;;  %v15226_v1 = vld [vmem:[#allocation11 + $0xa4] ss:$16 sps:$4 sm:$0xff]   ;;  %v15229_v48 = vld [vmem:[#allocation11 + $0xac] ss:$16 sps:$4 sm:$0xff]  }
0x125a   :  { %4156 = vmatpush1.bf16.msra.mxu1 %v13522_v12  ;;  %v3116_v12 = vld [vmem:[#allocation10 + $0x2b0] sm:$0xff] }
0x125b   :  { %4197 = vmatpush1.bf16.msra.mxu0 %v13524_v25  ;;  %4157 = vmatprep.subr.bf16.mxu1 %v13539_v33  ;;  %v3124_v25 = vld [vmem:[#allocation10 + $0x2f0] sm:$0xff]  ;;  %v3117_v33 = vld [vmem:[#allocation10 + $0x2b8] sm:$0xff] }
0x125c   :  { %4198 = vmatprep.subr.bf16.mxu0 %v13541_v21  ;;  %v3125_v21 = vld [vmem:[#allocation10 + $0x2f8] sm:$0xff]  ;;  %v13527_v51 = vcombine.high %v3116_v12, %v3124_v25  ;;  %v13526_v60 = vcombine.low %v3116_v12, %v3124_v25  ;;  %v15224_v50 = vld [vmem:[#allocation11 + $0xa0] ss:$16 sps:$4 sm:$0xff]   ;;  %v15238_v25 = vld [vmem:[#allocation11 + $0xe4] ss:$16 sps:$4 sm:$0xff]  }
0x125d   :  { %v13529_v9 = vcombine.high %v3117_v33, %v3125_v21  ;;  %v13528_v4 = vcombine.low %v3117_v33, %v3125_v21  ;;  %v15233_v12 = vld [vmem:[#allocation11 + $0xc8] ss:$16 sps:$4 sm:$0xff]   ;;  %v15241_v33 = vld [vmem:[#allocation11 + $0xec] ss:$16 sps:$4 sm:$0xff]   ;;  %v15236_v21 = vld [vmem:[#allocation11 + $0xe0] ss:$16 sps:$4 sm:$0xff]  }
0x125e   :  { %4158 = vmatpush1.bf16.msra.mxu1 %v13538_v38  ;;  %v3132_v38 = vld [vmem:[#allocation10 + $0x330] sm:$0xff] }
0x125f   :  { %4199 = vmatpush1.bf16.msra.mxu0 %v13540_v28  ;;  %4159 = vmatprep.subr.bf16.mxu1 %v13555_v58  ;;  %v3140_v28 = vld [vmem:[#allocation10 + $0x370] sm:$0xff]  ;;  %v3133_v58 = vld [vmem:[#allocation10 + $0x338] sm:$0xff] }
0x1260   :  { %4200 = vmatprep.subr.bf16.mxu0 %v13557_v32  ;;  %v3141_v32 = vld [vmem:[#allocation10 + $0x378] sm:$0xff]  ;;  %v13543_v17 = vcombine.high %v3132_v38, %v3140_v28  ;;  %v13542_v26 = vcombine.low %v3132_v38, %v3140_v28  ;;  %v15250_v28 = vld [vmem:[#allocation11 + $0x124] ss:$16 sps:$4 sm:$0xff]  }
0x1261   :  { %v13545_v18 = vcombine.high %v3133_v58, %v3141_v32  ;;  %v13544_v37 = vcombine.low %v3133_v58, %v3141_v32  ;;  %v15245_v38 = vld [vmem:[#allocation11 + $0x108] ss:$16 sps:$4 sm:$0xff]   ;;  %v15253_v58 = vld [vmem:[#allocation11 + $0x12c] ss:$16 sps:$4 sm:$0xff]   ;;  %v15248_v32 = vld [vmem:[#allocation11 + $0x120] ss:$16 sps:$4 sm:$0xff]  }
0x1262   :  { %4160 = vmatpush1.bf16.msra.mxu1 %v13554_v41  ;;  %v3148_v41 = vld [vmem:[#allocation10 + $0x3b0] sm:$0xff] }
0x1263   :  { %4201 = vmatpush1.bf16.msra.mxu0 %v13556_v27  ;;  %4161 = vmatprep.subr.bf16.mxu1 %v13571_v20  ;;  %v3156_v27 = vld [vmem:[#allocation10 + $0x3f0] sm:$0xff]  ;;  %v3149_v20 = vld [vmem:[#allocation10 + $0x3b8] sm:$0xff] }
0x1264   :  { %4202 = vmatprep.subr.bf16.mxu0 %v13573_v39  ;;  %v3157_v39 = vld [vmem:[#allocation10 + $0x3f8] sm:$0xff]  ;;  %v13559_v43 = vcombine.high %v3148_v41, %v3156_v27  ;;  %v13558_v29 = vcombine.low %v3148_v41, %v3156_v27  ;;  %v15262_v27 = vld [vmem:[#allocation11 + $0x164] ss:$16 sps:$4 sm:$0xff]  }
0x1265   :  { %v13561_v49 = vcombine.high %v3149_v20, %v3157_v39  ;;  %v13560_v47 = vcombine.low %v3149_v20, %v3157_v39  ;;  %v15257_v41 = vld [vmem:[#allocation11 + $0x148] ss:$16 sps:$4 sm:$0xff]   ;;  %v15265_v20 = vld [vmem:[#allocation11 + $0x16c] ss:$16 sps:$4 sm:$0xff]   ;;  %v15260_v39 = vld [vmem:[#allocation11 + $0x160] ss:$16 sps:$4 sm:$0xff]  }
0x1266   :  { %4162 = vmatpush1.bf16.msra.mxu1 %v13570_v53  ;;  %v3164_v53 = vld [vmem:[#allocation10 + $0x430] sm:$0xff] }
0x1267   :  { %4203 = vmatpush1.bf16.msra.mxu0 %v13572_v46  ;;  %4227 = vmatprep.subr.bf16.mxu1 %v13447_v19  ;;  %v3172_v46 = vld [vmem:[#allocation10 + $0x470] sm:$0xff]  ;;  %v3165_v19 = vld [vmem:[#allocation10 + $0x438] sm:$0xff] }
0x1268   :  { %4268 = vmatprep.subr.bf16.mxu0 %v13449_v0  ;;  %v3173_v0 = vld [vmem:[#allocation10 + $0x478] sm:$0xff]  ;;  %v13574_v7 = vcombine.low %v3164_v53, %v3172_v46 }
0x1269   :  { %4178 = vmatmul.mubr.bf16.vlgmr.msra.gmra.mrb[32].mxu1 %v18369_v24  ;;  %v13577_v59 = vcombine.high %v3165_v19, %v3173_v0 }
0x126a   :  { %4219 = vmatmul.mubr.bf16.vlgmr.msra.gmra.mrb[28].mxu0 %v18369_v24  ;;  %4228 = vmatpush1.bf16.msra.mxu1 %v13446_v63  ;;  %v13575_v63 = vcombine.high %v3164_v53, %v3172_v46  ;;  %v15269_v53 = vld [vmem:[#allocation11 + $0x188] ss:$16 sps:$4 sm:$0xff]   ;;  %v15274_v46 = vld [vmem:[#allocation11 + $0x1a4] ss:$16 sps:$4 sm:$0xff]  }
0x126b   :  { %13584 = vmatprep.mubr.msk.bf16.mxu1 %vm560_vm6, %v18367_v22  ;;  %4269 = vmatpush1.bf16.msra.mxu0 %v13448_v10  ;;  %v13576_v10 = vcombine.low %v3165_v19, %v3173_v0  ;;  %v15277_v19 = vld [vmem:[#allocation11 + $0x1ac] ss:$16 sps:$4 sm:$0xff]   ;;  %v15272_v0 = vld [vmem:[#allocation11 + $0x1a0] ss:$16 sps:$4 sm:$0xff]  }
0x126c   :  { %13585 = vmatprep.mubr.msk.bf16.mxu0 %vm560_vm6, %v18367_v22  ;;  %4229 = vmatprep.subr.bf16.mxu1 %v13463_v5  ;;  %v13494_v22 = vcombine.low %v3084_v35, %v3092_v11  ;;  %v15196_v5 = vld [vmem:[#allocation11 + $0x4] ss:$16 sps:$4 sm:$0xff]   ;;  %v15206_v35 = vld [vmem:[#allocation11 + $0x40] ss:$16 sps:$4 sm:$0xff]   ;;  %v15209_v11 = vld [vmem:[#allocation11 + $0x48] ss:$16 sps:$4 sm:$0xff]  }
0x126d   :  { %4270 = vmatprep.subr.bf16.mxu0 %v13465_v14  ;;  %v15197_v14 = vld [vmem:[#allocation11 + $0x8] ss:$16 sps:$4 sm:$0xff]  }
0x126e   :  { %4230 = vmatpush1.bf16.msra.mxu1 %v13462_v36  ;;  %v15200_v36 = vld [vmem:[#allocation11 + $0x20] ss:$16 sps:$4 sm:$0xff]  }
0x126f   :  { %4271 = vmatpush1.bf16.msra.mxu0 %v13464_v16  ;;  %4231 = vmatprep.subr.bf16.mxu1 %v13479_v55  ;;  %v15203_v16 = vld [vmem:[#allocation11 + $0x28] ss:$16 sps:$4 sm:$0xff]   ;;  %v15208_v55 = vld [vmem:[#allocation11 + $0x44] ss:$16 sps:$4 sm:$0xff]  }
0x1270   :  { %4272 = vmatprep.subr.bf16.mxu0 %v13481_v61  ;;  %v15211_v61 = vld [vmem:[#allocation11 + $0x4c] ss:$16 sps:$4 sm:$0xff]  }
0x1272   :  { %4232 = vmatpush1.bf16.msra.mxu1 %v13478_v40  ;;  %v15212_v40 = vld [vmem:[#allocation11 + $0x60] ss:$16 sps:$4 sm:$0xff]  }
0x1273   :  { %4273 = vmatpush1.bf16.msra.mxu0 %v13480_v23  ;;  %4233 = vmatprep.subr.bf16.mxu1 %v13495_v56  ;;  %v15220_v23 = vld [vmem:[#allocation11 + $0x84] ss:$16 sps:$4 sm:$0xff]   ;;  %v15223_v56 = vld [vmem:[#allocation11 + $0x8c] ss:$16 sps:$4 sm:$0xff]  }
0x1274   :  { %4274 = vmatprep.subr.bf16.mxu0 %v13497_v8  ;;  %v15218_v8 = vld [vmem:[#allocation11 + $0x80] ss:$16 sps:$4 sm:$0xff]  }
0x1276   :  { %4234 = vmatpush1.bf16.msra.mxu1 %v13494_v22  ;;  %v15227_v22 = vld [vmem:[#allocation11 + $0xa8] ss:$16 sps:$4 sm:$0xff]  }
0x1277   :  { %4275 = vmatpush1.bf16.msra.mxu0 %v13496_v2  ;;  %4235 = vmatprep.subr.bf16.mxu1 %v13511_v44  ;;  %v15232_v2 = vld [vmem:[#allocation11 + $0xc4] ss:$16 sps:$4 sm:$0xff]   ;;  %v15235_v44 = vld [vmem:[#allocation11 + $0xcc] ss:$16 sps:$4 sm:$0xff]  }
0x1278   :  { %4276 = vmatprep.subr.bf16.mxu0 %v13513_v34  ;;  %v15230_v34 = vld [vmem:[#allocation11 + $0xc0] ss:$16 sps:$4 sm:$0xff]  }
0x127a   :  { %4236 = vmatpush1.bf16.msra.mxu1 %v13510_v13  ;;  %v15239_v13 = vld [vmem:[#allocation11 + $0xe8] ss:$16 sps:$4 sm:$0xff]  }
0x127b   :  { %4277 = vmatpush1.bf16.msra.mxu0 %v13512_v42  ;;  %4237 = vmatprep.subr.bf16.mxu1 %v13527_v51  ;;  %v15244_v42 = vld [vmem:[#allocation11 + $0x104] ss:$16 sps:$4 sm:$0xff]   ;;  %v15247_v51 = vld [vmem:[#allocation11 + $0x10c] ss:$16 sps:$4 sm:$0xff]  }
0x127c   :  { %4278 = vmatprep.subr.bf16.mxu0 %v13529_v9  ;;  %v15242_v9 = vld [vmem:[#allocation11 + $0x100] ss:$16 sps:$4 sm:$0xff]  }
0x127e   :  { %4238 = vmatpush1.bf16.msra.mxu1 %v13526_v60  ;;  %v15251_v60 = vld [vmem:[#allocation11 + $0x128] ss:$16 sps:$4 sm:$0xff]  }
0x127f   :  { %4279 = vmatpush1.bf16.msra.mxu0 %v13528_v4  ;;  %4239 = vmatprep.subr.bf16.mxu1 %v13543_v17  ;;  %v15256_v4 = vld [vmem:[#allocation11 + $0x144] ss:$16 sps:$4 sm:$0xff]   ;;  %v15259_v17 = vld [vmem:[#allocation11 + $0x14c] ss:$16 sps:$4 sm:$0xff]  }
0x1280   :  { %4280 = vmatprep.subr.bf16.mxu0 %v13545_v18  ;;  %v15254_v18 = vld [vmem:[#allocation11 + $0x140] ss:$16 sps:$4 sm:$0xff]  }
0x1282   :  { %4240 = vmatpush1.bf16.msra.mxu1 %v13542_v26  ;;  %v15263_v26 = vld [vmem:[#allocation11 + $0x168] ss:$16 sps:$4 sm:$0xff]  }
0x1283   :  { %4281 = vmatpush1.bf16.msra.mxu0 %v13544_v37  ;;  %4241 = vmatprep.subr.bf16.mxu1 %v13559_v43  ;;  %v15268_v37 = vld [vmem:[#allocation11 + $0x184] ss:$16 sps:$4 sm:$0xff]   ;;  %v15271_v43 = vld [vmem:[#allocation11 + $0x18c] ss:$16 sps:$4 sm:$0xff]  }
0x1284   :  { %4282 = vmatprep.subr.bf16.mxu0 %v13561_v49  ;;  %v15266_v49 = vld [vmem:[#allocation11 + $0x180] ss:$16 sps:$4 sm:$0xff]  }
0x1286   :  { %4242 = vmatpush1.bf16.msra.mxu1 %v13558_v29  ;;  %v15275_v29 = vld [vmem:[#allocation11 + $0x1a8] ss:$16 sps:$4 sm:$0xff]  }
0x1287   :  { %4283 = vmatpush1.bf16.msra.mxu0 %v13560_v47  ;;  %4243 = vmatprep.subr.bf16.mxu1 %v13575_v63  ;;  %v15280_v47 = vld [vmem:[#allocation11 + $0x1c4] ss:$16 sps:$4 sm:$0xff]   ;;  %v15283_v63 = vld [vmem:[#allocation11 + $0x1cc] ss:$16 sps:$4 sm:$0xff]  }
0x1288   :  { %4284 = vmatprep.subr.bf16.mxu0 %v13577_v59  ;;  %v15278_v59 = vld [vmem:[#allocation11 + $0x1c0] ss:$16 sps:$4 sm:$0xff]  }
0x128a   :  { %4244 = vmatpush1.bf16.msra.mxu1 %v13574_v7  ;;  %v15281_v7 = vld [vmem:[#allocation11 + $0x1c8] ss:$16 sps:$4 sm:$0xff]  }
0x128b   :  { %4285 = vmatpush1.bf16.msra.mxu0 %v13576_v10  ;;  %5891 = vmatprep.subr.bf16.mxu1 %v15196_v5  ;;  %v15286_v10 = vld [vmem:[#allocation11 + $0x1e4] ss:$16 sps:$4 sm:$0xff]   ;;  %v15289_v5 = vld [vmem:[#allocation11 + $0x1ec] ss:$16 sps:$4 sm:$0xff]  }
0x128c   :  { %6055 = vmatprep.subr.bf16.mxu0 %v15199_v52  ;;  %v15284_v52 = vld [vmem:[#allocation11 + $0x1e0] ss:$16 sps:$4 sm:$0xff]  }
0x128d   :  { %4260 = vmatmul.mubr.bf16.vlgmr.msra.gmra.mrb[36].mxu1 %v18369_v24 }
0x128e   :  { %4301 = vmatmul.mubr.bf16.vlgmr.msra.gmra.mrb[32].mxu0 %v18369_v24  ;;  %5892 = vmatpush1.bf16.msra.mxu1 %v15194_v57  ;;  %v15215_v24 = vld [vmem:[#allocation11 + $0x68] ss:$16 sps:$4 sm:$0xff]  }
0x128f   :  { %6056 = vmatpush1.bf16.msra.mxu0 %v15197_v14  ;;  %5893 = vmatprep.subr.bf16.mxu1 %v15202_v30  ;;  %v15287_v57 = vld [vmem:[#allocation11 + $0x1e8] ss:$16 sps:$4 sm:$0xff]   ;;  %v15292_v14 = vld [vmem:[#allocation11 + $0x204] ss:$16 sps:$4 sm:$0xff]   ;;  %v15295_v30 = vld [vmem:[#allocation11 + $0x20c] ss:$16 sps:$4 sm:$0xff]  }
0x1290   :  { %6057 = vmatprep.subr.bf16.mxu0 %v15205_v62  ;;  %v18398_v62 = vld [vmem:[%s18670_s10] sm:$0xff] }
0x1292   :  { %5894 = vmatpush1.bf16.msra.mxu1 %v15200_v36  ;;  %v18401_v36 = vsub.s32 3, %v17283_v6 }
0x1293   :  { %6058 = vmatpush1.bf16.msra.mxu0 %v15203_v16  ;;  %5895 = vmatprep.subr.bf16.mxu1 %v15208_v55  ;;  %v3181_v16 = vrot.slane %v18398_v62, %v17286_v31  ;;  %v3185_v55 = vrot.slane %v18398_v62, %v17339_v54 }
0x1294   :  { %6059 = vmatprep.subr.bf16.mxu0 %v15211_v61  ;;  %v3193_v61 = vrot.slane %v18398_v62, %v18401_v36 }
0x1296   :  { %5896 = vmatpush1.bf16.msra.mxu1 %v15206_v35 }
0x1297   :  { %6060 = vmatpush1.bf16.msra.mxu0 %v15209_v11  ;;  %5897 = vmatprep.subr.bf16.mxu1 %v15214_v3 }
0x1298   :  { %6061 = vmatprep.subr.bf16.mxu0 %v15217_v15 }
0x129a   :  { %5898 = vmatpush1.bf16.msra.mxu1 %v15212_v40 }
0x129b   :  { %6062 = vmatpush1.bf16.msra.mxu0 %v15215_v24  ;;  %5899 = vmatprep.subr.bf16.mxu1 %v15220_v23 }
0x129c   :  { %6063 = vmatprep.subr.bf16.mxu0 %v15223_v56 }
0x129e   :  { %5900 = vmatpush1.bf16.msra.mxu1 %v15218_v8 }
0x129f   :  { %6064 = vmatpush1.bf16.msra.mxu0 %v15221_v45  ;;  %5901 = vmatprep.subr.bf16.mxu1 %v15226_v1 }
0x12a0   :  { %6065 = vmatprep.subr.bf16.mxu0 %v15229_v48 }
0x12a2   :  { %5902 = vmatpush1.bf16.msra.mxu1 %v15224_v50 }
0x12a3   :  { %6066 = vmatpush1.bf16.msra.mxu0 %v15227_v22  ;;  %5903 = vmatprep.subr.bf16.mxu1 %v15232_v2 }
0x12a4   :  { %6067 = vmatprep.subr.bf16.mxu0 %v15235_v44  ;;  %v15290_v44 = vld [vmem:[#allocation11 + $0x200] ss:$16 sps:$4 sm:$0xff]  }
0x12a6   :  { %5904 = vmatpush1.bf16.msra.mxu1 %v15230_v34  ;;  %v15293_v34 = vld [vmem:[#allocation11 + $0x208] ss:$16 sps:$4 sm:$0xff]  }
0x12a7   :  { %6068 = vmatpush1.bf16.msra.mxu0 %v15233_v12  ;;  %5905 = vmatprep.subr.bf16.mxu1 %v15238_v25  ;;  %v15298_v25 = vld [vmem:[#allocation11 + $0x224] ss:$16 sps:$4 sm:$0xff]  }
0x12a8   :  { %6069 = vmatprep.subr.bf16.mxu0 %v15241_v33  ;;  %v15301_v33 = vld [vmem:[#allocation11 + $0x22c] ss:$16 sps:$4 sm:$0xff]  }
0x12aa   :  { %5906 = vmatpush1.bf16.msra.mxu1 %v15236_v21 }
0x12ab   :  { %6070 = vmatpush1.bf16.msra.mxu0 %v15239_v13  ;;  %5907 = vmatprep.subr.bf16.mxu1 %v15244_v42  ;;  %v15296_v13 = vld [vmem:[#allocation11 + $0x220] ss:$16 sps:$4 sm:$0xff]   ;;  %v15299_v42 = vld [vmem:[#allocation11 + $0x228] ss:$16 sps:$4 sm:$0xff]  }
0x12ac   :  { %6071 = vmatprep.subr.bf16.mxu0 %v15247_v51  ;;  %v15304_v51 = vld [vmem:[#allocation11 + $0x244] ss:$16 sps:$4 sm:$0xff]  }
0x12ae   :  { %5908 = vmatpush1.bf16.msra.mxu1 %v15242_v9  ;;  %v15307_v9 = vld [vmem:[#allocation11 + $0x24c] ss:$16 sps:$4 sm:$0xff]  }
0x12af   :  { %6072 = vmatpush1.bf16.msra.mxu0 %v15245_v38  ;;  %5909 = vmatprep.subr.bf16.mxu1 %v15250_v28  ;;  %v15302_v38 = vld [vmem:[#allocation11 + $0x240] ss:$16 sps:$4 sm:$0xff]   ;;  %v15305_v28 = vld [vmem:[#allocation11 + $0x248] ss:$16 sps:$4 sm:$0xff]  }
0x12b0   :  { %6073 = vmatprep.subr.bf16.mxu0 %v15253_v58  ;;  %v15310_v58 = vld [vmem:[#allocation11 + $0x264] ss:$16 sps:$4 sm:$0xff]  }
0x12b2   :  { %5910 = vmatpush1.bf16.msra.mxu1 %v15248_v32  ;;  %v15313_v32 = vld [vmem:[#allocation11 + $0x26c] ss:$16 sps:$4 sm:$0xff]  }
0x12b3   :  { %6074 = vmatpush1.bf16.msra.mxu0 %v15251_v60  ;;  %5911 = vmatprep.subr.bf16.mxu1 %v15256_v4  ;;  %v15308_v60 = vld [vmem:[#allocation11 + $0x260] ss:$16 sps:$4 sm:$0xff]   ;;  %v15311_v4 = vld [vmem:[#allocation11 + $0x268] ss:$16 sps:$4 sm:$0xff]  }
0x12b4   :  { %6075 = vmatprep.subr.bf16.mxu0 %v15259_v17  ;;  %v15316_v17 = vld [vmem:[#allocation11 + $0x284] ss:$16 sps:$4 sm:$0xff]  }
0x12b6   :  { %5912 = vmatpush1.bf16.msra.mxu1 %v15254_v18  ;;  %v15319_v18 = vld [vmem:[#allocation11 + $0x28c] ss:$16 sps:$4 sm:$0xff]  }
0x12b7   :  { %6076 = vmatpush1.bf16.msra.mxu0 %v15257_v41  ;;  %5913 = vmatprep.subr.bf16.mxu1 %v15262_v27  ;;  %v15314_v41 = vld [vmem:[#allocation11 + $0x280] ss:$16 sps:$4 sm:$0xff]   ;;  %v15317_v27 = vld [vmem:[#allocation11 + $0x288] ss:$16 sps:$4 sm:$0xff]  }
0x12b8   :  { %6077 = vmatprep.subr.bf16.mxu0 %v15265_v20  ;;  %v15322_v20 = vld [vmem:[#allocation11 + $0x2a4] ss:$16 sps:$4 sm:$0xff]  }
0x12ba   :  { %5914 = vmatpush1.bf16.msra.mxu1 %v15260_v39  ;;  %v15325_v39 = vld [vmem:[#allocation11 + $0x2ac] ss:$16 sps:$4 sm:$0xff]  }
0x12bb   :  { %6078 = vmatpush1.bf16.msra.mxu0 %v15263_v26  ;;  %5915 = vmatprep.subr.bf16.mxu1 %v15268_v37  ;;  %v15320_v26 = vld [vmem:[#allocation11 + $0x2a0] ss:$16 sps:$4 sm:$0xff]   ;;  %v15323_v37 = vld [vmem:[#allocation11 + $0x2a8] ss:$16 sps:$4 sm:$0xff]  }
0x12bc   :  { %6079 = vmatprep.subr.bf16.mxu0 %v15271_v43  ;;  %v15328_v43 = vld [vmem:[#allocation11 + $0x2c4] ss:$16 sps:$4 sm:$0xff]  }
0x12be   :  { %5916 = vmatpush1.bf16.msra.mxu1 %v15266_v49  ;;  %v15331_v49 = vld [vmem:[#allocation11 + $0x2cc] ss:$16 sps:$4 sm:$0xff]  }
0x12bf   :  { %6080 = vmatpush1.bf16.msra.mxu0 %v15269_v53  ;;  %5917 = vmatprep.subr.bf16.mxu1 %v15274_v46  ;;  %v15326_v53 = vld [vmem:[#allocation11 + $0x2c0] ss:$16 sps:$4 sm:$0xff]   ;;  %v15329_v46 = vld [vmem:[#allocation11 + $0x2c8] ss:$16 sps:$4 sm:$0xff]  }
0x12c0   :  { %6081 = vmatprep.subr.bf16.mxu0 %v15277_v19  ;;  %v15334_v19 = vld [vmem:[#allocation11 + $0x2e4] ss:$16 sps:$4 sm:$0xff]  }
0x12c2   :  { %5918 = vmatpush1.bf16.msra.mxu1 %v15272_v0  ;;  %v15337_v0 = vld [vmem:[#allocation11 + $0x2ec] ss:$16 sps:$4 sm:$0xff]  }
0x12c3   :  { %6082 = vmatpush1.bf16.msra.mxu0 %v15275_v29  ;;  %5919 = vmatprep.subr.bf16.mxu1 %v15280_v47  ;;  %v15332_v29 = vld [vmem:[#allocation11 + $0x2e0] ss:$16 sps:$4 sm:$0xff]   ;;  %v15335_v47 = vld [vmem:[#allocation11 + $0x2e8] ss:$16 sps:$4 sm:$0xff]  }
0x12c4   :  { %6083 = vmatprep.subr.bf16.mxu0 %v15283_v63  ;;  %v15340_v63 = vld [vmem:[#allocation11 + $0x304] ss:$16 sps:$4 sm:$0xff]  }
0x12c6   :  { %5920 = vmatpush1.bf16.msra.mxu1 %v15278_v59  ;;  %v15343_v59 = vld [vmem:[#allocation11 + $0x30c] ss:$16 sps:$4 sm:$0xff]  }
0x12c7   :  { %6084 = vmatpush1.bf16.msra.mxu0 %v15281_v7  ;;  %5921 = vmatprep.subr.bf16.mxu1 %v15286_v10 }
0x12c8   :  { %6085 = vmatprep.subr.bf16.mxu0 %v15289_v5 }
0x12ca   :  { %5922 = vmatpush1.bf16.msra.mxu1 %v15284_v52 }
0x12cb   :  { %6086 = vmatpush1.bf16.msra.mxu0 %v15287_v57  ;;  %5932 = vmatprep.subr.bf16.mxu1 %v15292_v14 }
0x12cc   :  { %6096 = vmatprep.subr.bf16.mxu0 %v15295_v30  ;;  %v15338_v30 = vld [vmem:[#allocation11 + $0x300] ss:$16 sps:$4 sm:$0xff]  }
0x12f4   :  { %v4015_v35 = vpop.f32.mrb[24].mxu1  ;;  %v18409_v11 = vpop.f32.mrb[20].mxu0 }
0x12f5   :  { %v4016_v3 = vadd.f32 %v4015_v35, %v3181_v16  ;;  %v4017_v15 = vpop.f32.mrb[25].mxu1  ;;  %v4058_v40 = vpop.f32.mrb[21].mxu0  ;;  %v15341_v16 = vld [vmem:[#allocation11 + $0x308] ss:$16 sps:$4 sm:$0xff]   ;;  %v15346_v35 = vld [vmem:[#allocation11 + $0x324] ss:$16 sps:$4 sm:$0xff]  }
0x12f6   :  { %v4018_v24 = vadd.f32 %v4017_v15, %v3185_v55  ;;  %v4059_v23 = vadd.f32 %v4058_v40, %v3193_v61  ;;  %v4019_v56 = vpop.f32.mrb[26].mxu1  ;;  %v4060_v8 = vpop.f32.mrb[22].mxu0  ;;  %v15344_v15 = vld [vmem:[#allocation11 + $0x320] ss:$16 sps:$4 sm:$0xff]   ;;  %v15347_v40 = vld [vmem:[#allocation11 + $0x328] ss:$16 sps:$4 sm:$0xff]  }
0x12f7   :  { %v4309_v45 = vmax.f32 %v4016_v3, 0.0  ;;  %v4020_v1 = vpop.f32.mrb[27].mxu1  ;;  %v4061_v48 = vpop.f32.mrb[23].mxu0  ;;  %v15349_v3 = vld [vmem:[#allocation11 + $0x32c] ss:$16 sps:$4 sm:$0xff]  }
0x12f8   :  { %v4310_v50 = vmax.f32 %v4018_v24, 0.0  ;;  %v4312_v22 = vmax.f32 %v4059_v23, 0.0  ;;  %v15352_v24 = vld [vmem:[#allocation11 + $0x344] ss:$16 sps:$4 sm:$0xff]   ;;  %v15355_v23 = vld [vmem:[#allocation11 + $0x34c] ss:$16 sps:$4 sm:$0xff]  }
0x12f9   :  { %v4325_v12 = vpack.c.bf16 %v4309_v45, %v4309_v45  ;;  %v15350_v56 = vld [vmem:[#allocation11 + $0x340] ss:$16 sps:$4 sm:$0xff]   ;;  %v15353_v8 = vld [vmem:[#allocation11 + $0x348] ss:$16 sps:$4 sm:$0xff]   ;;  %v15358_v45 = vld [vmem:[#allocation11 + $0x364] ss:$16 sps:$4 sm:$0xff]  }
0x12fa   :  { %v4326_v2 = vpack.c.bf16 %v4310_v50, %v4310_v50  ;;  %v4328_v21 = vpack.c.bf16 %v4312_v22, %v4312_v22  ;;  %v15361_v1 = vld [vmem:[#allocation11 + $0x36c] ss:$16 sps:$4 sm:$0xff]   ;;  %v15356_v48 = vld [vmem:[#allocation11 + $0x360] ss:$16 sps:$4 sm:$0xff]   ;;  %v15359_v50 = vld [vmem:[#allocation11 + $0x368] ss:$16 sps:$4 sm:$0xff]  }
0x12fb   :  { %v15364_v22 = vld [vmem:[#allocation11 + $0x384] ss:$16 sps:$4 sm:$0xff]  }
0x12fc   :  { %5923 = vmatprep.mubr.bf16.mxu1 %v4326_v2  ;;  %6087 = vmatprep.mubr.bf16.mxu0 %v4326_v2  ;;  %v15367_v2 = vld [vmem:[#allocation11 + $0x38c] ss:$16 sps:$4 sm:$0xff]  }
0x12fd   :  { %5924 = vmatmul.mubr.bf16.vlgmr.msra.gmra.mrb[40].mxu1 %v4325_v12  ;;  %6088 = vmatmul.mubr.bf16.vlgmr.msra.gmra.mrb[36].mxu0 %v4325_v12  ;;  %v18420_v12 = vsub.s32 2, %v17283_v6 }
0x12fe   :  { %5933 = vmatpush1.bf16.msra.mxu1 %v15290_v44  ;;  %6097 = vmatpush1.bf16.msra.mxu0 %v15293_v34  ;;  %v15362_v44 = vld [vmem:[#allocation11 + $0x380] ss:$16 sps:$4 sm:$0xff]   ;;  %v15365_v34 = vld [vmem:[#allocation11 + $0x388] ss:$16 sps:$4 sm:$0xff]  }
0x12ff   :  { %5964 = vmatprep.mubr.bf16.mxu1 %v4328_v21  ;;  %6128 = vmatprep.mubr.bf16.mxu0 %v4328_v21  ;;  %v18423_v21 = vsub.s32 5, %v17283_v6 }
0x1300   :  { %5934 = vmatprep.subr.bf16.mxu1 %v15298_v25  ;;  %6098 = vmatprep.subr.bf16.mxu0 %v15301_v33  ;;  %v15370_v25 = vld [vmem:[#allocation11 + $0x3a4] ss:$16 sps:$4 sm:$0xff]   ;;  %v15373_v33 = vld [vmem:[#allocation11 + $0x3ac] ss:$16 sps:$4 sm:$0xff]  }
0x1302   :  { %5935 = vmatpush1.bf16.msra.mxu1 %v15296_v13  ;;  %6099 = vmatpush1.bf16.msra.mxu0 %v15299_v42  ;;  %v15368_v13 = vld [vmem:[#allocation11 + $0x3a0] ss:$16 sps:$4 sm:$0xff]   ;;  %v15371_v42 = vld [vmem:[#allocation11 + $0x3a8] ss:$16 sps:$4 sm:$0xff]  }
0x1303   :  { %5936 = vmatprep.subr.bf16.mxu1 %v15304_v51  ;;  %6100 = vmatprep.subr.bf16.mxu0 %v15307_v9  ;;  %v3189_v51 = vrot.slane %v18398_v62, %v18420_v12  ;;  %v15376_v9 = vld [vmem:[#allocation11 + $0x3c4] ss:$16 sps:$4 sm:$0xff]  }
0x1306   :  { %5937 = vmatpush1.bf16.msra.mxu1 %v15302_v38  ;;  %6101 = vmatpush1.bf16.msra.mxu0 %v15305_v28  ;;  %v15379_v38 = vld [vmem:[#allocation11 + $0x3cc] ss:$16 sps:$4 sm:$0xff]   ;;  %v3201_v28 = vrot.slane %v18398_v62, %v18423_v21 }
0x1307   :  { %5938 = vmatprep.subr.bf16.mxu1 %v15310_v58  ;;  %6102 = vmatprep.subr.bf16.mxu0 %v15313_v32  ;;  %v15374_v58 = vld [vmem:[#allocation11 + $0x3c0] ss:$16 sps:$4 sm:$0xff]   ;;  %v15377_v32 = vld [vmem:[#allocation11 + $0x3c8] ss:$16 sps:$4 sm:$0xff]  }
0x130a   :  { %5939 = vmatpush1.bf16.msra.mxu1 %v15308_v60  ;;  %6103 = vmatpush1.bf16.msra.mxu0 %v15311_v4  ;;  %v4057_v60 = vadd.f32 %v18409_v11, %v3189_v51  ;;  %v15382_v4 = vld [vmem:[#allocation11 + $0x3e4] ss:$16 sps:$4 sm:$0xff]   ;;  %v15391_v11 = vld [vmem:[#allocation11 + $0x40c] ss:$16 sps:$4 sm:$0xff]  }
0x130b   :  { %5940 = vmatprep.subr.bf16.mxu1 %v15316_v17  ;;  %6104 = vmatprep.subr.bf16.mxu0 %v15319_v18  ;;  %v15385_v17 = vld [vmem:[#allocation11 + $0x3ec] ss:$16 sps:$4 sm:$0xff]  }
0x130c   :  { %v15427_v51 = vld [vmem:[#allocation11 + $0x4cc] ss:$16 sps:$4 sm:$0xff]  }
0x130e   :  { %5941 = vmatpush1.bf16.msra.mxu1 %v15314_v41  ;;  %6105 = vmatpush1.bf16.msra.mxu0 %v15317_v27  ;;  %v15380_v41 = vld [vmem:[#allocation11 + $0x3e0] ss:$16 sps:$4 sm:$0xff]   ;;  %v15383_v27 = vld [vmem:[#allocation11 + $0x3e8] ss:$16 sps:$4 sm:$0xff]  }
0x130f   :  { %5942 = vmatprep.subr.bf16.mxu1 %v15322_v20  ;;  %6106 = vmatprep.subr.bf16.mxu0 %v15325_v39  ;;  %v4311_v20 = vmax.f32 %v4057_v60, 0.0  ;;  %v18434_v39 = vld [vmem:[%s18670_s10 + $0x8] sm:$0xff] }
0x1310   :  { %v15431_v60 = vld [vmem:[#allocation11 + $0x4e8] ss:$16 sps:$4 sm:$0xff]  }
0x1312   :  { %5943 = vmatpush1.bf16.msra.mxu1 %v15320_v26  ;;  %6107 = vmatpush1.bf16.msra.mxu0 %v15323_v37  ;;  %v15388_v26 = vld [vmem:[#allocation11 + $0x404] ss:$16 sps:$4 sm:$0xff]  }
0x1313   :  { %5944 = vmatprep.subr.bf16.mxu1 %v15328_v43  ;;  %6108 = vmatprep.subr.bf16.mxu0 %v15331_v49  ;;  %v3221_v43 = vrot.slane %v18434_v39, %v18420_v12  ;;  %v15386_v49 = vld [vmem:[#allocation11 + $0x400] ss:$16 sps:$4 sm:$0xff]  }
0x1316   :  { %5945 = vmatpush1.bf16.msra.mxu1 %v15326_v53  ;;  %6109 = vmatpush1.bf16.msra.mxu0 %v15329_v46  ;;  %v4327_v53 = vpack.c.bf16 %v4311_v20, %v4311_v20  ;;  %v3225_v46 = vrot.slane %v18434_v39, %v18401_v36  ;;  %v15442_v20 = vld [vmem:[#allocation11 + $0x524] ss:$16 sps:$4 sm:$0xff]  }
0x1317   :  { %5946 = vmatprep.subr.bf16.mxu1 %v15334_v19  ;;  %6110 = vmatprep.subr.bf16.mxu0 %v15337_v0  ;;  %v15389_v19 = vld [vmem:[#allocation11 + $0x408] ss:$16 sps:$4 sm:$0xff]  }
0x1318   :  { %v18411_v7 = vpop.f32.mrb[28].mxu1  ;;  %v18413_v10 = vpop.f32.mrb[24].mxu0 }
0x1319   :  { %v18415_v5 = vpop.f32.mrb[29].mxu1  ;;  %v18417_v52 = vpop.f32.mrb[25].mxu0 }
0x131a   :  { %v4101_v57 = vpop.f32.mrb[30].mxu1  ;;  %v4142_v14 = vpop.f32.mrb[26].mxu0  ;;  %5947 = vmatpush1.bf16.msra.mxu1 %v15332_v29  ;;  %6111 = vmatpush1.bf16.msra.mxu0 %v15335_v47  ;;  %v4100_v18 = vadd.f32 %v18415_v5, %v3201_v28  ;;  %v15394_v47 = vld [vmem:[#allocation11 + $0x424] ss:$16 sps:$4 sm:$0xff]  }
0x131b   :  { %v4102_v55 = vpop.f32.mrb[31].mxu1  ;;  %v4143_v61 = vpop.f32.mrb[27].mxu0  ;;  %5948 = vmatprep.subr.bf16.mxu1 %v15340_v63  ;;  %6112 = vmatprep.subr.bf16.mxu0 %v15343_v59  ;;  %v15397_v63 = vld [vmem:[#allocation11 + $0x42c] ss:$16 sps:$4 sm:$0xff]   ;;  %v15430_v28 = vld [vmem:[#allocation11 + $0x4e4] ss:$16 sps:$4 sm:$0xff]  }
0x131c   :  { %v4314_v37 = vmax.f32 %v4100_v18, 0.0  ;;  %v15434_v18 = vld [vmem:[#allocation11 + $0x500] ss:$16 sps:$4 sm:$0xff]  }
0x131e   :  { %5949 = vmatpush1.bf16.msra.mxu1 %v15338_v30  ;;  %6113 = vmatpush1.bf16.msra.mxu0 %v15341_v16  ;;  %v4330_v0 = vpack.c.bf16 %v4314_v37, %v4314_v37  ;;  %v15392_v16 = vld [vmem:[#allocation11 + $0x420] ss:$16 sps:$4 sm:$0xff]   ;;  %v18455_v37 = vsub.s32 7, %v17283_v6 }
0x131f   :  { %5950 = vmatprep.subr.bf16.mxu1 %v15346_v35  ;;  %6114 = vmatprep.subr.bf16.mxu0 %v15349_v3  ;;  %v15395_v3 = vld [vmem:[#allocation11 + $0x428] ss:$16 sps:$4 sm:$0xff]  }
0x1322   :  { %5951 = vmatpush1.bf16.msra.mxu1 %v15344_v15  ;;  %6115 = vmatpush1.bf16.msra.mxu0 %v15347_v40  ;;  %v15400_v15 = vld [vmem:[#allocation11 + $0x444] ss:$16 sps:$4 sm:$0xff]  }
0x1323   :  { %5952 = vmatprep.subr.bf16.mxu1 %v15352_v24  ;;  %6116 = vmatprep.subr.bf16.mxu0 %v15355_v23  ;;  %v15403_v24 = vld [vmem:[#allocation11 + $0x44c] ss:$16 sps:$4 sm:$0xff]   ;;  %v15398_v23 = vld [vmem:[#allocation11 + $0x440] ss:$16 sps:$4 sm:$0xff]  }
0x1326   :  { %5953 = vmatpush1.bf16.msra.mxu1 %v15350_v56  ;;  %6117 = vmatpush1.bf16.msra.mxu0 %v15353_v8  ;;  %v15401_v56 = vld [vmem:[#allocation11 + $0x448] ss:$16 sps:$4 sm:$0xff]   ;;  %v15406_v8 = vld [vmem:[#allocation11 + $0x464] ss:$16 sps:$4 sm:$0xff]  }
0x1327   :  { %5954 = vmatprep.subr.bf16.mxu1 %v15358_v45  ;;  %6118 = vmatprep.subr.bf16.mxu0 %v15361_v1  ;;  %v15409_v45 = vld [vmem:[#allocation11 + $0x46c] ss:$16 sps:$4 sm:$0xff]   ;;  %v15404_v1 = vld [vmem:[#allocation11 + $0x460] ss:$16 sps:$4 sm:$0xff]  }
0x132a   :  { %5955 = vmatpush1.bf16.msra.mxu1 %v15356_v48  ;;  %6119 = vmatpush1.bf16.msra.mxu0 %v15359_v50  ;;  %v15407_v48 = vld [vmem:[#allocation11 + $0x468] ss:$16 sps:$4 sm:$0xff]   ;;  %v15412_v50 = vld [vmem:[#allocation11 + $0x484] ss:$16 sps:$4 sm:$0xff]  }
0x132b   :  { %5956 = vmatprep.subr.bf16.mxu1 %v15364_v22  ;;  %6120 = vmatprep.subr.bf16.mxu0 %v15367_v2  ;;  %v15415_v22 = vld [vmem:[#allocation11 + $0x48c] ss:$16 sps:$4 sm:$0xff]   ;;  %v15410_v2 = vld [vmem:[#allocation11 + $0x480] ss:$16 sps:$4 sm:$0xff]  }
0x132e   :  { %5957 = vmatpush1.bf16.msra.mxu1 %v15362_v44  ;;  %6121 = vmatpush1.bf16.msra.mxu0 %v15365_v34  ;;  %v15413_v44 = vld [vmem:[#allocation11 + $0x488] ss:$16 sps:$4 sm:$0xff]   ;;  %v15418_v34 = vld [vmem:[#allocation11 + $0x4a4] ss:$16 sps:$4 sm:$0xff]  }
0x132f   :  { %5958 = vmatprep.subr.bf16.mxu1 %v15370_v25  ;;  %6122 = vmatprep.subr.bf16.mxu0 %v15373_v33  ;;  %v15421_v25 = vld [vmem:[#allocation11 + $0x4ac] ss:$16 sps:$4 sm:$0xff]   ;;  %v15416_v33 = vld [vmem:[#allocation11 + $0x4a0] ss:$16 sps:$4 sm:$0xff]  }
0x1332   :  { %5959 = vmatpush1.bf16.msra.mxu1 %v15368_v13  ;;  %6123 = vmatpush1.bf16.msra.mxu0 %v15371_v42  ;;  %v15419_v13 = vld [vmem:[#allocation11 + $0x4a8] ss:$16 sps:$4 sm:$0xff]   ;;  %v15424_v42 = vld [vmem:[#allocation11 + $0x4c4] ss:$16 sps:$4 sm:$0xff]  }
0x1333   :  { %5960 = vmatprep.subr.bf16.mxu1 %v15376_v9  ;;  %6124 = vmatprep.subr.bf16.mxu0 %v15379_v38  ;;  %v15422_v9 = vld [vmem:[#allocation11 + $0x4c0] ss:$16 sps:$4 sm:$0xff]   ;;  %v15425_v38 = vld [vmem:[#allocation11 + $0x4c8] ss:$16 sps:$4 sm:$0xff]  }
0x1336   :  { %5961 = vmatpush1.bf16.msra.mxu1 %v15374_v58  ;;  %6125 = vmatpush1.bf16.msra.mxu0 %v15377_v32  ;;  %v15433_v58 = vld [vmem:[#allocation11 + $0x4ec] ss:$16 sps:$4 sm:$0xff]   ;;  %v15428_v32 = vld [vmem:[#allocation11 + $0x4e0] ss:$16 sps:$4 sm:$0xff]  }
0x1337   :  { %5962 = vmatprep.subr.bf16.mxu1 %v15382_v4  ;;  %6126 = vmatprep.subr.bf16.mxu0 %v15385_v17  ;;  %v15436_v4 = vld [vmem:[#allocation11 + $0x504] ss:$16 sps:$4 sm:$0xff]   ;;  %v15439_v17 = vld [vmem:[#allocation11 + $0x50c] ss:$16 sps:$4 sm:$0xff]  }
0x133a   :  { %5963 = vmatpush1.bf16.msra.mxu1 %v15380_v41  ;;  %6127 = vmatpush1.bf16.msra.mxu0 %v15383_v27  ;;  %v18449_v41 = vsub.s32 4, %v17283_v6  ;;  %v15437_v27 = vld [vmem:[#allocation11 + $0x508] ss:$16 sps:$4 sm:$0xff]  }
0x133b   :  { %5973 = vmatprep.subr.bf16.mxu1 %v15388_v26  ;;  %6137 = vmatprep.subr.bf16.mxu0 %v15391_v11  ;;  %v18452_v26 = vsub.s32 6, %v17283_v6  ;;  %v15445_v11 = vld [vmem:[#allocation11 + $0x52c] ss:$16 sps:$4 sm:$0xff]  }
0x133c   :  { %v18440_v29 = vpop.f32.mrb[32].mxu1 }
0x133d   :  { %v4220_v59 = vpop.f32.mrb[28].mxu0  ;;  %v18442_v5 = vpop.f32.mrb[33].mxu1  ;;  %5965 = vmatmul.mubr.bf16.vlgmr.msra.gmra.mrb[40].mxu1 %v4327_v53  ;;  %6129 = vmatmul.mubr.bf16.vlgmr.msra.gmra.mrb[36].mxu0 %v4327_v53  ;;  %v3233_v53 = vrot.slane %v18434_v39, %v18423_v21 }
0x133e   :  { %v18444_v57 = vadd.f32 %v4220_v59, %v3221_v43  ;;  %v4222_v14 = vpop.f32.mrb[29].mxu0  ;;  %v4183_v30 = vpop.f32.mrb[34].mxu1  ;;  %5974 = vmatpush1.bf16.msra.mxu1 %v15386_v49  ;;  %6005 = vmatprep.mubr.bf16.mxu1 %v4330_v0  ;;  %v3229_v43 = vrot.slane %v18434_v39, %v18449_v41  ;;  %v3237_v49 = vrot.slane %v18434_v39, %v18452_v26 }
0x133f   :  { %v18446_v55 = vadd.f32 %v4222_v14, %v3225_v46  ;;  %v4224_v61 = vpop.f32.mrb[30].mxu0  ;;  %6138 = vmatpush1.bf16.msra.mxu0 %v15389_v19  ;;  %6169 = vmatprep.mubr.bf16.mxu0 %v4330_v0  ;;  %v4184_v35 = vpop.f32.mrb[35].mxu1  ;;  %v15440_v46 = vld [vmem:[#allocation11 + $0x520] ss:$16 sps:$4 sm:$0xff]   ;;  %v3241_v19 = vrot.slane %v18434_v39, %v18455_v37  ;;  %v15443_v0 = vld [vmem:[#allocation11 + $0x528] ss:$16 sps:$4 sm:$0xff]  }
0x1340   :  { %v4225_v40 = vpop.f32.mrb[31].mxu0  ;;  %5975 = vmatprep.subr.bf16.mxu1 %v15394_v47  ;;  %6139 = vmatprep.subr.bf16.mxu0 %v15397_v63  ;;  %v15448_v47 = vld [vmem:[#allocation11 + $0x544] ss:$16 sps:$4 sm:$0xff]   ;;  %v15451_v63 = vld [vmem:[#allocation11 + $0x54c] ss:$16 sps:$4 sm:$0xff]  }
0x1342   :  { %5976 = vmatpush1.bf16.msra.mxu1 %v15392_v16 }
0x1343   :  { %6140 = vmatpush1.bf16.msra.mxu0 %v15395_v3  ;;  %5977 = vmatprep.subr.bf16.mxu1 %v15400_v15  ;;  %v15446_v15 = vld [vmem:[#allocation11 + $0x540] ss:$16 sps:$4 sm:$0xff]  }
0x1344   :  { %6141 = vmatprep.subr.bf16.mxu0 %v15403_v24 }
0x1346   :  { %5978 = vmatpush1.bf16.msra.mxu1 %v15398_v23  ;;  %v15449_v23 = vld [vmem:[#allocation11 + $0x548] ss:$16 sps:$4 sm:$0xff]  }
0x1347   :  { %6142 = vmatpush1.bf16.msra.mxu0 %v15401_v56  ;;  %5979 = vmatprep.subr.bf16.mxu1 %v15406_v8  ;;  %v15454_v56 = vld [vmem:[#allocation11 + $0x564] ss:$16 sps:$4 sm:$0xff]  }
0x1348   :  { %6143 = vmatprep.subr.bf16.mxu0 %v15409_v45  ;;  %v15457_v45 = vld [vmem:[#allocation11 + $0x56c] ss:$16 sps:$4 sm:$0xff]  }
0x134a   :  { %5980 = vmatpush1.bf16.msra.mxu1 %v15404_v1  ;;  %v15452_v1 = vld [vmem:[#allocation11 + $0x560] ss:$16 sps:$4 sm:$0xff]  }
0x134b   :  { %6144 = vmatpush1.bf16.msra.mxu0 %v15407_v48  ;;  %5981 = vmatprep.subr.bf16.mxu1 %v15412_v50  ;;  %v15455_v48 = vld [vmem:[#allocation11 + $0x568] ss:$16 sps:$4 sm:$0xff]   ;;  %v15460_v50 = vld [vmem:[#allocation11 + $0x584] ss:$16 sps:$4 sm:$0xff]  }
0x134c   :  { %6145 = vmatprep.subr.bf16.mxu0 %v15415_v22  ;;  %v15463_v22 = vld [vmem:[#allocation11 + $0x58c] ss:$16 sps:$4 sm:$0xff]  }
0x134e   :  { %5982 = vmatpush1.bf16.msra.mxu1 %v15410_v2  ;;  %v15458_v2 = vld [vmem:[#allocation11 + $0x580] ss:$16 sps:$4 sm:$0xff]  }
0x134f   :  { %6146 = vmatpush1.bf16.msra.mxu0 %v15413_v44  ;;  %5983 = vmatprep.subr.bf16.mxu1 %v15418_v34  ;;  %v15461_v44 = vld [vmem:[#allocation11 + $0x588] ss:$16 sps:$4 sm:$0xff]   ;;  %v15466_v34 = vld [vmem:[#allocation11 + $0x5a4] ss:$16 sps:$4 sm:$0xff]  }
0x1350   :  { %6147 = vmatprep.subr.bf16.mxu0 %v15421_v25  ;;  %v15469_v25 = vld [vmem:[#allocation11 + $0x5ac] ss:$16 sps:$4 sm:$0xff]  }
0x1352   :  { %5984 = vmatpush1.bf16.msra.mxu1 %v15416_v33  ;;  %v15464_v33 = vld [vmem:[#allocation11 + $0x5a0] ss:$16 sps:$4 sm:$0xff]  }
0x1353   :  { %6148 = vmatpush1.bf16.msra.mxu0 %v15419_v13  ;;  %5985 = vmatprep.subr.bf16.mxu1 %v15424_v42  ;;  %v3197_v13 = vrot.slane %v18398_v62, %v18449_v41  ;;  %v15467_v42 = vld [vmem:[#allocation11 + $0x5a8] ss:$16 sps:$4 sm:$0xff]  }
0x1354   :  { %6149 = vmatprep.subr.bf16.mxu0 %v15427_v51  ;;  %v15472_v51 = vld [vmem:[#allocation11 + $0x5c4] ss:$16 sps:$4 sm:$0xff]  }
0x1356   :  { %5986 = vmatpush1.bf16.msra.mxu1 %v15422_v9  ;;  %v15475_v9 = vld [vmem:[#allocation11 + $0x5cc] ss:$16 sps:$4 sm:$0xff]  }
0x1357   :  { %6150 = vmatpush1.bf16.msra.mxu0 %v15425_v38  ;;  %5987 = vmatprep.subr.bf16.mxu1 %v15430_v28  ;;  %v3209_v38 = vrot.slane %v18398_v62, %v18455_v37  ;;  %v15470_v28 = vld [vmem:[#allocation11 + $0x5c0] ss:$16 sps:$4 sm:$0xff]  }
0x1358   :  { %6151 = vmatprep.subr.bf16.mxu0 %v15433_v58  ;;  %v4098_v58 = vadd.f32 %v18411_v7, %v3197_v13  ;;  %v15482_v7 = vld [vmem:[#allocation11 + $0x600] ss:$16 sps:$4 sm:$0xff]   ;;  %v15529_v13 = vld [vmem:[#allocation11 + $0x6ec] ss:$16 sps:$4 sm:$0xff]  }
0x135a   :  { %5988 = vmatpush1.bf16.msra.mxu1 %v15428_v32  ;;  %v15473_v32 = vld [vmem:[#allocation11 + $0x5c8] ss:$16 sps:$4 sm:$0xff]  }
0x135b   :  { %6152 = vmatpush1.bf16.msra.mxu0 %v15431_v60  ;;  %5989 = vmatprep.subr.bf16.mxu1 %v15436_v4  ;;  %v15478_v60 = vld [vmem:[#allocation11 + $0x5e4] ss:$16 sps:$4 sm:$0xff]   ;;  %v15481_v4 = vld [vmem:[#allocation11 + $0x5ec] ss:$16 sps:$4 sm:$0xff]  }
0x135c   :  { %6153 = vmatprep.subr.bf16.mxu0 %v15439_v17  ;;  %v4141_v17 = vadd.f32 %v18417_v52, %v3209_v38  ;;  %v15493_v52 = vld [vmem:[#allocation11 + $0x62c] ss:$16 sps:$4 sm:$0xff]  }
0x135d   :  { %v15535_v38 = vld [vmem:[#allocation11 + $0x70c] ss:$16 sps:$4 sm:$0xff]  }
0x135e   :  { %5990 = vmatpush1.bf16.msra.mxu1 %v15434_v18  ;;  %v15476_v18 = vld [vmem:[#allocation11 + $0x5e0] ss:$16 sps:$4 sm:$0xff]  }
0x135f   :  { %6154 = vmatpush1.bf16.msra.mxu0 %v15437_v27  ;;  %5991 = vmatprep.subr.bf16.mxu1 %v15442_v20  ;;  %v4313_v27 = vmax.f32 %v4098_v58, 0.0  ;;  %v15479_v20 = vld [vmem:[#allocation11 + $0x5e8] ss:$16 sps:$4 sm:$0xff]  }
0x1360   :  { %v4261_v6 = vpop.f32.mrb[36].mxu1  ;;  %6155 = vmatprep.subr.bf16.mxu0 %v15445_v11  ;;  %v15484_v11 = vld [vmem:[#allocation11 + $0x604] ss:$16 sps:$4 sm:$0xff]   ;;  %v15533_v58 = vld [vmem:[#allocation11 + $0x708] ss:$16 sps:$4 sm:$0xff]  }
0x1361   :  { %v18465_v59 = vadd.f32 %v4261_v6, %v3229_v43  ;;  %v4302_v14 = vpop.f32.mrb[32].mxu0  ;;  %v4263_v30 = vpop.f32.mrb[37].mxu1  ;;  %v15487_v43 = vld [vmem:[#allocation11 + $0x60c] ss:$16 sps:$4 sm:$0xff]   ;;  %v15491_v6 = vld [vmem:[#allocation11 + $0x628] ss:$16 sps:$4 sm:$0xff]  }
0x1362   :  { %v18467_v16 = vadd.f32 %v4302_v14, %v3237_v49  ;;  %v18469_v61 = vadd.f32 %v4263_v30, %v3233_v53  ;;  %v4304_v35 = vpop.f32.mrb[33].mxu0  ;;  %v4265_v3 = vpop.f32.mrb[38].mxu1  ;;  %5992 = vmatpush1.bf16.msra.mxu1 %v15440_v46  ;;  %v4316_v49 = vmax.f32 %v4141_v17, 0.0  ;;  %v4329_v53 = vpack.c.bf16 %v4313_v27, %v4313_v27  ;;  %v15485_v46 = vld [vmem:[#allocation11 + $0x608] ss:$16 sps:$4 sm:$0xff]  }
0x1363   :  { %v18471_v40 = vadd.f32 %v4304_v35, %v3241_v19  ;;  %v4306_v39 = vpop.f32.mrb[34].mxu0  ;;  %6156 = vmatpush1.bf16.msra.mxu0 %v15443_v0  ;;  %v4266_v24 = vpop.f32.mrb[39].mxu1  ;;  %5993 = vmatprep.subr.bf16.mxu1 %v15448_v47  ;;  %v15490_v19 = vld [vmem:[#allocation11 + $0x624] ss:$16 sps:$4 sm:$0xff]   ;;  %v15488_v47 = vld [vmem:[#allocation11 + $0x620] ss:$16 sps:$4 sm:$0xff]  }
0x1364   :  { %v4307_v8 = vpop.f32.mrb[35].mxu0  ;;  %6157 = vmatprep.subr.bf16.mxu0 %v15451_v63  ;;  %v4332_v0 = vpack.c.bf16 %v4316_v49, %v4316_v49  ;;  %v15496_v63 = vld [vmem:[#allocation11 + $0x644] ss:$16 sps:$4 sm:$0xff]   ;;  %v15499_v14 = vld [vmem:[#allocation11 + $0x64c] ss:$16 sps:$4 sm:$0xff]  }
0x1365   :  { %v15494_v30 = vld [vmem:[#allocation11 + $0x640] ss:$16 sps:$4 sm:$0xff]   ;;  %v15497_v35 = vld [vmem:[#allocation11 + $0x648] ss:$16 sps:$4 sm:$0xff]   ;;  %v15502_v3 = vld [vmem:[#allocation11 + $0x664] ss:$16 sps:$4 sm:$0xff]  }
0x1366   :  { %5994 = vmatpush1.bf16.msra.mxu1 %v15446_v15  ;;  %v15505_v15 = vld [vmem:[#allocation11 + $0x66c] ss:$16 sps:$4 sm:$0xff]   ;;  %v15500_v39 = vld [vmem:[#allocation11 + $0x660] ss:$16 sps:$4 sm:$0xff]   ;;  %v15503_v24 = vld [vmem:[#allocation11 + $0x668] ss:$16 sps:$4 sm:$0xff]  }
0x1367   :  { %6158 = vmatpush1.bf16.msra.mxu0 %v15449_v23  ;;  %5995 = vmatprep.subr.bf16.mxu1 %v15454_v56  ;;  %v15508_v23 = vld [vmem:[#allocation11 + $0x684] ss:$16 sps:$4 sm:$0xff]   ;;  %v15511_v56 = vld [vmem:[#allocation11 + $0x68c] ss:$16 sps:$4 sm:$0xff]   ;;  %v15506_v8 = vld [vmem:[#allocation11 + $0x680] ss:$16 sps:$4 sm:$0xff]  }
0x1368   :  { %6159 = vmatprep.subr.bf16.mxu0 %v15457_v45  ;;  %v15509_v45 = vld [vmem:[#allocation11 + $0x688] ss:$16 sps:$4 sm:$0xff]   ;;  %v15547_v27 = vld [vmem:[#allocation11 + $0x74c] ss:$16 sps:$4 sm:$0xff]  }
0x1369   :  { %v15539_v17 = vld [vmem:[#allocation11 + $0x728] ss:$16 sps:$4 sm:$0xff]   ;;  %v15553_v49 = vld [vmem:[#allocation11 + $0x76c] ss:$16 sps:$4 sm:$0xff]  }
0x136a   :  { %5996 = vmatpush1.bf16.msra.mxu1 %v15452_v1  ;;  %v15514_v1 = vld [vmem:[#allocation11 + $0x6a4] ss:$16 sps:$4 sm:$0xff]  }
0x136b   :  { %6160 = vmatpush1.bf16.msra.mxu0 %v15455_v48  ;;  %5997 = vmatprep.subr.bf16.mxu1 %v15460_v50  ;;  %v15517_v48 = vld [vmem:[#allocation11 + $0x6ac] ss:$16 sps:$4 sm:$0xff]   ;;  %v15512_v50 = vld [vmem:[#allocation11 + $0x6a0] ss:$16 sps:$4 sm:$0xff]  }
0x136c   :  { %6161 = vmatprep.subr.bf16.mxu0 %v15463_v22  ;;  %v15515_v22 = vld [vmem:[#allocation11 + $0x6a8] ss:$16 sps:$4 sm:$0xff]  }
0x136e   :  { %5998 = vmatpush1.bf16.msra.mxu1 %v15458_v2  ;;  %v15520_v2 = vld [vmem:[#allocation11 + $0x6c4] ss:$16 sps:$4 sm:$0xff]  }
0x136f   :  { %6162 = vmatpush1.bf16.msra.mxu0 %v15461_v44  ;;  %5999 = vmatprep.subr.bf16.mxu1 %v15466_v34  ;;  %v15523_v44 = vld [vmem:[#allocation11 + $0x6cc] ss:$16 sps:$4 sm:$0xff]   ;;  %v15518_v34 = vld [vmem:[#allocation11 + $0x6c0] ss:$16 sps:$4 sm:$0xff]  }
0x1370   :  { %6163 = vmatprep.subr.bf16.mxu0 %v15469_v25  ;;  %v15521_v25 = vld [vmem:[#allocation11 + $0x6c8] ss:$16 sps:$4 sm:$0xff]  }
0x1372   :  { %6000 = vmatpush1.bf16.msra.mxu1 %v15464_v33  ;;  %v15526_v33 = vld [vmem:[#allocation11 + $0x6e4] ss:$16 sps:$4 sm:$0xff]  }
0x1373   :  { %6164 = vmatpush1.bf16.msra.mxu0 %v15467_v42  ;;  %6001 = vmatprep.subr.bf16.mxu1 %v15472_v51  ;;  %v15524_v42 = vld [vmem:[#allocation11 + $0x6e0] ss:$16 sps:$4 sm:$0xff]   ;;  %v15527_v51 = vld [vmem:[#allocation11 + $0x6e8] ss:$16 sps:$4 sm:$0xff]  }
0x1374   :  { %6165 = vmatprep.subr.bf16.mxu0 %v15475_v9  ;;  %v15532_v9 = vld [vmem:[#allocation11 + $0x704] ss:$16 sps:$4 sm:$0xff]  }
0x1376   :  { %6002 = vmatpush1.bf16.msra.mxu1 %v15470_v28  ;;  %v15530_v28 = vld [vmem:[#allocation11 + $0x700] ss:$16 sps:$4 sm:$0xff]  }
0x1377   :  { %6166 = vmatpush1.bf16.msra.mxu0 %v15473_v32  ;;  %6003 = vmatprep.subr.bf16.mxu1 %v15478_v60  ;;  %v15538_v32 = vld [vmem:[#allocation11 + $0x724] ss:$16 sps:$4 sm:$0xff]   ;;  %v15541_v60 = vld [vmem:[#allocation11 + $0x72c] ss:$16 sps:$4 sm:$0xff]  }
0x1378   :  { %6167 = vmatprep.subr.bf16.mxu0 %v15481_v4  ;;  %v15536_v4 = vld [vmem:[#allocation11 + $0x720] ss:$16 sps:$4 sm:$0xff]  }
0x137a   :  { %6004 = vmatpush1.bf16.msra.mxu1 %v15476_v18  ;;  %v15544_v18 = vld [vmem:[#allocation11 + $0x744] ss:$16 sps:$4 sm:$0xff]  }
0x137b   :  { %6168 = vmatpush1.bf16.msra.mxu0 %v15479_v20  ;;  %6014 = vmatprep.subr.bf16.mxu1 %v15484_v11  ;;  %v15542_v20 = vld [vmem:[#allocation11 + $0x740] ss:$16 sps:$4 sm:$0xff]   ;;  %v15545_v11 = vld [vmem:[#allocation11 + $0x748] ss:$16 sps:$4 sm:$0xff]  }
0x137c   :  { %6178 = vmatprep.subr.bf16.mxu0 %v15487_v43  ;;  %v15550_v43 = vld [vmem:[#allocation11 + $0x764] ss:$16 sps:$4 sm:$0xff]  }
0x137d   :  { %6006 = vmatmul.mubr.bf16.vlgmr.msra.gmra.mrb[40].mxu1 %v4329_v53 }
0x137e   :  { %6170 = vmatmul.mubr.bf16.vlgmr.msra.gmra.mrb[36].mxu0 %v4329_v53  ;;  %6015 = vmatpush1.bf16.msra.mxu1 %v15482_v7  ;;  %v15548_v7 = vld [vmem:[#allocation11 + $0x760] ss:$16 sps:$4 sm:$0xff]   ;;  %v15551_v53 = vld [vmem:[#allocation11 + $0x768] ss:$16 sps:$4 sm:$0xff]  }
0x137f   :  { %6046 = vmatprep.mubr.bf16.mxu1 %v4332_v0  ;;  %6179 = vmatpush1.bf16.msra.mxu0 %v15485_v46  ;;  %v15556_v46 = vld [vmem:[#allocation11 + $0x784] ss:$16 sps:$4 sm:$0xff]  }
0x1380   :  { %6210 = vmatprep.mubr.bf16.mxu0 %v4332_v0  ;;  %6016 = vmatprep.subr.bf16.mxu1 %v15490_v19  ;;  %v15559_v19 = vld [vmem:[#allocation11 + $0x78c] ss:$16 sps:$4 sm:$0xff]   ;;  %v15554_v0 = vld [vmem:[#allocation11 + $0x780] ss:$16 sps:$4 sm:$0xff]  }
0x1381   :  { %6180 = vmatprep.subr.bf16.mxu0 %v15493_v52  ;;  %v15557_v52 = vld [vmem:[#allocation11 + $0x788] ss:$16 sps:$4 sm:$0xff]  }
0x1382   :  { %6017 = vmatpush1.bf16.msra.mxu1 %v15488_v47  ;;  %v15562_v47 = vld [vmem:[#allocation11 + $0x7a4] ss:$16 sps:$4 sm:$0xff]  }
0x1383   :  { %6181 = vmatpush1.bf16.msra.mxu0 %v15491_v6  ;;  %6018 = vmatprep.subr.bf16.mxu1 %v15496_v63  ;;  %v15565_v6 = vld [vmem:[#allocation11 + $0x7ac] ss:$16 sps:$4 sm:$0xff]   ;;  %v15560_v63 = vld [vmem:[#allocation11 + $0x7a0] ss:$16 sps:$4 sm:$0xff]  }
0x1384   :  { %6182 = vmatprep.subr.bf16.mxu0 %v15499_v14  ;;  %v3205_v14 = vrot.slane %v18398_v62, %v18452_v26  ;;  %v6232_v62 = vld [vmem:[#allocation13 + $0x28] sm:$0xff] }
0x1386   :  { %6019 = vmatpush1.bf16.msra.mxu1 %v15494_v30  ;;  %v15563_v30 = vld [vmem:[#allocation11 + $0x7a8] ss:$16 sps:$4 sm:$0xff]  }
0x1387   :  { %6183 = vmatpush1.bf16.msra.mxu0 %v15497_v35  ;;  %6020 = vmatprep.subr.bf16.mxu1 %v15502_v3  ;;  %v15568_v35 = vld [vmem:[#allocation11 + $0x7c4] ss:$16 sps:$4 sm:$0xff]   ;;  %v15571_v3 = vld [vmem:[#allocation11 + $0x7cc] ss:$16 sps:$4 sm:$0xff]  }
0x1388   :  { %6184 = vmatprep.subr.bf16.mxu0 %v15505_v15  ;;  %v15566_v15 = vld [vmem:[#allocation11 + $0x7c0] ss:$16 sps:$4 sm:$0xff]  }
0x138a   :  { %6021 = vmatpush1.bf16.msra.mxu1 %v15500_v39  ;;  %v4139_v39 = vadd.f32 %v18413_v10, %v3205_v14  ;;  %v6235_v10 = vld [vmem:[#allocation13 + $0x40] sm:$0xff] }
0x138b   :  { %6185 = vmatpush1.bf16.msra.mxu0 %v15503_v24  ;;  %6022 = vmatprep.subr.bf16.mxu1 %v15508_v23  ;;  %v15569_v24 = vld [vmem:[#allocation11 + $0x7c8] ss:$16 sps:$4 sm:$0xff]   ;;  %v15574_v23 = vld [vmem:[#allocation11 + $0x7e4] ss:$16 sps:$4 sm:$0xff]  }
0x138c   :  { %6186 = vmatprep.subr.bf16.mxu0 %v15511_v56  ;;  %v15577_v56 = vld [vmem:[#allocation11 + $0x7ec] ss:$16 sps:$4 sm:$0xff]  }
0x138e   :  { %6023 = vmatpush1.bf16.msra.mxu1 %v15506_v8  ;;  %v6227_v8 = vld [vmem:[#allocation13] sm:$0xff] }
0x138f   :  { %6187 = vmatpush1.bf16.msra.mxu0 %v15509_v45  ;;  %6024 = vmatprep.subr.bf16.mxu1 %v15514_v1  ;;  %v6231_v45 = vld [vmem:[#allocation13 + $0x20] sm:$0xff]  ;;  %v6228_v1 = vld [vmem:[#allocation13 + $0x8] sm:$0xff] }
0x1390   :  { %6188 = vmatprep.subr.bf16.mxu0 %v15517_v48  ;;  %v15572_v48 = vld [vmem:[#allocation11 + $0x7e0] ss:$16 sps:$4 sm:$0xff]  }
0x1392   :  { %6025 = vmatpush1.bf16.msra.mxu1 %v15512_v50  ;;  %v4315_v50 = vmax.f32 %v4139_v39, 0.0  ;;  %v6268_v39 = vld [vmem:[#allocation13 + $0x148] sm:$0xff] }
0x1393   :  { %6189 = vmatpush1.bf16.msra.mxu0 %v15515_v22  ;;  %6026 = vmatprep.subr.bf16.mxu1 %v15520_v2  ;;  %v15575_v22 = vld [vmem:[#allocation11 + $0x7e8] ss:$16 sps:$4 sm:$0xff]   ;;  %v13843_v2 = vcombine.high %v6227_v8, %v6231_v45 }
0x1394   :  { %6190 = vmatprep.subr.bf16.mxu0 %v15523_v44  ;;  %v13845_v44 = vcombine.high %v6228_v1, %v6232_v62 }
0x1396   :  { %6027 = vmatpush1.bf16.msra.mxu1 %v15518_v34  ;;  %v6239_v34 = vld [vmem:[#allocation13 + $0x60] sm:$0xff] }
0x1397   :  { %6191 = vmatpush1.bf16.msra.mxu0 %v15521_v25  ;;  %6028 = vmatprep.subr.bf16.mxu1 %v15526_v33  ;;  %v6236_v25 = vld [vmem:[#allocation13 + $0x48] sm:$0xff] }
0x1398   :  { %6192 = vmatprep.subr.bf16.mxu0 %v15529_v13  ;;  %v6240_v33 = vld [vmem:[#allocation13 + $0x68] sm:$0xff]  ;;  %v13842_v13 = vcombine.low %v6227_v8, %v6231_v45 }
0x139a   :  { %6029 = vmatpush1.bf16.msra.mxu1 %v15524_v42  ;;  %v4331_v42 = vpack.c.bf16 %v4315_v50, %v4315_v50  ;;  %v6280_v50 = vld [vmem:[#allocation13 + $0x1a8] sm:$0xff] }
0x139b   :  { %6193 = vmatpush1.bf16.msra.mxu0 %v15527_v51  ;;  %6030 = vmatprep.subr.bf16.mxu1 %v15532_v9  ;;  %v13844_v51 = vcombine.low %v6228_v1, %v6232_v62  ;;  %v13851_v9 = vcombine.high %v6235_v10, %v6239_v34  ;;  %v6275_v1 = vld [vmem:[#allocation13 + $0x180] sm:$0xff] }
0x139c   :  { %6194 = vmatprep.subr.bf16.mxu0 %v15535_v38  ;;  %v13853_v38 = vcombine.high %v6236_v25, %v6240_v33  ;;  %v6279_v62 = vld [vmem:[#allocation13 + $0x1a0] sm:$0xff] }
0x139e   :  { %6031 = vmatpush1.bf16.msra.mxu1 %v15530_v28  ;;  %v6243_v28 = vld [vmem:[#allocation13 + $0x80] sm:$0xff] }
0x139f   :  { %6195 = vmatpush1.bf16.msra.mxu0 %v15533_v58  ;;  %6032 = vmatprep.subr.bf16.mxu1 %v15538_v32  ;;  %v6247_v58 = vld [vmem:[#allocation13 + $0xa0] sm:$0xff]  ;;  %v6244_v32 = vld [vmem:[#allocation13 + $0x88] sm:$0xff] }
0x13a0   :  { %6196 = vmatprep.subr.bf16.mxu0 %v15541_v60  ;;  %v6248_v60 = vld [vmem:[#allocation13 + $0xa8] sm:$0xff] }
0x13a2   :  { %6033 = vmatpush1.bf16.msra.mxu1 %v15536_v4  ;;  %v13850_v4 = vcombine.low %v6235_v10, %v6239_v34  ;;  %v6283_v34 = vld [vmem:[#allocation13 + $0x1c0] sm:$0xff] }
0x13a3   :  { %6197 = vmatpush1.bf16.msra.mxu0 %v15539_v17  ;;  %6034 = vmatprep.subr.bf16.mxu1 %v15544_v18  ;;  %v13852_v17 = vcombine.low %v6236_v25, %v6240_v33  ;;  %v13859_v18 = vcombine.high %v6243_v28, %v6247_v58  ;;  %v6287_v25 = vld [vmem:[#allocation13 + $0x1e0] sm:$0xff]  ;;  %v6284_v33 = vld [vmem:[#allocation13 + $0x1c8] sm:$0xff] }
0x13a4   :  { %6198 = vmatprep.subr.bf16.mxu0 %v15547_v27  ;;  %v13861_v27 = vcombine.high %v6244_v32, %v6248_v60 }
0x13a6   :  { %6035 = vmatpush1.bf16.msra.mxu1 %v15542_v20  ;;  %v6251_v20 = vld [vmem:[#allocation13 + $0xc0] sm:$0xff] }
0x13a7   :  { %6199 = vmatpush1.bf16.msra.mxu0 %v15545_v11  ;;  %6036 = vmatprep.subr.bf16.mxu1 %v15550_v43  ;;  %v6255_v11 = vld [vmem:[#allocation13 + $0xe0] sm:$0xff]  ;;  %v6252_v43 = vld [vmem:[#allocation13 + $0xc8] sm:$0xff] }
0x13a8   :  { %6200 = vmatprep.subr.bf16.mxu0 %v15553_v49  ;;  %v6256_v49 = vld [vmem:[#allocation13 + $0xe8] sm:$0xff] }
0x13a9   :  { %v13868_v14 = vcombine.low %v6252_v43, %v6256_v49 }
0x13aa   :  { %6037 = vmatpush1.bf16.msra.mxu1 %v15548_v7  ;;  %v13858_v7 = vcombine.low %v6243_v28, %v6247_v58  ;;  %v6291_v28 = vld [vmem:[#allocation13 + $0x200] sm:$0xff] }
0x13ab   :  { %6201 = vmatpush1.bf16.msra.mxu0 %v15551_v53  ;;  %6038 = vmatprep.subr.bf16.mxu1 %v15556_v46  ;;  %v13860_v53 = vcombine.low %v6244_v32, %v6248_v60  ;;  %v13867_v46 = vcombine.high %v6251_v20, %v6255_v11  ;;  %v6295_v58 = vld [vmem:[#allocation13 + $0x220] sm:$0xff]  ;;  %v6292_v32 = vld [vmem:[#allocation13 + $0x208] sm:$0xff] }
0x13ac   :  { %6202 = vmatprep.subr.bf16.mxu0 %v15559_v19  ;;  %v13869_v19 = vcombine.high %v6252_v43, %v6256_v49  ;;  %v6296_v60 = vld [vmem:[#allocation13 + $0x228] sm:$0xff] }
0x13ad   :  { %v6300_v43 = vld [vmem:[#allocation13 + $0x248] sm:$0xff] }
0x13ae   :  { %6039 = vmatpush1.bf16.msra.mxu1 %v15554_v0  ;;  %v6259_v0 = vld [vmem:[#allocation13 + $0x100] sm:$0xff]  ;;  %v6304_v49 = vld [vmem:[#allocation13 + $0x268] sm:$0xff] }
0x13af   :  { %6203 = vmatpush1.bf16.msra.mxu0 %v15557_v52  ;;  %6040 = vmatprep.subr.bf16.mxu1 %v15562_v47  ;;  %v6263_v52 = vld [vmem:[#allocation13 + $0x120] sm:$0xff]  ;;  %v6260_v47 = vld [vmem:[#allocation13 + $0x108] sm:$0xff] }
0x13b0   :  { %6204 = vmatprep.subr.bf16.mxu0 %v15565_v6  ;;  %v6264_v6 = vld [vmem:[#allocation13 + $0x128] sm:$0xff] }
0x13b2   :  { %6041 = vmatpush1.bf16.msra.mxu1 %v15560_v63  ;;  %v13866_v63 = vcombine.low %v6251_v20, %v6255_v11  ;;  %v6299_v20 = vld [vmem:[#allocation13 + $0x240] sm:$0xff] }
0x13b3   :  { %6205 = vmatpush1.bf16.msra.mxu0 %v15563_v30  ;;  %6042 = vmatprep.subr.bf16.mxu1 %v15568_v35  ;;  %v13875_v30 = vcombine.high %v6259_v0, %v6263_v52  ;;  %v13877_v35 = vcombine.high %v6260_v47, %v6264_v6  ;;  %v6303_v11 = vld [vmem:[#allocation13 + $0x260] sm:$0xff] }
0x13b4   :  { %6206 = vmatprep.subr.bf16.mxu0 %v15571_v3  ;;  %v6267_v3 = vld [vmem:[#allocation13 + $0x140] sm:$0xff] }
0x13b6   :  { %6043 = vmatpush1.bf16.msra.mxu1 %v15566_v15  ;;  %v6271_v15 = vld [vmem:[#allocation13 + $0x160] sm:$0xff] }
0x13b7   :  { %6207 = vmatpush1.bf16.msra.mxu0 %v15569_v24  ;;  %6044 = vmatprep.subr.bf16.mxu1 %v15574_v23  ;;  %v6272_v24 = vld [vmem:[#allocation13 + $0x168] sm:$0xff]  ;;  %v13874_v23 = vcombine.low %v6259_v0, %v6263_v52  ;;  %v13883_v8 = vcombine.high %v6267_v3, %v6271_v15  ;;  %v6307_v0 = vld [vmem:[#allocation13 + $0x280] sm:$0xff] }
0x13b8   :  { %6208 = vmatprep.subr.bf16.mxu0 %v15577_v56  ;;  %v13876_v56 = vcombine.low %v6260_v47, %v6264_v6  ;;  %v13885_v45 = vcombine.high %v6268_v39, %v6272_v24  ;;  %v6311_v52 = vld [vmem:[#allocation13 + $0x2a0] sm:$0xff]  ;;  %v6308_v47 = vld [vmem:[#allocation13 + $0x288] sm:$0xff] }
0x13b9   :  { %v6312_v6 = vld [vmem:[#allocation13 + $0x2a8] sm:$0xff] }
0x13ba   :  { %6045 = vmatpush1.bf16.msra.mxu1 %v15572_v48  ;;  %v6276_v48 = vld [vmem:[#allocation13 + $0x188] sm:$0xff] }
0x13bb   :  { %6209 = vmatpush1.bf16.msra.mxu0 %v15575_v22  ;;  %7805 = vmatprep.subr.bf16.mxu1 %v13843_v2  ;;  %v13882_v22 = vcombine.low %v6267_v3, %v6271_v15  ;;  %v13884_v2 = vcombine.low %v6268_v39, %v6272_v24  ;;  %v13893_v10 = vcombine.high %v6276_v48, %v6280_v50  ;;  %v6315_v3 = vld [vmem:[#allocation13 + $0x2c0] sm:$0xff]  ;;  %v6316_v39 = vld [vmem:[#allocation13 + $0x2c8] sm:$0xff] }
0x13bc   :  { %7887 = vmatprep.subr.bf16.mxu0 %v13845_v44  ;;  %v13891_v44 = vcombine.high %v6275_v1, %v6279_v62  ;;  %v6319_v15 = vld [vmem:[#allocation13 + $0x2e0] sm:$0xff]  ;;  %v6320_v24 = vld [vmem:[#allocation13 + $0x2e8] sm:$0xff] }
0x13bd   :  { %6047 = vmatmul.mubr.bf16.vlgmr.msra.gmra.mrb[40].mxu1 %v4331_v42 }
0x13be   :  { %6211 = vmatmul.mubr.bf16.vlgmr.msra.gmra.mrb[36].mxu0 %v4331_v42  ;;  %7806 = vmatpush1.bf16.msra.mxu1 %v13842_v13  ;;  %v6288_v13 = vld [vmem:[#allocation13 + $0x1e8] sm:$0xff]  ;;  %v13890_v42 = vcombine.low %v6275_v1, %v6279_v62  ;;  %v6323_v1 = vld [vmem:[#allocation13 + $0x300] sm:$0xff] }
0x13bf   :  { %7888 = vmatpush1.bf16.msra.mxu0 %v13844_v51  ;;  %7807 = vmatprep.subr.bf16.mxu1 %v13851_v9  ;;  %v13892_v51 = vcombine.low %v6276_v48, %v6280_v50  ;;  %v13899_v9 = vcombine.high %v6283_v34, %v6287_v25  ;;  %v6327_v62 = vld [vmem:[#allocation13 + $0x320] sm:$0xff]  ;;  %v6324_v48 = vld [vmem:[#allocation13 + $0x308] sm:$0xff] }
0x13c0   :  { %7889 = vmatprep.subr.bf16.mxu0 %v13853_v38  ;;  %v13901_v38 = vcombine.high %v6284_v33, %v6288_v13  ;;  %v6328_v50 = vld [vmem:[#allocation13 + $0x328] sm:$0xff] }
0x13c2   :  { %7808 = vmatpush1.bf16.msra.mxu1 %v13850_v4  ;;  %v13898_v4 = vcombine.low %v6283_v34, %v6287_v25  ;;  %v6331_v34 = vld [vmem:[#allocation13 + $0x340] sm:$0xff] }
0x13c3   :  { %7890 = vmatpush1.bf16.msra.mxu0 %v13852_v17  ;;  %7809 = vmatprep.subr.bf16.mxu1 %v13859_v18  ;;  %v13900_v17 = vcombine.low %v6284_v33, %v6288_v13  ;;  %v13907_v18 = vcombine.high %v6291_v28, %v6295_v58  ;;  %v6335_v25 = vld [vmem:[#allocation13 + $0x360] sm:$0xff]  ;;  %v6332_v33 = vld [vmem:[#allocation13 + $0x348] sm:$0xff] }
0x13c4   :  { %7891 = vmatprep.subr.bf16.mxu0 %v13861_v27  ;;  %v13909_v27 = vcombine.high %v6292_v32, %v6296_v60  ;;  %v6336_v13 = vld [vmem:[#allocation13 + $0x368] sm:$0xff] }
0x13c6   :  { %7810 = vmatpush1.bf16.msra.mxu1 %v13858_v7  ;;  %v13906_v7 = vcombine.low %v6291_v28, %v6295_v58  ;;  %v13946_v28 = vcombine.low %v6331_v34, %v6335_v25  ;;  %v13948_v58 = vcombine.low %v6332_v33, %v6336_v13 }
0x13c7   :  { %7892 = vmatpush1.bf16.msra.mxu0 %v13860_v53  ;;  %7811 = vmatprep.subr.bf16.mxu1 %v13867_v46  ;;  %v13908_v53 = vcombine.low %v6292_v32, %v6296_v60  ;;  %v13915_v46 = vcombine.high %v6299_v20, %v6303_v11  ;;  %v6339_v32 = vld [vmem:[#allocation13 + $0x380] sm:$0xff] }
0x13c8   :  { %7893 = vmatprep.subr.bf16.mxu0 %v13869_v19  ;;  %v13917_v19 = vcombine.high %v6300_v43, %v6304_v49  ;;  %v6343_v60 = vld [vmem:[#allocation13 + $0x3a0] sm:$0xff] }
0x13ca   :  { %7812 = vmatpush1.bf16.msra.mxu1 %v13866_v63  ;;  %v13914_v63 = vcombine.low %v6299_v20, %v6303_v11 }
0x13cb   :  { %7894 = vmatpush1.bf16.msra.mxu0 %v13868_v14  ;;  %7813 = vmatprep.subr.bf16.mxu1 %v13875_v30  ;;  %v13916_v14 = vcombine.low %v6300_v43, %v6304_v49  ;;  %v13923_v30 = vcombine.high %v6307_v0, %v6311_v52  ;;  %v6347_v43 = vld [vmem:[#allocation13 + $0x3c0] sm:$0xff] }
0x13cc   :  { %7895 = vmatprep.subr.bf16.mxu0 %v13877_v35  ;;  %v13925_v35 = vcombine.high %v6308_v47, %v6312_v6  ;;  %v6351_v49 = vld [vmem:[#allocation13 + $0x3e0] sm:$0xff] }
0x13ce   :  { %7814 = vmatpush1.bf16.msra.mxu1 %v13874_v23  ;;  %v13922_v23 = vcombine.low %v6307_v0, %v6311_v52  ;;  %v6355_v0 = vld [vmem:[#allocation13 + $0x400] sm:$0xff] }
0x13cf   :  { %7896 = vmatpush1.bf16.msra.mxu0 %v13876_v56  ;;  %7815 = vmatprep.subr.bf16.mxu1 %v13883_v8  ;;  %v13924_v56 = vcombine.low %v6308_v47, %v6312_v6  ;;  %v13931_v8 = vcombine.high %v6315_v3, %v6319_v15  ;;  %v6359_v52 = vld [vmem:[#allocation13 + $0x420] sm:$0xff] }
0x13d0   :  { %7897 = vmatprep.subr.bf16.mxu0 %v13885_v45  ;;  %v13933_v45 = vcombine.high %v6316_v39, %v6320_v24 }
0x13d2   :  { %7816 = vmatpush1.bf16.msra.mxu1 %v13882_v22  ;;  %v13930_v22 = vcombine.low %v6315_v3, %v6319_v15 }
0x13d3   :  { %7898 = vmatpush1.bf16.msra.mxu0 %v13884_v2  ;;  %7817 = vmatprep.subr.bf16.mxu1 %v13891_v44  ;;  %v13932_v2 = vcombine.low %v6316_v39, %v6320_v24  ;;  %v13939_v44 = vcombine.high %v6323_v1, %v6327_v62  ;;  %v18485_v39 = vld [vmem:[%s18672_s12] sm:$0xf] }
0x13d4   :  { %7899 = vmatprep.subr.bf16.mxu0 %v13893_v10  ;;  %v13941_v10 = vcombine.high %v6324_v48, %v6328_v50  ;;  %v4594_v24 = vrot.slane %v18485_v39, %v17286_v31 }
0x13d6   :  { %7818 = vmatpush1.bf16.msra.mxu1 %v13890_v42  ;;  %v13938_v42 = vcombine.low %v6323_v1, %v6327_v62 }
0x13d7   :  { %7900 = vmatpush1.bf16.msra.mxu0 %v13892_v51  ;;  %7819 = vmatprep.subr.bf16.mxu1 %v13899_v9  ;;  %v13940_v51 = vcombine.low %v6324_v48, %v6328_v50  ;;  %v13947_v9 = vcombine.high %v6331_v34, %v6335_v25 }
0x13d8   :  { %7901 = vmatprep.subr.bf16.mxu0 %v13901_v38  ;;  %v13949_v38 = vcombine.high %v6332_v33, %v6336_v13  ;;  %v6363_v13 = vld [vmem:[#allocation13 + $0x440] sm:$0xff] }
0x13da   :  { %7820 = vmatpush1.bf16.msra.mxu1 %v13898_v4  ;;  %v6340_v4 = vld [vmem:[#allocation13 + $0x388] sm:$0xff] }
0x13db   :  { %7902 = vmatpush1.bf16.msra.mxu0 %v13900_v17  ;;  %7821 = vmatprep.subr.bf16.mxu1 %v13907_v18  ;;  %v13955_v17 = vcombine.high %v6339_v32, %v6343_v60  ;;  %v6344_v18 = vld [vmem:[#allocation13 + $0x3a8] sm:$0xff] }
0x13dc   :  { %7903 = vmatprep.subr.bf16.mxu0 %v13909_v27  ;;  %v13954_v27 = vcombine.low %v6339_v32, %v6343_v60  ;;  %v13956_v20 = vcombine.low %v6340_v4, %v6344_v18  ;;  %v13957_v11 = vcombine.high %v6340_v4, %v6344_v18  ;;  %v6371_v32 = vld [vmem:[#allocation13 + $0x480] sm:$0xff]  ;;  %v6372_v18 = vld [vmem:[#allocation13 + $0x488] sm:$0xff] }
0x13de   :  { %7822 = vmatpush1.bf16.msra.mxu1 %v13906_v7  ;;  %v6348_v7 = vld [vmem:[#allocation13 + $0x3c8] sm:$0xff] }
0x13df   :  { %7904 = vmatpush1.bf16.msra.mxu0 %v13908_v53  ;;  %7823 = vmatprep.subr.bf16.mxu1 %v13915_v46  ;;  %v13962_v53 = vcombine.low %v6347_v43, %v6351_v49  ;;  %v13963_v46 = vcombine.high %v6347_v43, %v6351_v49 }
0x13e0   :  { %7905 = vmatprep.subr.bf16.mxu0 %v13917_v19  ;;  %v6352_v19 = vld [vmem:[#allocation13 + $0x3e8] sm:$0xff] }
0x13e1   :  { %v13964_v47 = vcombine.low %v6348_v7, %v6352_v19  ;;  %v13965_v6 = vcombine.high %v6348_v7, %v6352_v19  ;;  %v6380_v19 = vld [vmem:[#allocation13 + $0x4c8] sm:$0xff] }
0x13e2   :  { %7824 = vmatpush1.bf16.msra.mxu1 %v13914_v63  ;;  %v13970_v63 = vcombine.low %v6355_v0, %v6359_v52 }
0x13e3   :  { %7906 = vmatpush1.bf16.msra.mxu0 %v13916_v14  ;;  %7825 = vmatprep.subr.bf16.mxu1 %v13923_v30  ;;  %v13971_v14 = vcombine.high %v6355_v0, %v6359_v52  ;;  %v6356_v30 = vld [vmem:[#allocation13 + $0x408] sm:$0xff] }
0x13e4   :  { %7907 = vmatprep.subr.bf16.mxu0 %v13925_v35  ;;  %v6360_v35 = vld [vmem:[#allocation13 + $0x428] sm:$0xff] }
0x13e5   :  { %v13972_v3 = vcombine.low %v6356_v30, %v6360_v35  ;;  %v13973_v15 = vcombine.high %v6356_v30, %v6360_v35  ;;  %v6384_v0 = vld [vmem:[#allocation13 + $0x4e8] sm:$0xff]  ;;  %v6391_v30 = vld [vmem:[#allocation13 + $0x520] sm:$0xff] }
0x13e6   :  { %7826 = vmatpush1.bf16.msra.mxu1 %v13922_v23  ;;  %v4598_v23 = vrot.slane %v18485_v39, %v17339_v54  ;;  %v6388_v35 = vld [vmem:[#allocation13 + $0x508] sm:$0xff] }
0x13e7   :  { %7908 = vmatpush1.bf16.msra.mxu0 %v13924_v56  ;;  %7827 = vmatprep.subr.bf16.mxu1 %v13931_v8  ;;  %v4606_v56 = vrot.slane %v18485_v39, %v18401_v36 }
0x13e8   :  { %7909 = vmatprep.subr.bf16.mxu0 %v13933_v45 }
0x13ea   :  { %7828 = vmatpush1.bf16.msra.mxu1 %v13930_v22 }
0x13eb   :  { %7910 = vmatpush1.bf16.msra.mxu0 %v13932_v2  ;;  %7829 = vmatprep.subr.bf16.mxu1 %v13939_v44 }
0x13ec   :  { %7911 = vmatprep.subr.bf16.mxu0 %v13941_v10 }
0x13ee   :  { %7830 = vmatpush1.bf16.msra.mxu1 %v13938_v42 }
0x13ef   :  { %7912 = vmatpush1.bf16.msra.mxu0 %v13940_v51  ;;  %7831 = vmatprep.subr.bf16.mxu1 %v13947_v9  ;;  %v6367_v51 = vld [vmem:[#allocation13 + $0x460] sm:$0xff]  ;;  %v6364_v9 = vld [vmem:[#allocation13 + $0x448] sm:$0xff] }
0x13f0   :  { %7913 = vmatprep.subr.bf16.mxu0 %v13949_v38  ;;  %v6368_v38 = vld [vmem:[#allocation13 + $0x468] sm:$0xff]  ;;  %v13979_v60 = vcombine.high %v6363_v13, %v6367_v51 }
0x13f1   :  { %v13981_v4 = vcombine.high %v6364_v9, %v6368_v38  ;;  %v13980_v43 = vcombine.low %v6364_v9, %v6368_v38  ;;  %v6411_v38 = vld [vmem:[#allocation13 + $0x5c0] sm:$0xff] }
0x13f2   :  { %7832 = vmatpush1.bf16.msra.mxu1 %v13946_v28 }
0x13f3   :  { %7914 = vmatpush1.bf16.msra.mxu0 %v13948_v58  ;;  %7833 = vmatprep.subr.bf16.mxu1 %v13955_v17  ;;  %v6375_v17 = vld [vmem:[#allocation13 + $0x4a0] sm:$0xff] }
0x13f4   :  { %7915 = vmatprep.subr.bf16.mxu0 %v13957_v11  ;;  %v13978_v11 = vcombine.low %v6363_v13, %v6367_v51  ;;  %v13987_v49 = vcombine.high %v6371_v32, %v6375_v17  ;;  %v13986_v52 = vcombine.low %v6371_v32, %v6375_v17  ;;  %v6415_v32 = vld [vmem:[#allocation13 + $0x5e0] sm:$0xff] }
0x13f6   :  { %7834 = vmatpush1.bf16.msra.mxu1 %v13954_v27  ;;  %v6376_v27 = vld [vmem:[#allocation13 + $0x4a8] sm:$0xff] }
0x13f7   :  { %7916 = vmatpush1.bf16.msra.mxu0 %v13956_v20  ;;  %7835 = vmatprep.subr.bf16.mxu1 %v13963_v46  ;;  %v13989_v7 = vcombine.high %v6372_v18, %v6376_v27  ;;  %v6383_v46 = vld [vmem:[#allocation13 + $0x4e0] sm:$0xff] }
0x13f8   :  { %7917 = vmatprep.subr.bf16.mxu0 %v13965_v6 }
0x13fa   :  { %7836 = vmatpush1.bf16.msra.mxu1 %v13962_v53  ;;  %v6379_v53 = vld [vmem:[#allocation13 + $0x4c0] sm:$0xff] }
0x13fb   :  { %7918 = vmatpush1.bf16.msra.mxu0 %v13964_v47  ;;  %7846 = vmatprep.subr.bf16.mxu1 %v13971_v14  ;;  %v13988_v47 = vcombine.low %v6372_v18, %v6376_v27  ;;  %v13995_v6 = vcombine.high %v6379_v53, %v6383_v46  ;;  %v6387_v14 = vld [vmem:[#allocation13 + $0x500] sm:$0xff]  ;;  %v14027_v27 = vcombine.high %v6411_v38, %v6415_v32 }
0x13fc   :  { %7928 = vmatprep.subr.bf16.mxu0 %v13973_v15  ;;  %v13994_v15 = vcombine.low %v6379_v53, %v6383_v46  ;;  %v6424_v53 = vld [vmem:[#allocation13 + $0x628] sm:$0xff]  ;;  %v14026_v46 = vcombine.low %v6411_v38, %v6415_v32 }
0x13fd   :  { %v6456_v38 = vld [vmem:[#allocation13 + $0x728] sm:$0xff] }
0x1490   :  { %v6048_v8 = vpop.f32.mrb[40].mxu1 }
0x1491   :  { %v15070_v45 = vadd.f32 %v6048_v8, %v4594_v24  ;;  %v18493_v1 = vpop.f32.mrb[36].mxu0  ;;  %v6050_v62 = vpop.f32.mrb[41].mxu1  ;;  %v13996_v24 = vcombine.low %v6380_v19, %v6384_v0  ;;  %v6395_v8 = vld [vmem:[#allocation13 + $0x540] sm:$0xff] }
0x1492   :  { %v15071_v48 = vadd.f32 %v6050_v62, %v4598_v23  ;;  %v6214_v50 = vpop.f32.mrb[37].mxu0  ;;  %v6052_v22 = vpop.f32.mrb[42].mxu1  ;;  %v14003_v23 = vcombine.high %v6387_v14, %v6391_v30  ;;  %v6396_v62 = vld [vmem:[#allocation13 + $0x548] sm:$0xff] }
0x1493   :  { %v6219_v2 = vmax.f32 %v15070_v45, 0.0  ;;  %v15073_v44 = vadd.f32 %v6214_v50, %v4606_v56  ;;  %v6216_v10 = vpop.f32.mrb[38].mxu0  ;;  %v6053_v34 = vpop.f32.mrb[43].mxu1  ;;  %v6399_v45 = vld [vmem:[#allocation13 + $0x560] sm:$0xff]  ;;  %v14002_v50 = vcombine.low %v6387_v14, %v6391_v30  ;;  %v6432_v14 = vld [vmem:[#allocation13 + $0x668] sm:$0xff] }
0x1494   :  { %v6220_v25 = vmax.f32 %v15071_v48, 0.0  ;;  %v6217_v33 = vpop.f32.mrb[39].mxu0  ;;  %v6400_v48 = vld [vmem:[#allocation13 + $0x568] sm:$0xff]  ;;  %v6403_v10 = vld [vmem:[#allocation13 + $0x580] sm:$0xff]  ;;  %v14010_v13 = vcombine.low %v6395_v8, %v6399_v45 }
0x1495   :  { %v6222_v42 = vmax.f32 %v15073_v44, 0.0  ;;  %v18497_v58 = vpack.c.bf16 %v6219_v2, %v6219_v2  ;;  %v14011_v2 = vcombine.high %v6395_v8, %v6399_v45  ;;  %v14013_v44 = vcombine.high %v6396_v62, %v6400_v48  ;;  %v6407_v34 = vld [vmem:[#allocation13 + $0x5a0] sm:$0xff]  ;;  %v6408_v33 = vld [vmem:[#allocation13 + $0x5a8] sm:$0xff] }
0x1496   :  { %v18495_v28 = vpack.c.bf16 %v6220_v25, %v6220_v25  ;;  %v6404_v25 = vld [vmem:[#allocation13 + $0x588] sm:$0xff]  ;;  %v14019_v51 = vcombine.high %v6403_v10, %v6407_v34  ;;  %v14018_v17 = vcombine.low %v6403_v10, %v6407_v34 }
0x1497   :  { %v18501_v20 = vpack.c.bf16 %v6222_v42, %v6222_v42  ;;  %v14012_v42 = vcombine.low %v6396_v62, %v6400_v48  ;;  %v14021_v9 = vcombine.high %v6404_v25, %v6408_v33  ;;  %v14020_v18 = vcombine.low %v6404_v25, %v6408_v33  ;;  %v6440_v8 = vld [vmem:[#allocation13 + $0x6a8] sm:$0xff] }
0x1498   :  { %7837 = vmatprep.mubr.bf16.mxu1 %v18495_v28  ;;  %7919 = vmatprep.mubr.bf16.mxu0 %v18495_v28  ;;  %v6448_v10 = vld [vmem:[#allocation13 + $0x6e8] sm:$0xff] }
0x1499   :  { %7838 = vmatmul.mubr.bf16.vlgmr.msra.gmra.mrb[44].mxu1 %v18497_v58  ;;  %7920 = vmatmul.mubr.bf16.vlgmr.msra.gmra.mrb[40].mxu0 %v18497_v58 }
0x149a   :  { %7847 = vmatpush1.bf16.msra.mxu1 %v13970_v63  ;;  %7929 = vmatpush1.bf16.msra.mxu0 %v13972_v3  ;;  %v13997_v63 = vcombine.high %v6380_v19, %v6384_v0  ;;  %v6392_v3 = vld [vmem:[#allocation13 + $0x528] sm:$0xff] }
0x149b   :  { %7878 = vmatprep.mubr.bf16.mxu1 %v18501_v20  ;;  %7960 = vmatprep.mubr.bf16.mxu0 %v18501_v20  ;;  %v14005_v56 = vcombine.high %v6388_v35, %v6392_v3  ;;  %v14004_v22 = vcombine.low %v6388_v35, %v6392_v3 }
0x149c   :  { %7848 = vmatprep.subr.bf16.mxu1 %v13979_v60  ;;  %7930 = vmatprep.subr.bf16.mxu0 %v13981_v4  ;;  %v6412_v60 = vld [vmem:[#allocation13 + $0x5c8] sm:$0xff] }
0x149d   :  { %v6416_v4 = vld [vmem:[#allocation13 + $0x5e8] sm:$0xff] }
0x149e   :  { %7849 = vmatpush1.bf16.msra.mxu1 %v13978_v11  ;;  %7931 = vmatpush1.bf16.msra.mxu0 %v13980_v43  ;;  %v14029_v11 = vcombine.high %v6412_v60, %v6416_v4  ;;  %v6419_v43 = vld [vmem:[#allocation13 + $0x600] sm:$0xff]  ;;  %v14028_v19 = vcombine.low %v6412_v60, %v6416_v4 }
0x149f   :  { %7850 = vmatprep.subr.bf16.mxu1 %v13987_v49  ;;  %7932 = vmatprep.subr.bf16.mxu0 %v13989_v7  ;;  %v6423_v49 = vld [vmem:[#allocation13 + $0x620] sm:$0xff]  ;;  %v6420_v7 = vld [vmem:[#allocation13 + $0x608] sm:$0xff] }
0x14a0   :  { %v14035_v0 = vcombine.high %v6419_v43, %v6423_v49  ;;  %v14034_v30 = vcombine.low %v6419_v43, %v6423_v49  ;;  %v14036_v35 = vcombine.low %v6420_v7, %v6424_v53  ;;  %v6464_v43 = vld [vmem:[#allocation13 + $0x768] sm:$0xff] }
0x14a2   :  { %7851 = vmatpush1.bf16.msra.mxu1 %v13986_v52  ;;  %7933 = vmatpush1.bf16.msra.mxu0 %v13988_v47  ;;  %v14037_v52 = vcombine.high %v6420_v7, %v6424_v53  ;;  %v6427_v47 = vld [vmem:[#allocation13 + $0x640] sm:$0xff] }
0x14a3   :  { %7852 = vmatprep.subr.bf16.mxu1 %v13995_v6  ;;  %7934 = vmatprep.subr.bf16.mxu0 %v13997_v63  ;;  %v6431_v6 = vld [vmem:[#allocation13 + $0x660] sm:$0xff]  ;;  %v6428_v63 = vld [vmem:[#allocation13 + $0x648] sm:$0xff] }
0x14a4   :  { %v14043_v3 = vcombine.high %v6427_v47, %v6431_v6  ;;  %v14042_v45 = vcombine.low %v6427_v47, %v6431_v6  ;;  %v14044_v62 = vcombine.low %v6428_v63, %v6432_v14  ;;  %v6472_v47 = vld [vmem:[#allocation13 + $0x7a8] sm:$0xff] }
0x14a6   :  { %7853 = vmatpush1.bf16.msra.mxu1 %v13994_v15  ;;  %7935 = vmatpush1.bf16.msra.mxu0 %v13996_v24  ;;  %v14045_v15 = vcombine.high %v6428_v63, %v6432_v14  ;;  %v6435_v24 = vld [vmem:[#allocation13 + $0x680] sm:$0xff]  ;;  %v4602_v14 = vrot.slane %v18485_v39, %v18420_v12  ;;  %v6233_v39 = vld [vmem:[#allocation13 + $0x30] sm:$0xff] }
0x14a7   :  { %7854 = vmatprep.subr.bf16.mxu1 %v14003_v23  ;;  %7936 = vmatprep.subr.bf16.mxu0 %v14005_v56  ;;  %v6439_v23 = vld [vmem:[#allocation13 + $0x6a0] sm:$0xff]  ;;  %v6436_v56 = vld [vmem:[#allocation13 + $0x688] sm:$0xff] }
0x14a8   :  { %v14051_v48 = vcombine.high %v6435_v24, %v6439_v23  ;;  %v14050_v34 = vcombine.low %v6435_v24, %v6439_v23  ;;  %v14052_v25 = vcombine.low %v6436_v56, %v6440_v8  ;;  %v6476_v24 = vld [vmem:[#allocation13 + $0x7c8] sm:$0xff] }
0x14a9   :  { %v6480_v23 = vld [vmem:[#allocation13 + $0x7e8] sm:$0xff] }
0x14aa   :  { %7855 = vmatpush1.bf16.msra.mxu1 %v14002_v50  ;;  %7937 = vmatpush1.bf16.msra.mxu0 %v14004_v22  ;;  %v14053_v50 = vcombine.high %v6436_v56, %v6440_v8  ;;  %v6443_v22 = vld [vmem:[#allocation13 + $0x6c0] sm:$0xff] }
0x14ab   :  { %7856 = vmatprep.subr.bf16.mxu1 %v14011_v2  ;;  %7938 = vmatprep.subr.bf16.mxu0 %v14013_v44  ;;  %v6447_v2 = vld [vmem:[#allocation13 + $0x6e0] sm:$0xff]  ;;  %v6444_v44 = vld [vmem:[#allocation13 + $0x6c8] sm:$0xff] }
0x14ac   :  { %v14059_v33 = vcombine.high %v6443_v22, %v6447_v2  ;;  %v14058_v32 = vcombine.low %v6443_v22, %v6447_v2  ;;  %v14060_v60 = vcombine.low %v6444_v44, %v6448_v10  ;;  %v6230_v22 = vld [vmem:[#allocation13 + $0x18] sm:$0xff] }
0x14ad   :  { %v6234_v2 = vld [vmem:[#allocation13 + $0x38] sm:$0xff] }
0x14ae   :  { %7857 = vmatpush1.bf16.msra.mxu1 %v14010_v13  ;;  %7939 = vmatpush1.bf16.msra.mxu0 %v14012_v42  ;;  %v14061_v13 = vcombine.high %v6444_v44, %v6448_v10  ;;  %v6451_v42 = vld [vmem:[#allocation13 + $0x700] sm:$0xff]  ;;  %v14092_v10 = vcombine.low %v6476_v24, %v6480_v23 }
0x14af   :  { %7858 = vmatprep.subr.bf16.mxu1 %v14019_v51  ;;  %7940 = vmatprep.subr.bf16.mxu0 %v14021_v9  ;;  %v6455_v51 = vld [vmem:[#allocation13 + $0x720] sm:$0xff]  ;;  %v6452_v9 = vld [vmem:[#allocation13 + $0x708] sm:$0xff] }
0x14b0   :  { %v14067_v4 = vcombine.high %v6451_v42, %v6455_v51  ;;  %v14066_v49 = vcombine.low %v6451_v42, %v6455_v51  ;;  %v14068_v7 = vcombine.low %v6452_v9, %v6456_v38  ;;  %v6241_v42 = vld [vmem:[#allocation13 + $0x70] sm:$0xff]  ;;  %v6242_v51 = vld [vmem:[#allocation13 + $0x78] sm:$0xff] }
0x14b2   :  { %7859 = vmatpush1.bf16.msra.mxu1 %v14018_v17  ;;  %7941 = vmatpush1.bf16.msra.mxu0 %v14020_v18  ;;  %v14069_v17 = vcombine.high %v6452_v9, %v6456_v38  ;;  %v6459_v18 = vld [vmem:[#allocation13 + $0x740] sm:$0xff] }
0x14b3   :  { %7860 = vmatprep.subr.bf16.mxu1 %v14027_v27  ;;  %7942 = vmatprep.subr.bf16.mxu0 %v14029_v11  ;;  %v6463_v27 = vld [vmem:[#allocation13 + $0x760] sm:$0xff]  ;;  %v6460_v11 = vld [vmem:[#allocation13 + $0x748] sm:$0xff] }
0x14b4   :  { %v14075_v53 = vcombine.high %v6459_v18, %v6463_v27  ;;  %v14074_v6 = vcombine.low %v6459_v18, %v6463_v27  ;;  %v14076_v63 = vcombine.low %v6460_v11, %v6464_v43  ;;  %v6249_v18 = vld [vmem:[#allocation13 + $0xb0] sm:$0xff]  ;;  %v6246_v27 = vld [vmem:[#allocation13 + $0x98] sm:$0xff] }
0x14b6   :  { %7861 = vmatpush1.bf16.msra.mxu1 %v14026_v46  ;;  %7943 = vmatpush1.bf16.msra.mxu0 %v14028_v19  ;;  %v14077_v46 = vcombine.high %v6460_v11, %v6464_v43  ;;  %v6467_v19 = vld [vmem:[#allocation13 + $0x780] sm:$0xff]  ;;  %v6250_v11 = vld [vmem:[#allocation13 + $0xb8] sm:$0xff] }
0x14b7   :  { %7862 = vmatprep.subr.bf16.mxu1 %v14035_v0  ;;  %7944 = vmatprep.subr.bf16.mxu0 %v14037_v52  ;;  %v6471_v0 = vld [vmem:[#allocation13 + $0x7a0] sm:$0xff]  ;;  %v6468_v52 = vld [vmem:[#allocation13 + $0x788] sm:$0xff] }
0x14b8   :  { %v14082_v56 = vcombine.low %v6467_v19, %v6471_v0  ;;  %v14084_v8 = vcombine.low %v6468_v52, %v6472_v47 }
0x14ba   :  { %7863 = vmatpush1.bf16.msra.mxu1 %v14034_v30  ;;  %7945 = vmatpush1.bf16.msra.mxu0 %v14036_v35  ;;  %v14083_v30 = vcombine.high %v6467_v19, %v6471_v0  ;;  %v14085_v35 = vcombine.high %v6468_v52, %v6472_v47  ;;  %v6257_v19 = vld [vmem:[#allocation13 + $0xf0] sm:$0xff]  ;;  %v6254_v0 = vld [vmem:[#allocation13 + $0xd8] sm:$0xff] }
0x14bb   :  { %7864 = vmatprep.subr.bf16.mxu1 %v14043_v3  ;;  %7946 = vmatprep.subr.bf16.mxu0 %v14045_v15  ;;  %v6475_v3 = vld [vmem:[#allocation13 + $0x7c0] sm:$0xff]  ;;  %v6258_v52 = vld [vmem:[#allocation13 + $0xf8] sm:$0xff] }
0x14bc   :  { %v6479_v15 = vld [vmem:[#allocation13 + $0x7e0] sm:$0xff] }
0x14bd   :  { %v14090_v44 = vcombine.low %v6475_v3, %v6479_v15 }
0x14be   :  { %7865 = vmatpush1.bf16.msra.mxu1 %v14042_v45  ;;  %7947 = vmatpush1.bf16.msra.mxu0 %v14044_v62  ;;  %v15072_v45 = vadd.f32 %v18493_v1, %v4602_v14  ;;  %v14091_v62 = vcombine.high %v6475_v3, %v6479_v15  ;;  %v6238_v1 = vld [vmem:[#allocation13 + $0x58] sm:$0xff]  ;;  %v13873_v14 = vcombine.high %v6254_v0, %v6258_v52 }
0x14bf   :  { %7866 = vmatprep.subr.bf16.mxu1 %v14051_v48  ;;  %7948 = vmatprep.subr.bf16.mxu0 %v14053_v50  ;;  %v14093_v48 = vcombine.high %v6476_v24, %v6480_v23  ;;  %v6229_v50 = vld [vmem:[#allocation13 + $0x10] sm:$0xff]  ;;  %v6266_v3 = vld [vmem:[#allocation13 + $0x138] sm:$0xff]  ;;  %v13872_v24 = vcombine.low %v6254_v0, %v6258_v52 }
0x14c0   :  { %v13846_v9 = vcombine.low %v6229_v50, %v6233_v39  ;;  %v6301_v52 = vld [vmem:[#allocation13 + $0x250] sm:$0xff] }
0x14c2   :  { %7867 = vmatpush1.bf16.msra.mxu1 %v14050_v34  ;;  %7949 = vmatpush1.bf16.msra.mxu0 %v14052_v25  ;;  %v6221_v34 = vmax.f32 %v15072_v45, 0.0  ;;  %v13847_v25 = vcombine.high %v6229_v50, %v6233_v39  ;;  %v6273_v45 = vld [vmem:[#allocation13 + $0x170] sm:$0xff] }
0x14c3   :  { %7868 = vmatprep.subr.bf16.mxu1 %v14059_v33  ;;  %7950 = vmatprep.subr.bf16.mxu0 %v14061_v13  ;;  %v13849_v33 = vcombine.high %v6230_v22, %v6234_v2  ;;  %v6237_v13 = vld [vmem:[#allocation13 + $0x50] sm:$0xff] }
0x14c4   :  { %v18510_v38 = vpack.c.bf16 %v6221_v34, %v6221_v34  ;;  %v13854_v43 = vcombine.low %v6237_v13, %v6241_v42  ;;  %v6278_v34 = vld [vmem:[#allocation13 + $0x198] sm:$0xff] }
0x14c6   :  { %7869 = vmatpush1.bf16.msra.mxu1 %v14058_v32  ;;  %7951 = vmatpush1.bf16.msra.mxu0 %v14060_v60  ;;  %v13848_v32 = vcombine.low %v6230_v22, %v6234_v2  ;;  %v13855_v60 = vcombine.high %v6237_v13, %v6241_v42 }
0x14c7   :  { %7870 = vmatprep.subr.bf16.mxu1 %v14067_v4  ;;  %7952 = vmatprep.subr.bf16.mxu0 %v14069_v17  ;;  %v13857_v4 = vcombine.high %v6238_v1, %v6242_v51  ;;  %v6245_v17 = vld [vmem:[#allocation13 + $0x90] sm:$0xff] }
0x14c8   :  { %v13862_v47 = vcombine.low %v6245_v17, %v6249_v18 }
0x14ca   :  { %7871 = vmatpush1.bf16.msra.mxu1 %v14066_v49  ;;  %7953 = vmatpush1.bf16.msra.mxu0 %v14068_v7  ;;  %v13856_v49 = vcombine.low %v6238_v1, %v6242_v51  ;;  %v13863_v7 = vcombine.high %v6245_v17, %v6249_v18  ;;  %v6285_v51 = vld [vmem:[#allocation13 + $0x1d0] sm:$0xff] }
0x14cb   :  { %7872 = vmatprep.subr.bf16.mxu1 %v14075_v53  ;;  %7954 = vmatprep.subr.bf16.mxu0 %v14077_v46  ;;  %v13865_v53 = vcombine.high %v6246_v27, %v6250_v11  ;;  %v6253_v46 = vld [vmem:[#allocation13 + $0xd0] sm:$0xff] }
0x14cc   :  { %v13870_v15 = vcombine.low %v6253_v46, %v6257_v19 }
0x14ce   :  { %7873 = vmatpush1.bf16.msra.mxu1 %v14074_v6  ;;  %7955 = vmatpush1.bf16.msra.mxu0 %v14076_v63  ;;  %v13864_v6 = vcombine.low %v6246_v27, %v6250_v11  ;;  %v13871_v63 = vcombine.high %v6253_v46, %v6257_v19  ;;  %v6293_v11 = vld [vmem:[#allocation13 + $0x210] sm:$0xff] }
0x14cf   :  { %7874 = vmatprep.subr.bf16.mxu1 %v14083_v30  ;;  %7956 = vmatprep.subr.bf16.mxu0 %v14085_v35  ;;  %v6261_v30 = vld [vmem:[#allocation13 + $0x110] sm:$0xff] }
0x14d0   :  { %v6265_v35 = vld [vmem:[#allocation13 + $0x130] sm:$0xff] }
0x14d1   :  { %v13879_v23 = vcombine.high %v6261_v30, %v6265_v35  ;;  %v13878_v50 = vcombine.low %v6261_v30, %v6265_v35 }
0x14d2   :  { %7875 = vmatpush1.bf16.msra.mxu1 %v14082_v56  ;;  %7957 = vmatpush1.bf16.msra.mxu0 %v14084_v8  ;;  %v6269_v8 = vld [vmem:[#allocation13 + $0x150] sm:$0xff] }
0x14d3   :  { %7876 = vmatprep.subr.bf16.mxu1 %v14091_v62  ;;  %7958 = vmatprep.subr.bf16.mxu0 %v14093_v48  ;;  %v6270_v62 = vld [vmem:[#allocation13 + $0x158] sm:$0xff]  ;;  %v13887_v22 = vcombine.high %v6269_v8, %v6273_v45 }
0x14d4   :  { %v6274_v48 = vld [vmem:[#allocation13 + $0x178] sm:$0xff] }
0x14d5   :  { %v13889_v2 = vcombine.high %v6270_v62, %v6274_v48  ;;  %v13888_v13 = vcombine.low %v6270_v62, %v6274_v48  ;;  %v6317_v48 = vld [vmem:[#allocation13 + $0x2d0] sm:$0xff] }
0x14d6   :  { %7877 = vmatpush1.bf16.msra.mxu1 %v14090_v44  ;;  %7959 = vmatpush1.bf16.msra.mxu0 %v14092_v10  ;;  %v6277_v44 = vld [vmem:[#allocation13 + $0x190] sm:$0xff] }
0x14d7   :  { %7969 = vmatprep.subr.bf16.mxu1 %v13847_v25  ;;  %8051 = vmatprep.subr.bf16.mxu0 %v13849_v33  ;;  %v6281_v10 = vld [vmem:[#allocation13 + $0x1b0] sm:$0xff]  ;;  %v6282_v25 = vld [vmem:[#allocation13 + $0x1b8] sm:$0xff]  ;;  %v13886_v33 = vcombine.low %v6269_v8, %v6273_v45 }
0x14d8   :  { %v13895_v42 = vcombine.high %v6277_v44, %v6281_v10  ;;  %v13897_v1 = vcombine.high %v6278_v34, %v6282_v25  ;;  %v13896_v17 = vcombine.low %v6278_v34, %v6282_v25  ;;  %v6325_v25 = vld [vmem:[#allocation13 + $0x310] sm:$0xff] }
0x14d9   :  { %7879 = vmatmul.mubr.bf16.vlgmr.msra.gmra.mrb[44].mxu1 %v18510_v38  ;;  %7961 = vmatmul.mubr.bf16.vlgmr.msra.gmra.mrb[40].mxu0 %v18510_v38 }
0x14da   :  { %7970 = vmatpush1.bf16.msra.mxu1 %v13846_v9  ;;  %8001 = vmatprep.mubr.bf16.mxu1 %v18495_v28  ;;  %v6289_v9 = vld [vmem:[#allocation13 + $0x1f0] sm:$0xff] }
0x14db   :  { %8052 = vmatpush1.bf16.msra.mxu0 %v13848_v32  ;;  %8083 = vmatprep.mubr.bf16.mxu0 %v18495_v28  ;;  %v6262_v28 = vld [vmem:[#allocation13 + $0x118] sm:$0xff]  ;;  %v13903_v18 = vcombine.high %v6285_v51, %v6289_v9 }
0x14dc   :  { %7971 = vmatprep.subr.bf16.mxu1 %v13855_v60  ;;  %8053 = vmatprep.subr.bf16.mxu0 %v13857_v4  ;;  %v13881_v56 = vcombine.high %v6262_v28, %v6266_v3  ;;  %v13880_v39 = vcombine.low %v6262_v28, %v6266_v3  ;;  %v6286_v32 = vld [vmem:[#allocation13 + $0x1d8] sm:$0xff]  ;;  %v13894_v4 = vcombine.low %v6277_v44, %v6281_v10  ;;  %v6309_v3 = vld [vmem:[#allocation13 + $0x290] sm:$0xff] }
0x14dd   :  { %v6290_v60 = vld [vmem:[#allocation13 + $0x1f8] sm:$0xff] }
0x14de   :  { %7972 = vmatpush1.bf16.msra.mxu1 %v13854_v43  ;;  %v13905_v27 = vcombine.high %v6286_v32, %v6290_v60  ;;  %v6297_v43 = vld [vmem:[#allocation13 + $0x230] sm:$0xff]  ;;  %v13904_v46 = vcombine.low %v6286_v32, %v6290_v60 }
0x14df   :  { %8054 = vmatpush1.bf16.msra.mxu0 %v13856_v49  ;;  %7973 = vmatprep.subr.bf16.mxu1 %v13863_v7  ;;  %v6294_v49 = vld [vmem:[#allocation13 + $0x218] sm:$0xff]  ;;  %v13911_v19 = vcombine.high %v6293_v11, %v6297_v43  ;;  %v6333_v60 = vld [vmem:[#allocation13 + $0x350] sm:$0xff] }
0x14e0   :  { %8055 = vmatprep.subr.bf16.mxu0 %v13865_v53  ;;  %v6298_v7 = vld [vmem:[#allocation13 + $0x238] sm:$0xff]  ;;  %v13902_v53 = vcombine.low %v6285_v51, %v6289_v9 }
0x14e1   :  { %v13913_v0 = vcombine.high %v6294_v49, %v6298_v7  ;;  %v13912_v30 = vcombine.low %v6294_v49, %v6298_v7  ;;  %v6341_v7 = vld [vmem:[#allocation13 + $0x390] sm:$0xff] }
0x14e2   :  { %7974 = vmatpush1.bf16.msra.mxu1 %v13862_v47  ;;  %v6305_v47 = vld [vmem:[#allocation13 + $0x270] sm:$0xff] }
0x14e3   :  { %8056 = vmatpush1.bf16.msra.mxu0 %v13864_v6  ;;  %7975 = vmatprep.subr.bf16.mxu1 %v13871_v63  ;;  %v6302_v6 = vld [vmem:[#allocation13 + $0x258] sm:$0xff]  ;;  %v13919_v35 = vcombine.high %v6301_v52, %v6305_v47 }
0x14e4   :  { %8057 = vmatprep.subr.bf16.mxu0 %v13873_v14  ;;  %v6306_v63 = vld [vmem:[#allocation13 + $0x278] sm:$0xff]  ;;  %v13910_v14 = vcombine.low %v6293_v11, %v6297_v43 }
0x14e5   :  { %v13921_v28 = vcombine.high %v6302_v6, %v6306_v63  ;;  %v13920_v8 = vcombine.low %v6302_v6, %v6306_v63  ;;  %v6349_v63 = vld [vmem:[#allocation13 + $0x3d0] sm:$0xff] }
0x14e6   :  { %7976 = vmatpush1.bf16.msra.mxu1 %v13870_v15  ;;  %v6313_v15 = vld [vmem:[#allocation13 + $0x2b0] sm:$0xff] }
0x14e7   :  { %8058 = vmatpush1.bf16.msra.mxu0 %v13872_v24  ;;  %7977 = vmatprep.subr.bf16.mxu1 %v13879_v23  ;;  %v6310_v24 = vld [vmem:[#allocation13 + $0x298] sm:$0xff]  ;;  %v13927_v45 = vcombine.high %v6309_v3, %v6313_v15 }
0x14e8   :  { %8059 = vmatprep.subr.bf16.mxu0 %v13881_v56  ;;  %v6314_v23 = vld [vmem:[#allocation13 + $0x2b8] sm:$0xff]  ;;  %v13918_v56 = vcombine.low %v6301_v52, %v6305_v47 }
0x14e9   :  { %v13929_v62 = vcombine.high %v6310_v24, %v6314_v23  ;;  %v13928_v44 = vcombine.low %v6310_v24, %v6314_v23  ;;  %v6357_v23 = vld [vmem:[#allocation13 + $0x410] sm:$0xff] }
0x14ea   :  { %7978 = vmatpush1.bf16.msra.mxu1 %v13878_v50  ;;  %v6321_v50 = vld [vmem:[#allocation13 + $0x2f0] sm:$0xff] }
0x14eb   :  { %8060 = vmatpush1.bf16.msra.mxu0 %v13880_v39  ;;  %7979 = vmatprep.subr.bf16.mxu1 %v13887_v22  ;;  %v6318_v39 = vld [vmem:[#allocation13 + $0x2d8] sm:$0xff]  ;;  %v13935_v10 = vcombine.high %v6317_v48, %v6321_v50 }
0x14ec   :  { %8061 = vmatprep.subr.bf16.mxu0 %v13889_v2  ;;  %v6322_v22 = vld [vmem:[#allocation13 + $0x2f8] sm:$0xff]  ;;  %v13926_v2 = vcombine.low %v6309_v3, %v6313_v15 }
0x14ed   :  { %v13937_v34 = vcombine.high %v6318_v39, %v6322_v22  ;;  %v13936_v51 = vcombine.low %v6318_v39, %v6322_v22  ;;  %v6365_v22 = vld [vmem:[#allocation13 + $0x450] sm:$0xff] }
0x14ee   :  { %7980 = vmatpush1.bf16.msra.mxu1 %v13886_v33  ;;  %v6329_v33 = vld [vmem:[#allocation13 + $0x330] sm:$0xff] }
0x14ef   :  { %8062 = vmatpush1.bf16.msra.mxu0 %v13888_v13  ;;  %7981 = vmatprep.subr.bf16.mxu1 %v13895_v42  ;;  %v6326_v13 = vld [vmem:[#allocation13 + $0x318] sm:$0xff]  ;;  %v13943_v9 = vcombine.high %v6325_v25, %v6329_v33 }
0x14f0   :  { %8063 = vmatprep.subr.bf16.mxu0 %v13897_v1  ;;  %v6330_v42 = vld [vmem:[#allocation13 + $0x338] sm:$0xff]  ;;  %v13934_v1 = vcombine.low %v6317_v48, %v6321_v50 }
0x14f1   :  { %v13945_v32 = vcombine.high %v6326_v13, %v6330_v42  ;;  %v13944_v11 = vcombine.low %v6326_v13, %v6330_v42  ;;  %v6373_v13 = vld [vmem:[#allocation13 + $0x490] sm:$0xff] }
0x14f2   :  { %7982 = vmatpush1.bf16.msra.mxu1 %v13894_v4  ;;  %v6337_v4 = vld [vmem:[#allocation13 + $0x370] sm:$0xff] }
0x14f3   :  { %8064 = vmatpush1.bf16.msra.mxu0 %v13896_v17  ;;  %7983 = vmatprep.subr.bf16.mxu1 %v13903_v18  ;;  %v6334_v17 = vld [vmem:[#allocation13 + $0x358] sm:$0xff]  ;;  %v13951_v43 = vcombine.high %v6333_v60, %v6337_v4  ;;  %v6377_v42 = vld [vmem:[#allocation13 + $0x4b0] sm:$0xff] }
0x14f4   :  { %8065 = vmatprep.subr.bf16.mxu0 %v13905_v27  ;;  %v6338_v18 = vld [vmem:[#allocation13 + $0x378] sm:$0xff]  ;;  %v13942_v27 = vcombine.low %v6325_v25, %v6329_v33 }
0x14f5   :  { %v13953_v49 = vcombine.high %v6334_v17, %v6338_v18  ;;  %v13952_v52 = vcombine.low %v6334_v17, %v6338_v18  ;;  %v6381_v18 = vld [vmem:[#allocation13 + $0x4d0] sm:$0xff] }
0x14f6   :  { %7984 = vmatpush1.bf16.msra.mxu1 %v13902_v53  ;;  %v6345_v53 = vld [vmem:[#allocation13 + $0x3b0] sm:$0xff] }
0x14f7   :  { %8066 = vmatpush1.bf16.msra.mxu0 %v13904_v46  ;;  %7985 = vmatprep.subr.bf16.mxu1 %v13911_v19  ;;  %v6342_v46 = vld [vmem:[#allocation13 + $0x398] sm:$0xff]  ;;  %v13959_v47 = vcombine.high %v6341_v7, %v6345_v53 }
0x14f8   :  { %8067 = vmatprep.subr.bf16.mxu0 %v13913_v0  ;;  %v6346_v19 = vld [vmem:[#allocation13 + $0x3b8] sm:$0xff]  ;;  %v13950_v0 = vcombine.low %v6333_v60, %v6337_v4  ;;  %v13991_v4 = vcombine.high %v6373_v13, %v6377_v42 }
0x14f9   :  { %v13961_v6 = vcombine.high %v6342_v46, %v6346_v19  ;;  %v13960_v3 = vcombine.low %v6342_v46, %v6346_v19  ;;  %v6389_v46 = vld [vmem:[#allocation13 + $0x510] sm:$0xff] }
0x14fa   :  { %7986 = vmatpush1.bf16.msra.mxu1 %v13910_v14  ;;  %v6353_v14 = vld [vmem:[#allocation13 + $0x3f0] sm:$0xff] }
0x14fb   :  { %8068 = vmatpush1.bf16.msra.mxu0 %v13912_v30  ;;  %7987 = vmatprep.subr.bf16.mxu1 %v13919_v35  ;;  %v6350_v30 = vld [vmem:[#allocation13 + $0x3d8] sm:$0xff]  ;;  %v13967_v15 = vcombine.high %v6349_v63, %v6353_v14  ;;  %v6393_v19 = vld [vmem:[#allocation13 + $0x530] sm:$0xff] }
0x14fc   :  { %8069 = vmatprep.subr.bf16.mxu0 %v13921_v28  ;;  %v6354_v35 = vld [vmem:[#allocation13 + $0x3f8] sm:$0xff]  ;;  %v13958_v28 = vcombine.low %v6341_v7, %v6345_v53 }
0x14fd   :  { %v13969_v24 = vcombine.high %v6350_v30, %v6354_v35  ;;  %v13968_v48 = vcombine.low %v6350_v30, %v6354_v35  ;;  %v6401_v30 = vld [vmem:[#allocation13 + $0x570] sm:$0xff]  ;;  %v6398_v35 = vld [vmem:[#allocation13 + $0x558] sm:$0xff] }
0x14fe   :  { %7988 = vmatpush1.bf16.msra.mxu1 %v13918_v56  ;;  %v6361_v56 = vld [vmem:[#allocation13 + $0x430] sm:$0xff] }
0x14ff   :  { %8070 = vmatpush1.bf16.msra.mxu0 %v13920_v8  ;;  %7989 = vmatprep.subr.bf16.mxu1 %v13927_v45  ;;  %v6358_v8 = vld [vmem:[#allocation13 + $0x418] sm:$0xff]  ;;  %v13975_v50 = vcombine.high %v6357_v23, %v6361_v56 }
0x1500   :  { %8071 = vmatprep.subr.bf16.mxu0 %v13929_v62  ;;  %v6362_v45 = vld [vmem:[#allocation13 + $0x438] sm:$0xff]  ;;  %v13966_v62 = vcombine.low %v6349_v63, %v6353_v14  ;;  %v6397_v14 = vld [vmem:[#allocation13 + $0x550] sm:$0xff] }
0x1501   :  { %v13977_v39 = vcombine.high %v6358_v8, %v6362_v45  ;;  %v13976_v25 = vcombine.low %v6358_v8, %v6362_v45  ;;  %v6409_v8 = vld [vmem:[#allocation13 + $0x5b0] sm:$0xff]  ;;  %v6406_v45 = vld [vmem:[#allocation13 + $0x598] sm:$0xff] }
0x1502   :  { %7990 = vmatpush1.bf16.msra.mxu1 %v13926_v2  ;;  %v6369_v2 = vld [vmem:[#allocation13 + $0x470] sm:$0xff] }
0x1503   :  { %8072 = vmatpush1.bf16.msra.mxu0 %v13928_v44  ;;  %7991 = vmatprep.subr.bf16.mxu1 %v13935_v10  ;;  %v13974_v44 = vcombine.low %v6357_v23, %v6361_v56  ;;  %v6366_v10 = vld [vmem:[#allocation13 + $0x458] sm:$0xff]  ;;  %v13983_v33 = vcombine.high %v6365_v22, %v6369_v2  ;;  %v6405_v56 = vld [vmem:[#allocation13 + $0x590] sm:$0xff] }
0x1504   :  { %8073 = vmatprep.subr.bf16.mxu0 %v13937_v34  ;;  %v6370_v34 = vld [vmem:[#allocation13 + $0x478] sm:$0xff] }
0x1505   :  { %v13984_v60 = vcombine.low %v6366_v10, %v6370_v34 }
0x1506   :  { %7992 = vmatpush1.bf16.msra.mxu1 %v13934_v1  ;;  %v13985_v1 = vcombine.high %v6366_v10, %v6370_v34  ;;  %v6414_v10 = vld [vmem:[#allocation13 + $0x5d8] sm:$0xff] }
0x1507   :  { %8074 = vmatpush1.bf16.msra.mxu0 %v13936_v51  ;;  %7993 = vmatprep.subr.bf16.mxu1 %v13943_v9  ;;  %v6374_v51 = vld [vmem:[#allocation13 + $0x498] sm:$0xff] }
0x1508   :  { %8075 = vmatprep.subr.bf16.mxu0 %v13945_v32  ;;  %v6378_v9 = vld [vmem:[#allocation13 + $0x4b8] sm:$0xff]  ;;  %v13982_v32 = vcombine.low %v6365_v22, %v6369_v2  ;;  %v6413_v2 = vld [vmem:[#allocation13 + $0x5d0] sm:$0xff] }
0x1509   :  { %v13993_v17 = vcombine.high %v6374_v51, %v6378_v9  ;;  %v6418_v34 = vld [vmem:[#allocation13 + $0x5f8] sm:$0xff] }
0x150a   :  { %7994 = vmatpush1.bf16.msra.mxu1 %v13942_v27  ;;  %v6385_v27 = vld [vmem:[#allocation13 + $0x4f0] sm:$0xff] }
0x150b   :  { %8076 = vmatpush1.bf16.msra.mxu0 %v13944_v11  ;;  %7995 = vmatprep.subr.bf16.mxu1 %v13951_v43  ;;  %v6382_v11 = vld [vmem:[#allocation13 + $0x4d8] sm:$0xff]  ;;  %v13999_v7 = vcombine.high %v6381_v18, %v6385_v27 }
0x150c   :  { %8077 = vmatprep.subr.bf16.mxu0 %v13953_v49  ;;  %v6386_v43 = vld [vmem:[#allocation13 + $0x4f8] sm:$0xff]  ;;  %v13990_v49 = vcombine.low %v6373_v13, %v6377_v42  ;;  %v14033_v42 = vcombine.high %v6414_v10, %v6418_v34 }
0x150d   :  { %v14001_v53 = vcombine.high %v6382_v11, %v6386_v43 }
0x150e   :  { %7996 = vmatpush1.bf16.msra.mxu1 %v13950_v0  ;;  %v6390_v0 = vld [vmem:[#allocation13 + $0x518] sm:$0xff] }
0x150f   :  { %8078 = vmatpush1.bf16.msra.mxu0 %v13952_v52  ;;  %7997 = vmatprep.subr.bf16.mxu1 %v13959_v47  ;;  %v6394_v52 = vld [vmem:[#allocation13 + $0x538] sm:$0xff]  ;;  %v14000_v47 = vcombine.low %v6382_v11, %v6386_v43  ;;  %v6433_v11 = vld [vmem:[#allocation13 + $0x670] sm:$0xff] }
0x1510   :  { %8079 = vmatprep.subr.bf16.mxu0 %v13961_v6  ;;  %v14007_v6 = vcombine.high %v6389_v46, %v6393_v19  ;;  %v14009_v63 = vcombine.high %v6390_v0, %v6394_v52  ;;  %v6430_v43 = vld [vmem:[#allocation13 + $0x658] sm:$0xff] }
0x1512   :  { %7998 = vmatpush1.bf16.msra.mxu1 %v13958_v28  ;;  %v6402_v28 = vld [vmem:[#allocation13 + $0x578] sm:$0xff] }
0x1513   :  { %8080 = vmatpush1.bf16.msra.mxu0 %v13960_v3  ;;  %7999 = vmatprep.subr.bf16.mxu1 %v13967_v15  ;;  %v14006_v3 = vcombine.low %v6389_v46, %v6393_v19  ;;  %v14008_v15 = vcombine.low %v6390_v0, %v6394_v52  ;;  %v14017_v23 = vcombine.high %v6398_v35, %v6402_v28  ;;  %v6437_v19 = vld [vmem:[#allocation13 + $0x690] sm:$0xff]  ;;  %v6438_v52 = vld [vmem:[#allocation13 + $0x698] sm:$0xff] }
0x1514   :  { %8081 = vmatprep.subr.bf16.mxu0 %v13969_v24  ;;  %v14015_v24 = vcombine.high %v6397_v14, %v6401_v30  ;;  %v6441_v0 = vld [vmem:[#allocation13 + $0x6b0] sm:$0xff] }
0x1516   :  { %8000 = vmatpush1.bf16.msra.mxu1 %v13966_v62  ;;  %v6410_v62 = vld [vmem:[#allocation13 + $0x5b8] sm:$0xff] }
0x1517   :  { %8082 = vmatpush1.bf16.msra.mxu0 %v13968_v48  ;;  %8010 = vmatprep.subr.bf16.mxu1 %v13975_v50  ;;  %v14014_v48 = vcombine.low %v6397_v14, %v6401_v30  ;;  %v14016_v50 = vcombine.low %v6398_v35, %v6402_v28  ;;  %v14025_v22 = vcombine.high %v6406_v45, %v6410_v62  ;;  %v6445_v30 = vld [vmem:[#allocation13 + $0x6d0] sm:$0xff]  ;;  %v6446_v28 = vld [vmem:[#allocation13 + $0x6d8] sm:$0xff] }
0x1518   :  { %8092 = vmatprep.subr.bf16.mxu0 %v13977_v39  ;;  %v14023_v39 = vcombine.high %v6405_v56, %v6409_v8  ;;  %v6449_v35 = vld [vmem:[#allocation13 + $0x6f0] sm:$0xff] }
0x1519   :  { %8002 = vmatmul.mubr.bf16.vlgmr.msra.gmra.mrb[48].mxu1 %v18497_v58 }
0x151a   :  { %8084 = vmatmul.mubr.bf16.vlgmr.msra.gmra.mrb[44].mxu0 %v18497_v58  ;;  %8011 = vmatpush1.bf16.msra.mxu1 %v13974_v44  ;;  %v13992_v58 = vcombine.low %v6374_v51, %v6378_v9  ;;  %v6417_v44 = vld [vmem:[#allocation13 + $0x5f0] sm:$0xff]  ;;  %v6422_v9 = vld [vmem:[#allocation13 + $0x618] sm:$0xff] }
0x151b   :  { %8042 = vmatprep.mubr.bf16.mxu1 %v18501_v20  ;;  %8093 = vmatpush1.bf16.msra.mxu0 %v13976_v25  ;;  %v14022_v25 = vcombine.low %v6405_v56, %v6409_v8  ;;  %v14031_v13 = vcombine.high %v6413_v2, %v6417_v44  ;;  %v6425_v51 = vld [vmem:[#allocation13 + $0x630] sm:$0xff] }
0x151c   :  { %8124 = vmatprep.mubr.bf16.mxu0 %v18501_v20  ;;  %8012 = vmatprep.subr.bf16.mxu1 %v13983_v33  ;;  %v13998_v20 = vcombine.low %v6381_v18, %v6385_v27  ;;  %v14024_v33 = vcombine.low %v6406_v45, %v6410_v62  ;;  %v6429_v27 = vld [vmem:[#allocation13 + $0x650] sm:$0xff]  ;;  %v6454_v62 = vld [vmem:[#allocation13 + $0x718] sm:$0xff] }
0x151d   :  { %8094 = vmatprep.subr.bf16.mxu0 %v13985_v1  ;;  %v6421_v1 = vld [vmem:[#allocation13 + $0x610] sm:$0xff] }
0x151e   :  { %8013 = vmatpush1.bf16.msra.mxu1 %v13982_v32  ;;  %v6426_v32 = vld [vmem:[#allocation13 + $0x638] sm:$0xff]  ;;  %v6453_v8 = vld [vmem:[#allocation13 + $0x710] sm:$0xff] }
0x151f   :  { %8095 = vmatpush1.bf16.msra.mxu0 %v13984_v60  ;;  %8014 = vmatprep.subr.bf16.mxu1 %v13991_v4  ;;  %v14030_v60 = vcombine.low %v6413_v2, %v6417_v44  ;;  %v14032_v4 = vcombine.low %v6414_v10, %v6418_v34  ;;  %v14041_v18 = vcombine.high %v6422_v9, %v6426_v32  ;;  %v6457_v45 = vld [vmem:[#allocation13 + $0x730] sm:$0xff]  ;;  %v6462_v34 = vld [vmem:[#allocation13 + $0x758] sm:$0xff] }
0x1520   :  { %8096 = vmatprep.subr.bf16.mxu0 %v13993_v17  ;;  %v14039_v17 = vcombine.high %v6421_v1, %v6425_v51  ;;  %v6461_v44 = vld [vmem:[#allocation13 + $0x750] sm:$0xff] }
0x1521   :  { %v6465_v10 = vld [vmem:[#allocation13 + $0x770] sm:$0xff] }
0x1522   :  { %8015 = vmatpush1.bf16.msra.mxu1 %v13990_v49  ;;  %v6434_v49 = vld [vmem:[#allocation13 + $0x678] sm:$0xff] }
0x1523   :  { %8097 = vmatpush1.bf16.msra.mxu0 %v13992_v58  ;;  %8016 = vmatprep.subr.bf16.mxu1 %v13999_v7  ;;  %v14038_v58 = vcombine.low %v6421_v1, %v6425_v51  ;;  %v14040_v7 = vcombine.low %v6422_v9, %v6426_v32  ;;  %v14049_v46 = vcombine.high %v6430_v43, %v6434_v49  ;;  %v6469_v51 = vld [vmem:[#allocation13 + $0x790] sm:$0xff]  ;;  %v6470_v32 = vld [vmem:[#allocation13 + $0x798] sm:$0xff] }
0x1524   :  { %8098 = vmatprep.subr.bf16.mxu0 %v14001_v53  ;;  %v14047_v53 = vcombine.high %v6429_v27, %v6433_v11  ;;  %v6473_v9 = vld [vmem:[#allocation13 + $0x7b0] sm:$0xff] }
0x1526   :  { %8017 = vmatpush1.bf16.msra.mxu1 %v13998_v20  ;;  %v6442_v20 = vld [vmem:[#allocation13 + $0x6b8] sm:$0xff] }
0x1527   :  { %8099 = vmatpush1.bf16.msra.mxu0 %v14000_v47  ;;  %8018 = vmatprep.subr.bf16.mxu1 %v14007_v6  ;;  %v14046_v47 = vcombine.low %v6429_v27, %v6433_v11  ;;  %v14048_v6 = vcombine.low %v6430_v43, %v6434_v49  ;;  %v14057_v14 = vcombine.high %v6438_v52, %v6442_v20  ;;  %v6477_v11 = vld [vmem:[#allocation13 + $0x7d0] sm:$0xff] }
0x1528   :  { %8100 = vmatprep.subr.bf16.mxu0 %v14009_v63  ;;  %v14055_v63 = vcombine.high %v6437_v19, %v6441_v0  ;;  %v6481_v43 = vld [vmem:[#allocation13 + $0x7f0] sm:$0xff] }
0x1529   :  { %v18523_v49 = vld [vmem:[%s18670_s10 + $0x8] sm:$0xff] }
0x152a   :  { %8019 = vmatpush1.bf16.msra.mxu1 %v14006_v3  ;;  %v6450_v3 = vld [vmem:[#allocation13 + $0x6f8] sm:$0xff] }
0x152b   :  { %8101 = vmatpush1.bf16.msra.mxu0 %v14008_v15  ;;  %8020 = vmatprep.subr.bf16.mxu1 %v14015_v24  ;;  %v14054_v15 = vcombine.low %v6437_v19, %v6441_v0  ;;  %v14056_v24 = vcombine.low %v6438_v52, %v6442_v20  ;;  %v14065_v56 = vcombine.high %v6446_v28, %v6450_v3 }
0x152c   :  { %8102 = vmatprep.subr.bf16.mxu0 %v14017_v23  ;;  %v14063_v23 = vcombine.high %v6445_v30, %v6449_v35  ;;  %v14095_v0 = vcombine.high %v6477_v11, %v6481_v43 }
0x152e   :  { %8021 = vmatpush1.bf16.msra.mxu1 %v14014_v48  ;;  %v6458_v48 = vld [vmem:[#allocation13 + $0x738] sm:$0xff] }
0x152f   :  { %8103 = vmatpush1.bf16.msra.mxu0 %v14016_v50  ;;  %8022 = vmatprep.subr.bf16.mxu1 %v14023_v39  ;;  %v14062_v50 = vcombine.low %v6445_v30, %v6449_v35  ;;  %v14064_v39 = vcombine.low %v6446_v28, %v6450_v3  ;;  %v14073_v2 = vcombine.high %v6454_v62, %v6458_v48  ;;  %v15578_v35 = vld [vmem:[#allocation14] ss:$16 sps:$4 sm:$0xff]   ;;  %v15581_v28 = vld [vmem:[#allocation14 + $0x8] ss:$16 sps:$4 sm:$0xff]   ;;  %v15586_v3 = vld [vmem:[#allocation14 + $0x24] ss:$16 sps:$4 sm:$0xff]  }
0x1530   :  { %8104 = vmatprep.subr.bf16.mxu0 %v14025_v22  ;;  %v14071_v22 = vcombine.high %v6453_v8, %v6457_v45 }
0x1532   :  { %8023 = vmatpush1.bf16.msra.mxu1 %v14022_v25  ;;  %v6466_v25 = vld [vmem:[#allocation13 + $0x778] sm:$0xff] }
0x1533   :  { %8105 = vmatpush1.bf16.msra.mxu0 %v14024_v33  ;;  %8024 = vmatprep.subr.bf16.mxu1 %v14031_v13  ;;  %v14070_v33 = vcombine.low %v6453_v8, %v6457_v45  ;;  %v14072_v13 = vcombine.low %v6454_v62, %v6458_v48  ;;  %v14081_v1 = vcombine.high %v6462_v34, %v6466_v25  ;;  %v15595_v8 = vld [vmem:[#allocation14 + $0x4c] ss:$16 sps:$4 sm:$0xff]   ;;  %v15590_v45 = vld [vmem:[#allocation14 + $0x40] ss:$16 sps:$4 sm:$0xff]   ;;  %v15593_v62 = vld [vmem:[#allocation14 + $0x48] ss:$16 sps:$4 sm:$0xff]  }
0x1534   :  { %8106 = vmatprep.subr.bf16.mxu0 %v14033_v42  ;;  %v14079_v42 = vcombine.high %v6461_v44, %v6465_v10  ;;  %v15598_v48 = vld [vmem:[#allocation14 + $0x64] ss:$16 sps:$4 sm:$0xff]  }
0x1536   :  { %8025 = vmatpush1.bf16.msra.mxu1 %v14030_v60  ;;  %v6474_v60 = vld [vmem:[#allocation13 + $0x7b8] sm:$0xff] }
0x1537   :  { %8107 = vmatpush1.bf16.msra.mxu0 %v14032_v4  ;;  %8026 = vmatprep.subr.bf16.mxu1 %v14039_v17  ;;  %v14078_v4 = vcombine.low %v6461_v44, %v6465_v10  ;;  %v14080_v17 = vcombine.low %v6462_v34, %v6466_v25  ;;  %v14089_v27 = vcombine.high %v6470_v32, %v6474_v60  ;;  %v15602_v44 = vld [vmem:[#allocation14 + $0x80] ss:$16 sps:$4 sm:$0xff]   ;;  %v15605_v10 = vld [vmem:[#allocation14 + $0x88] ss:$16 sps:$4 sm:$0xff]   ;;  %v15610_v34 = vld [vmem:[#allocation14 + $0xa4] ss:$16 sps:$4 sm:$0xff]  }
0x1538   :  { %8108 = vmatprep.subr.bf16.mxu0 %v14041_v18  ;;  %v14087_v18 = vcombine.high %v6469_v51, %v6473_v9  ;;  %v14088_v19 = vcombine.low %v6470_v32, %v6474_v60  ;;  %v15613_v25 = vld [vmem:[#allocation14 + $0xac] ss:$16 sps:$4 sm:$0xff]   ;;  %v15622_v32 = vld [vmem:[#allocation14 + $0xe4] ss:$16 sps:$4 sm:$0xff]  }
0x1539   :  { %v15625_v60 = vld [vmem:[#allocation14 + $0xec] ss:$16 sps:$4 sm:$0xff]  }
0x153a   :  { %8027 = vmatpush1.bf16.msra.mxu1 %v14038_v58  ;;  %v3217_v58 = vrot.slane %v18523_v49, %v17339_v54 }
0x153b   :  { %8109 = vmatpush1.bf16.msra.mxu0 %v14040_v7  ;;  %8028 = vmatprep.subr.bf16.mxu1 %v14047_v53  ;;  %v6478_v7 = vld [vmem:[#allocation13 + $0x7d8] sm:$0xff] }
0x153c   :  { %8110 = vmatprep.subr.bf16.mxu0 %v14049_v46  ;;  %v6482_v53 = vld [vmem:[#allocation13 + $0x7f8] sm:$0xff]  ;;  %v14086_v46 = vcombine.low %v6469_v51, %v6473_v9  ;;  %v4182_v20 = vadd.f32 %v18442_v5, %v3217_v58  ;;  %v15614_v51 = vld [vmem:[#allocation14 + $0xc0] ss:$16 sps:$4 sm:$0xff]   ;;  %v15634_v58 = vld [vmem:[#allocation14 + $0x124] ss:$16 sps:$4 sm:$0xff]  }
0x153d   :  { %v14097_v52 = vcombine.high %v6478_v7, %v6482_v53  ;;  %v15589_v5 = vld [vmem:[#allocation14 + $0x2c] ss:$16 sps:$4 sm:$0xff]   ;;  %v15617_v9 = vld [vmem:[#allocation14 + $0xc8] ss:$16 sps:$4 sm:$0xff]  }
0x153e   :  { %8029 = vmatpush1.bf16.msra.mxu1 %v14046_v47  ;;  %v14094_v47 = vcombine.low %v6477_v11, %v6481_v43  ;;  %v4318_v30 = vmax.f32 %v4182_v20, 0.0  ;;  %v15626_v11 = vld [vmem:[#allocation14 + $0x100] ss:$16 sps:$4 sm:$0xff]   ;;  %v15629_v43 = vld [vmem:[#allocation14 + $0x108] ss:$16 sps:$4 sm:$0xff]  }
0x153f   :  { %8111 = vmatpush1.bf16.msra.mxu0 %v14048_v6  ;;  %8030 = vmatprep.subr.bf16.mxu1 %v14055_v63  ;;  %v14096_v6 = vcombine.low %v6478_v7, %v6482_v53  ;;  %v15580_v63 = vld [vmem:[#allocation14 + $0x4] ss:$16 sps:$4 sm:$0xff]   ;;  %v15637_v7 = vld [vmem:[#allocation14 + $0x12c] ss:$16 sps:$4 sm:$0xff]   ;;  %v15632_v53 = vld [vmem:[#allocation14 + $0x120] ss:$16 sps:$4 sm:$0xff]  }
0x1540   :  { %8112 = vmatprep.subr.bf16.mxu0 %v14057_v14  ;;  %v15583_v14 = vld [vmem:[#allocation14 + $0xc] ss:$16 sps:$4 sm:$0xff]   ;;  %v15641_v20 = vld [vmem:[#allocation14 + $0x148] ss:$16 sps:$4 sm:$0xff]  }
0x1542   :  { %8031 = vmatpush1.bf16.msra.mxu1 %v14054_v15  ;;  %v8142_v15 = vpack.c.bf16 %v4318_v30, %v4318_v30  ;;  %v15652_v30 = vld [vmem:[#allocation14 + $0x184] ss:$16 sps:$4 sm:$0xff]  }
0x1543   :  { %8113 = vmatpush1.bf16.msra.mxu0 %v14056_v24  ;;  %8032 = vmatprep.subr.bf16.mxu1 %v14063_v23  ;;  %v15584_v24 = vld [vmem:[#allocation14 + $0x20] ss:$16 sps:$4 sm:$0xff]   ;;  %v15587_v23 = vld [vmem:[#allocation14 + $0x28] ss:$16 sps:$4 sm:$0xff]  }
0x1544   :  { %8114 = vmatprep.subr.bf16.mxu0 %v14065_v56  ;;  %v15592_v56 = vld [vmem:[#allocation14 + $0x44] ss:$16 sps:$4 sm:$0xff]  }
0x1546   :  { %8033 = vmatpush1.bf16.msra.mxu1 %v14062_v50  ;;  %v15601_v50 = vld [vmem:[#allocation14 + $0x6c] ss:$16 sps:$4 sm:$0xff]  }
0x1547   :  { %8115 = vmatpush1.bf16.msra.mxu0 %v14064_v39  ;;  %8034 = vmatprep.subr.bf16.mxu1 %v14071_v22  ;;  %v15599_v39 = vld [vmem:[#allocation14 + $0x68] ss:$16 sps:$4 sm:$0xff]   ;;  %v15604_v22 = vld [vmem:[#allocation14 + $0x84] ss:$16 sps:$4 sm:$0xff]  }
0x1548   :  { %8116 = vmatprep.subr.bf16.mxu0 %v14073_v2  ;;  %v15607_v2 = vld [vmem:[#allocation14 + $0x8c] ss:$16 sps:$4 sm:$0xff]  }
0x154a   :  { %8035 = vmatpush1.bf16.msra.mxu1 %v14070_v33  ;;  %v15608_v33 = vld [vmem:[#allocation14 + $0xa0] ss:$16 sps:$4 sm:$0xff]  }
0x154b   :  { %8117 = vmatpush1.bf16.msra.mxu0 %v14072_v13  ;;  %8036 = vmatprep.subr.bf16.mxu1 %v14079_v42  ;;  %v15611_v13 = vld [vmem:[#allocation14 + $0xa8] ss:$16 sps:$4 sm:$0xff]   ;;  %v15616_v42 = vld [vmem:[#allocation14 + $0xc4] ss:$16 sps:$4 sm:$0xff]  }
0x154c   :  { %8118 = vmatprep.subr.bf16.mxu0 %v14081_v1  ;;  %v15619_v1 = vld [vmem:[#allocation14 + $0xcc] ss:$16 sps:$4 sm:$0xff]  }
0x154e   :  { %8037 = vmatpush1.bf16.msra.mxu1 %v14078_v4  ;;  %v15620_v4 = vld [vmem:[#allocation14 + $0xe0] ss:$16 sps:$4 sm:$0xff]  }
0x154f   :  { %8119 = vmatpush1.bf16.msra.mxu0 %v14080_v17  ;;  %8038 = vmatprep.subr.bf16.mxu1 %v14087_v18  ;;  %v15623_v17 = vld [vmem:[#allocation14 + $0xe8] ss:$16 sps:$4 sm:$0xff]   ;;  %v15628_v18 = vld [vmem:[#allocation14 + $0x104] ss:$16 sps:$4 sm:$0xff]  }
0x1550   :  { %8120 = vmatprep.subr.bf16.mxu0 %v14089_v27  ;;  %v15631_v27 = vld [vmem:[#allocation14 + $0x10c] ss:$16 sps:$4 sm:$0xff]  }
0x1552   :  { %8039 = vmatpush1.bf16.msra.mxu1 %v14086_v46  ;;  %v15635_v46 = vld [vmem:[#allocation14 + $0x128] ss:$16 sps:$4 sm:$0xff]  }
0x1553   :  { %8121 = vmatpush1.bf16.msra.mxu0 %v14088_v19  ;;  %8040 = vmatprep.subr.bf16.mxu1 %v14095_v0  ;;  %v15640_v19 = vld [vmem:[#allocation14 + $0x144] ss:$16 sps:$4 sm:$0xff]   ;;  %v15643_v0 = vld [vmem:[#allocation14 + $0x14c] ss:$16 sps:$4 sm:$0xff]  }
0x1554   :  { %8122 = vmatprep.subr.bf16.mxu0 %v14097_v52  ;;  %v15638_v52 = vld [vmem:[#allocation14 + $0x140] ss:$16 sps:$4 sm:$0xff]  }
0x1556   :  { %8041 = vmatpush1.bf16.msra.mxu1 %v14094_v47  ;;  %v15646_v47 = vld [vmem:[#allocation14 + $0x164] ss:$16 sps:$4 sm:$0xff]  }
0x1557   :  { %8123 = vmatpush1.bf16.msra.mxu0 %v14096_v6  ;;  %9707 = vmatprep.subr.bf16.mxu1 %v15580_v63  ;;  %v15649_v6 = vld [vmem:[#allocation14 + $0x16c] ss:$16 sps:$4 sm:$0xff]   ;;  %v15644_v63 = vld [vmem:[#allocation14 + $0x160] ss:$16 sps:$4 sm:$0xff]  }
0x1558   :  { %9871 = vmatprep.subr.bf16.mxu0 %v15583_v14  ;;  %v15647_v14 = vld [vmem:[#allocation14 + $0x168] ss:$16 sps:$4 sm:$0xff]  }
0x1559   :  { %8043 = vmatmul.mubr.bf16.vlgmr.msra.gmra.mrb[48].mxu1 %v18510_v38 }
0x155a   :  { %8125 = vmatmul.mubr.bf16.vlgmr.msra.gmra.mrb[44].mxu0 %v18510_v38  ;;  %9708 = vmatpush1.bf16.msra.mxu1 %v15578_v35  ;;  %v15596_v38 = vld [vmem:[#allocation14 + $0x60] ss:$16 sps:$4 sm:$0xff]   ;;  %v15655_v35 = vld [vmem:[#allocation14 + $0x18c] ss:$16 sps:$4 sm:$0xff]  }
0x155b   :  { %9739 = vmatprep.mubr.bf16.mxu1 %v8142_v15  ;;  %9872 = vmatpush1.bf16.msra.mxu0 %v15581_v28  ;;  %v15650_v28 = vld [vmem:[#allocation14 + $0x180] ss:$16 sps:$4 sm:$0xff]  }
0x155c   :  { %9903 = vmatprep.mubr.bf16.mxu0 %v8142_v15  ;;  %9709 = vmatprep.subr.bf16.mxu1 %v15586_v3  ;;  %v15653_v3 = vld [vmem:[#allocation14 + $0x188] ss:$16 sps:$4 sm:$0xff]   ;;  %v15658_v15 = vld [vmem:[#allocation14 + $0x1a4] ss:$16 sps:$4 sm:$0xff]  }
0x155d   :  { %9873 = vmatprep.subr.bf16.mxu0 %v15589_v5  ;;  %v15661_v5 = vld [vmem:[#allocation14 + $0x1ac] ss:$16 sps:$4 sm:$0xff]  }
0x155e   :  { %9710 = vmatpush1.bf16.msra.mxu1 %v15584_v24  ;;  %v15656_v24 = vld [vmem:[#allocation14 + $0x1a0] ss:$16 sps:$4 sm:$0xff]  }
0x155f   :  { %9874 = vmatpush1.bf16.msra.mxu0 %v15587_v23  ;;  %9711 = vmatprep.subr.bf16.mxu1 %v15592_v56  ;;  %v3213_v23 = vrot.slane %v18523_v49, %v17286_v31  ;;  %v15659_v56 = vld [vmem:[#allocation14 + $0x1a8] ss:$16 sps:$4 sm:$0xff]  }
0x1560   :  { %9875 = vmatprep.subr.bf16.mxu0 %v15595_v8  ;;  %v15664_v8 = vld [vmem:[#allocation14 + $0x1c4] ss:$16 sps:$4 sm:$0xff]   ;;  %v15671_v49 = vld [vmem:[#allocation14 + $0x1e8] ss:$16 sps:$4 sm:$0xff]  }
0x1562   :  { %9712 = vmatpush1.bf16.msra.mxu1 %v15590_v45  ;;  %v15667_v45 = vld [vmem:[#allocation14 + $0x1cc] ss:$16 sps:$4 sm:$0xff]  }
0x1563   :  { %9876 = vmatpush1.bf16.msra.mxu0 %v15593_v62  ;;  %9713 = vmatprep.subr.bf16.mxu1 %v15598_v48  ;;  %v15662_v62 = vld [vmem:[#allocation14 + $0x1c0] ss:$16 sps:$4 sm:$0xff]   ;;  %v4180_v48 = vadd.f32 %v18440_v29, %v3213_v23  ;;  %v15718_v23 = vld [vmem:[#allocation14 + $0x2e4] ss:$16 sps:$4 sm:$0xff]  }
0x1564   :  { %9877 = vmatprep.subr.bf16.mxu0 %v15601_v50  ;;  %v15665_v50 = vld [vmem:[#allocation14 + $0x1c8] ss:$16 sps:$4 sm:$0xff]  }
0x1566   :  { %9714 = vmatpush1.bf16.msra.mxu1 %v15596_v38  ;;  %v15670_v38 = vld [vmem:[#allocation14 + $0x1e4] ss:$16 sps:$4 sm:$0xff]  }
0x1567   :  { %9878 = vmatpush1.bf16.msra.mxu0 %v15599_v39  ;;  %9715 = vmatprep.subr.bf16.mxu1 %v15604_v22  ;;  %v15673_v39 = vld [vmem:[#allocation14 + $0x1ec] ss:$16 sps:$4 sm:$0xff]   ;;  %v15668_v22 = vld [vmem:[#allocation14 + $0x1e0] ss:$16 sps:$4 sm:$0xff]  }
0x1568   :  { %9879 = vmatprep.subr.bf16.mxu0 %v15607_v2  ;;  %v4317_v2 = vmax.f32 %v4180_v48, 0.0  ;;  %v15727_v48 = vld [vmem:[#allocation14 + $0x30c] ss:$16 sps:$4 sm:$0xff]  }
0x156a   :  { %9716 = vmatpush1.bf16.msra.mxu1 %v15602_v44  ;;  %v15676_v44 = vld [vmem:[#allocation14 + $0x204] ss:$16 sps:$4 sm:$0xff]   ;;  %v8141_v29 = vpack.c.bf16 %v4317_v2, %v4317_v2  ;;  %v15728_v2 = vld [vmem:[#allocation14 + $0x320] ss:$16 sps:$4 sm:$0xff]  }
0x156b   :  { %9880 = vmatpush1.bf16.msra.mxu0 %v15605_v10  ;;  %9717 = vmatprep.subr.bf16.mxu1 %v15610_v34  ;;  %v15679_v10 = vld [vmem:[#allocation14 + $0x20c] ss:$16 sps:$4 sm:$0xff]   ;;  %v4320_v34 = vmax.f32 %v18446_v55, 0.0 }
0x156c   :  { %9881 = vmatprep.subr.bf16.mxu0 %v15613_v25  ;;  %v15674_v25 = vld [vmem:[#allocation14 + $0x200] ss:$16 sps:$4 sm:$0xff]   ;;  %v15691_v55 = vld [vmem:[#allocation14 + $0x24c] ss:$16 sps:$4 sm:$0xff]  }
0x156e   :  { %9718 = vmatpush1.bf16.msra.mxu1 %v15608_v33  ;;  %v15677_v33 = vld [vmem:[#allocation14 + $0x208] ss:$16 sps:$4 sm:$0xff]  }
0x156f   :  { %9882 = vmatpush1.bf16.msra.mxu0 %v15611_v13  ;;  %9719 = vmatprep.subr.bf16.mxu1 %v15616_v42  ;;  %v15682_v13 = vld [vmem:[#allocation14 + $0x224] ss:$16 sps:$4 sm:$0xff]   ;;  %v8144_v42 = vpack.c.bf16 %v4320_v34, %v4320_v34  ;;  %v15734_v34 = vld [vmem:[#allocation14 + $0x340] ss:$16 sps:$4 sm:$0xff]  }
0x1570   :  { %9883 = vmatprep.subr.bf16.mxu0 %v15619_v1  ;;  %v15685_v1 = vld [vmem:[#allocation14 + $0x22c] ss:$16 sps:$4 sm:$0xff]  }
0x1572   :  { %9720 = vmatpush1.bf16.msra.mxu1 %v15614_v51  ;;  %v15680_v51 = vld [vmem:[#allocation14 + $0x220] ss:$16 sps:$4 sm:$0xff]  }
0x1573   :  { %9884 = vmatpush1.bf16.msra.mxu0 %v15617_v9  ;;  %9721 = vmatprep.subr.bf16.mxu1 %v15622_v32  ;;  %v15683_v9 = vld [vmem:[#allocation14 + $0x228] ss:$16 sps:$4 sm:$0xff]   ;;  %v15688_v32 = vld [vmem:[#allocation14 + $0x244] ss:$16 sps:$4 sm:$0xff]  }
0x1574   :  { %9885 = vmatprep.subr.bf16.mxu0 %v15625_v60  ;;  %v15686_v60 = vld [vmem:[#allocation14 + $0x240] ss:$16 sps:$4 sm:$0xff]  }
0x1576   :  { %9722 = vmatpush1.bf16.msra.mxu1 %v15620_v4  ;;  %v15689_v4 = vld [vmem:[#allocation14 + $0x248] ss:$16 sps:$4 sm:$0xff]  }
0x1577   :  { %9886 = vmatpush1.bf16.msra.mxu0 %v15623_v17  ;;  %9723 = vmatprep.subr.bf16.mxu1 %v15628_v18  ;;  %v15694_v17 = vld [vmem:[#allocation14 + $0x264] ss:$16 sps:$4 sm:$0xff]   ;;  %v15697_v18 = vld [vmem:[#allocation14 + $0x26c] ss:$16 sps:$4 sm:$0xff]  }
0x1578   :  { %9887 = vmatprep.subr.bf16.mxu0 %v15631_v27  ;;  %v15692_v27 = vld [vmem:[#allocation14 + $0x260] ss:$16 sps:$4 sm:$0xff]  }
0x157a   :  { %9724 = vmatpush1.bf16.msra.mxu1 %v15626_v11  ;;  %v15695_v11 = vld [vmem:[#allocation14 + $0x268] ss:$16 sps:$4 sm:$0xff]  }
0x157b   :  { %9888 = vmatpush1.bf16.msra.mxu0 %v15629_v43  ;;  %9725 = vmatprep.subr.bf16.mxu1 %v15634_v58  ;;  %v15700_v43 = vld [vmem:[#allocation14 + $0x284] ss:$16 sps:$4 sm:$0xff]   ;;  %v15703_v58 = vld [vmem:[#allocation14 + $0x28c] ss:$16 sps:$4 sm:$0xff]  }
0x157c   :  { %9889 = vmatprep.subr.bf16.mxu0 %v15637_v7  ;;  %v15698_v7 = vld [vmem:[#allocation14 + $0x280] ss:$16 sps:$4 sm:$0xff]  }
0x157e   :  { %9726 = vmatpush1.bf16.msra.mxu1 %v15632_v53  ;;  %v15701_v53 = vld [vmem:[#allocation14 + $0x288] ss:$16 sps:$4 sm:$0xff]  }
0x157f   :  { %9890 = vmatpush1.bf16.msra.mxu0 %v15635_v46  ;;  %9727 = vmatprep.subr.bf16.mxu1 %v15640_v19  ;;  %v15706_v46 = vld [vmem:[#allocation14 + $0x2a4] ss:$16 sps:$4 sm:$0xff]   ;;  %v15709_v19 = vld [vmem:[#allocation14 + $0x2ac] ss:$16 sps:$4 sm:$0xff]  }
0x1580   :  { %9891 = vmatprep.subr.bf16.mxu0 %v15643_v0  ;;  %v15704_v0 = vld [vmem:[#allocation14 + $0x2a0] ss:$16 sps:$4 sm:$0xff]  }
0x1582   :  { %9728 = vmatpush1.bf16.msra.mxu1 %v15638_v52  ;;  %v15707_v52 = vld [vmem:[#allocation14 + $0x2a8] ss:$16 sps:$4 sm:$0xff]  }
0x1583   :  { %9892 = vmatpush1.bf16.msra.mxu0 %v15641_v20  ;;  %9729 = vmatprep.subr.bf16.mxu1 %v15646_v47  ;;  %v15712_v20 = vld [vmem:[#allocation14 + $0x2c4] ss:$16 sps:$4 sm:$0xff]  }
0x1584   :  { %9893 = vmatprep.subr.bf16.mxu0 %v15649_v6 }
0x1586   :  { %9730 = vmatpush1.bf16.msra.mxu1 %v15644_v63  ;;  %v15715_v63 = vld [vmem:[#allocation14 + $0x2cc] ss:$16 sps:$4 sm:$0xff]  }
0x1587   :  { %9894 = vmatpush1.bf16.msra.mxu0 %v15647_v14  ;;  %9731 = vmatprep.subr.bf16.mxu1 %v15652_v30 }
0x1588   :  { %9895 = vmatprep.subr.bf16.mxu0 %v15655_v35 }
0x158a   :  { %9732 = vmatpush1.bf16.msra.mxu1 %v15650_v28 }
0x158b   :  { %9896 = vmatpush1.bf16.msra.mxu0 %v15653_v3  ;;  %9733 = vmatprep.subr.bf16.mxu1 %v15658_v15  ;;  %v15710_v3 = vld [vmem:[#allocation14 + $0x2c0] ss:$16 sps:$4 sm:$0xff]  }
0x158c   :  { %9897 = vmatprep.subr.bf16.mxu0 %v15661_v5 }
0x158e   :  { %9734 = vmatpush1.bf16.msra.mxu1 %v15656_v24  ;;  %v15713_v24 = vld [vmem:[#allocation14 + $0x2c8] ss:$16 sps:$4 sm:$0xff]  }
0x158f   :  { %9898 = vmatpush1.bf16.msra.mxu0 %v15659_v56  ;;  %9735 = vmatprep.subr.bf16.mxu1 %v15664_v8  ;;  %v15721_v56 = vld [vmem:[#allocation14 + $0x2ec] ss:$16 sps:$4 sm:$0xff]   ;;  %v15716_v8 = vld [vmem:[#allocation14 + $0x2e0] ss:$16 sps:$4 sm:$0xff]  }
0x1590   :  { %9899 = vmatprep.subr.bf16.mxu0 %v15667_v45  ;;  %v15719_v45 = vld [vmem:[#allocation14 + $0x2e8] ss:$16 sps:$4 sm:$0xff]  }
0x1592   :  { %9736 = vmatpush1.bf16.msra.mxu1 %v15662_v62  ;;  %v15724_v62 = vld [vmem:[#allocation14 + $0x304] ss:$16 sps:$4 sm:$0xff]  }
0x1593   :  { %9900 = vmatpush1.bf16.msra.mxu0 %v15665_v50  ;;  %9737 = vmatprep.subr.bf16.mxu1 %v15670_v38  ;;  %v15722_v50 = vld [vmem:[#allocation14 + $0x300] ss:$16 sps:$4 sm:$0xff]   ;;  %v15725_v38 = vld [vmem:[#allocation14 + $0x308] ss:$16 sps:$4 sm:$0xff]  }
0x1594   :  { %9901 = vmatprep.subr.bf16.mxu0 %v15673_v39  ;;  %v15730_v39 = vld [vmem:[#allocation14 + $0x324] ss:$16 sps:$4 sm:$0xff]  }
0x1596   :  { %9738 = vmatpush1.bf16.msra.mxu1 %v15668_v22  ;;  %v15733_v22 = vld [vmem:[#allocation14 + $0x32c] ss:$16 sps:$4 sm:$0xff]  }
0x1597   :  { %9902 = vmatpush1.bf16.msra.mxu0 %v15671_v49  ;;  %9748 = vmatprep.subr.bf16.mxu1 %v15676_v44  ;;  %v15731_v49 = vld [vmem:[#allocation14 + $0x328] ss:$16 sps:$4 sm:$0xff]   ;;  %v15736_v44 = vld [vmem:[#allocation14 + $0x344] ss:$16 sps:$4 sm:$0xff]  }
0x1598   :  { %9912 = vmatprep.subr.bf16.mxu0 %v15679_v10  ;;  %v15739_v10 = vld [vmem:[#allocation14 + $0x34c] ss:$16 sps:$4 sm:$0xff]  }
0x1599   :  { %9740 = vmatmul.mubr.bf16.vlgmr.msra.gmra.mrb[52].mxu1 %v8141_v29 }
0x159a   :  { %9904 = vmatmul.mubr.bf16.vlgmr.msra.gmra.mrb[48].mxu0 %v8141_v29  ;;  %9749 = vmatpush1.bf16.msra.mxu1 %v15674_v25  ;;  %v15737_v25 = vld [vmem:[#allocation14 + $0x348] ss:$16 sps:$4 sm:$0xff]   ;;  %v15742_v29 = vld [vmem:[#allocation14 + $0x364] ss:$16 sps:$4 sm:$0xff]  }
0x159b   :  { %9780 = vmatprep.mubr.bf16.mxu1 %v8144_v42  ;;  %9913 = vmatpush1.bf16.msra.mxu0 %v15677_v33  ;;  %v15745_v33 = vld [vmem:[#allocation14 + $0x36c] ss:$16 sps:$4 sm:$0xff]  }
0x159c   :  { %9944 = vmatprep.mubr.bf16.mxu0 %v8144_v42  ;;  %9750 = vmatprep.subr.bf16.mxu1 %v15682_v13  ;;  %v15740_v13 = vld [vmem:[#allocation14 + $0x360] ss:$16 sps:$4 sm:$0xff]   ;;  %v15743_v42 = vld [vmem:[#allocation14 + $0x368] ss:$16 sps:$4 sm:$0xff]  }
0x159d   :  { %9914 = vmatprep.subr.bf16.mxu0 %v15685_v1  ;;  %v15748_v1 = vld [vmem:[#allocation14 + $0x384] ss:$16 sps:$4 sm:$0xff]  }
0x159e   :  { %9751 = vmatpush1.bf16.msra.mxu1 %v15680_v51  ;;  %v15751_v51 = vld [vmem:[#allocation14 + $0x38c] ss:$16 sps:$4 sm:$0xff]  }
0x159f   :  { %9915 = vmatpush1.bf16.msra.mxu0 %v15683_v9  ;;  %9752 = vmatprep.subr.bf16.mxu1 %v15688_v32  ;;  %v15746_v9 = vld [vmem:[#allocation14 + $0x380] ss:$16 sps:$4 sm:$0xff]   ;;  %v15749_v32 = vld [vmem:[#allocation14 + $0x388] ss:$16 sps:$4 sm:$0xff]  }
0x15a0   :  { %9916 = vmatprep.subr.bf16.mxu0 %v15691_v55  ;;  %v15754_v55 = vld [vmem:[#allocation14 + $0x3a4] ss:$16 sps:$4 sm:$0xff]  }
0x15a2   :  { %9753 = vmatpush1.bf16.msra.mxu1 %v15686_v60  ;;  %v15757_v60 = vld [vmem:[#allocation14 + $0x3ac] ss:$16 sps:$4 sm:$0xff]  }
0x15a3   :  { %9917 = vmatpush1.bf16.msra.mxu0 %v15689_v4  ;;  %9754 = vmatprep.subr.bf16.mxu1 %v15694_v17  ;;  %v15752_v4 = vld [vmem:[#allocation14 + $0x3a0] ss:$16 sps:$4 sm:$0xff]   ;;  %v15755_v17 = vld [vmem:[#allocation14 + $0x3a8] ss:$16 sps:$4 sm:$0xff]  }
0x15a4   :  { %9918 = vmatprep.subr.bf16.mxu0 %v15697_v18  ;;  %v15760_v18 = vld [vmem:[#allocation14 + $0x3c4] ss:$16 sps:$4 sm:$0xff]  }
0x15a6   :  { %9755 = vmatpush1.bf16.msra.mxu1 %v15692_v27  ;;  %v15763_v27 = vld [vmem:[#allocation14 + $0x3cc] ss:$16 sps:$4 sm:$0xff]  }
0x15a7   :  { %9919 = vmatpush1.bf16.msra.mxu0 %v15695_v11  ;;  %9756 = vmatprep.subr.bf16.mxu1 %v15700_v43  ;;  %v15758_v11 = vld [vmem:[#allocation14 + $0x3c0] ss:$16 sps:$4 sm:$0xff]   ;;  %v15761_v43 = vld [vmem:[#allocation14 + $0x3c8] ss:$16 sps:$4 sm:$0xff]  }
0x15a8   :  { %9920 = vmatprep.subr.bf16.mxu0 %v15703_v58  ;;  %v15766_v58 = vld [vmem:[#allocation14 + $0x3e4] ss:$16 sps:$4 sm:$0xff]  }
0x15aa   :  { %9757 = vmatpush1.bf16.msra.mxu1 %v15698_v7  ;;  %v15769_v7 = vld [vmem:[#allocation14 + $0x3ec] ss:$16 sps:$4 sm:$0xff]  }
0x15ab   :  { %9921 = vmatpush1.bf16.msra.mxu0 %v15701_v53  ;;  %9758 = vmatprep.subr.bf16.mxu1 %v15706_v46  ;;  %v15764_v53 = vld [vmem:[#allocation14 + $0x3e0] ss:$16 sps:$4 sm:$0xff]   ;;  %v4319_v46 = vmax.f32 %v18444_v57, 0.0 }
0x15ac   :  { %v18534_v47 = vpop.f32.mrb[44].mxu1  ;;  %v18536_v6 = vpop.f32.mrb[40].mxu0  ;;  %9922 = vmatprep.subr.bf16.mxu0 %v15709_v19  ;;  %v15767_v19 = vld [vmem:[#allocation14 + $0x3e8] ss:$16 sps:$4 sm:$0xff]   ;;  %v15776_v57 = vld [vmem:[#allocation14 + $0x420] ss:$16 sps:$4 sm:$0xff]  }
0x15ad   :  { %v18538_v14 = vpop.f32.mrb[45].mxu1  ;;  %v18540_v30 = vpop.f32.mrb[41].mxu0 }
0x15ae   :  { %v7884_v35 = vpop.f32.mrb[46].mxu1  ;;  %v7966_v28 = vpop.f32.mrb[42].mxu0  ;;  %9759 = vmatpush1.bf16.msra.mxu1 %v15704_v0  ;;  %v15772_v0 = vld [vmem:[#allocation14 + $0x404] ss:$16 sps:$4 sm:$0xff]  }
0x15af   :  { %9923 = vmatpush1.bf16.msra.mxu0 %v15707_v52  ;;  %v7885_v15 = vpop.f32.mrb[47].mxu1  ;;  %v7967_v5 = vpop.f32.mrb[43].mxu0  ;;  %9760 = vmatprep.subr.bf16.mxu1 %v15712_v20  ;;  %v15775_v52 = vld [vmem:[#allocation14 + $0x40c] ss:$16 sps:$4 sm:$0xff]   ;;  %v4322_v20 = vmax.f32 %v18469_v61, 0.0  ;;  %v8143_v35 = vpack.c.bf16 %v4319_v46, %v4319_v46 }
0x15b0   :  { %9924 = vmatprep.subr.bf16.mxu0 %v15715_v63  ;;  %v15770_v63 = vld [vmem:[#allocation14 + $0x400] ss:$16 sps:$4 sm:$0xff]   ;;  %v15773_v28 = vld [vmem:[#allocation14 + $0x408] ss:$16 sps:$4 sm:$0xff]   ;;  %v15781_v5 = vld [vmem:[#allocation14 + $0x42c] ss:$16 sps:$4 sm:$0xff]  }
0x15b1   :  { %v8146_v15 = vpack.c.bf16 %v4322_v20, %v4322_v20  ;;  %v15787_v61 = vld [vmem:[#allocation14 + $0x44c] ss:$16 sps:$4 sm:$0xff]   ;;  %v15838_v46 = vld [vmem:[#allocation14 + $0x564] ss:$16 sps:$4 sm:$0xff]  }
0x15b2   :  { %9761 = vmatpush1.bf16.msra.mxu1 %v15710_v3  ;;  %v15778_v3 = vld [vmem:[#allocation14 + $0x424] ss:$16 sps:$4 sm:$0xff]  }
0x15b3   :  { %9925 = vmatpush1.bf16.msra.mxu0 %v15713_v24  ;;  %9762 = vmatprep.subr.bf16.mxu1 %v15718_v23  ;;  %v15779_v24 = vld [vmem:[#allocation14 + $0x428] ss:$16 sps:$4 sm:$0xff]   ;;  %v15784_v23 = vld [vmem:[#allocation14 + $0x444] ss:$16 sps:$4 sm:$0xff]  }
0x15b4   :  { %9926 = vmatprep.subr.bf16.mxu0 %v15721_v56  ;;  %v15782_v56 = vld [vmem:[#allocation14 + $0x440] ss:$16 sps:$4 sm:$0xff]   ;;  %v15844_v20 = vld [vmem:[#allocation14 + $0x584] ss:$16 sps:$4 sm:$0xff]  }
0x15b6   :  { %9763 = vmatpush1.bf16.msra.mxu1 %v15716_v8  ;;  %v15785_v8 = vld [vmem:[#allocation14 + $0x448] ss:$16 sps:$4 sm:$0xff]  }
0x15b7   :  { %9927 = vmatpush1.bf16.msra.mxu0 %v15719_v45  ;;  %9764 = vmatprep.subr.bf16.mxu1 %v15724_v62  ;;  %v15790_v45 = vld [vmem:[#allocation14 + $0x464] ss:$16 sps:$4 sm:$0xff]   ;;  %v15793_v62 = vld [vmem:[#allocation14 + $0x46c] ss:$16 sps:$4 sm:$0xff]  }
0x15b8   :  { %9928 = vmatprep.subr.bf16.mxu0 %v15727_v48  ;;  %v15788_v48 = vld [vmem:[#allocation14 + $0x460] ss:$16 sps:$4 sm:$0xff]  }
0x15ba   :  { %9765 = vmatpush1.bf16.msra.mxu1 %v15722_v50  ;;  %v15791_v50 = vld [vmem:[#allocation14 + $0x468] ss:$16 sps:$4 sm:$0xff]  }
0x15bb   :  { %9929 = vmatpush1.bf16.msra.mxu0 %v15725_v38  ;;  %9766 = vmatprep.subr.bf16.mxu1 %v15730_v39  ;;  %v15796_v38 = vld [vmem:[#allocation14 + $0x484] ss:$16 sps:$4 sm:$0xff]   ;;  %v15799_v39 = vld [vmem:[#allocation14 + $0x48c] ss:$16 sps:$4 sm:$0xff]  }
0x15bc   :  { %9930 = vmatprep.subr.bf16.mxu0 %v15733_v22  ;;  %v15794_v22 = vld [vmem:[#allocation14 + $0x480] ss:$16 sps:$4 sm:$0xff]  }
0x15be   :  { %9767 = vmatpush1.bf16.msra.mxu1 %v15728_v2  ;;  %v15797_v2 = vld [vmem:[#allocation14 + $0x488] ss:$16 sps:$4 sm:$0xff]  }
0x15bf   :  { %9931 = vmatpush1.bf16.msra.mxu0 %v15731_v49  ;;  %9768 = vmatprep.subr.bf16.mxu1 %v15736_v44  ;;  %v15802_v49 = vld [vmem:[#allocation14 + $0x4a4] ss:$16 sps:$4 sm:$0xff]   ;;  %v15805_v44 = vld [vmem:[#allocation14 + $0x4ac] ss:$16 sps:$4 sm:$0xff]  }
0x15c0   :  { %9932 = vmatprep.subr.bf16.mxu0 %v15739_v10  ;;  %v15800_v10 = vld [vmem:[#allocation14 + $0x4a0] ss:$16 sps:$4 sm:$0xff]  }
0x15c2   :  { %9769 = vmatpush1.bf16.msra.mxu1 %v15734_v34  ;;  %v15803_v34 = vld [vmem:[#allocation14 + $0x4a8] ss:$16 sps:$4 sm:$0xff]  }
0x15c3   :  { %9933 = vmatpush1.bf16.msra.mxu0 %v15737_v25  ;;  %9770 = vmatprep.subr.bf16.mxu1 %v15742_v29  ;;  %v15808_v25 = vld [vmem:[#allocation14 + $0x4c4] ss:$16 sps:$4 sm:$0xff]   ;;  %v15811_v29 = vld [vmem:[#allocation14 + $0x4cc] ss:$16 sps:$4 sm:$0xff]  }
0x15c4   :  { %9934 = vmatprep.subr.bf16.mxu0 %v15745_v33  ;;  %v15806_v33 = vld [vmem:[#allocation14 + $0x4c0] ss:$16 sps:$4 sm:$0xff]  }
0x15c6   :  { %9771 = vmatpush1.bf16.msra.mxu1 %v15740_v13  ;;  %v15809_v13 = vld [vmem:[#allocation14 + $0x4c8] ss:$16 sps:$4 sm:$0xff]  }
0x15c7   :  { %9935 = vmatpush1.bf16.msra.mxu0 %v15743_v42  ;;  %9772 = vmatprep.subr.bf16.mxu1 %v15748_v1  ;;  %v15814_v42 = vld [vmem:[#allocation14 + $0x4e4] ss:$16 sps:$4 sm:$0xff]   ;;  %v15817_v1 = vld [vmem:[#allocation14 + $0x4ec] ss:$16 sps:$4 sm:$0xff]  }
0x15c8   :  { %9936 = vmatprep.subr.bf16.mxu0 %v15751_v51  ;;  %v15812_v51 = vld [vmem:[#allocation14 + $0x4e0] ss:$16 sps:$4 sm:$0xff]  }
0x15ca   :  { %9773 = vmatpush1.bf16.msra.mxu1 %v15746_v9  ;;  %v15815_v9 = vld [vmem:[#allocation14 + $0x4e8] ss:$16 sps:$4 sm:$0xff]  }
0x15cb   :  { %9937 = vmatpush1.bf16.msra.mxu0 %v15749_v32  ;;  %9774 = vmatprep.subr.bf16.mxu1 %v15754_v55  ;;  %v15820_v32 = vld [vmem:[#allocation14 + $0x504] ss:$16 sps:$4 sm:$0xff]   ;;  %v15823_v55 = vld [vmem:[#allocation14 + $0x50c] ss:$16 sps:$4 sm:$0xff]  }
0x15cc   :  { %9938 = vmatprep.subr.bf16.mxu0 %v15757_v60  ;;  %v15818_v60 = vld [vmem:[#allocation14 + $0x500] ss:$16 sps:$4 sm:$0xff]  }
0x15ce   :  { %9775 = vmatpush1.bf16.msra.mxu1 %v15752_v4  ;;  %v15821_v4 = vld [vmem:[#allocation14 + $0x508] ss:$16 sps:$4 sm:$0xff]  }
0x15cf   :  { %9939 = vmatpush1.bf16.msra.mxu0 %v15755_v17  ;;  %9776 = vmatprep.subr.bf16.mxu1 %v15760_v18  ;;  %v15826_v17 = vld [vmem:[#allocation14 + $0x524] ss:$16 sps:$4 sm:$0xff]   ;;  %v15829_v18 = vld [vmem:[#allocation14 + $0x52c] ss:$16 sps:$4 sm:$0xff]  }
0x15d0   :  { %9940 = vmatprep.subr.bf16.mxu0 %v15763_v27  ;;  %v15824_v27 = vld [vmem:[#allocation14 + $0x520] ss:$16 sps:$4 sm:$0xff]  }
0x15d2   :  { %9777 = vmatpush1.bf16.msra.mxu1 %v15758_v11  ;;  %v15827_v11 = vld [vmem:[#allocation14 + $0x528] ss:$16 sps:$4 sm:$0xff]  }
0x15d3   :  { %9941 = vmatpush1.bf16.msra.mxu0 %v15761_v43  ;;  %9778 = vmatprep.subr.bf16.mxu1 %v15766_v58  ;;  %v15832_v43 = vld [vmem:[#allocation14 + $0x544] ss:$16 sps:$4 sm:$0xff]   ;;  %v15835_v58 = vld [vmem:[#allocation14 + $0x54c] ss:$16 sps:$4 sm:$0xff]  }
0x15d4   :  { %9942 = vmatprep.subr.bf16.mxu0 %v15769_v7  ;;  %v15830_v7 = vld [vmem:[#allocation14 + $0x540] ss:$16 sps:$4 sm:$0xff]  }
0x15d6   :  { %9779 = vmatpush1.bf16.msra.mxu1 %v15764_v53  ;;  %v15833_v53 = vld [vmem:[#allocation14 + $0x548] ss:$16 sps:$4 sm:$0xff]  }
0x15d7   :  { %9943 = vmatpush1.bf16.msra.mxu0 %v15767_v19  ;;  %9789 = vmatprep.subr.bf16.mxu1 %v15772_v0  ;;  %v15841_v19 = vld [vmem:[#allocation14 + $0x56c] ss:$16 sps:$4 sm:$0xff]   ;;  %v15836_v0 = vld [vmem:[#allocation14 + $0x560] ss:$16 sps:$4 sm:$0xff]  }
0x15d8   :  { %9953 = vmatprep.subr.bf16.mxu0 %v15775_v52  ;;  %v15839_v52 = vld [vmem:[#allocation14 + $0x568] ss:$16 sps:$4 sm:$0xff]  }
0x15d9   :  { %9781 = vmatmul.mubr.bf16.vlgmr.msra.gmra.mrb[52].mxu1 %v8143_v35 }
0x15da   :  { %9945 = vmatmul.mubr.bf16.vlgmr.msra.gmra.mrb[48].mxu0 %v8143_v35  ;;  %9790 = vmatpush1.bf16.msra.mxu1 %v15770_v63  ;;  %v15847_v63 = vld [vmem:[#allocation14 + $0x58c] ss:$16 sps:$4 sm:$0xff]   ;;  %v15842_v35 = vld [vmem:[#allocation14 + $0x580] ss:$16 sps:$4 sm:$0xff]  }
0x15db   :  { %9821 = vmatprep.mubr.bf16.mxu1 %v8146_v15  ;;  %9954 = vmatpush1.bf16.msra.mxu0 %v15773_v28  ;;  %v15845_v28 = vld [vmem:[#allocation14 + $0x588] ss:$16 sps:$4 sm:$0xff]  }
0x15dc   :  { %9985 = vmatprep.mubr.bf16.mxu0 %v8146_v15  ;;  %9791 = vmatprep.subr.bf16.mxu1 %v15778_v3  ;;  %v15850_v3 = vld [vmem:[#allocation14 + $0x5a4] ss:$16 sps:$4 sm:$0xff]   ;;  %v15853_v15 = vld [vmem:[#allocation14 + $0x5ac] ss:$16 sps:$4 sm:$0xff]  }
0x15dd   :  { %9955 = vmatprep.subr.bf16.mxu0 %v15781_v5  ;;  %v15848_v5 = vld [vmem:[#allocation14 + $0x5a0] ss:$16 sps:$4 sm:$0xff]  }
0x15de   :  { %9792 = vmatpush1.bf16.msra.mxu1 %v15776_v57  ;;  %v15851_v57 = vld [vmem:[#allocation14 + $0x5a8] ss:$16 sps:$4 sm:$0xff]  }
0x15df   :  { %9956 = vmatpush1.bf16.msra.mxu0 %v15779_v24  ;;  %9793 = vmatprep.subr.bf16.mxu1 %v15784_v23  ;;  %v15856_v24 = vld [vmem:[#allocation14 + $0x5c4] ss:$16 sps:$4 sm:$0xff]   ;;  %v15859_v23 = vld [vmem:[#allocation14 + $0x5cc] ss:$16 sps:$4 sm:$0xff]  }
0x15e0   :  { %9957 = vmatprep.subr.bf16.mxu0 %v15787_v61  ;;  %v15854_v61 = vld [vmem:[#allocation14 + $0x5c0] ss:$16 sps:$4 sm:$0xff]  }
0x15e2   :  { %9794 = vmatpush1.bf16.msra.mxu1 %v15782_v56  ;;  %v15857_v56 = vld [vmem:[#allocation14 + $0x5c8] ss:$16 sps:$4 sm:$0xff]  }
0x15e3   :  { %9958 = vmatpush1.bf16.msra.mxu0 %v15785_v8  ;;  %9795 = vmatprep.subr.bf16.mxu1 %v15790_v45  ;;  %v15862_v8 = vld [vmem:[#allocation14 + $0x5e4] ss:$16 sps:$4 sm:$0xff]   ;;  %v15865_v45 = vld [vmem:[#allocation14 + $0x5ec] ss:$16 sps:$4 sm:$0xff]  }
0x15e4   :  { %9959 = vmatprep.subr.bf16.mxu0 %v15793_v62  ;;  %v15860_v62 = vld [vmem:[#allocation14 + $0x5e0] ss:$16 sps:$4 sm:$0xff]  }
0x15e6   :  { %9796 = vmatpush1.bf16.msra.mxu1 %v15788_v48  ;;  %v4321_v48 = vmax.f32 %v18465_v59, 0.0  ;;  %v15872_v59 = vld [vmem:[#allocation14 + $0x620] ss:$16 sps:$4 sm:$0xff]  }
0x15e7   :  { %9960 = vmatpush1.bf16.msra.mxu0 %v15791_v50  ;;  %9797 = vmatprep.subr.bf16.mxu1 %v15796_v38  ;;  %v15863_v50 = vld [vmem:[#allocation14 + $0x5e8] ss:$16 sps:$4 sm:$0xff]   ;;  %v15868_v38 = vld [vmem:[#allocation14 + $0x604] ss:$16 sps:$4 sm:$0xff]  }
0x15e8   :  { %9961 = vmatprep.subr.bf16.mxu0 %v15799_v39  ;;  %v15871_v39 = vld [vmem:[#allocation14 + $0x60c] ss:$16 sps:$4 sm:$0xff]  }
0x15ea   :  { %9798 = vmatpush1.bf16.msra.mxu1 %v15794_v22  ;;  %v4324_v22 = vmax.f32 %v18471_v40, 0.0  ;;  %v15883_v40 = vld [vmem:[#allocation14 + $0x64c] ss:$16 sps:$4 sm:$0xff]  }
0x15eb   :  { %9962 = vmatpush1.bf16.msra.mxu0 %v15797_v2  ;;  %9799 = vmatprep.subr.bf16.mxu1 %v15802_v49  ;;  %v15866_v2 = vld [vmem:[#allocation14 + $0x600] ss:$16 sps:$4 sm:$0xff]   ;;  %v8145_v49 = vpack.c.bf16 %v4321_v48, %v4321_v48 }
0x15ec   :  { %9963 = vmatprep.subr.bf16.mxu0 %v15805_v44  ;;  %v15869_v44 = vld [vmem:[#allocation14 + $0x608] ss:$16 sps:$4 sm:$0xff]   ;;  %v15920_v48 = vld [vmem:[#allocation14 + $0x720] ss:$16 sps:$4 sm:$0xff]  }
0x15ee   :  { %9800 = vmatpush1.bf16.msra.mxu1 %v15800_v10  ;;  %v15874_v10 = vld [vmem:[#allocation14 + $0x624] ss:$16 sps:$4 sm:$0xff]  }
0x15ef   :  { %9964 = vmatpush1.bf16.msra.mxu0 %v15803_v34  ;;  %9801 = vmatprep.subr.bf16.mxu1 %v15808_v25  ;;  %v8148_v34 = vpack.c.bf16 %v4324_v22, %v4324_v22  ;;  %v15877_v25 = vld [vmem:[#allocation14 + $0x62c] ss:$16 sps:$4 sm:$0xff]   ;;  %v15926_v22 = vld [vmem:[#allocation14 + $0x740] ss:$16 sps:$4 sm:$0xff]  }
0x15f0   :  { %9965 = vmatprep.subr.bf16.mxu0 %v15811_v29  ;;  %v15875_v29 = vld [vmem:[#allocation14 + $0x628] ss:$16 sps:$4 sm:$0xff]  }
0x15f2   :  { %9802 = vmatpush1.bf16.msra.mxu1 %v15806_v33  ;;  %v15880_v33 = vld [vmem:[#allocation14 + $0x644] ss:$16 sps:$4 sm:$0xff]  }
0x15f3   :  { %9966 = vmatpush1.bf16.msra.mxu0 %v15809_v13  ;;  %9803 = vmatprep.subr.bf16.mxu1 %v15814_v42  ;;  %v15878_v13 = vld [vmem:[#allocation14 + $0x640] ss:$16 sps:$4 sm:$0xff]   ;;  %v15881_v42 = vld [vmem:[#allocation14 + $0x648] ss:$16 sps:$4 sm:$0xff]  }
0x15f4   :  { %9967 = vmatprep.subr.bf16.mxu0 %v15817_v1  ;;  %v15886_v1 = vld [vmem:[#allocation14 + $0x664] ss:$16 sps:$4 sm:$0xff]  }
0x15f6   :  { %9804 = vmatpush1.bf16.msra.mxu1 %v15812_v51  ;;  %v15889_v51 = vld [vmem:[#allocation14 + $0x66c] ss:$16 sps:$4 sm:$0xff]  }
0x15f7   :  { %9968 = vmatpush1.bf16.msra.mxu0 %v15815_v9  ;;  %9805 = vmatprep.subr.bf16.mxu1 %v15820_v32  ;;  %v15884_v9 = vld [vmem:[#allocation14 + $0x660] ss:$16 sps:$4 sm:$0xff]   ;;  %v15887_v32 = vld [vmem:[#allocation14 + $0x668] ss:$16 sps:$4 sm:$0xff]  }
0x15f8   :  { %9969 = vmatprep.subr.bf16.mxu0 %v15823_v55  ;;  %v15892_v55 = vld [vmem:[#allocation14 + $0x684] ss:$16 sps:$4 sm:$0xff]  }
0x15fa   :  { %9806 = vmatpush1.bf16.msra.mxu1 %v15818_v60  ;;  %v15895_v60 = vld [vmem:[#allocation14 + $0x68c] ss:$16 sps:$4 sm:$0xff]  }
0x15fb   :  { %9970 = vmatpush1.bf16.msra.mxu0 %v15821_v4  ;;  %9807 = vmatprep.subr.bf16.mxu1 %v15826_v17  ;;  %v15890_v4 = vld [vmem:[#allocation14 + $0x680] ss:$16 sps:$4 sm:$0xff]   ;;  %v15893_v17 = vld [vmem:[#allocation14 + $0x688] ss:$16 sps:$4 sm:$0xff]  }
0x15fc   :  { %9971 = vmatprep.subr.bf16.mxu0 %v15829_v18  ;;  %v15898_v18 = vld [vmem:[#allocation14 + $0x6a4] ss:$16 sps:$4 sm:$0xff]  }
0x15fe   :  { %9808 = vmatpush1.bf16.msra.mxu1 %v15824_v27  ;;  %v15901_v27 = vld [vmem:[#allocation14 + $0x6ac] ss:$16 sps:$4 sm:$0xff]  }
0x15ff   :  { %9972 = vmatpush1.bf16.msra.mxu0 %v15827_v11  ;;  %9809 = vmatprep.subr.bf16.mxu1 %v15832_v43  ;;  %v15896_v11 = vld [vmem:[#allocation14 + $0x6a0] ss:$16 sps:$4 sm:$0xff]   ;;  %v15899_v43 = vld [vmem:[#allocation14 + $0x6a8] ss:$16 sps:$4 sm:$0xff]  }
0x1600   :  { %9973 = vmatprep.subr.bf16.mxu0 %v15835_v58  ;;  %v15904_v58 = vld [vmem:[#allocation14 + $0x6c4] ss:$16 sps:$4 sm:$0xff]  }
0x1602   :  { %9810 = vmatpush1.bf16.msra.mxu1 %v15830_v7 }
0x1603   :  { %9974 = vmatpush1.bf16.msra.mxu0 %v15833_v53  ;;  %9811 = vmatprep.subr.bf16.mxu1 %v15838_v46  ;;  %v15907_v53 = vld [vmem:[#allocation14 + $0x6cc] ss:$16 sps:$4 sm:$0xff]  }
0x1604   :  { %9975 = vmatprep.subr.bf16.mxu0 %v15841_v19 }
0x1606   :  { %9812 = vmatpush1.bf16.msra.mxu1 %v15836_v0 }
0x1607   :  { %9976 = vmatpush1.bf16.msra.mxu0 %v15839_v52  ;;  %9813 = vmatprep.subr.bf16.mxu1 %v15844_v20  ;;  %v15902_v20 = vld [vmem:[#allocation14 + $0x6c0] ss:$16 sps:$4 sm:$0xff]  }
0x1608   :  { %9977 = vmatprep.subr.bf16.mxu0 %v15847_v63 }
0x160a   :  { %9814 = vmatpush1.bf16.msra.mxu1 %v15842_v35 }
0x160b   :  { %9978 = vmatpush1.bf16.msra.mxu0 %v15845_v28  ;;  %9815 = vmatprep.subr.bf16.mxu1 %v15850_v3  ;;  %v15905_v28 = vld [vmem:[#allocation14 + $0x6c8] ss:$16 sps:$4 sm:$0xff]   ;;  %v15910_v3 = vld [vmem:[#allocation14 + $0x6e4] ss:$16 sps:$4 sm:$0xff]  }
0x160c   :  { %9979 = vmatprep.subr.bf16.mxu0 %v15853_v15 }
0x160e   :  { %9816 = vmatpush1.bf16.msra.mxu1 %v15848_v5  ;;  %v15913_v5 = vld [vmem:[#allocation14 + $0x6ec] ss:$16 sps:$4 sm:$0xff]  }
0x160f   :  { %9980 = vmatpush1.bf16.msra.mxu0 %v15851_v57  ;;  %9817 = vmatprep.subr.bf16.mxu1 %v15856_v24  ;;  %v15908_v57 = vld [vmem:[#allocation14 + $0x6e0] ss:$16 sps:$4 sm:$0xff]   ;;  %v15911_v24 = vld [vmem:[#allocation14 + $0x6e8] ss:$16 sps:$4 sm:$0xff]  }
0x1610   :  { %9981 = vmatprep.subr.bf16.mxu0 %v15859_v23  ;;  %v15916_v23 = vld [vmem:[#allocation14 + $0x704] ss:$16 sps:$4 sm:$0xff]  }
0x1612   :  { %9818 = vmatpush1.bf16.msra.mxu1 %v15854_v61  ;;  %v15919_v61 = vld [vmem:[#allocation14 + $0x70c] ss:$16 sps:$4 sm:$0xff]  }
0x1613   :  { %9982 = vmatpush1.bf16.msra.mxu0 %v15857_v56  ;;  %9819 = vmatprep.subr.bf16.mxu1 %v15862_v8  ;;  %v15914_v56 = vld [vmem:[#allocation14 + $0x700] ss:$16 sps:$4 sm:$0xff]   ;;  %v15917_v8 = vld [vmem:[#allocation14 + $0x708] ss:$16 sps:$4 sm:$0xff]  }
0x1614   :  { %9983 = vmatprep.subr.bf16.mxu0 %v15865_v45  ;;  %v15922_v45 = vld [vmem:[#allocation14 + $0x724] ss:$16 sps:$4 sm:$0xff]  }
0x1616   :  { %9820 = vmatpush1.bf16.msra.mxu1 %v15860_v62  ;;  %v15925_v62 = vld [vmem:[#allocation14 + $0x72c] ss:$16 sps:$4 sm:$0xff]  }
0x1617   :  { %9984 = vmatpush1.bf16.msra.mxu0 %v15863_v50  ;;  %9830 = vmatprep.subr.bf16.mxu1 %v15868_v38  ;;  %v15923_v50 = vld [vmem:[#allocation14 + $0x728] ss:$16 sps:$4 sm:$0xff]   ;;  %v15928_v38 = vld [vmem:[#allocation14 + $0x744] ss:$16 sps:$4 sm:$0xff]  }
0x1618   :  { %9994 = vmatprep.subr.bf16.mxu0 %v15871_v39  ;;  %v15931_v39 = vld [vmem:[#allocation14 + $0x74c] ss:$16 sps:$4 sm:$0xff]  }
0x1619   :  { %9822 = vmatmul.mubr.bf16.vlgmr.msra.gmra.mrb[52].mxu1 %v8145_v49 }
0x161a   :  { %9986 = vmatmul.mubr.bf16.vlgmr.msra.gmra.mrb[48].mxu0 %v8145_v49  ;;  %9831 = vmatpush1.bf16.msra.mxu1 %v15866_v2  ;;  %v15929_v2 = vld [vmem:[#allocation14 + $0x748] ss:$16 sps:$4 sm:$0xff]   ;;  %v15934_v49 = vld [vmem:[#allocation14 + $0x764] ss:$16 sps:$4 sm:$0xff]  }
0x161b   :  { %9862 = vmatprep.mubr.bf16.mxu1 %v8148_v34  ;;  %9995 = vmatpush1.bf16.msra.mxu0 %v15869_v44  ;;  %v15937_v44 = vld [vmem:[#allocation14 + $0x76c] ss:$16 sps:$4 sm:$0xff]  }
0x161c   :  { %10026 = vmatprep.mubr.bf16.mxu0 %v8148_v34  ;;  %9832 = vmatprep.subr.bf16.mxu1 %v15874_v10  ;;  %v15932_v10 = vld [vmem:[#allocation14 + $0x760] ss:$16 sps:$4 sm:$0xff]   ;;  %v15935_v34 = vld [vmem:[#allocation14 + $0x768] ss:$16 sps:$4 sm:$0xff]  }
0x161d   :  { %9996 = vmatprep.subr.bf16.mxu0 %v15877_v25  ;;  %v15940_v25 = vld [vmem:[#allocation14 + $0x784] ss:$16 sps:$4 sm:$0xff]  }
0x161e   :  { %9833 = vmatpush1.bf16.msra.mxu1 %v15872_v59  ;;  %v15943_v59 = vld [vmem:[#allocation14 + $0x78c] ss:$16 sps:$4 sm:$0xff]  }
0x161f   :  { %9997 = vmatpush1.bf16.msra.mxu0 %v15875_v29  ;;  %9834 = vmatprep.subr.bf16.mxu1 %v15880_v33  ;;  %v15938_v29 = vld [vmem:[#allocation14 + $0x780] ss:$16 sps:$4 sm:$0xff]   ;;  %v15941_v33 = vld [vmem:[#allocation14 + $0x788] ss:$16 sps:$4 sm:$0xff]  }
0x1620   :  { %9998 = vmatprep.subr.bf16.mxu0 %v15883_v40  ;;  %v15946_v40 = vld [vmem:[#allocation14 + $0x7a4] ss:$16 sps:$4 sm:$0xff]  }
0x1622   :  { %9835 = vmatpush1.bf16.msra.mxu1 %v15878_v13  ;;  %v15949_v13 = vld [vmem:[#allocation14 + $0x7ac] ss:$16 sps:$4 sm:$0xff]  }
0x1623   :  { %9999 = vmatpush1.bf16.msra.mxu0 %v15881_v42  ;;  %9836 = vmatprep.subr.bf16.mxu1 %v15886_v1  ;;  %v15944_v42 = vld [vmem:[#allocation14 + $0x7a0] ss:$16 sps:$4 sm:$0xff]   ;;  %v15947_v1 = vld [vmem:[#allocation14 + $0x7a8] ss:$16 sps:$4 sm:$0xff]  }
0x1624   :  { %10000 = vmatprep.subr.bf16.mxu0 %v15889_v51  ;;  %v15952_v51 = vld [vmem:[#allocation14 + $0x7c4] ss:$16 sps:$4 sm:$0xff]  }
0x1626   :  { %9837 = vmatpush1.bf16.msra.mxu1 %v15884_v9  ;;  %v15955_v9 = vld [vmem:[#allocation14 + $0x7cc] ss:$16 sps:$4 sm:$0xff]  }
0x1627   :  { %10001 = vmatpush1.bf16.msra.mxu0 %v15887_v32  ;;  %9838 = vmatprep.subr.bf16.mxu1 %v15892_v55  ;;  %v15950_v32 = vld [vmem:[#allocation14 + $0x7c0] ss:$16 sps:$4 sm:$0xff]   ;;  %v15953_v55 = vld [vmem:[#allocation14 + $0x7c8] ss:$16 sps:$4 sm:$0xff]  }
0x1628   :  { %10002 = vmatprep.subr.bf16.mxu0 %v15895_v60  ;;  %v15958_v60 = vld [vmem:[#allocation14 + $0x7e4] ss:$16 sps:$4 sm:$0xff]  }
0x162a   :  { %9839 = vmatpush1.bf16.msra.mxu1 %v15890_v4  ;;  %v15961_v4 = vld [vmem:[#allocation14 + $0x7ec] ss:$16 sps:$4 sm:$0xff]  }
0x162b   :  { %10003 = vmatpush1.bf16.msra.mxu0 %v15893_v17  ;;  %9840 = vmatprep.subr.bf16.mxu1 %v15898_v18  ;;  %v10043_v17 = vld [vmem:[#allocation16] sm:$0xff] }
0x162c   :  { %v18546_v7 = vpop.f32.mrb[48].mxu1  ;;  %10004 = vmatprep.subr.bf16.mxu0 %v15901_v27  ;;  %v10047_v18 = vld [vmem:[#allocation16 + $0x20] sm:$0xff]  ;;  %v10044_v27 = vld [vmem:[#allocation16 + $0x8] sm:$0xff] }
0x162d   :  { %v18548_v46 = vpop.f32.mrb[44].mxu0  ;;  %v18550_v19 = vpop.f32.mrb[49].mxu1 }
0x162e   :  { %v18552_v0 = vpop.f32.mrb[45].mxu0  ;;  %v8048_v52 = vpop.f32.mrb[50].mxu1  ;;  %9841 = vmatpush1.bf16.msra.mxu1 %v15896_v11  ;;  %v10048_v11 = vld [vmem:[#allocation16 + $0x28] sm:$0xff] }
0x162f   :  { %v8130_v63 = vpop.f32.mrb[46].mxu0  ;;  %10005 = vmatpush1.bf16.msra.mxu0 %v15899_v43  ;;  %v8049_v35 = vpop.f32.mrb[51].mxu1  ;;  %9842 = vmatprep.subr.bf16.mxu1 %v15904_v58  ;;  %v15956_v43 = vld [vmem:[#allocation14 + $0x7e0] ss:$16 sps:$4 sm:$0xff]   ;;  %v4323_v58 = vmax.f32 %v18467_v16, 0.0  ;;  %v14355_v52 = vcombine.high %v10043_v17, %v10047_v18 }
0x1630   :  { %v8131_v15 = vpop.f32.mrb[47].mxu0  ;;  %10006 = vmatprep.subr.bf16.mxu0 %v15907_v53  ;;  %v15959_v53 = vld [vmem:[#allocation14 + $0x7e8] ss:$16 sps:$4 sm:$0xff]   ;;  %v10051_v63 = vld [vmem:[#allocation16 + $0x40] sm:$0xff] }
0x1631   :  { %v10055_v35 = vld [vmem:[#allocation16 + $0x60] sm:$0xff]  ;;  %v14354_v15 = vcombine.low %v10043_v17, %v10047_v18 }
0x1632   :  { %9843 = vmatpush1.bf16.msra.mxu1 %v15902_v20  ;;  %v14357_v20 = vcombine.high %v10044_v27, %v10048_v11  ;;  %v10059_v16 = vld [vmem:[#allocation16 + $0x80] sm:$0xff] }
0x1633   :  { %10007 = vmatpush1.bf16.msra.mxu0 %v15905_v28  ;;  %9844 = vmatprep.subr.bf16.mxu1 %v15910_v3  ;;  %v10052_v28 = vld [vmem:[#allocation16 + $0x48] sm:$0xff] }
0x1634   :  { %10008 = vmatprep.subr.bf16.mxu0 %v15913_v5  ;;  %v10056_v3 = vld [vmem:[#allocation16 + $0x68] sm:$0xff]  ;;  %v8147_v5 = vpack.c.bf16 %v4323_v58, %v4323_v58 }
0x1635   :  { %v10096_v58 = vld [vmem:[#allocation16 + $0x1a8] sm:$0xff] }
0x1636   :  { %9845 = vmatpush1.bf16.msra.mxu1 %v15908_v57  ;;  %v14356_v57 = vcombine.low %v10044_v27, %v10048_v11  ;;  %v10091_v27 = vld [vmem:[#allocation16 + $0x180] sm:$0xff] }
0x1637   :  { %10009 = vmatpush1.bf16.msra.mxu0 %v15911_v24  ;;  %9846 = vmatprep.subr.bf16.mxu1 %v15916_v23  ;;  %v14363_v24 = vcombine.high %v10051_v63, %v10055_v35  ;;  %v14365_v23 = vcombine.high %v10052_v28, %v10056_v3  ;;  %v10095_v11 = vld [vmem:[#allocation16 + $0x1a0] sm:$0xff] }
0x1638   :  { %10010 = vmatprep.subr.bf16.mxu0 %v15919_v61  ;;  %v10063_v61 = vld [vmem:[#allocation16 + $0xa0] sm:$0xff] }
0x163a   :  { %9847 = vmatpush1.bf16.msra.mxu1 %v15914_v56  ;;  %v10060_v56 = vld [vmem:[#allocation16 + $0x88] sm:$0xff] }
0x163b   :  { %10011 = vmatpush1.bf16.msra.mxu0 %v15917_v8  ;;  %9848 = vmatprep.subr.bf16.mxu1 %v15922_v45  ;;  %v10064_v8 = vld [vmem:[#allocation16 + $0xa8] sm:$0xff]  ;;  %v14362_v45 = vcombine.low %v10051_v63, %v10055_v35  ;;  %v10099_v35 = vld [vmem:[#allocation16 + $0x1c0] sm:$0xff] }
0x163c   :  { %10012 = vmatprep.subr.bf16.mxu0 %v15925_v62  ;;  %v14364_v62 = vcombine.low %v10052_v28, %v10056_v3  ;;  %v10103_v28 = vld [vmem:[#allocation16 + $0x1e0] sm:$0xff]  ;;  %v10100_v3 = vld [vmem:[#allocation16 + $0x1c8] sm:$0xff] }
0x163e   :  { %9849 = vmatpush1.bf16.msra.mxu1 %v15920_v48  ;;  %v14371_v48 = vcombine.high %v10059_v16, %v10063_v61 }
0x163f   :  { %10013 = vmatpush1.bf16.msra.mxu0 %v15923_v50  ;;  %9850 = vmatprep.subr.bf16.mxu1 %v15928_v38  ;;  %v14373_v50 = vcombine.high %v10060_v56, %v10064_v8  ;;  %v10067_v38 = vld [vmem:[#allocation16 + $0xc0] sm:$0xff] }
0x1640   :  { %10014 = vmatprep.subr.bf16.mxu0 %v15931_v39  ;;  %v10071_v39 = vld [vmem:[#allocation16 + $0xe0] sm:$0xff] }
0x1642   :  { %9851 = vmatpush1.bf16.msra.mxu1 %v15926_v22  ;;  %v10068_v22 = vld [vmem:[#allocation16 + $0xc8] sm:$0xff] }
0x1643   :  { %10015 = vmatpush1.bf16.msra.mxu0 %v15929_v2  ;;  %9852 = vmatprep.subr.bf16.mxu1 %v15934_v49  ;;  %v10072_v2 = vld [vmem:[#allocation16 + $0xe8] sm:$0xff]  ;;  %v14370_v49 = vcombine.low %v10059_v16, %v10063_v61  ;;  %v10107_v16 = vld [vmem:[#allocation16 + $0x200] sm:$0xff] }
0x1644   :  { %10016 = vmatprep.subr.bf16.mxu0 %v15937_v44  ;;  %v14372_v44 = vcombine.low %v10060_v56, %v10064_v8  ;;  %v10111_v61 = vld [vmem:[#allocation16 + $0x220] sm:$0xff]  ;;  %v10108_v56 = vld [vmem:[#allocation16 + $0x208] sm:$0xff] }
0x1645   :  { %v10112_v8 = vld [vmem:[#allocation16 + $0x228] sm:$0xff] }
0x1646   :  { %9853 = vmatpush1.bf16.msra.mxu1 %v15932_v10  ;;  %v14379_v10 = vcombine.high %v10067_v38, %v10071_v39 }
0x1647   :  { %10017 = vmatpush1.bf16.msra.mxu0 %v15935_v34  ;;  %9854 = vmatprep.subr.bf16.mxu1 %v15940_v25  ;;  %v14381_v34 = vcombine.high %v10068_v22, %v10072_v2  ;;  %v10075_v25 = vld [vmem:[#allocation16 + $0x100] sm:$0xff] }
0x1648   :  { %10018 = vmatprep.subr.bf16.mxu0 %v15943_v59  ;;  %v10079_v59 = vld [vmem:[#allocation16 + $0x120] sm:$0xff] }
0x164a   :  { %9855 = vmatpush1.bf16.msra.mxu1 %v15938_v29  ;;  %v10076_v29 = vld [vmem:[#allocation16 + $0x108] sm:$0xff] }
0x164b   :  { %10019 = vmatpush1.bf16.msra.mxu0 %v15941_v33  ;;  %9856 = vmatprep.subr.bf16.mxu1 %v15946_v40  ;;  %v10080_v33 = vld [vmem:[#allocation16 + $0x128] sm:$0xff]  ;;  %v14378_v40 = vcombine.low %v10067_v38, %v10071_v39  ;;  %v10115_v38 = vld [vmem:[#allocation16 + $0x240] sm:$0xff] }
0x164c   :  { %10020 = vmatprep.subr.bf16.mxu0 %v15949_v13  ;;  %v14380_v13 = vcombine.low %v10068_v22, %v10072_v2  ;;  %v10119_v39 = vld [vmem:[#allocation16 + $0x260] sm:$0xff]  ;;  %v10116_v22 = vld [vmem:[#allocation16 + $0x248] sm:$0xff] }
0x164d   :  { %v10120_v2 = vld [vmem:[#allocation16 + $0x268] sm:$0xff] }
0x164e   :  { %9857 = vmatpush1.bf16.msra.mxu1 %v15944_v42  ;;  %v14387_v42 = vcombine.high %v10075_v25, %v10079_v59 }
0x164f   :  { %10021 = vmatpush1.bf16.msra.mxu0 %v15947_v1  ;;  %9858 = vmatprep.subr.bf16.mxu1 %v15952_v51  ;;  %v14389_v1 = vcombine.high %v10076_v29, %v10080_v33  ;;  %v10083_v51 = vld [vmem:[#allocation16 + $0x140] sm:$0xff] }
0x1650   :  { %10022 = vmatprep.subr.bf16.mxu0 %v15955_v9  ;;  %v10087_v9 = vld [vmem:[#allocation16 + $0x160] sm:$0xff] }
0x1651   :  { %v14395_v17 = vcombine.high %v10083_v51, %v10087_v9 }
0x1652   :  { %9859 = vmatpush1.bf16.msra.mxu1 %v15950_v32  ;;  %v10084_v32 = vld [vmem:[#allocation16 + $0x148] sm:$0xff] }
0x1653   :  { %10023 = vmatpush1.bf16.msra.mxu0 %v15953_v55  ;;  %9860 = vmatprep.subr.bf16.mxu1 %v15958_v60  ;;  %v10088_v55 = vld [vmem:[#allocation16 + $0x168] sm:$0xff]  ;;  %v14386_v60 = vcombine.low %v10075_v25, %v10079_v59  ;;  %v10123_v25 = vld [vmem:[#allocation16 + $0x280] sm:$0xff] }
0x1654   :  { %10024 = vmatprep.subr.bf16.mxu0 %v15961_v4  ;;  %v14388_v4 = vcombine.low %v10076_v29, %v10080_v33  ;;  %v14397_v18 = vcombine.high %v10084_v32, %v10088_v55  ;;  %v10127_v59 = vld [vmem:[#allocation16 + $0x2a0] sm:$0xff]  ;;  %v10124_v29 = vld [vmem:[#allocation16 + $0x288] sm:$0xff] }
0x1655   :  { %v10128_v33 = vld [vmem:[#allocation16 + $0x2a8] sm:$0xff] }
0x1656   :  { %9861 = vmatpush1.bf16.msra.mxu1 %v15956_v43  ;;  %v10092_v43 = vld [vmem:[#allocation16 + $0x188] sm:$0xff] }
0x1657   :  { %10025 = vmatpush1.bf16.msra.mxu0 %v15959_v53  ;;  %11621 = vmatprep.subr.bf16.mxu1 %v14355_v52  ;;  %v14394_v53 = vcombine.low %v10083_v51, %v10087_v9  ;;  %v14396_v52 = vcombine.low %v10084_v32, %v10088_v55  ;;  %v14405_v63 = vcombine.high %v10092_v43, %v10096_v58  ;;  %v10131_v51 = vld [vmem:[#allocation16 + $0x2c0] sm:$0xff]  ;;  %v10132_v32 = vld [vmem:[#allocation16 + $0x2c8] sm:$0xff] }
0x1658   :  { %11703 = vmatprep.subr.bf16.mxu0 %v14357_v20  ;;  %v14403_v20 = vcombine.high %v10091_v27, %v10095_v11  ;;  %v10135_v9 = vld [vmem:[#allocation16 + $0x2e0] sm:$0xff]  ;;  %v10136_v55 = vld [vmem:[#allocation16 + $0x2e8] sm:$0xff] }
0x1659   :  { %9863 = vmatmul.mubr.bf16.vlgmr.msra.gmra.mrb[52].mxu1 %v8147_v5 }
0x165a   :  { %10027 = vmatmul.mubr.bf16.vlgmr.msra.gmra.mrb[48].mxu0 %v8147_v5  ;;  %11622 = vmatpush1.bf16.msra.mxu1 %v14354_v15  ;;  %v10104_v15 = vld [vmem:[#allocation16 + $0x1e8] sm:$0xff]  ;;  %v14402_v5 = vcombine.low %v10091_v27, %v10095_v11  ;;  %v10139_v27 = vld [vmem:[#allocation16 + $0x300] sm:$0xff] }
0x165b   :  { %11704 = vmatpush1.bf16.msra.mxu0 %v14356_v57  ;;  %11623 = vmatprep.subr.bf16.mxu1 %v14363_v24  ;;  %v14404_v57 = vcombine.low %v10092_v43, %v10096_v58  ;;  %v14411_v24 = vcombine.high %v10099_v35, %v10103_v28  ;;  %v10143_v11 = vld [vmem:[#allocation16 + $0x320] sm:$0xff]  ;;  %v10140_v43 = vld [vmem:[#allocation16 + $0x308] sm:$0xff] }
0x165c   :  { %11705 = vmatprep.subr.bf16.mxu0 %v14365_v23  ;;  %v14413_v23 = vcombine.high %v10100_v3, %v10104_v15  ;;  %v10144_v58 = vld [vmem:[#allocation16 + $0x328] sm:$0xff] }
0x165e   :  { %11624 = vmatpush1.bf16.msra.mxu1 %v14362_v45  ;;  %v14410_v45 = vcombine.low %v10099_v35, %v10103_v28  ;;  %v10147_v35 = vld [vmem:[#allocation16 + $0x340] sm:$0xff] }
0x165f   :  { %11706 = vmatpush1.bf16.msra.mxu0 %v14364_v62  ;;  %11625 = vmatprep.subr.bf16.mxu1 %v14371_v48  ;;  %v14412_v62 = vcombine.low %v10100_v3, %v10104_v15  ;;  %v14419_v48 = vcombine.high %v10107_v16, %v10111_v61  ;;  %v10151_v28 = vld [vmem:[#allocation16 + $0x360] sm:$0xff]  ;;  %v10148_v3 = vld [vmem:[#allocation16 + $0x348] sm:$0xff] }
0x1660   :  { %11707 = vmatprep.subr.bf16.mxu0 %v14373_v50  ;;  %v14421_v50 = vcombine.high %v10108_v56, %v10112_v8  ;;  %v10152_v15 = vld [vmem:[#allocation16 + $0x368] sm:$0xff] }
0x1662   :  { %11626 = vmatpush1.bf16.msra.mxu1 %v14370_v49  ;;  %v14418_v49 = vcombine.low %v10107_v16, %v10111_v61  ;;  %v14458_v16 = vcombine.low %v10147_v35, %v10151_v28  ;;  %v14460_v61 = vcombine.low %v10148_v3, %v10152_v15 }
0x1663   :  { %11708 = vmatpush1.bf16.msra.mxu0 %v14372_v44  ;;  %11627 = vmatprep.subr.bf16.mxu1 %v14379_v10  ;;  %v14420_v44 = vcombine.low %v10108_v56, %v10112_v8  ;;  %v14427_v10 = vcombine.high %v10115_v38, %v10119_v39  ;;  %v10155_v56 = vld [vmem:[#allocation16 + $0x380] sm:$0xff] }
0x1664   :  { %11709 = vmatprep.subr.bf16.mxu0 %v14381_v34  ;;  %v14429_v34 = vcombine.high %v10116_v22, %v10120_v2  ;;  %v10159_v8 = vld [vmem:[#allocation16 + $0x3a0] sm:$0xff] }
0x1666   :  { %11628 = vmatpush1.bf16.msra.mxu1 %v14378_v40  ;;  %v14426_v40 = vcombine.low %v10115_v38, %v10119_v39 }
0x1667   :  { %11710 = vmatpush1.bf16.msra.mxu0 %v14380_v13  ;;  %11629 = vmatprep.subr.bf16.mxu1 %v14387_v42  ;;  %v14428_v13 = vcombine.low %v10116_v22, %v10120_v2  ;;  %v14435_v42 = vcombine.high %v10123_v25, %v10127_v59  ;;  %v10163_v22 = vld [vmem:[#allocation16 + $0x3c0] sm:$0xff] }
0x1668   :  { %11711 = vmatprep.subr.bf16.mxu0 %v14389_v1  ;;  %v14437_v1 = vcombine.high %v10124_v29, %v10128_v33  ;;  %v10167_v2 = vld [vmem:[#allocation16 + $0x3e0] sm:$0xff] }
0x166a   :  { %11630 = vmatpush1.bf16.msra.mxu1 %v14386_v60  ;;  %v14434_v60 = vcombine.low %v10123_v25, %v10127_v59  ;;  %v10171_v25 = vld [vmem:[#allocation16 + $0x400] sm:$0xff] }
0x166b   :  { %11712 = vmatpush1.bf16.msra.mxu0 %v14388_v4  ;;  %11631 = vmatprep.subr.bf16.mxu1 %v14395_v17  ;;  %v14436_v4 = vcombine.low %v10124_v29, %v10128_v33  ;;  %v14443_v17 = vcombine.high %v10131_v51, %v10135_v9  ;;  %v10175_v59 = vld [vmem:[#allocation16 + $0x420] sm:$0xff] }
0x166c   :  { %11713 = vmatprep.subr.bf16.mxu0 %v14397_v18  ;;  %v14445_v18 = vcombine.high %v10132_v32, %v10136_v55 }
0x166e   :  { %11632 = vmatpush1.bf16.msra.mxu1 %v14394_v53  ;;  %v14442_v53 = vcombine.low %v10131_v51, %v10135_v9 }
0x166f   :  { %11714 = vmatpush1.bf16.msra.mxu0 %v14396_v52  ;;  %11633 = vmatprep.subr.bf16.mxu1 %v14403_v20  ;;  %v14444_v52 = vcombine.low %v10132_v32, %v10136_v55  ;;  %v14451_v20 = vcombine.high %v10139_v27, %v10143_v11  ;;  %v18558_v32 = vld [vmem:[%s18676_s16] sm:$0xf] }
0x1670   :  { %11715 = vmatprep.subr.bf16.mxu0 %v14405_v63  ;;  %v14453_v63 = vcombine.high %v10140_v43, %v10144_v58  ;;  %v8410_v55 = vrot.slane %v18558_v32, %v17286_v31 }
0x1672   :  { %11634 = vmatpush1.bf16.msra.mxu1 %v14402_v5  ;;  %v14450_v5 = vcombine.low %v10139_v27, %v10143_v11 }
0x1673   :  { %11716 = vmatpush1.bf16.msra.mxu0 %v14404_v57  ;;  %11635 = vmatprep.subr.bf16.mxu1 %v14411_v24  ;;  %v14452_v57 = vcombine.low %v10140_v43, %v10144_v58  ;;  %v14459_v24 = vcombine.high %v10147_v35, %v10151_v28 }
0x1674   :  { %11717 = vmatprep.subr.bf16.mxu0 %v14413_v23  ;;  %v14461_v23 = vcombine.high %v10148_v3, %v10152_v15  ;;  %v10179_v15 = vld [vmem:[#allocation16 + $0x440] sm:$0xff] }
0x1676   :  { %11636 = vmatpush1.bf16.msra.mxu1 %v14410_v45  ;;  %v10156_v45 = vld [vmem:[#allocation16 + $0x388] sm:$0xff] }
0x1677   :  { %11718 = vmatpush1.bf16.msra.mxu0 %v14412_v62  ;;  %11637 = vmatprep.subr.bf16.mxu1 %v14419_v48  ;;  %v14467_v62 = vcombine.high %v10155_v56, %v10159_v8  ;;  %v10160_v48 = vld [vmem:[#allocation16 + $0x3a8] sm:$0xff] }
0x1678   :  { %11719 = vmatprep.subr.bf16.mxu0 %v14421_v50  ;;  %v14466_v50 = vcombine.low %v10155_v56, %v10159_v8  ;;  %v14468_v38 = vcombine.low %v10156_v45, %v10160_v48  ;;  %v14469_v39 = vcombine.high %v10156_v45, %v10160_v48  ;;  %v10187_v56 = vld [vmem:[#allocation16 + $0x480] sm:$0xff]  ;;  %v10188_v48 = vld [vmem:[#allocation16 + $0x488] sm:$0xff] }
0x167a   :  { %11638 = vmatpush1.bf16.msra.mxu1 %v14418_v49  ;;  %v10164_v49 = vld [vmem:[#allocation16 + $0x3c8] sm:$0xff] }
0x167b   :  { %11720 = vmatpush1.bf16.msra.mxu0 %v14420_v44  ;;  %11639 = vmatprep.subr.bf16.mxu1 %v14427_v10  ;;  %v14474_v44 = vcombine.low %v10163_v22, %v10167_v2  ;;  %v14475_v10 = vcombine.high %v10163_v22, %v10167_v2 }
0x167c   :  { %11721 = vmatprep.subr.bf16.mxu0 %v14429_v34  ;;  %v10168_v34 = vld [vmem:[#allocation16 + $0x3e8] sm:$0xff] }
0x167d   :  { %v14476_v29 = vcombine.low %v10164_v49, %v10168_v34  ;;  %v14477_v33 = vcombine.high %v10164_v49, %v10168_v34  ;;  %v10196_v34 = vld [vmem:[#allocation16 + $0x4c8] sm:$0xff] }
0x167e   :  { %11640 = vmatpush1.bf16.msra.mxu1 %v14426_v40  ;;  %v14482_v40 = vcombine.low %v10171_v25, %v10175_v59 }
0x167f   :  { %11722 = vmatpush1.bf16.msra.mxu0 %v14428_v13  ;;  %11641 = vmatprep.subr.bf16.mxu1 %v14435_v42  ;;  %v14483_v13 = vcombine.high %v10171_v25, %v10175_v59  ;;  %v10172_v42 = vld [vmem:[#allocation16 + $0x408] sm:$0xff] }
0x1680   :  { %11723 = vmatprep.subr.bf16.mxu0 %v14437_v1  ;;  %v10176_v1 = vld [vmem:[#allocation16 + $0x428] sm:$0xff] }
0x1681   :  { %v14484_v51 = vcombine.low %v10172_v42, %v10176_v1  ;;  %v14485_v9 = vcombine.high %v10172_v42, %v10176_v1  ;;  %v10200_v25 = vld [vmem:[#allocation16 + $0x4e8] sm:$0xff]  ;;  %v10207_v42 = vld [vmem:[#allocation16 + $0x520] sm:$0xff] }
0x1682   :  { %11642 = vmatpush1.bf16.msra.mxu1 %v14434_v60  ;;  %v8414_v60 = vrot.slane %v18558_v32, %v17339_v54  ;;  %v10204_v1 = vld [vmem:[#allocation16 + $0x508] sm:$0xff] }
0x1683   :  { %11724 = vmatpush1.bf16.msra.mxu0 %v14436_v4  ;;  %11643 = vmatprep.subr.bf16.mxu1 %v14443_v17  ;;  %v8422_v4 = vrot.slane %v18558_v32, %v18401_v36 }
0x1684   :  { %11725 = vmatprep.subr.bf16.mxu0 %v14445_v18 }
0x1686   :  { %11644 = vmatpush1.bf16.msra.mxu1 %v14442_v53 }
0x1687   :  { %11726 = vmatpush1.bf16.msra.mxu0 %v14444_v52  ;;  %11645 = vmatprep.subr.bf16.mxu1 %v14451_v20 }
0x1688   :  { %11727 = vmatprep.subr.bf16.mxu0 %v14453_v63 }
0x168a   :  { %11646 = vmatpush1.bf16.msra.mxu1 %v14450_v5 }
0x168b   :  { %11728 = vmatpush1.bf16.msra.mxu0 %v14452_v57  ;;  %11647 = vmatprep.subr.bf16.mxu1 %v14459_v24  ;;  %v10183_v57 = vld [vmem:[#allocation16 + $0x460] sm:$0xff]  ;;  %v10180_v24 = vld [vmem:[#allocation16 + $0x448] sm:$0xff] }
0x168c   :  { %11729 = vmatprep.subr.bf16.mxu0 %v14461_v23  ;;  %v10184_v23 = vld [vmem:[#allocation16 + $0x468] sm:$0xff]  ;;  %v14491_v8 = vcombine.high %v10179_v15, %v10183_v57 }
0x168d   :  { %v14493_v45 = vcombine.high %v10180_v24, %v10184_v23  ;;  %v14492_v22 = vcombine.low %v10180_v24, %v10184_v23  ;;  %v10227_v23 = vld [vmem:[#allocation16 + $0x5c0] sm:$0xff] }
0x168e   :  { %11648 = vmatpush1.bf16.msra.mxu1 %v14458_v16 }
0x168f   :  { %11730 = vmatpush1.bf16.msra.mxu0 %v14460_v61  ;;  %11649 = vmatprep.subr.bf16.mxu1 %v14467_v62  ;;  %v10191_v62 = vld [vmem:[#allocation16 + $0x4a0] sm:$0xff] }
0x1690   :  { %11731 = vmatprep.subr.bf16.mxu0 %v14469_v39  ;;  %v14490_v39 = vcombine.low %v10179_v15, %v10183_v57  ;;  %v14499_v2 = vcombine.high %v10187_v56, %v10191_v62  ;;  %v14498_v59 = vcombine.low %v10187_v56, %v10191_v62  ;;  %v10231_v56 = vld [vmem:[#allocation16 + $0x5e0] sm:$0xff] }
0x1692   :  { %11650 = vmatpush1.bf16.msra.mxu1 %v14466_v50  ;;  %v10192_v50 = vld [vmem:[#allocation16 + $0x4a8] sm:$0xff] }
0x1693   :  { %11732 = vmatpush1.bf16.msra.mxu0 %v14468_v38  ;;  %11651 = vmatprep.subr.bf16.mxu1 %v14475_v10  ;;  %v14501_v49 = vcombine.high %v10188_v48, %v10192_v50  ;;  %v10199_v10 = vld [vmem:[#allocation16 + $0x4e0] sm:$0xff] }
0x1694   :  { %11733 = vmatprep.subr.bf16.mxu0 %v14477_v33 }
0x1696   :  { %11652 = vmatpush1.bf16.msra.mxu1 %v14474_v44  ;;  %v10195_v44 = vld [vmem:[#allocation16 + $0x4c0] sm:$0xff] }
0x1697   :  { %11734 = vmatpush1.bf16.msra.mxu0 %v14476_v29  ;;  %11662 = vmatprep.subr.bf16.mxu1 %v14483_v13  ;;  %v14500_v29 = vcombine.low %v10188_v48, %v10192_v50  ;;  %v14507_v33 = vcombine.high %v10195_v44, %v10199_v10  ;;  %v10203_v13 = vld [vmem:[#allocation16 + $0x500] sm:$0xff]  ;;  %v14539_v50 = vcombine.high %v10227_v23, %v10231_v56 }
0x1698   :  { %11744 = vmatprep.subr.bf16.mxu0 %v14485_v9  ;;  %v14506_v9 = vcombine.low %v10195_v44, %v10199_v10  ;;  %v10240_v44 = vld [vmem:[#allocation16 + $0x628] sm:$0xff]  ;;  %v14538_v10 = vcombine.low %v10227_v23, %v10231_v56 }
0x1699   :  { %v10272_v23 = vld [vmem:[#allocation16 + $0x728] sm:$0xff] }
0x172c   :  { %v9864_v17 = vpop.f32.mrb[52].mxu1 }
0x172d   :  { %v15082_v18 = vadd.f32 %v9864_v17, %v8410_v55  ;;  %v18566_v27 = vpop.f32.mrb[48].mxu0  ;;  %v9866_v11 = vpop.f32.mrb[53].mxu1  ;;  %v14508_v55 = vcombine.low %v10196_v34, %v10200_v25  ;;  %v10211_v17 = vld [vmem:[#allocation16 + $0x540] sm:$0xff] }
0x172e   :  { %v15083_v43 = vadd.f32 %v9866_v11, %v8414_v60  ;;  %v10030_v58 = vpop.f32.mrb[49].mxu0  ;;  %v9868_v53 = vpop.f32.mrb[54].mxu1  ;;  %v14515_v60 = vcombine.high %v10203_v13, %v10207_v42  ;;  %v10212_v11 = vld [vmem:[#allocation16 + $0x548] sm:$0xff] }
0x172f   :  { %v10035_v52 = vmax.f32 %v15082_v18, 0.0  ;;  %v15085_v20 = vadd.f32 %v10030_v58, %v8422_v4  ;;  %v10032_v63 = vpop.f32.mrb[50].mxu0  ;;  %v9869_v35 = vpop.f32.mrb[55].mxu1  ;;  %v10215_v18 = vld [vmem:[#allocation16 + $0x560] sm:$0xff]  ;;  %v14514_v58 = vcombine.low %v10203_v13, %v10207_v42  ;;  %v10248_v13 = vld [vmem:[#allocation16 + $0x668] sm:$0xff] }
0x1730   :  { %v10036_v28 = vmax.f32 %v15083_v43, 0.0  ;;  %v10033_v3 = vpop.f32.mrb[51].mxu0  ;;  %v10216_v43 = vld [vmem:[#allocation16 + $0x568] sm:$0xff]  ;;  %v10219_v63 = vld [vmem:[#allocation16 + $0x580] sm:$0xff]  ;;  %v14522_v15 = vcombine.low %v10211_v17, %v10215_v18 }
0x1731   :  { %v10038_v5 = vmax.f32 %v15085_v20, 0.0  ;;  %v18570_v61 = vpack.c.bf16 %v10035_v52, %v10035_v52  ;;  %v14523_v52 = vcombine.high %v10211_v17, %v10215_v18  ;;  %v14525_v20 = vcombine.high %v10212_v11, %v10216_v43  ;;  %v10223_v35 = vld [vmem:[#allocation16 + $0x5a0] sm:$0xff]  ;;  %v10224_v3 = vld [vmem:[#allocation16 + $0x5a8] sm:$0xff] }
0x1732   :  { %v18568_v16 = vpack.c.bf16 %v10036_v28, %v10036_v28  ;;  %v10220_v28 = vld [vmem:[#allocation16 + $0x588] sm:$0xff]  ;;  %v14531_v57 = vcombine.high %v10219_v63, %v10223_v35  ;;  %v14530_v62 = vcombine.low %v10219_v63, %v10223_v35 }
0x1733   :  { %v18574_v38 = vpack.c.bf16 %v10038_v5, %v10038_v5  ;;  %v14524_v5 = vcombine.low %v10212_v11, %v10216_v43  ;;  %v14533_v24 = vcombine.high %v10220_v28, %v10224_v3  ;;  %v14532_v48 = vcombine.low %v10220_v28, %v10224_v3  ;;  %v10256_v17 = vld [vmem:[#allocation16 + $0x6a8] sm:$0xff] }
0x1734   :  { %11653 = vmatprep.mubr.bf16.mxu1 %v18568_v16  ;;  %11735 = vmatprep.mubr.bf16.mxu0 %v18568_v16  ;;  %v10264_v63 = vld [vmem:[#allocation16 + $0x6e8] sm:$0xff] }
0x1735   :  { %11654 = vmatmul.mubr.bf16.vlgmr.msra.gmra.mrb[56].mxu1 %v18570_v61  ;;  %11736 = vmatmul.mubr.bf16.vlgmr.msra.gmra.mrb[52].mxu0 %v18570_v61 }
0x1736   :  { %11663 = vmatpush1.bf16.msra.mxu1 %v14482_v40  ;;  %11745 = vmatpush1.bf16.msra.mxu0 %v14484_v51  ;;  %v14509_v40 = vcombine.high %v10196_v34, %v10200_v25  ;;  %v10208_v51 = vld [vmem:[#allocation16 + $0x528] sm:$0xff] }
0x1737   :  { %11694 = vmatprep.mubr.bf16.mxu1 %v18574_v38  ;;  %11776 = vmatprep.mubr.bf16.mxu0 %v18574_v38  ;;  %v14517_v4 = vcombine.high %v10204_v1, %v10208_v51  ;;  %v14516_v53 = vcombine.low %v10204_v1, %v10208_v51 }
0x1738   :  { %11664 = vmatprep.subr.bf16.mxu1 %v14491_v8  ;;  %11746 = vmatprep.subr.bf16.mxu0 %v14493_v45  ;;  %v10228_v8 = vld [vmem:[#allocation16 + $0x5c8] sm:$0xff] }
0x1739   :  { %v10232_v45 = vld [vmem:[#allocation16 + $0x5e8] sm:$0xff] }
0x173a   :  { %11665 = vmatpush1.bf16.msra.mxu1 %v14490_v39  ;;  %11747 = vmatpush1.bf16.msra.mxu0 %v14492_v22  ;;  %v14541_v39 = vcombine.high %v10228_v8, %v10232_v45  ;;  %v10235_v22 = vld [vmem:[#allocation16 + $0x600] sm:$0xff]  ;;  %v14540_v34 = vcombine.low %v10228_v8, %v10232_v45 }
0x173b   :  { %11666 = vmatprep.subr.bf16.mxu1 %v14499_v2  ;;  %11748 = vmatprep.subr.bf16.mxu0 %v14501_v49  ;;  %v10239_v2 = vld [vmem:[#allocation16 + $0x620] sm:$0xff]  ;;  %v10236_v49 = vld [vmem:[#allocation16 + $0x608] sm:$0xff] }
0x173c   :  { %v14547_v25 = vcombine.high %v10235_v22, %v10239_v2  ;;  %v14546_v42 = vcombine.low %v10235_v22, %v10239_v2  ;;  %v14548_v1 = vcombine.low %v10236_v49, %v10240_v44  ;;  %v10280_v22 = vld [vmem:[#allocation16 + $0x768] sm:$0xff] }
0x173e   :  { %11667 = vmatpush1.bf16.msra.mxu1 %v14498_v59  ;;  %11749 = vmatpush1.bf16.msra.mxu0 %v14500_v29  ;;  %v14549_v59 = vcombine.high %v10236_v49, %v10240_v44  ;;  %v10243_v29 = vld [vmem:[#allocation16 + $0x640] sm:$0xff] }
0x173f   :  { %11668 = vmatprep.subr.bf16.mxu1 %v14507_v33  ;;  %11750 = vmatprep.subr.bf16.mxu0 %v14509_v40  ;;  %v10247_v33 = vld [vmem:[#allocation16 + $0x660] sm:$0xff]  ;;  %v10244_v40 = vld [vmem:[#allocation16 + $0x648] sm:$0xff] }
0x1740   :  { %v14555_v51 = vcombine.high %v10243_v29, %v10247_v33  ;;  %v14554_v18 = vcombine.low %v10243_v29, %v10247_v33  ;;  %v14556_v11 = vcombine.low %v10244_v40, %v10248_v13  ;;  %v10288_v29 = vld [vmem:[#allocation16 + $0x7a8] sm:$0xff] }
0x1742   :  { %11669 = vmatpush1.bf16.msra.mxu1 %v14506_v9  ;;  %11751 = vmatpush1.bf16.msra.mxu0 %v14508_v55  ;;  %v14557_v9 = vcombine.high %v10244_v40, %v10248_v13  ;;  %v10251_v55 = vld [vmem:[#allocation16 + $0x680] sm:$0xff]  ;;  %v8418_v13 = vrot.slane %v18558_v32, %v18420_v12  ;;  %v10049_v32 = vld [vmem:[#allocation16 + $0x30] sm:$0xff] }
0x1743   :  { %11670 = vmatprep.subr.bf16.mxu1 %v14515_v60  ;;  %11752 = vmatprep.subr.bf16.mxu0 %v14517_v4  ;;  %v10255_v60 = vld [vmem:[#allocation16 + $0x6a0] sm:$0xff]  ;;  %v10252_v4 = vld [vmem:[#allocation16 + $0x688] sm:$0xff] }
0x1744   :  { %v14563_v43 = vcombine.high %v10251_v55, %v10255_v60  ;;  %v14562_v35 = vcombine.low %v10251_v55, %v10255_v60  ;;  %v14564_v28 = vcombine.low %v10252_v4, %v10256_v17  ;;  %v10292_v55 = vld [vmem:[#allocation16 + $0x7c8] sm:$0xff] }
0x1745   :  { %v10296_v60 = vld [vmem:[#allocation16 + $0x7e8] sm:$0xff] }
0x1746   :  { %11671 = vmatpush1.bf16.msra.mxu1 %v14514_v58  ;;  %11753 = vmatpush1.bf16.msra.mxu0 %v14516_v53  ;;  %v14565_v58 = vcombine.high %v10252_v4, %v10256_v17  ;;  %v10259_v53 = vld [vmem:[#allocation16 + $0x6c0] sm:$0xff] }
0x1747   :  { %11672 = vmatprep.subr.bf16.mxu1 %v14523_v52  ;;  %11754 = vmatprep.subr.bf16.mxu0 %v14525_v20  ;;  %v10263_v52 = vld [vmem:[#allocation16 + $0x6e0] sm:$0xff]  ;;  %v10260_v20 = vld [vmem:[#allocation16 + $0x6c8] sm:$0xff] }
0x1748   :  { %v14571_v3 = vcombine.high %v10259_v53, %v10263_v52  ;;  %v14570_v56 = vcombine.low %v10259_v53, %v10263_v52  ;;  %v14572_v8 = vcombine.low %v10260_v20, %v10264_v63  ;;  %v10046_v53 = vld [vmem:[#allocation16 + $0x18] sm:$0xff] }
0x1749   :  { %v10050_v52 = vld [vmem:[#allocation16 + $0x38] sm:$0xff] }
0x174a   :  { %11673 = vmatpush1.bf16.msra.mxu1 %v14522_v15  ;;  %11755 = vmatpush1.bf16.msra.mxu0 %v14524_v5  ;;  %v14573_v15 = vcombine.high %v10260_v20, %v10264_v63  ;;  %v10267_v5 = vld [vmem:[#allocation16 + $0x700] sm:$0xff]  ;;  %v14604_v63 = vcombine.low %v10292_v55, %v10296_v60 }
0x174b   :  { %11674 = vmatprep.subr.bf16.mxu1 %v14531_v57  ;;  %11756 = vmatprep.subr.bf16.mxu0 %v14533_v24  ;;  %v10271_v57 = vld [vmem:[#allocation16 + $0x720] sm:$0xff]  ;;  %v10268_v24 = vld [vmem:[#allocation16 + $0x708] sm:$0xff] }
0x174c   :  { %v14579_v45 = vcombine.high %v10267_v5, %v10271_v57  ;;  %v14578_v2 = vcombine.low %v10267_v5, %v10271_v57  ;;  %v14580_v49 = vcombine.low %v10268_v24, %v10272_v23  ;;  %v10057_v5 = vld [vmem:[#allocation16 + $0x70] sm:$0xff]  ;;  %v10058_v57 = vld [vmem:[#allocation16 + $0x78] sm:$0xff] }
0x174e   :  { %11675 = vmatpush1.bf16.msra.mxu1 %v14530_v62  ;;  %11757 = vmatpush1.bf16.msra.mxu0 %v14532_v48  ;;  %v14581_v62 = vcombine.high %v10268_v24, %v10272_v23  ;;  %v10275_v48 = vld [vmem:[#allocation16 + $0x740] sm:$0xff] }
0x174f   :  { %11676 = vmatprep.subr.bf16.mxu1 %v14539_v50  ;;  %11758 = vmatprep.subr.bf16.mxu0 %v14541_v39  ;;  %v10279_v50 = vld [vmem:[#allocation16 + $0x760] sm:$0xff]  ;;  %v10276_v39 = vld [vmem:[#allocation16 + $0x748] sm:$0xff] }
0x1750   :  { %v14587_v44 = vcombine.high %v10275_v48, %v10279_v50  ;;  %v14586_v33 = vcombine.low %v10275_v48, %v10279_v50  ;;  %v14588_v40 = vcombine.low %v10276_v39, %v10280_v22  ;;  %v10065_v48 = vld [vmem:[#allocation16 + $0xb0] sm:$0xff]  ;;  %v10062_v50 = vld [vmem:[#allocation16 + $0x98] sm:$0xff] }
0x1752   :  { %11677 = vmatpush1.bf16.msra.mxu1 %v14538_v10  ;;  %11759 = vmatpush1.bf16.msra.mxu0 %v14540_v34  ;;  %v14589_v10 = vcombine.high %v10276_v39, %v10280_v22  ;;  %v10283_v34 = vld [vmem:[#allocation16 + $0x780] sm:$0xff]  ;;  %v10066_v39 = vld [vmem:[#allocation16 + $0xb8] sm:$0xff] }
0x1753   :  { %11678 = vmatprep.subr.bf16.mxu1 %v14547_v25  ;;  %11760 = vmatprep.subr.bf16.mxu0 %v14549_v59  ;;  %v10287_v25 = vld [vmem:[#allocation16 + $0x7a0] sm:$0xff]  ;;  %v10284_v59 = vld [vmem:[#allocation16 + $0x788] sm:$0xff] }
0x1754   :  { %v14594_v4 = vcombine.low %v10283_v34, %v10287_v25  ;;  %v14596_v17 = vcombine.low %v10284_v59, %v10288_v29 }
0x1756   :  { %11679 = vmatpush1.bf16.msra.mxu1 %v14546_v42  ;;  %11761 = vmatpush1.bf16.msra.mxu0 %v14548_v1  ;;  %v14595_v42 = vcombine.high %v10283_v34, %v10287_v25  ;;  %v14597_v1 = vcombine.high %v10284_v59, %v10288_v29  ;;  %v10073_v34 = vld [vmem:[#allocation16 + $0xf0] sm:$0xff]  ;;  %v10070_v25 = vld [vmem:[#allocation16 + $0xd8] sm:$0xff] }
0x1757   :  { %11680 = vmatprep.subr.bf16.mxu1 %v14555_v51  ;;  %11762 = vmatprep.subr.bf16.mxu0 %v14557_v9  ;;  %v10291_v51 = vld [vmem:[#allocation16 + $0x7c0] sm:$0xff]  ;;  %v10074_v59 = vld [vmem:[#allocation16 + $0xf8] sm:$0xff] }
0x1758   :  { %v10295_v9 = vld [vmem:[#allocation16 + $0x7e0] sm:$0xff] }
0x1759   :  { %v14602_v20 = vcombine.low %v10291_v51, %v10295_v9 }
0x175a   :  { %11681 = vmatpush1.bf16.msra.mxu1 %v14554_v18  ;;  %11763 = vmatpush1.bf16.msra.mxu0 %v14556_v11  ;;  %v15084_v18 = vadd.f32 %v18566_v27, %v8418_v13  ;;  %v14603_v11 = vcombine.high %v10291_v51, %v10295_v9  ;;  %v10054_v27 = vld [vmem:[#allocation16 + $0x58] sm:$0xff]  ;;  %v14385_v13 = vcombine.high %v10070_v25, %v10074_v59 }
0x175b   :  { %11682 = vmatprep.subr.bf16.mxu1 %v14563_v43  ;;  %11764 = vmatprep.subr.bf16.mxu0 %v14565_v58  ;;  %v14605_v43 = vcombine.high %v10292_v55, %v10296_v60  ;;  %v10045_v58 = vld [vmem:[#allocation16 + $0x10] sm:$0xff]  ;;  %v10082_v51 = vld [vmem:[#allocation16 + $0x138] sm:$0xff]  ;;  %v14384_v55 = vcombine.low %v10070_v25, %v10074_v59 }
0x175c   :  { %v14358_v24 = vcombine.low %v10045_v58, %v10049_v32  ;;  %v10117_v59 = vld [vmem:[#allocation16 + $0x250] sm:$0xff] }
0x175e   :  { %11683 = vmatpush1.bf16.msra.mxu1 %v14562_v35  ;;  %11765 = vmatpush1.bf16.msra.mxu0 %v14564_v28  ;;  %v10037_v35 = vmax.f32 %v15084_v18, 0.0  ;;  %v14359_v28 = vcombine.high %v10045_v58, %v10049_v32  ;;  %v10089_v18 = vld [vmem:[#allocation16 + $0x170] sm:$0xff] }
0x175f   :  { %11684 = vmatprep.subr.bf16.mxu1 %v14571_v3  ;;  %11766 = vmatprep.subr.bf16.mxu0 %v14573_v15  ;;  %v14361_v3 = vcombine.high %v10046_v53, %v10050_v52  ;;  %v10053_v15 = vld [vmem:[#allocation16 + $0x50] sm:$0xff] }
0x1760   :  { %v18583_v23 = vpack.c.bf16 %v10037_v35, %v10037_v35  ;;  %v14366_v22 = vcombine.low %v10053_v15, %v10057_v5  ;;  %v10094_v35 = vld [vmem:[#allocation16 + $0x198] sm:$0xff] }
0x1762   :  { %11685 = vmatpush1.bf16.msra.mxu1 %v14570_v56  ;;  %11767 = vmatpush1.bf16.msra.mxu0 %v14572_v8  ;;  %v14360_v56 = vcombine.low %v10046_v53, %v10050_v52  ;;  %v14367_v8 = vcombine.high %v10053_v15, %v10057_v5 }
0x1763   :  { %11686 = vmatprep.subr.bf16.mxu1 %v14579_v45  ;;  %11768 = vmatprep.subr.bf16.mxu0 %v14581_v62  ;;  %v14369_v45 = vcombine.high %v10054_v27, %v10058_v57  ;;  %v10061_v62 = vld [vmem:[#allocation16 + $0x90] sm:$0xff] }
0x1764   :  { %v14374_v29 = vcombine.low %v10061_v62, %v10065_v48 }
0x1766   :  { %11687 = vmatpush1.bf16.msra.mxu1 %v14578_v2  ;;  %11769 = vmatpush1.bf16.msra.mxu0 %v14580_v49  ;;  %v14368_v2 = vcombine.low %v10054_v27, %v10058_v57  ;;  %v14375_v49 = vcombine.high %v10061_v62, %v10065_v48  ;;  %v10101_v57 = vld [vmem:[#allocation16 + $0x1d0] sm:$0xff] }
0x1767   :  { %11688 = vmatprep.subr.bf16.mxu1 %v14587_v44  ;;  %11770 = vmatprep.subr.bf16.mxu0 %v14589_v10  ;;  %v14377_v44 = vcombine.high %v10062_v50, %v10066_v39  ;;  %v10069_v10 = vld [vmem:[#allocation16 + $0xd0] sm:$0xff] }
0x1768   :  { %v14382_v9 = vcombine.low %v10069_v10, %v10073_v34 }
0x176a   :  { %11689 = vmatpush1.bf16.msra.mxu1 %v14586_v33  ;;  %11771 = vmatpush1.bf16.msra.mxu0 %v14588_v40  ;;  %v14376_v33 = vcombine.low %v10062_v50, %v10066_v39  ;;  %v14383_v40 = vcombine.high %v10069_v10, %v10073_v34  ;;  %v10109_v39 = vld [vmem:[#allocation16 + $0x210] sm:$0xff] }
0x176b   :  { %11690 = vmatprep.subr.bf16.mxu1 %v14595_v42  ;;  %11772 = vmatprep.subr.bf16.mxu0 %v14597_v1  ;;  %v10077_v42 = vld [vmem:[#allocation16 + $0x110] sm:$0xff] }
0x176c   :  { %v10081_v1 = vld [vmem:[#allocation16 + $0x130] sm:$0xff] }
0x176d   :  { %v14391_v60 = vcombine.high %v10077_v42, %v10081_v1  ;;  %v14390_v58 = vcombine.low %v10077_v42, %v10081_v1 }
0x176e   :  { %11691 = vmatpush1.bf16.msra.mxu1 %v14594_v4  ;;  %11773 = vmatpush1.bf16.msra.mxu0 %v14596_v17  ;;  %v10085_v17 = vld [vmem:[#allocation16 + $0x150] sm:$0xff] }
0x176f   :  { %11692 = vmatprep.subr.bf16.mxu1 %v14603_v11  ;;  %11774 = vmatprep.subr.bf16.mxu0 %v14605_v43  ;;  %v10086_v11 = vld [vmem:[#allocation16 + $0x158] sm:$0xff]  ;;  %v14399_v53 = vcombine.high %v10085_v17, %v10089_v18 }
0x1770   :  { %v10090_v43 = vld [vmem:[#allocation16 + $0x178] sm:$0xff] }
0x1771   :  { %v14401_v52 = vcombine.high %v10086_v11, %v10090_v43  ;;  %v14400_v15 = vcombine.low %v10086_v11, %v10090_v43  ;;  %v10133_v43 = vld [vmem:[#allocation16 + $0x2d0] sm:$0xff] }
0x1772   :  { %11693 = vmatpush1.bf16.msra.mxu1 %v14602_v20  ;;  %11775 = vmatpush1.bf16.msra.mxu0 %v14604_v63  ;;  %v10093_v20 = vld [vmem:[#allocation16 + $0x190] sm:$0xff] }
0x1773   :  { %11785 = vmatprep.subr.bf16.mxu1 %v14359_v28  ;;  %11867 = vmatprep.subr.bf16.mxu0 %v14361_v3  ;;  %v10097_v63 = vld [vmem:[#allocation16 + $0x1b0] sm:$0xff]  ;;  %v10098_v28 = vld [vmem:[#allocation16 + $0x1b8] sm:$0xff]  ;;  %v14398_v3 = vcombine.low %v10085_v17, %v10089_v18 }
0x1774   :  { %v14407_v5 = vcombine.high %v10093_v20, %v10097_v63  ;;  %v14409_v27 = vcombine.high %v10094_v35, %v10098_v28  ;;  %v14408_v62 = vcombine.low %v10094_v35, %v10098_v28  ;;  %v10141_v28 = vld [vmem:[#allocation16 + $0x310] sm:$0xff] }
0x1775   :  { %11695 = vmatmul.mubr.bf16.vlgmr.msra.gmra.mrb[56].mxu1 %v18583_v23  ;;  %11777 = vmatmul.mubr.bf16.vlgmr.msra.gmra.mrb[52].mxu0 %v18583_v23 }
0x1776   :  { %11786 = vmatpush1.bf16.msra.mxu1 %v14358_v24  ;;  %11817 = vmatprep.mubr.bf16.mxu1 %v18568_v16  ;;  %v10105_v24 = vld [vmem:[#allocation16 + $0x1f0] sm:$0xff] }
0x1777   :  { %11868 = vmatpush1.bf16.msra.mxu0 %v14360_v56  ;;  %11899 = vmatprep.mubr.bf16.mxu0 %v18568_v16  ;;  %v10078_v16 = vld [vmem:[#allocation16 + $0x118] sm:$0xff]  ;;  %v14415_v48 = vcombine.high %v10101_v57, %v10105_v24 }
0x1778   :  { %11787 = vmatprep.subr.bf16.mxu1 %v14367_v8  ;;  %11869 = vmatprep.subr.bf16.mxu0 %v14369_v45  ;;  %v14393_v4 = vcombine.high %v10078_v16, %v10082_v51  ;;  %v14392_v32 = vcombine.low %v10078_v16, %v10082_v51  ;;  %v10102_v56 = vld [vmem:[#allocation16 + $0x1d8] sm:$0xff]  ;;  %v14406_v45 = vcombine.low %v10093_v20, %v10097_v63  ;;  %v10125_v51 = vld [vmem:[#allocation16 + $0x290] sm:$0xff] }
0x1779   :  { %v10106_v8 = vld [vmem:[#allocation16 + $0x1f8] sm:$0xff] }
0x177a   :  { %11788 = vmatpush1.bf16.msra.mxu1 %v14366_v22  ;;  %v14417_v50 = vcombine.high %v10102_v56, %v10106_v8  ;;  %v10113_v22 = vld [vmem:[#allocation16 + $0x230] sm:$0xff]  ;;  %v14416_v10 = vcombine.low %v10102_v56, %v10106_v8 }
0x177b   :  { %11870 = vmatpush1.bf16.msra.mxu0 %v14368_v2  ;;  %11789 = vmatprep.subr.bf16.mxu1 %v14375_v49  ;;  %v10110_v2 = vld [vmem:[#allocation16 + $0x218] sm:$0xff]  ;;  %v14423_v34 = vcombine.high %v10109_v39, %v10113_v22  ;;  %v10149_v8 = vld [vmem:[#allocation16 + $0x350] sm:$0xff] }
0x177c   :  { %11871 = vmatprep.subr.bf16.mxu0 %v14377_v44  ;;  %v10114_v49 = vld [vmem:[#allocation16 + $0x238] sm:$0xff]  ;;  %v14414_v44 = vcombine.low %v10101_v57, %v10105_v24 }
0x177d   :  { %v14425_v25 = vcombine.high %v10110_v2, %v10114_v49  ;;  %v14424_v42 = vcombine.low %v10110_v2, %v10114_v49  ;;  %v10157_v49 = vld [vmem:[#allocation16 + $0x390] sm:$0xff] }
0x177e   :  { %11790 = vmatpush1.bf16.msra.mxu1 %v14374_v29  ;;  %v10121_v29 = vld [vmem:[#allocation16 + $0x270] sm:$0xff] }
0x177f   :  { %11872 = vmatpush1.bf16.msra.mxu0 %v14376_v33  ;;  %11791 = vmatprep.subr.bf16.mxu1 %v14383_v40  ;;  %v10118_v33 = vld [vmem:[#allocation16 + $0x258] sm:$0xff]  ;;  %v14431_v1 = vcombine.high %v10117_v59, %v10121_v29 }
0x1780   :  { %11873 = vmatprep.subr.bf16.mxu0 %v14385_v13  ;;  %v10122_v40 = vld [vmem:[#allocation16 + $0x278] sm:$0xff]  ;;  %v14422_v13 = vcombine.low %v10109_v39, %v10113_v22 }
0x1781   :  { %v14433_v16 = vcombine.high %v10118_v33, %v10122_v40  ;;  %v14432_v17 = vcombine.low %v10118_v33, %v10122_v40  ;;  %v10165_v40 = vld [vmem:[#allocation16 + $0x3d0] sm:$0xff] }
0x1782   :  { %11792 = vmatpush1.bf16.msra.mxu1 %v14382_v9  ;;  %v10129_v9 = vld [vmem:[#allocation16 + $0x2b0] sm:$0xff] }
0x1783   :  { %11874 = vmatpush1.bf16.msra.mxu0 %v14384_v55  ;;  %11793 = vmatprep.subr.bf16.mxu1 %v14391_v60  ;;  %v10126_v55 = vld [vmem:[#allocation16 + $0x298] sm:$0xff]  ;;  %v14439_v18 = vcombine.high %v10125_v51, %v10129_v9 }
0x1784   :  { %11875 = vmatprep.subr.bf16.mxu0 %v14393_v4  ;;  %v10130_v60 = vld [vmem:[#allocation16 + $0x2b8] sm:$0xff]  ;;  %v14430_v4 = vcombine.low %v10117_v59, %v10121_v29 }
0x1785   :  { %v14441_v11 = vcombine.high %v10126_v55, %v10130_v60  ;;  %v14440_v20 = vcombine.low %v10126_v55, %v10130_v60  ;;  %v10173_v60 = vld [vmem:[#allocation16 + $0x410] sm:$0xff] }
0x1786   :  { %11794 = vmatpush1.bf16.msra.mxu1 %v14390_v58  ;;  %v10137_v58 = vld [vmem:[#allocation16 + $0x2f0] sm:$0xff] }
0x1787   :  { %11876 = vmatpush1.bf16.msra.mxu0 %v14392_v32  ;;  %11795 = vmatprep.subr.bf16.mxu1 %v14399_v53  ;;  %v10134_v32 = vld [vmem:[#allocation16 + $0x2d8] sm:$0xff]  ;;  %v14447_v63 = vcombine.high %v10133_v43, %v10137_v58 }
0x1788   :  { %11877 = vmatprep.subr.bf16.mxu0 %v14401_v52  ;;  %v10138_v53 = vld [vmem:[#allocation16 + $0x2f8] sm:$0xff]  ;;  %v14438_v52 = vcombine.low %v10125_v51, %v10129_v9 }
0x1789   :  { %v14449_v35 = vcombine.high %v10134_v32, %v10138_v53  ;;  %v14448_v57 = vcombine.low %v10134_v32, %v10138_v53  ;;  %v10181_v53 = vld [vmem:[#allocation16 + $0x450] sm:$0xff] }
0x178a   :  { %11796 = vmatpush1.bf16.msra.mxu1 %v14398_v3  ;;  %v10145_v3 = vld [vmem:[#allocation16 + $0x330] sm:$0xff] }
0x178b   :  { %11878 = vmatpush1.bf16.msra.mxu0 %v14400_v15  ;;  %11797 = vmatprep.subr.bf16.mxu1 %v14407_v5  ;;  %v10142_v15 = vld [vmem:[#allocation16 + $0x318] sm:$0xff]  ;;  %v14455_v24 = vcombine.high %v10141_v28, %v10145_v3 }
0x178c   :  { %11879 = vmatprep.subr.bf16.mxu0 %v14409_v27  ;;  %v10146_v5 = vld [vmem:[#allocation16 + $0x338] sm:$0xff]  ;;  %v14446_v27 = vcombine.low %v10133_v43, %v10137_v58 }
0x178d   :  { %v14457_v56 = vcombine.high %v10142_v15, %v10146_v5  ;;  %v14456_v39 = vcombine.low %v10142_v15, %v10146_v5  ;;  %v10189_v15 = vld [vmem:[#allocation16 + $0x490] sm:$0xff] }
0x178e   :  { %11798 = vmatpush1.bf16.msra.mxu1 %v14406_v45  ;;  %v10153_v45 = vld [vmem:[#allocation16 + $0x370] sm:$0xff] }
0x178f   :  { %11880 = vmatpush1.bf16.msra.mxu0 %v14408_v62  ;;  %11799 = vmatprep.subr.bf16.mxu1 %v14415_v48  ;;  %v10150_v62 = vld [vmem:[#allocation16 + $0x358] sm:$0xff]  ;;  %v14463_v22 = vcombine.high %v10149_v8, %v10153_v45  ;;  %v10193_v5 = vld [vmem:[#allocation16 + $0x4b0] sm:$0xff] }
0x1790   :  { %11881 = vmatprep.subr.bf16.mxu0 %v14417_v50  ;;  %v10154_v48 = vld [vmem:[#allocation16 + $0x378] sm:$0xff]  ;;  %v14454_v50 = vcombine.low %v10141_v28, %v10145_v3 }
0x1791   :  { %v14465_v2 = vcombine.high %v10150_v62, %v10154_v48  ;;  %v14464_v59 = vcombine.low %v10150_v62, %v10154_v48  ;;  %v10197_v48 = vld [vmem:[#allocation16 + $0x4d0] sm:$0xff] }
0x1792   :  { %11800 = vmatpush1.bf16.msra.mxu1 %v14414_v44  ;;  %v10161_v44 = vld [vmem:[#allocation16 + $0x3b0] sm:$0xff] }
0x1793   :  { %11882 = vmatpush1.bf16.msra.mxu0 %v14416_v10  ;;  %11801 = vmatprep.subr.bf16.mxu1 %v14423_v34  ;;  %v10158_v10 = vld [vmem:[#allocation16 + $0x398] sm:$0xff]  ;;  %v14471_v29 = vcombine.high %v10157_v49, %v10161_v44 }
0x1794   :  { %11883 = vmatprep.subr.bf16.mxu0 %v14425_v25  ;;  %v10162_v34 = vld [vmem:[#allocation16 + $0x3b8] sm:$0xff]  ;;  %v14462_v25 = vcombine.low %v10149_v8, %v10153_v45  ;;  %v14503_v45 = vcombine.high %v10189_v15, %v10193_v5 }
0x1795   :  { %v14473_v33 = vcombine.high %v10158_v10, %v10162_v34  ;;  %v14472_v51 = vcombine.low %v10158_v10, %v10162_v34  ;;  %v10205_v10 = vld [vmem:[#allocation16 + $0x510] sm:$0xff] }
0x1796   :  { %11802 = vmatpush1.bf16.msra.mxu1 %v14422_v13  ;;  %v10169_v13 = vld [vmem:[#allocation16 + $0x3f0] sm:$0xff] }
0x1797   :  { %11884 = vmatpush1.bf16.msra.mxu0 %v14424_v42  ;;  %11803 = vmatprep.subr.bf16.mxu1 %v14431_v1  ;;  %v10166_v42 = vld [vmem:[#allocation16 + $0x3d8] sm:$0xff]  ;;  %v14479_v9 = vcombine.high %v10165_v40, %v10169_v13  ;;  %v10209_v34 = vld [vmem:[#allocation16 + $0x530] sm:$0xff] }
0x1798   :  { %11885 = vmatprep.subr.bf16.mxu0 %v14433_v16  ;;  %v10170_v1 = vld [vmem:[#allocation16 + $0x3f8] sm:$0xff]  ;;  %v14470_v16 = vcombine.low %v10157_v49, %v10161_v44 }
0x1799   :  { %v14481_v55 = vcombine.high %v10166_v42, %v10170_v1  ;;  %v14480_v43 = vcombine.low %v10166_v42, %v10170_v1  ;;  %v10217_v42 = vld [vmem:[#allocation16 + $0x570] sm:$0xff]  ;;  %v10214_v1 = vld [vmem:[#allocation16 + $0x558] sm:$0xff] }
0x179a   :  { %11804 = vmatpush1.bf16.msra.mxu1 %v14430_v4  ;;  %v10177_v4 = vld [vmem:[#allocation16 + $0x430] sm:$0xff] }
0x179b   :  { %11886 = vmatpush1.bf16.msra.mxu0 %v14432_v17  ;;  %11805 = vmatprep.subr.bf16.mxu1 %v14439_v18  ;;  %v10174_v17 = vld [vmem:[#allocation16 + $0x418] sm:$0xff]  ;;  %v14487_v58 = vcombine.high %v10173_v60, %v10177_v4 }
0x179c   :  { %11887 = vmatprep.subr.bf16.mxu0 %v14441_v11  ;;  %v10178_v18 = vld [vmem:[#allocation16 + $0x438] sm:$0xff]  ;;  %v14478_v11 = vcombine.low %v10165_v40, %v10169_v13  ;;  %v10213_v13 = vld [vmem:[#allocation16 + $0x550] sm:$0xff] }
0x179d   :  { %v14489_v32 = vcombine.high %v10174_v17, %v10178_v18  ;;  %v14488_v28 = vcombine.low %v10174_v17, %v10178_v18  ;;  %v10225_v17 = vld [vmem:[#allocation16 + $0x5b0] sm:$0xff]  ;;  %v10222_v18 = vld [vmem:[#allocation16 + $0x598] sm:$0xff] }
0x179e   :  { %11806 = vmatpush1.bf16.msra.mxu1 %v14438_v52  ;;  %v10185_v52 = vld [vmem:[#allocation16 + $0x470] sm:$0xff] }
0x179f   :  { %11888 = vmatpush1.bf16.msra.mxu0 %v14440_v20  ;;  %11807 = vmatprep.subr.bf16.mxu1 %v14447_v63  ;;  %v14486_v20 = vcombine.low %v10173_v60, %v10177_v4  ;;  %v10182_v63 = vld [vmem:[#allocation16 + $0x458] sm:$0xff]  ;;  %v14495_v3 = vcombine.high %v10181_v53, %v10185_v52  ;;  %v10221_v4 = vld [vmem:[#allocation16 + $0x590] sm:$0xff] }
0x17a0   :  { %11889 = vmatprep.subr.bf16.mxu0 %v14449_v35  ;;  %v10186_v35 = vld [vmem:[#allocation16 + $0x478] sm:$0xff] }
0x17a1   :  { %v14496_v8 = vcombine.low %v10182_v63, %v10186_v35 }
0x17a2   :  { %11808 = vmatpush1.bf16.msra.mxu1 %v14446_v27  ;;  %v14497_v27 = vcombine.high %v10182_v63, %v10186_v35  ;;  %v10230_v63 = vld [vmem:[#allocation16 + $0x5d8] sm:$0xff] }
0x17a3   :  { %11890 = vmatpush1.bf16.msra.mxu0 %v14448_v57  ;;  %11809 = vmatprep.subr.bf16.mxu1 %v14455_v24  ;;  %v10190_v57 = vld [vmem:[#allocation16 + $0x498] sm:$0xff] }
0x17a4   :  { %11891 = vmatprep.subr.bf16.mxu0 %v14457_v56  ;;  %v10194_v24 = vld [vmem:[#allocation16 + $0x4b8] sm:$0xff]  ;;  %v14494_v56 = vcombine.low %v10181_v53, %v10185_v52  ;;  %v10229_v52 = vld [vmem:[#allocation16 + $0x5d0] sm:$0xff] }
0x17a5   :  { %v14505_v62 = vcombine.high %v10190_v57, %v10194_v24  ;;  %v10234_v35 = vld [vmem:[#allocation16 + $0x5f8] sm:$0xff] }
0x17a6   :  { %11810 = vmatpush1.bf16.msra.mxu1 %v14454_v50  ;;  %v10201_v50 = vld [vmem:[#allocation16 + $0x4f0] sm:$0xff] }
0x17a7   :  { %11892 = vmatpush1.bf16.msra.mxu0 %v14456_v39  ;;  %11811 = vmatprep.subr.bf16.mxu1 %v14463_v22  ;;  %v10198_v39 = vld [vmem:[#allocation16 + $0x4d8] sm:$0xff]  ;;  %v14511_v49 = vcombine.high %v10197_v48, %v10201_v50 }
0x17a8   :  { %11893 = vmatprep.subr.bf16.mxu0 %v14465_v2  ;;  %v10202_v22 = vld [vmem:[#allocation16 + $0x4f8] sm:$0xff]  ;;  %v14502_v2 = vcombine.low %v10189_v15, %v10193_v5  ;;  %v14545_v5 = vcombine.high %v10230_v63, %v10234_v35 }
0x17a9   :  { %v14513_v44 = vcombine.high %v10198_v39, %v10202_v22 }
0x17aa   :  { %11812 = vmatpush1.bf16.msra.mxu1 %v14462_v25  ;;  %v10206_v25 = vld [vmem:[#allocation16 + $0x518] sm:$0xff] }
0x17ab   :  { %11894 = vmatpush1.bf16.msra.mxu0 %v14464_v59  ;;  %11813 = vmatprep.subr.bf16.mxu1 %v14471_v29  ;;  %v10210_v59 = vld [vmem:[#allocation16 + $0x538] sm:$0xff]  ;;  %v14512_v29 = vcombine.low %v10198_v39, %v10202_v22  ;;  %v10249_v39 = vld [vmem:[#allocation16 + $0x670] sm:$0xff] }
0x17ac   :  { %11895 = vmatprep.subr.bf16.mxu0 %v14473_v33  ;;  %v14519_v33 = vcombine.high %v10205_v10, %v10209_v34  ;;  %v14521_v40 = vcombine.high %v10206_v25, %v10210_v59  ;;  %v10246_v22 = vld [vmem:[#allocation16 + $0x658] sm:$0xff] }
0x17ae   :  { %11814 = vmatpush1.bf16.msra.mxu1 %v14470_v16  ;;  %v10218_v16 = vld [vmem:[#allocation16 + $0x578] sm:$0xff] }
0x17af   :  { %11896 = vmatpush1.bf16.msra.mxu0 %v14472_v51  ;;  %11815 = vmatprep.subr.bf16.mxu1 %v14479_v9  ;;  %v14518_v51 = vcombine.low %v10205_v10, %v10209_v34  ;;  %v14520_v9 = vcombine.low %v10206_v25, %v10210_v59  ;;  %v14529_v60 = vcombine.high %v10214_v1, %v10218_v16  ;;  %v10253_v34 = vld [vmem:[#allocation16 + $0x690] sm:$0xff]  ;;  %v10254_v59 = vld [vmem:[#allocation16 + $0x698] sm:$0xff] }
0x17b0   :  { %11897 = vmatprep.subr.bf16.mxu0 %v14481_v55  ;;  %v14527_v55 = vcombine.high %v10213_v13, %v10217_v42  ;;  %v10257_v25 = vld [vmem:[#allocation16 + $0x6b0] sm:$0xff] }
0x17b2   :  { %11816 = vmatpush1.bf16.msra.mxu1 %v14478_v11  ;;  %v10226_v11 = vld [vmem:[#allocation16 + $0x5b8] sm:$0xff] }
0x17b3   :  { %11898 = vmatpush1.bf16.msra.mxu0 %v14480_v43  ;;  %11826 = vmatprep.subr.bf16.mxu1 %v14487_v58  ;;  %v14526_v43 = vcombine.low %v10213_v13, %v10217_v42  ;;  %v14528_v58 = vcombine.low %v10214_v1, %v10218_v16  ;;  %v14537_v53 = vcombine.high %v10222_v18, %v10226_v11  ;;  %v10261_v42 = vld [vmem:[#allocation16 + $0x6d0] sm:$0xff]  ;;  %v10262_v16 = vld [vmem:[#allocation16 + $0x6d8] sm:$0xff] }
0x17b4   :  { %11908 = vmatprep.subr.bf16.mxu0 %v14489_v32  ;;  %v14535_v32 = vcombine.high %v10221_v4, %v10225_v17  ;;  %v10265_v1 = vld [vmem:[#allocation16 + $0x6f0] sm:$0xff] }
0x17b5   :  { %11818 = vmatmul.mubr.bf16.vlgmr.msra.gmra.mrb[60].mxu1 %v18570_v61 }
0x17b6   :  { %11900 = vmatmul.mubr.bf16.vlgmr.msra.gmra.mrb[56].mxu0 %v18570_v61  ;;  %11827 = vmatpush1.bf16.msra.mxu1 %v14486_v20  ;;  %v14504_v61 = vcombine.low %v10190_v57, %v10194_v24  ;;  %v10233_v20 = vld [vmem:[#allocation16 + $0x5f0] sm:$0xff]  ;;  %v10238_v24 = vld [vmem:[#allocation16 + $0x618] sm:$0xff] }
0x17b7   :  { %11858 = vmatprep.mubr.bf16.mxu1 %v18574_v38  ;;  %11909 = vmatpush1.bf16.msra.mxu0 %v14488_v28  ;;  %v14534_v28 = vcombine.low %v10221_v4, %v10225_v17  ;;  %v14543_v15 = vcombine.high %v10229_v52, %v10233_v20  ;;  %v10241_v57 = vld [vmem:[#allocation16 + $0x630] sm:$0xff] }
0x17b8   :  { %11940 = vmatprep.mubr.bf16.mxu0 %v18574_v38  ;;  %11828 = vmatprep.subr.bf16.mxu1 %v14495_v3  ;;  %v14510_v38 = vcombine.low %v10197_v48, %v10201_v50  ;;  %v14536_v3 = vcombine.low %v10222_v18, %v10226_v11  ;;  %v10245_v50 = vld [vmem:[#allocation16 + $0x650] sm:$0xff]  ;;  %v10270_v11 = vld [vmem:[#allocation16 + $0x718] sm:$0xff] }
0x17b9   :  { %11910 = vmatprep.subr.bf16.mxu0 %v14497_v27  ;;  %v10237_v27 = vld [vmem:[#allocation16 + $0x610] sm:$0xff] }
0x17ba   :  { %11829 = vmatpush1.bf16.msra.mxu1 %v14494_v56  ;;  %v10242_v56 = vld [vmem:[#allocation16 + $0x638] sm:$0xff]  ;;  %v10269_v17 = vld [vmem:[#allocation16 + $0x710] sm:$0xff] }
0x17bb   :  { %11911 = vmatpush1.bf16.msra.mxu0 %v14496_v8  ;;  %11830 = vmatprep.subr.bf16.mxu1 %v14503_v45  ;;  %v14542_v8 = vcombine.low %v10229_v52, %v10233_v20  ;;  %v14544_v45 = vcombine.low %v10230_v63, %v10234_v35  ;;  %v14553_v48 = vcombine.high %v10238_v24, %v10242_v56  ;;  %v10273_v18 = vld [vmem:[#allocation16 + $0x730] sm:$0xff]  ;;  %v10278_v35 = vld [vmem:[#allocation16 + $0x758] sm:$0xff] }
0x17bc   :  { %11912 = vmatprep.subr.bf16.mxu0 %v14505_v62  ;;  %v14551_v62 = vcombine.high %v10237_v27, %v10241_v57  ;;  %v10277_v20 = vld [vmem:[#allocation16 + $0x750] sm:$0xff] }
0x17bd   :  { %v10281_v63 = vld [vmem:[#allocation16 + $0x770] sm:$0xff] }
0x17be   :  { %11831 = vmatpush1.bf16.msra.mxu1 %v14502_v2  ;;  %v10250_v2 = vld [vmem:[#allocation16 + $0x678] sm:$0xff] }
0x17bf   :  { %11913 = vmatpush1.bf16.msra.mxu0 %v14504_v61  ;;  %11832 = vmatprep.subr.bf16.mxu1 %v14511_v49  ;;  %v14550_v61 = vcombine.low %v10237_v27, %v10241_v57  ;;  %v14552_v49 = vcombine.low %v10238_v24, %v10242_v56  ;;  %v14561_v10 = vcombine.high %v10246_v22, %v10250_v2  ;;  %v10285_v57 = vld [vmem:[#allocation16 + $0x790] sm:$0xff]  ;;  %v10286_v56 = vld [vmem:[#allocation16 + $0x798] sm:$0xff] }
0x17c0   :  { %11914 = vmatprep.subr.bf16.mxu0 %v14513_v44  ;;  %v14559_v44 = vcombine.high %v10245_v50, %v10249_v39  ;;  %v10289_v24 = vld [vmem:[#allocation16 + $0x7b0] sm:$0xff] }
0x17c2   :  { %11833 = vmatpush1.bf16.msra.mxu1 %v14510_v38  ;;  %v10258_v38 = vld [vmem:[#allocation16 + $0x6b8] sm:$0xff] }
0x17c3   :  { %11915 = vmatpush1.bf16.msra.mxu0 %v14512_v29  ;;  %11834 = vmatprep.subr.bf16.mxu1 %v14519_v33  ;;  %v14558_v29 = vcombine.low %v10245_v50, %v10249_v39  ;;  %v14560_v33 = vcombine.low %v10246_v22, %v10250_v2  ;;  %v14569_v13 = vcombine.high %v10254_v59, %v10258_v38  ;;  %v10293_v22 = vld [vmem:[#allocation16 + $0x7d0] sm:$0xff] }
0x17c4   :  { %11916 = vmatprep.subr.bf16.mxu0 %v14521_v40  ;;  %v14567_v40 = vcombine.high %v10253_v34, %v10257_v25  ;;  %v14599_v50 = vcombine.high %v10285_v57, %v10289_v24  ;;  %v10297_v2 = vld [vmem:[#allocation16 + $0x7f0] sm:$0xff] }
0x17c6   :  { %11835 = vmatpush1.bf16.msra.mxu1 %v14518_v51  ;;  %v10266_v51 = vld [vmem:[#allocation16 + $0x6f8] sm:$0xff] }
0x17c7   :  { %11917 = vmatpush1.bf16.msra.mxu0 %v14520_v9  ;;  %11836 = vmatprep.subr.bf16.mxu1 %v14527_v55  ;;  %v14566_v9 = vcombine.low %v10253_v34, %v10257_v25  ;;  %v14568_v55 = vcombine.low %v10254_v59, %v10258_v38  ;;  %v14577_v4 = vcombine.high %v10262_v16, %v10266_v51 }
0x17c8   :  { %11918 = vmatprep.subr.bf16.mxu0 %v14529_v60  ;;  %v14575_v60 = vcombine.high %v10261_v42, %v10265_v1  ;;  %v14598_v34 = vcombine.low %v10285_v57, %v10289_v24  ;;  %v14607_v59 = vcombine.high %v10293_v22, %v10297_v2  ;;  %v15985_v24 = vld [vmem:[#allocation17 + $0xa8] sm:$0xff]  }
0x17ca   :  { %11837 = vmatpush1.bf16.msra.mxu1 %v14526_v43  ;;  %v10274_v43 = vld [vmem:[#allocation16 + $0x738] sm:$0xff] }
0x17cb   :  { %11919 = vmatpush1.bf16.msra.mxu0 %v14528_v58  ;;  %11838 = vmatprep.subr.bf16.mxu1 %v14535_v32  ;;  %v14574_v58 = vcombine.low %v10261_v42, %v10265_v1  ;;  %v14576_v32 = vcombine.low %v10262_v16, %v10266_v51  ;;  %v14585_v52 = vcombine.high %v10270_v11, %v10274_v43  ;;  %v15962_v42 = vld [vmem:[#allocation17 + $0x40] sm:$0xff]  }
0x17cc   :  { %11920 = vmatprep.subr.bf16.mxu0 %v14537_v53  ;;  %v14583_v53 = vcombine.high %v10269_v17, %v10273_v18  ;;  %v15963_v1 = vld [vmem:[#allocation17 + $0xc0] sm:$0xff]  }
0x17ce   :  { %11839 = vmatpush1.bf16.msra.mxu1 %v14534_v28  ;;  %v10282_v28 = vld [vmem:[#allocation16 + $0x778] sm:$0xff] }
0x17cf   :  { %11921 = vmatpush1.bf16.msra.mxu0 %v14536_v3  ;;  %11840 = vmatprep.subr.bf16.mxu1 %v14543_v15  ;;  %v14582_v3 = vcombine.low %v10269_v17, %v10273_v18  ;;  %v14584_v15 = vcombine.low %v10270_v11, %v10274_v43  ;;  %v14593_v27 = vcombine.high %v10278_v35, %v10282_v28  ;;  %v15968_v17 = vld [vmem:[#allocation17 + $0x8] sm:$0xff]   ;;  %v15970_v11 = vld [vmem:[#allocation17 + $0x50] sm:$0xff]  }
0x17d0   :  { %11922 = vmatprep.subr.bf16.mxu0 %v14545_v5  ;;  %v14591_v5 = vcombine.high %v10277_v20, %v10281_v63  ;;  %v15969_v18 = vld [vmem:[#allocation17 + $0x88] sm:$0xff]   ;;  %v15971_v43 = vld [vmem:[#allocation17 + $0xd0] sm:$0xff]  }
0x17d2   :  { %11841 = vmatpush1.bf16.msra.mxu1 %v14542_v8  ;;  %v10290_v8 = vld [vmem:[#allocation16 + $0x7b8] sm:$0xff] }
0x17d3   :  { %11923 = vmatpush1.bf16.msra.mxu0 %v14544_v45  ;;  %11842 = vmatprep.subr.bf16.mxu1 %v14551_v62  ;;  %v18596_v45 = vld [vmem:[%s18674_s14] sm:$0xff]  ;;  %v14590_v62 = vcombine.low %v10277_v20, %v10281_v63  ;;  %v14601_v39 = vcombine.high %v10286_v56, %v10290_v8  ;;  %v14600_v25 = vcombine.low %v10286_v56, %v10290_v8  ;;  %v15977_v20 = vld [vmem:[#allocation17 + $0x98] sm:$0xff]   ;;  %v15978_v63 = vld [vmem:[#allocation17 + $0x60] sm:$0xff]  }
0x17d4   :  { %11924 = vmatprep.subr.bf16.mxu0 %v14553_v48  ;;  %v14592_v48 = vcombine.low %v10278_v35, %v10282_v28  ;;  %v15979_v35 = vld [vmem:[#allocation17 + $0xe0] sm:$0xff]   ;;  %v6488_v57 = vrot.slane %v18596_v45, %v17286_v31  ;;  %v15986_v56 = vld [vmem:[#allocation17 + $0x70] sm:$0xff]   ;;  %v6496_v8 = vrot.slane %v18596_v45, %v18420_v12 }
0x17d5   :  { %v15980_v28 = vld [vmem:[#allocation17 + $0x20] sm:$0xff]  }
0x17d6   :  { %11843 = vmatpush1.bf16.msra.mxu1 %v14550_v61  ;;  %v6492_v61 = vrot.slane %v18596_v45, %v17339_v54 }
0x17d7   :  { %11925 = vmatpush1.bf16.msra.mxu0 %v14552_v49  ;;  %11844 = vmatprep.subr.bf16.mxu1 %v14559_v44  ;;  %v10294_v49 = vld [vmem:[#allocation16 + $0x7d8] sm:$0xff] }
0x17d8   :  { %11926 = vmatprep.subr.bf16.mxu0 %v14561_v10  ;;  %v10298_v44 = vld [vmem:[#allocation16 + $0x7f8] sm:$0xff]  ;;  %v6500_v10 = vrot.slane %v18596_v45, %v18401_v36 }
0x17d9   :  { %v14609_v38 = vcombine.high %v10294_v49, %v10298_v44 }
0x17da   :  { %11845 = vmatpush1.bf16.msra.mxu1 %v14558_v29  ;;  %v15075_v29 = vadd.f32 %v18538_v14, %v6492_v61  ;;  %v15990_v61 = vld [vmem:[#allocation17 + $0x78] sm:$0xff]  }
0x17db   :  { %11927 = vmatpush1.bf16.msra.mxu0 %v14560_v33  ;;  %11846 = vmatprep.subr.bf16.mxu1 %v14567_v40  ;;  %v15077_v33 = vadd.f32 %v18540_v30, %v6500_v10  ;;  %v14606_v40 = vcombine.low %v10293_v22, %v10297_v2  ;;  %v15967_v30 = vld [vmem:[#allocation17 + $0xc8] sm:$0xff]   ;;  %v15074_v22 = vadd.f32 %v18534_v47, %v6488_v57  ;;  %v15989_v2 = vld [vmem:[#allocation17 + $0xb0] sm:$0xff]  }
0x17dc   :  { %11928 = vmatprep.subr.bf16.mxu0 %v14569_v13  ;;  %v14608_v13 = vcombine.low %v10294_v49, %v10298_v44  ;;  %v8134_v16 = vmax.f32 %v15075_v29, 0.0  ;;  %v15076_v49 = vadd.f32 %v18536_v6, %v6496_v8  ;;  %v15991_v44 = vld [vmem:[#allocation17 + $0xf8] sm:$0xff]   ;;  %v15994_v29 = vld [vmem:[#allocation17 + $0x140] sm:$0xff]   ;;  %v16020_v57 = vld [vmem:[#allocation17 + $0x130] sm:$0xff]  }
0x17dd   :  { %v8136_v51 = vmax.f32 %v15077_v33, 0.0  ;;  %v15995_v33 = vld [vmem:[#allocation17 + $0x1c0] sm:$0xff]   ;;  %v16022_v8 = vld [vmem:[#allocation17 + $0x178] sm:$0xff]  }
0x17de   :  { %11847 = vmatpush1.bf16.msra.mxu1 %v14566_v9  ;;  %v15964_v9 = vld [vmem:[#allocation17] sm:$0xff]   ;;  %v11958_v14 = vpack.c.bf16 %v8134_v16, %v8134_v16  ;;  %v8135_v47 = vmax.f32 %v15076_v49, 0.0 }
0x17df   :  { %11929 = vmatpush1.bf16.msra.mxu0 %v14568_v55  ;;  %11848 = vmatprep.subr.bf16.mxu1 %v14575_v60  ;;  %v15965_v55 = vld [vmem:[#allocation17 + $0x80] sm:$0xff]   ;;  %v15966_v60 = vld [vmem:[#allocation17 + $0x48] sm:$0xff]  }
0x17e0   :  { %11930 = vmatprep.subr.bf16.mxu0 %v14577_v4  ;;  %v11960_v4 = vpack.c.bf16 %v8136_v51, %v8136_v51  ;;  %v15996_v6 = vld [vmem:[#allocation17 + $0x100] sm:$0xff]   ;;  %v15999_v51 = vld [vmem:[#allocation17 + $0x1c8] sm:$0xff]  }
0x17e2   :  { %11849 = vmatpush1.bf16.msra.mxu1 %v14574_v58  ;;  %v15972_v58 = vld [vmem:[#allocation17 + $0x10] sm:$0xff]  }
0x17e3   :  { %11931 = vmatpush1.bf16.msra.mxu0 %v14576_v32  ;;  %11850 = vmatprep.subr.bf16.mxu1 %v14583_v53  ;;  %v15973_v32 = vld [vmem:[#allocation17 + $0x90] sm:$0xff]   ;;  %v15974_v53 = vld [vmem:[#allocation17 + $0x58] sm:$0xff]  }
0x17e4   :  { %11932 = vmatprep.subr.bf16.mxu0 %v14585_v52  ;;  %v15975_v52 = vld [vmem:[#allocation17 + $0xd8] sm:$0xff]  }
0x17e6   :  { %11851 = vmatpush1.bf16.msra.mxu1 %v14582_v3  ;;  %v15981_v3 = vld [vmem:[#allocation17 + $0xa0] sm:$0xff]  }
0x17e7   :  { %11933 = vmatpush1.bf16.msra.mxu0 %v14584_v15  ;;  %11852 = vmatprep.subr.bf16.mxu1 %v14591_v5  ;;  %v15982_v15 = vld [vmem:[#allocation17 + $0x68] sm:$0xff]  }
0x17e8   :  { %11934 = vmatprep.subr.bf16.mxu0 %v14593_v27  ;;  %v15983_v5 = vld [vmem:[#allocation17 + $0xe8] sm:$0xff]  }
0x17e9   :  { %v15984_v27 = vld [vmem:[#allocation17 + $0x28] sm:$0xff]  }
0x17ea   :  { %11853 = vmatpush1.bf16.msra.mxu1 %v14590_v62  ;;  %v15987_v62 = vld [vmem:[#allocation17 + $0xf0] sm:$0xff]  }
0x17eb   :  { %11935 = vmatpush1.bf16.msra.mxu0 %v14592_v48  ;;  %11854 = vmatprep.subr.bf16.mxu1 %v14599_v50  ;;  %v6508_v48 = vrot.slane %v18596_v45, %v18423_v21  ;;  %v6516_v50 = vrot.slane %v18596_v45, %v18455_v37 }
0x17ec   :  { %11936 = vmatprep.subr.bf16.mxu0 %v14601_v39  ;;  %v15988_v39 = vld [vmem:[#allocation17 + $0x30] sm:$0xff]  }
0x17ed   :  { %v15079_v10 = vadd.f32 %v18550_v19, %v6508_v48  ;;  %v15997_v19 = vld [vmem:[#allocation17 + $0x180] sm:$0xff]   ;;  %v16023_v48 = vld [vmem:[#allocation17 + $0x1f8] sm:$0xff]  }
0x17ee   :  { %11855 = vmatpush1.bf16.msra.mxu1 %v14598_v34  ;;  %v15081_v34 = vadd.f32 %v18552_v0, %v6516_v50  ;;  %v15998_v0 = vld [vmem:[#allocation17 + $0x148] sm:$0xff]   ;;  %v16024_v50 = vld [vmem:[#allocation17 + $0x138] sm:$0xff]  }
0x17ef   :  { %11937 = vmatpush1.bf16.msra.mxu0 %v14600_v25  ;;  %11856 = vmatprep.subr.bf16.mxu1 %v14607_v59  ;;  %v15992_v25 = vld [vmem:[#allocation17 + $0x38] sm:$0xff]   ;;  %v8133_v59 = vmax.f32 %v15074_v22, 0.0  ;;  %v16026_v22 = vld [vmem:[#allocation17 + $0x240] sm:$0xff]  }
0x17f0   :  { %11938 = vmatprep.subr.bf16.mxu0 %v14609_v38  ;;  %v15993_v38 = vld [vmem:[#allocation17 + $0xb8] sm:$0xff]  }
0x17f2   :  { %11857 = vmatpush1.bf16.msra.mxu1 %v14606_v40  ;;  %v8138_v40 = vmax.f32 %v15079_v10, 0.0  ;;  %v16030_v10 = vld [vmem:[#allocation17 + $0x248] sm:$0xff]  }
0x17f3   :  { %11939 = vmatpush1.bf16.msra.mxu0 %v14608_v13  ;;  %14748 = vmatprep.subr.bf16.mxu1 %v15962_v42  ;;  %v8140_v13 = vmax.f32 %v15081_v34, 0.0  ;;  %v11957_v42 = vpack.c.bf16 %v8133_v59, %v8133_v59  ;;  %v16031_v34 = vld [vmem:[#allocation17 + $0x2c8] sm:$0xff]  }
0x17f4   :  { %14770 = vmatprep.subr.bf16.mxu0 %v15963_v1  ;;  %v11959_v1 = vpack.c.bf16 %v8135_v47, %v8135_v47  ;;  %v11962_v16 = vpack.c.bf16 %v8138_v40, %v8138_v40  ;;  %v16033_v59 = vld [vmem:[#allocation17 + $0x288] sm:$0xff]   ;;  %v16036_v47 = vld [vmem:[#allocation17 + $0x210] sm:$0xff]   ;;  %v16038_v40 = vld [vmem:[#allocation17 + $0x258] sm:$0xff]  }
0x17f5   :  { %11859 = vmatmul.mubr.bf16.vlgmr.msra.gmra.mrb[60].mxu1 %v18583_v23 }
0x17f6   :  { %11941 = vmatmul.mubr.bf16.vlgmr.msra.gmra.mrb[56].mxu0 %v18583_v23  ;;  %14749 = vmatpush3.bf16.msra.mxu1 %v15964_v9  ;;  %v15976_v23 = vld [vmem:[#allocation17 + $0x18] sm:$0xff]   ;;  %v11964_v9 = vpack.c.bf16 %v8140_v13, %v8140_v13 }
0x17f7   :  { %13036 = vmatprep.mubr.bf16.mxu1 %v11958_v14  ;;  %14771 = vmatpush3.bf16.msra.mxu0 %v15965_v55  ;;  %v16000_v55 = vld [vmem:[#allocation17 + $0x108] sm:$0xff]   ;;  %v16002_v14 = vld [vmem:[#allocation17 + $0x150] sm:$0xff]   ;;  %v16039_v13 = vld [vmem:[#allocation17 + $0x2d8] sm:$0xff]  }
0x17f8   :  { %13076 = vmatprep.mubr.bf16.mxu0 %v11960_v4  ;;  %14750 = vmatprep.subr.bf16.mxu1 %v15966_v60  ;;  %v16001_v60 = vld [vmem:[#allocation17 + $0x188] sm:$0xff]   ;;  %v16004_v4 = vld [vmem:[#allocation17 + $0x110] sm:$0xff]  }
0x17f9   :  { %14772 = vmatprep.subr.bf16.mxu0 %v15967_v30  ;;  %v16003_v30 = vld [vmem:[#allocation17 + $0x1d0] sm:$0xff]  }
0x17fa   :  { %14751 = vmatpush3.bf16.msra.mxu1 %v15968_v17  ;;  %v16005_v17 = vld [vmem:[#allocation17 + $0x190] sm:$0xff]  }
0x17fb   :  { %14773 = vmatpush3.bf16.msra.mxu0 %v15969_v18  ;;  %14752 = vmatprep.subr.bf16.mxu1 %v15970_v11  ;;  %v16006_v18 = vld [vmem:[#allocation17 + $0x158] sm:$0xff]  }
0x17fc   :  { %14774 = vmatprep.subr.bf16.mxu0 %v15971_v43  ;;  %v16007_v11 = vld [vmem:[#allocation17 + $0x1d8] sm:$0xff]  }
0x17fd   :  { %v16008_v43 = vld [vmem:[#allocation17 + $0x118] sm:$0xff]  }
0x17fe   :  { %14753 = vmatpush3.bf16.msra.mxu1 %v15972_v58  ;;  %v16009_v58 = vld [vmem:[#allocation17 + $0x198] sm:$0xff]  }
0x17ff   :  { %14775 = vmatpush3.bf16.msra.mxu0 %v15973_v32  ;;  %14754 = vmatprep.subr.bf16.mxu1 %v15974_v53  ;;  %v16010_v32 = vld [vmem:[#allocation17 + $0x160] sm:$0xff]  }
0x1800   :  { %14776 = vmatprep.subr.bf16.mxu0 %v15975_v52  ;;  %v16011_v53 = vld [vmem:[#allocation17 + $0x1e0] sm:$0xff]  }
0x1801   :  { %v16012_v52 = vld [vmem:[#allocation17 + $0x120] sm:$0xff]  }
0x1802   :  { %14755 = vmatpush3.bf16.msra.mxu1 %v15976_v23  ;;  %v16013_v23 = vld [vmem:[#allocation17 + $0x1a0] sm:$0xff]  }
0x1803   :  { %14777 = vmatpush3.bf16.msra.mxu0 %v15977_v20  ;;  %14756 = vmatprep.subr.bf16.mxu1 %v15978_v63  ;;  %v16014_v20 = vld [vmem:[#allocation17 + $0x168] sm:$0xff]  }
0x1804   :  { %14778 = vmatprep.subr.bf16.mxu0 %v15979_v35  ;;  %v16015_v63 = vld [vmem:[#allocation17 + $0x1e8] sm:$0xff]  }
0x1805   :  { %v16016_v35 = vld [vmem:[#allocation17 + $0x128] sm:$0xff]  }
0x1806   :  { %14757 = vmatpush3.bf16.msra.mxu1 %v15980_v28  ;;  %v6504_v28 = vrot.slane %v18596_v45, %v18449_v41 }
0x1807   :  { %14779 = vmatpush3.bf16.msra.mxu0 %v15981_v3  ;;  %14758 = vmatprep.subr.bf16.mxu1 %v15982_v15  ;;  %v16017_v3 = vld [vmem:[#allocation17 + $0x1a8] sm:$0xff]   ;;  %v16018_v15 = vld [vmem:[#allocation17 + $0x170] sm:$0xff]  }
0x1808   :  { %14780 = vmatprep.subr.bf16.mxu0 %v15983_v5  ;;  %v6512_v5 = vrot.slane %v18596_v45, %v18452_v26  ;;  %v16025_v45 = vld [vmem:[#allocation17 + $0x1b8] sm:$0xff]  }
0x180a   :  { %14759 = vmatpush3.bf16.msra.mxu1 %v15984_v27  ;;  %v16019_v27 = vld [vmem:[#allocation17 + $0x1f0] sm:$0xff]  }
0x180b   :  { %14781 = vmatpush3.bf16.msra.mxu0 %v15985_v24  ;;  %14760 = vmatprep.subr.bf16.mxu1 %v15986_v56  ;;  %v15078_v24 = vadd.f32 %v18546_v7, %v6504_v28  ;;  %v16021_v56 = vld [vmem:[#allocation17 + $0x1b0] sm:$0xff]   ;;  %v16028_v7 = vld [vmem:[#allocation17 + $0x200] sm:$0xff]  }
0x180c   :  { %14782 = vmatprep.subr.bf16.mxu0 %v15987_v62  ;;  %v15080_v62 = vadd.f32 %v18548_v46, %v6512_v5 }
0x180e   :  { %14761 = vmatpush3.bf16.msra.mxu1 %v15988_v39  ;;  %v8137_v39 = vmax.f32 %v15078_v24, 0.0 }
0x180f   :  { %14783 = vmatpush3.bf16.msra.mxu0 %v15989_v2  ;;  %14762 = vmatprep.subr.bf16.mxu1 %v15990_v61  ;;  %v8139_v2 = vmax.f32 %v15080_v62, 0.0  ;;  %v16027_v61 = vld [vmem:[#allocation17 + $0x2c0] sm:$0xff]  }
0x1810   :  { %14784 = vmatprep.subr.bf16.mxu0 %v15991_v44  ;;  %v11961_v49 = vpack.c.bf16 %v8137_v39, %v8137_v39  ;;  %v16029_v44 = vld [vmem:[#allocation17 + $0x280] sm:$0xff]  }
0x1811   :  { %v11963_v46 = vpack.c.bf16 %v8139_v2, %v8139_v2 }
0x1812   :  { %14763 = vmatpush3.bf16.msra.mxu1 %v15992_v25  ;;  %v16032_v25 = vld [vmem:[#allocation17 + $0x208] sm:$0xff]  }
0x1813   :  { %14785 = vmatpush3.bf16.msra.mxu0 %v15993_v38  ;;  %14792 = vmatprep.subr.bf16.mxu1 %v15994_v29  ;;  %v16034_v38 = vld [vmem:[#allocation17 + $0x250] sm:$0xff]  }
0x1814   :  { %14814 = vmatprep.subr.bf16.mxu0 %v15995_v33  ;;  %v16035_v29 = vld [vmem:[#allocation17 + $0x2d0] sm:$0xff]  }
0x1815   :  { %13037 = vmatmul.mubr.bf16.vlgmr.msra.gmra.mrb[64].mxu1 %v11957_v42  ;;  %v16037_v33 = vld [vmem:[#allocation17 + $0x290] sm:$0xff]   ;;  %v16041_v42 = vld [vmem:[#allocation17 + $0x298] sm:$0xff]  }
0x1816   :  { %13077 = vmatmul.mubr.bf16.vlgmr.msra.gmra.mrb[60].mxu0 %v11959_v1  ;;  %14793 = vmatpush3.bf16.msra.mxu1 %v15996_v6  ;;  %v16040_v6 = vld [vmem:[#allocation17 + $0x218] sm:$0xff]   ;;  %v16043_v1 = vld [vmem:[#allocation17 + $0x2e0] sm:$0xff]  }
0x1817   :  { %13116 = vmatprep.mubr.bf16.mxu1 %v11962_v16  ;;  %14815 = vmatpush3.bf16.msra.mxu0 %v15997_v19  ;;  %v16042_v19 = vld [vmem:[#allocation17 + $0x260] sm:$0xff]  }
0x1818   :  { %13156 = vmatprep.mubr.bf16.mxu0 %v11964_v9  ;;  %14794 = vmatprep.subr.bf16.mxu1 %v15998_v0  ;;  %v16044_v0 = vld [vmem:[#allocation17 + $0x220] sm:$0xff]   ;;  %v16046_v9 = vld [vmem:[#allocation17 + $0x268] sm:$0xff]  }
0x1819   :  { %14816 = vmatprep.subr.bf16.mxu0 %v15999_v51  ;;  %v16045_v16 = vld [vmem:[#allocation17 + $0x2a0] sm:$0xff]   ;;  %v18627_v51 = vld [vmem:[%s18678_s18] sm:$0xff] }
0x181a   :  { %14795 = vmatpush3.bf16.msra.mxu1 %v16000_v55  ;;  %v16047_v55 = vld [vmem:[#allocation17 + $0x2e8] sm:$0xff]  }
0x181b   :  { %14817 = vmatpush3.bf16.msra.mxu0 %v16001_v60  ;;  %14796 = vmatprep.subr.bf16.mxu1 %v16002_v14  ;;  %v10308_v60 = vrot.slane %v18627_v51, %v17339_v54  ;;  %v10316_v14 = vrot.slane %v18627_v51, %v18401_v36 }
0x181c   :  { %14818 = vmatprep.subr.bf16.mxu0 %v16003_v30  ;;  %v16048_v30 = vld [vmem:[#allocation17 + $0x228] sm:$0xff]  }
0x181e   :  { %14797 = vmatpush3.bf16.msra.mxu1 %v16004_v4  ;;  %v10304_v4 = vrot.slane %v18627_v51, %v17286_v31 }
0x181f   :  { %14819 = vmatpush3.bf16.msra.mxu0 %v16005_v17  ;;  %14798 = vmatprep.subr.bf16.mxu1 %v16006_v18  ;;  %v16049_v17 = vld [vmem:[#allocation17 + $0x2a8] sm:$0xff]   ;;  %v16050_v18 = vld [vmem:[#allocation17 + $0x270] sm:$0xff]  }
0x1820   :  { %14820 = vmatprep.subr.bf16.mxu0 %v16007_v11 }
0x1822   :  { %14799 = vmatpush3.bf16.msra.mxu1 %v16008_v43  ;;  %v10312_v43 = vrot.slane %v18627_v51, %v18420_v12 }
0x1823   :  { %14821 = vmatpush3.bf16.msra.mxu0 %v16009_v58  ;;  %14800 = vmatprep.subr.bf16.mxu1 %v16010_v32  ;;  %v16051_v32 = vld [vmem:[#allocation17 + $0x2f0] sm:$0xff]  }
0x1824   :  { %14822 = vmatprep.subr.bf16.mxu0 %v16011_v53 }
0x1826   :  { %14801 = vmatpush3.bf16.msra.mxu1 %v16012_v52 }
0x1827   :  { %14823 = vmatpush3.bf16.msra.mxu0 %v16013_v23  ;;  %14802 = vmatprep.subr.bf16.mxu1 %v16014_v20 }
0x1828   :  { %14824 = vmatprep.subr.bf16.mxu0 %v16015_v63  ;;  %v16052_v63 = vld [vmem:[#allocation17 + $0x230] sm:$0xff]  }
0x182a   :  { %14803 = vmatpush3.bf16.msra.mxu1 %v16016_v35 }
0x182b   :  { %14825 = vmatpush3.bf16.msra.mxu0 %v16017_v3  ;;  %14804 = vmatprep.subr.bf16.mxu1 %v16018_v15  ;;  %v16053_v3 = vld [vmem:[#allocation17 + $0x2b0] sm:$0xff]   ;;  %v16054_v15 = vld [vmem:[#allocation17 + $0x278] sm:$0xff]  }
0x182c   :  { %14826 = vmatprep.subr.bf16.mxu0 %v16019_v27 }
0x182e   :  { %14805 = vmatpush3.bf16.msra.mxu1 %v16020_v57  ;;  %v16055_v57 = vld [vmem:[#allocation17 + $0x2f8] sm:$0xff]  }
0x182f   :  { %14827 = vmatpush3.bf16.msra.mxu0 %v16021_v56  ;;  %14806 = vmatprep.subr.bf16.mxu1 %v16022_v8  ;;  %v16056_v8 = vld [vmem:[#allocation17 + $0x238] sm:$0xff]  }
0x1830   :  { %14828 = vmatprep.subr.bf16.mxu0 %v16023_v48  ;;  %v16057_v48 = vld [vmem:[#allocation17 + $0x2b8] sm:$0xff]  }
0x1832   :  { %14807 = vmatpush3.bf16.msra.mxu1 %v16024_v50  ;;  %v16058_v50 = vld [vmem:[#allocation17 + $0x340] sm:$0xff]  }
0x1833   :  { %14829 = vmatpush3.bf16.msra.mxu0 %v16025_v45  ;;  %14836 = vmatprep.subr.bf16.mxu1 %v16026_v22  ;;  %v16059_v45 = vld [vmem:[#allocation17 + $0x3c0] sm:$0xff]  }
0x1834   :  { %14858 = vmatprep.subr.bf16.mxu0 %v16027_v61  ;;  %v16060_v22 = vld [vmem:[#allocation17 + $0x300] sm:$0xff]  }
0x1835   :  { %13117 = vmatmul.mubr.bf16.vlgmr.msra.gmra.mrb[68].mxu1 %v11961_v49  ;;  %v16061_v61 = vld [vmem:[#allocation17 + $0x380] sm:$0xff]  }
0x1836   :  { %13157 = vmatmul.mubr.bf16.vlgmr.msra.gmra.mrb[64].mxu0 %v11963_v46  ;;  %14837 = vmatpush3.bf16.msra.mxu1 %v16028_v7  ;;  %v16062_v7 = vld [vmem:[#allocation17 + $0x348] sm:$0xff]  }
0x1837   :  { %14859 = vmatpush3.bf16.msra.mxu0 %v16029_v44  ;;  %14838 = vmatprep.subr.bf16.mxu1 %v16030_v10  ;;  %v16063_v44 = vld [vmem:[#allocation17 + $0x3c8] sm:$0xff]  }
0x1838   :  { %14860 = vmatprep.subr.bf16.mxu0 %v16031_v34  ;;  %v16064_v10 = vld [vmem:[#allocation17 + $0x308] sm:$0xff]   ;;  %v16066_v34 = vld [vmem:[#allocation17 + $0x350] sm:$0xff]  }
0x1839   :  { %v16065_v46 = vld [vmem:[#allocation17 + $0x388] sm:$0xff]  }
0x183a   :  { %14839 = vmatpush3.bf16.msra.mxu1 %v16032_v25  ;;  %v16067_v25 = vld [vmem:[#allocation17 + $0x3d0] sm:$0xff]  }
0x183b   :  { %14861 = vmatpush3.bf16.msra.mxu0 %v16033_v59  ;;  %14840 = vmatprep.subr.bf16.mxu1 %v16034_v38  ;;  %v16068_v59 = vld [vmem:[#allocation17 + $0x310] sm:$0xff]  }
0x183c   :  { %14862 = vmatprep.subr.bf16.mxu0 %v16035_v29  ;;  %v16069_v38 = vld [vmem:[#allocation17 + $0x390] sm:$0xff]   ;;  %v16070_v29 = vld [vmem:[#allocation17 + $0x358] sm:$0xff]  }
0x183e   :  { %14841 = vmatpush3.bf16.msra.mxu1 %v16036_v47  ;;  %v16071_v47 = vld [vmem:[#allocation17 + $0x3d8] sm:$0xff]  }
0x183f   :  { %14863 = vmatpush3.bf16.msra.mxu0 %v16037_v33  ;;  %14842 = vmatprep.subr.bf16.mxu1 %v16038_v40  ;;  %v16072_v33 = vld [vmem:[#allocation17 + $0x318] sm:$0xff]  }
0x1840   :  { %14864 = vmatprep.subr.bf16.mxu0 %v16039_v13  ;;  %v16073_v40 = vld [vmem:[#allocation17 + $0x398] sm:$0xff]   ;;  %v16074_v13 = vld [vmem:[#allocation17 + $0x360] sm:$0xff]  }
0x1842   :  { %14843 = vmatpush3.bf16.msra.mxu1 %v16040_v6  ;;  %v16075_v6 = vld [vmem:[#allocation17 + $0x3e0] sm:$0xff]  }
0x1843   :  { %14865 = vmatpush3.bf16.msra.mxu0 %v16041_v42  ;;  %14844 = vmatprep.subr.bf16.mxu1 %v16042_v19  ;;  %v16076_v42 = vld [vmem:[#allocation17 + $0x320] sm:$0xff]  }
0x1844   :  { %14866 = vmatprep.subr.bf16.mxu0 %v16043_v1  ;;  %v16077_v19 = vld [vmem:[#allocation17 + $0x3a0] sm:$0xff]   ;;  %v16078_v1 = vld [vmem:[#allocation17 + $0x368] sm:$0xff]  }
0x1846   :  { %14845 = vmatpush3.bf16.msra.mxu1 %v16044_v0  ;;  %v16079_v0 = vld [vmem:[#allocation17 + $0x3e8] sm:$0xff]  }
0x1847   :  { %14867 = vmatpush3.bf16.msra.mxu0 %v16045_v16  ;;  %14846 = vmatprep.subr.bf16.mxu1 %v16046_v9  ;;  %v16080_v16 = vld [vmem:[#allocation17 + $0x328] sm:$0xff]  }
0x1848   :  { %v11696_v11 = vpop.f32.mrb[56].mxu1  ;;  %v11778_v58 = vpop.f32.mrb[52].mxu0  ;;  %14868 = vmatprep.subr.bf16.mxu0 %v16047_v55  ;;  %v16081_v9 = vld [vmem:[#allocation17 + $0x3a8] sm:$0xff]   ;;  %v16082_v55 = vld [vmem:[#allocation17 + $0x370] sm:$0xff]  }
0x1849   :  { %v11698_v53 = vpop.f32.mrb[57].mxu1  ;;  %v11780_v54 = vpop.f32.mrb[53].mxu0  ;;  %v15086_v35 = vadd.f32 %v11696_v11, %v10304_v4  ;;  %v15088_v5 = vadd.f32 %v11778_v58, %v10312_v43  ;;  %v16086_v4 = vld [vmem:[#allocation17 + $0x378] sm:$0xff]   ;;  %v10320_v43 = vrot.slane %v18627_v51, %v18449_v41  ;;  %v10328_v58 = vrot.slane %v18627_v51, %v18452_v26 }
0x184a   :  { %v15087_v52 = vadd.f32 %v11698_v53, %v10308_v60  ;;  %v15089_v23 = vadd.f32 %v11780_v54, %v10316_v14  ;;  %v11700_v36 = vpop.f32.mrb[58].mxu1  ;;  %v11782_v20 = vpop.f32.mrb[54].mxu0  ;;  %14847 = vmatpush3.bf16.msra.mxu1 %v16048_v30  ;;  %v16083_v60 = vld [vmem:[#allocation17 + $0x3f0] sm:$0xff]   ;;  %v16089_v11 = vld [vmem:[#allocation17 + $0x3b8] sm:$0xff]   ;;  %v10332_v53 = vrot.slane %v18627_v51, %v18455_v37 }
0x184b   :  { %14869 = vmatpush3.bf16.msra.mxu0 %v16049_v17  ;;  %v11701_v31 = vpop.f32.mrb[59].mxu1  ;;  %v11783_v28 = vpop.f32.mrb[55].mxu0  ;;  %14848 = vmatprep.subr.bf16.mxu1 %v16050_v18  ;;  %v11949_v62 = vmax.f32 %v15086_v35, 0.0  ;;  %v11951_v39 = vmax.f32 %v15088_v5, 0.0  ;;  %v16084_v14 = vld [vmem:[#allocation17 + $0x330] sm:$0xff]   ;;  %v16087_v17 = vld [vmem:[#allocation17 + $0x3f8] sm:$0xff]  }
0x184c   :  { %v11950_v12 = vmax.f32 %v15087_v52, 0.0  ;;  %v11952_v27 = vmax.f32 %v15089_v23, 0.0  ;;  %14870 = vmatprep.subr.bf16.mxu0 %v16051_v32  ;;  %v16085_v30 = vld [vmem:[#allocation17 + $0x3b0] sm:$0xff]   ;;  %v16088_v18 = vld [vmem:[#allocation17 + $0x338] sm:$0xff]   ;;  %v10324_v32 = vrot.slane %v18627_v51, %v18423_v21 }
0x184d   :  { %v11965_v2 = vpack.c.bf16 %v11949_v62, %v11949_v62  ;;  %v11967_v49 = vpack.c.bf16 %v11951_v39, %v11951_v39 }
0x184e   :  { %v11966_v24 = vpack.c.bf16 %v11950_v12, %v11950_v12  ;;  %v11968_v56 = vpack.c.bf16 %v11952_v27, %v11952_v27  ;;  %14849 = vmatpush3.bf16.msra.mxu1 %v16052_v63 }
0x184f   :  { %14871 = vmatpush3.bf16.msra.mxu0 %v16053_v3  ;;  %14850 = vmatprep.subr.bf16.mxu1 %v16054_v15 }
0x1850   :  { %13196 = vmatprep.mubr.bf16.mxu1 %v11966_v24  ;;  %13236 = vmatprep.mubr.bf16.mxu0 %v11968_v56 }
0x1851   :  { %14872 = vmatprep.subr.bf16.mxu0 %v16055_v57 }
0x1852   :  { %14851 = vmatpush3.bf16.msra.mxu1 %v16056_v8  ;;  %v14610_v8 = vld [vmem:[%s18680_s20] ss:$0 sm:$0xff]  ;;  %s16750_s20 = smov [#allocation19]  }
0x1853   :  { %14873 = vmatpush3.bf16.msra.mxu0 %v16057_v48  ;;  %14880 = vmatprep.subr.bf16.mxu1 %v16058_v50  ;;  %s13331_s2 = sshll.u32 %s16750_s20, 4  ;;  %s13332_s2 = int_to_ptr.vmem [resolvable:$true] %s13331_s2 }
0x1854   :  { %14902 = vmatprep.subr.bf16.mxu0 %v16059_v45  ;;  %s16695_s3 = scalar_lea.vmem %s13332_s2, 128  ;;  %p16700_p11 = scmp.lt.s32.totalorder %s13332_s2, %s13332_s2 }
0x1855   :  { %13197 = vmatmul.mubr.bf16.vlgmr.msra.gmra.mrb[72].mxu1 %v11965_v2  ;;  %p16696_p10 = scmp.ne.s32.totalorder %s13332_s2, %s16695_s3  ;;  %p16701_p12 = scmp.lt.s32.totalorder %s16695_s3, %s16695_s3 }
0x1856   :  { %13237 = vmatmul.mubr.bf16.vlgmr.msra.gmra.mrb[68].mxu0 %v11967_v49  ;;  %14881 = vmatpush3.bf16.msra.mxu1 %v16060_v22 }
0x1857   :  { %14903 = vmatpush3.bf16.msra.mxu0 %v16061_v61  ;;  %14882 = vmatprep.subr.bf16.mxu1 %v16062_v7  ;;  %p16702_p13 = por %p16701_p12, %p16700_p11 }
0x1858   :  { %14904 = vmatprep.subr.bf16.mxu0 %v16063_v44 }
0x1859   :  { %p16703_p0 = pnand %p16702_p13, %p16696_p10 }
0x185a   :  { %14883 = vmatpush3.bf16.msra.mxu1 %v16064_v10 }
0x185b   :  { %14905 = vmatpush3.bf16.msra.mxu0 %v16065_v46  ;;  %14884 = vmatprep.subr.bf16.mxu1 %v16066_v34 }
0x185c   :  { %14906 = vmatprep.subr.bf16.mxu0 %v16067_v25 }
0x185e   :  { %14885 = vmatpush3.bf16.msra.mxu1 %v16068_v59 }
0x185f   :  { %14907 = vmatpush3.bf16.msra.mxu0 %v16069_v38  ;;  %14886 = vmatprep.subr.bf16.mxu1 %v16070_v29 }
0x1860   :  { %14908 = vmatprep.subr.bf16.mxu0 %v16071_v47 }
0x1862   :  { %14887 = vmatpush3.bf16.msra.mxu1 %v16072_v33 }
0x1863   :  { %14909 = vmatpush3.bf16.msra.mxu0 %v16073_v40  ;;  %14888 = vmatprep.subr.bf16.mxu1 %v16074_v13 }
0x1864   :  { %14910 = vmatprep.subr.bf16.mxu0 %v16075_v6 }
0x1866   :  { %14889 = vmatpush3.bf16.msra.mxu1 %v16076_v42 }
0x1867   :  { %14911 = vmatpush3.bf16.msra.mxu0 %v16077_v19  ;;  %14890 = vmatprep.subr.bf16.mxu1 %v16078_v1 }
0x1868   :  { %14912 = vmatprep.subr.bf16.mxu0 %v16079_v0 }
0x186a   :  { %14891 = vmatpush3.bf16.msra.mxu1 %v16080_v16 }
0x186b   :  { %14913 = vmatpush3.bf16.msra.mxu0 %v16081_v9  ;;  %14892 = vmatprep.subr.bf16.mxu1 %v16082_v55 }
0x186c   :  { %14914 = vmatprep.subr.bf16.mxu0 %v16083_v60 }
0x186e   :  { %14893 = vmatpush3.bf16.msra.mxu1 %v16084_v14 }
0x186f   :  { %14915 = vmatpush3.bf16.msra.mxu0 %v16085_v30  ;;  %14894 = vmatprep.subr.bf16.mxu1 %v16086_v4 }
0x1870   :  { %14916 = vmatprep.subr.bf16.mxu0 %v16087_v17 }
0x1872   :  { %14895 = vmatpush3.bf16.msra.mxu1 %v16088_v18 }
0x1873   :  { %14917 = vmatpush3.bf16.msra.mxu0 %v16089_v11 }
0x18c8   :  { %v11860_v54 = vpop.f32.mrb[60].mxu1 }
0x18c9   :  { %v15090_v52 = vadd.f32 %v11860_v54, %v10320_v43  ;;  %v11942_v23 = vpop.f32.mrb[56].mxu0  ;;  %v11862_v36 = vpop.f32.mrb[61].mxu1 }
0x18ca   :  { %v15092_v20 = vadd.f32 %v11942_v23, %v10328_v58  ;;  %v15091_v63 = vadd.f32 %v11862_v36, %v10324_v32  ;;  %v11944_v35 = vpop.f32.mrb[57].mxu0  ;;  %v11864_v31 = vpop.f32.mrb[62].mxu1 }
0x18cb   :  { %v11953_v28 = vmax.f32 %v15090_v52, 0.0  ;;  %v15093_v3 = vadd.f32 %v11944_v35, %v10332_v53  ;;  %v11946_v41 = vpop.f32.mrb[58].mxu0  ;;  %v11865_v15 = vpop.f32.mrb[63].mxu1 }
0x18cc   :  { %v11955_v5 = vmax.f32 %v15092_v20, 0.0  ;;  %v11954_v26 = vmax.f32 %v15091_v63, 0.0  ;;  %v11947_v12 = vpop.f32.mrb[59].mxu0 }
0x18cd   :  { %v11956_v27 = vmax.f32 %v15093_v3, 0.0  ;;  %v11969_v57 = vpack.c.bf16 %v11953_v28, %v11953_v28 }
0x18ce   :  { %v11970_v21 = vpack.c.bf16 %v11954_v26, %v11954_v26  ;;  %v11971_v37 = vpack.c.bf16 %v11955_v5, %v11955_v5 }
0x18cf   :  { %v11972_v24 = vpack.c.bf16 %v11956_v27, %v11956_v27 }
0x18d0   :  { %13276 = vmatprep.mubr.bf16.mxu1 %v11970_v21 }
0x18d1   :  { %13316 = vmatprep.mubr.bf16.mxu0 %v11972_v24  ;;  %13277 = vmatmul.mubr.bf16.vlgmr.msra.gmra.mrb[76].mxu1 %v11969_v57 }
0x18d2   :  { %13317 = vmatmul.mubr.bf16.vlgmr.msra.gmra.mrb[72].mxu0 %v11971_v37 }
0x18e8   :  { %v14764_v51 = vpop.f32.mrb[64].mxu1 }
0x18e9   :  { %v14786_v56 = vpop.f32.mrb[60].mxu0  ;;  %v14765_v62 = vpop.f32.mrb[65].mxu1 }
0x18ea   :  { %v14766_v48 = vadd.f32 %v14765_v62, %v14764_v51  ;;  %v14787_v50 = vpop.f32.mrb[61].mxu0  ;;  %v14767_v39 = vpop.f32.mrb[66].mxu1 }
0x18eb   :  { %v14788_v45 = vadd.f32 %v14787_v50, %v14786_v56  ;;  %v14789_v22 = vpop.f32.mrb[62].mxu0  ;;  %v14768_v2 = vpop.f32.mrb[67].mxu1 }
0x18ec   :  { %v13039_v61 = vadd.f32 %v14766_v48, %v14610_v8  ;;  %v14790_v7 = vpop.f32.mrb[63].mxu0 }
0x18ee   :  { %v13079_v49 = vadd.f32 %v14788_v45, %v13039_v61 }
0x1908   :  { %v14808_v44 = vpop.f32.mrb[68].mxu1 }
0x1909   :  { %v14830_v10 = vpop.f32.mrb[64].mxu0  ;;  %v14809_v46 = vpop.f32.mrb[69].mxu1 }
0x190a   :  { %v14810_v34 = vadd.f32 %v14809_v46, %v14808_v44  ;;  %v14831_v25 = vpop.f32.mrb[65].mxu0  ;;  %v14811_v59 = vpop.f32.mrb[70].mxu1 }
0x190b   :  { %v14832_v38 = vadd.f32 %v14831_v25, %v14830_v10  ;;  %v14833_v29 = vpop.f32.mrb[66].mxu0  ;;  %v14812_v47 = vpop.f32.mrb[71].mxu1 }
0x190c   :  { %v13119_v33 = vadd.f32 %v14810_v34, %v13079_v49  ;;  %v14834_v40 = vpop.f32.mrb[67].mxu0 }
0x190e   :  { %v13159_v13 = vadd.f32 %v14832_v38, %v13119_v33 }
0x1928   :  { %v14852_v6 = vpop.f32.mrb[72].mxu1 }
0x1929   :  { %v14874_v42 = vpop.f32.mrb[68].mxu0  ;;  %v14853_v19 = vpop.f32.mrb[73].mxu1 }
0x192a   :  { %v14854_v1 = vadd.f32 %v14853_v19, %v14852_v6  ;;  %v14875_v0 = vpop.f32.mrb[69].mxu0  ;;  %v14855_v16 = vpop.f32.mrb[74].mxu1 }
0x192b   :  { %v14876_v9 = vadd.f32 %v14875_v0, %v14874_v42  ;;  %v14877_v55 = vpop.f32.mrb[70].mxu0  ;;  %v14856_v60 = vpop.f32.mrb[75].mxu1 }
0x192c   :  { %v13199_v14 = vadd.f32 %v14854_v1, %v13159_v13  ;;  %v14878_v30 = vpop.f32.mrb[71].mxu0 }
0x192e   :  { %v13239_v4 = vadd.f32 %v14876_v9, %v13199_v14 }
0x19a4   :  { %v14896_v17 = vpop.f32.mrb[76].mxu1 }
0x19a5   :  { %v14918_v18 = vpop.f32.mrb[72].mxu0  ;;  %v14897_v11 = vpop.f32.mrb[77].mxu1 }
0x19a6   :  { %v14898_v43 = vadd.f32 %v14897_v11, %v14896_v17  ;;  %v14919_v58 = vpop.f32.mrb[73].mxu0  ;;  %v14899_v32 = vpop.f32.mrb[78].mxu1 }
0x19a7   :  { %v14920_v53 = vadd.f32 %v14919_v58, %v14918_v18  ;;  %v14921_v54 = vpop.f32.mrb[74].mxu0  ;;  %v14900_v52 = vpop.f32.mrb[79].mxu1 }
0x19a8   :  { %v13279_v23 = vadd.f32 %v14898_v43, %v13239_v4  ;;  %v14922_v36 = vpop.f32.mrb[75].mxu0 }
0x19aa   :  { %v13319_v20 = vadd.f32 %v14920_v53, %v13279_v23 }
0x19ac   :  { %13324 = vst [vmem:[#allocation19] sm:$0xff] %v13319_v20 }
0x19ad   :  { %16706 = shalt.err (!%p16703_p0)
}
0x19ae   :  { %s16707_s11 = scalar_lea.hbm %s18681_s21, 128 }
0x19af   :  { %p16708_p1 = scmp.ne.s32.totalorder %s18681_s21, %s16707_s11  ;;  %p16711_p2 = scmp.lt.u32.totalorder %s16707_s11, %s18681_s21 }
0x19b1   :  { %p16713_p3 = pnand %p16711_p2, %p16708_p1 }
0x19b3   :  { %16716 = shalt.err (!%p16713_p3)
}
0x19b4   :  { %13334 = dma.vmem_to_hbm [thread:$0]  %s13332_s2, 128, %s18681_s21, [#allocation4]  }
0x19b5   :  { %16729 = dma.done.wait [#allocation4], 128  }
0x19b6   :  { %16730 = vsyncadd [#allocation4], 4294967168 }
0x19b7   :  { %13338 = vsyncpa [#allocation3], 1 }
0x19b8   :  { %13339 = vsyncpa [#allocation6], 1 }
0x19b9   :  { %13340 = vsyncpa [#allocation9], 1 }
0x19ba   :  { %13341 = vsyncpa [#allocation12], 1 }
0x19bb   :  { %13342 = vsyncpa [#allocation15], 1 }
0x19bc   :  { %13343 = vsyncpa [#allocation18], 1 }
0x19bd   :  { %13344 = vsyncpa [#allocation4], 1 }

</bundles_post_ra>
